<compile_context>
chip_gen: v5e
topology: v5e:2x2
jax: 0.10.0
libtpu: 0.0.40
codegen_flags: <defaults>
</compile_context>

<pallas_src>
import functools

import jax
import jax.numpy as jnp
from jax.experimental import pallas as pl
from jax.experimental.pallas import tpu as pltpu


def _mlp_kernel(xT_ref, w1_ref, b1_ref, w2_ref, b2_ref, wf_ref, bf_ref, o_ref):
    """Fused eval-mode MLP; activations are (features, batch) = (sublane, lane)."""
    xT = xT_ref[...]                                            # (D, blk), compute dtype
    # Linear(D, 1024)   [Dropout(0.2) is identity in eval]
    h = jnp.dot(w1_ref[...], xT, preferred_element_type=jnp.float32)
    h = h + b1_ref[...]                                         # (1024, blk) f32
    # Linear(1024, 128) [Dropout(0.2) is identity in eval]
    h = jnp.dot(w2_ref[...], h.astype(w2_ref.dtype),
                preferred_element_type=jnp.float32)
    h = h + b2_ref[...]                                         # (128, blk) f32
    # Folded Linear(128,64)->Linear(64,16)->Linear(16,1) tail (exact: purely
    # linear, Dropout(0.1) identity).  VPU multiply + sublane reduce keeps the
    # tiny K=128 contraction in full f32 and yields a lane-dense (1, blk) row.
    out = jnp.sum(wf_ref[...] * h, axis=0, keepdims=True) + bf_ref[...]
    o_ref[...] = out.astype(o_ref.dtype)


@functools.partial(jax.jit, static_argnames=("block_b", "compute_dtype"))
def aesthetic_predictor(x, params, *, block_b=128, compute_dtype=jnp.bfloat16):
    """Eval-mode forward.  x: (B, D) float32.  params: PyTorch-layout tensors
    (w_i is (out_features, in_features), b_i is (out_features,)).  Returns (B, 1)."""
    B, D = x.shape
    assert block_b % 128 == 0, "block_b must be a multiple of the 128-lane width"

    w1, b1 = params["w1"], params["b1"]    # (1024, D), (1024,)
    w2, b2 = params["w2"], params["b2"]    # (128, 1024), (128,)
    w3, b3 = params["w3"], params["b3"]    # (64, 128), (64,)
    w4, b4 = params["w4"], params["b4"]    # (16, 64), (16,)
    w5, b5 = params["w5"], params["b5"]    # (1, 16), (1,)

    # ---- exact fold of the purely-linear tail (layers 3..5), done in f32 ----
    w54 = w5 @ w4                                          # (1, 64)
    wf = (w54 @ w3).reshape(128, 1).astype(jnp.float32)    # column -> lane bcast
    bf = (w54 @ b3 + w5 @ b4 + b5).reshape(1, 1).astype(jnp.float32)

    # ---- dtype / layout prep hoisted out of the kernel ----------------------
    w1c = w1.astype(compute_dtype)                         # bf16 MXU operands
    w2c = w2.astype(compute_dtype)
    b1c = b1.reshape(1024, 1).astype(jnp.float32)          # f32 bias columns
    b2c = b2.reshape(128, 1).astype(jnp.float32)

    # Transposed, zero-padded input: (D, Bp) with batch on the lane axis.
    num_tiles = (B + block_b - 1) // block_b
    Bp = num_tiles * block_b
    xT = x.T.astype(compute_dtype)
    if Bp != B:
        xT = jnp.pad(xT, ((0, 0), (0, Bp - B)))

    def full(shape):
        return pl.BlockSpec(shape, lambda i: (0, 0))       # resident params

    out = pl.pallas_call(
        _mlp_kernel,
        out_shape=jax.ShapeDtypeStruct((1, Bp), x.dtype),
        grid_spec=pltpu.PrefetchScalarGridSpec(
            num_scalar_prefetch=0,
            grid=(num_tiles,),
            in_specs=[
                pl.BlockSpec((D, block_b), lambda i: (0, i)),   # x^T batch tile
                full(w1c.shape), full(b1c.shape),
                full(w2c.shape), full(b2c.shape),
                full(wf.shape), full(bf.shape),
            ],
            out_specs=pl.BlockSpec((1, block_b), lambda i: (0, i)),  # lane-dense
        ),
        compiler_params=pltpu.CompilerParams(
            dimension_semantics=("parallel",),   # batch tiles shard across TCs
        ),
    )(xT, w1c, b1c, w2c, b2c, wf, bf)

    return out[0, :B].reshape(B, 1)


def init_params(key, input_size):
    """Deterministic init mirroring nn.Linear (PyTorch layout: (out, in) weights)."""
    sizes = [(input_size, 1024), (1024, 128), (128, 64), (64, 16), (16, 1)]
    params = {}
    for idx, (fan_in, fan_out) in enumerate(sizes, start=1):
        key, kw, kb = jax.random.split(key, 3)
        bound = 1.0 / (fan_in ** 0.5)
        params[f"w{idx}"] = jax.random.uniform(
            kw, (fan_out, fan_in), jnp.float32, -bound, bound)
        params[f"b{idx}"] = jax.random.uniform(
            kb, (fan_out,), jnp.float32, -bound, bound)
    return params


def reference_forward_f32(x, params):
    """Unfused full-f32 reference with PyTorch eval-mode semantics."""
    h = x
    for i in range(1, 6):
        h = h @ params[f"w{i}"].T + params[f"b{i}"]
    return h


def reference_forward_matched(x, params, compute_dtype):
    """Reference using the kernel's exact precision policy (bf16 operands for the
    two big matmuls, f32 accumulation, f32 folded tail)."""
    xT = x.T.astype(compute_dtype)
    h = jnp.dot(params["w1"].astype(compute_dtype), xT,
                preferred_element_type=jnp.float32) + params["b1"][:, None]
    h = jnp.dot(params["w2"].astype(compute_dtype), h.astype(compute_dtype),
                preferred_element_type=jnp.float32) + params["b2"][:, None]
    w54 = params["w5"] @ params["w4"]
    wf = (w54 @ params["w3"]).reshape(128, 1)
    bf = (w54 @ params["b3"] + params["w5"] @ params["b4"] + params["b5"]).reshape(1, 1)
    out = jnp.sum(wf * h, axis=0, keepdims=True) + bf
    return out.T.astype(x.dtype)


if __name__ == "__main__":
    key = jax.random.PRNGKey(0)
    k_param, k_x = jax.random.split(key)

    input_size = 768    # CLIP ViT-L/14 embedding width typically fed to this scorer
    batch = 200         # not a multiple of block_b: exercises padding; grid = 2 tiles

    params = init_params(k_param, input_size)
    x = jax.random.normal(k_x, (batch, input_size), jnp.float32)

    out = aesthetic_predictor(x, params)     # block_b=128, bf16 matmul operands
    out = jax.block_until_ready(out)
    assert out.shape == (batch, 1)

    # Same-precision reference: should agree tightly (only accumulation order differs).
    ref_matched = reference_forward_matched(x, params, jnp.bfloat16)
    assert jnp.allclose(out, ref_matched, atol=5e-3, rtol=5e-3), \
        "mismatch vs matched-precision reference"

    # Full-f32 reference: within the bf16-operand error budget.
    ref_f32 = reference_forward_f32(x, params)
    assert jnp.allclose(out, ref_f32, atol=5e-2, rtol=5e-2), \
        "mismatch vs f32 reference"

    print("KERNEL_OK")
</pallas_src>

<mosaic_0001>
module attributes {stable_mosaic.version = 11 : i64} {
  func.func @_mlp_kernel(%arg0: i32, %arg1: memref<768x128xbf16, #tpu.memory_space<vmem>>, %arg2: memref<1024x768xbf16, #tpu.memory_space<vmem>>, %arg3: memref<1024x1xf32, #tpu.memory_space<vmem>>, %arg4: memref<128x1024xbf16, #tpu.memory_space<vmem>>, %arg5: memref<128x1xf32, #tpu.memory_space<vmem>>, %arg6: memref<128x1xf32, #tpu.memory_space<vmem>>, %arg7: memref<1x1xf32, #tpu.memory_space<vmem>>, %arg8: memref<1x128xf32, #tpu.memory_space<vmem>>) attributes {dimension_semantics = [#tpu.dimension_semantics<parallel>], iteration_bounds = array<i64: 2>, scalar_prefetch = 0 : i64, scratch_operands = 0 : i64, tpu.core_type = #tpu.core_type<tc>, window_params = [{transform_indices = @transform_0, window_bounds = array<i64: 768, 128>}, {pipeline_mode = #tpu.pipeline_mode<synchronous>, transform_indices = @transform_1, window_bounds = array<i64: 1024, 768>}, {pipeline_mode = #tpu.pipeline_mode<synchronous>, transform_indices = @transform_2, window_bounds = array<i64: 1024, 1>}, {pipeline_mode = #tpu.pipeline_mode<synchronous>, transform_indices = @transform_3, window_bounds = array<i64: 128, 1024>}, {pipeline_mode = #tpu.pipeline_mode<synchronous>, transform_indices = @transform_4, window_bounds = array<i64: 128, 1>}, {pipeline_mode = #tpu.pipeline_mode<synchronous>, transform_indices = @transform_5, window_bounds = array<i64: 128, 1>}, {pipeline_mode = #tpu.pipeline_mode<synchronous>, transform_indices = @transform_6, window_bounds = array<i64: 1, 1>}, {transform_indices = @transform_7, window_bounds = array<i64: 1, 128>}]} {
    %c0 = arith.constant 0 : index
    %c0_0 = arith.constant 0 : index
    %0 = vector.load %arg1[%c0, %c0_0] : memref<768x128xbf16, #tpu.memory_space<vmem>>, vector<768x128xbf16>
    %c0_1 = arith.constant 0 : index
    %c0_2 = arith.constant 0 : index
    %1 = vector.load %arg2[%c0_1, %c0_2] : memref<1024x768xbf16, #tpu.memory_space<vmem>>, vector<1024x768xbf16>
    %cst = arith.constant dense<0.000000e+00> : vector<1024x128xf32>
    %2 = tpu.matmul %1, %0, %cst {dimension_numbers = #tpu.dot_dimension_numbers<[1], [0], [0], [1], [0, 0, 1, 1], [], []>} : vector<1024x768xbf16>, vector<768x128xbf16>, vector<1024x128xf32> -> vector<1024x128xf32>
    %c0_3 = arith.constant 0 : index
    %c0_4 = arith.constant 0 : index
    %3 = vector.load %arg3[%c0_3, %c0_4] : memref<1024x1xf32, #tpu.memory_space<vmem>>, vector<1024x1xf32>
    %4 = vector.broadcast %3 : vector<1024x1xf32> to vector<1024x128xf32>
    %5 = arith.addf %2, %4 : vector<1024x128xf32>
    %c0_5 = arith.constant 0 : index
    %c0_6 = arith.constant 0 : index
    %6 = vector.load %arg4[%c0_5, %c0_6] : memref<128x1024xbf16, #tpu.memory_space<vmem>>, vector<128x1024xbf16>
    %7 = arith.truncf %5 : vector<1024x128xf32> to vector<1024x128xbf16>
    %cst_7 = arith.constant dense<0.000000e+00> : vector<128x128xf32>
    %8 = tpu.matmul %6, %7, %cst_7 {dimension_numbers = #tpu.dot_dimension_numbers<[1], [0], [0], [1], [0, 0, 1, 1], [], []>} : vector<128x1024xbf16>, vector<1024x128xbf16>, vector<128x128xf32> -> vector<128x128xf32>
    %c0_8 = arith.constant 0 : index
    %c0_9 = arith.constant 0 : index
    %9 = vector.load %arg5[%c0_8, %c0_9] : memref<128x1xf32, #tpu.memory_space<vmem>>, vector<128x1xf32>
    %10 = vector.broadcast %9 : vector<128x1xf32> to vector<128x128xf32>
    %11 = arith.addf %8, %10 : vector<128x128xf32>
    %c0_10 = arith.constant 0 : index
    %c0_11 = arith.constant 0 : index
    %12 = vector.load %arg6[%c0_10, %c0_11] : memref<128x1xf32, #tpu.memory_space<vmem>>, vector<128x1xf32>
    %13 = vector.broadcast %12 : vector<128x1xf32> to vector<128x128xf32>
    %14 = arith.mulf %13, %11 : vector<128x128xf32>
    %cst_12 = arith.constant dense<0.000000e+00> : vector<128xf32>
    %15 = vector.multi_reduction <add>, %14, %cst_12 [0] : vector<128x128xf32> to vector<128xf32>
    %16 = vector.shape_cast %15 : vector<128xf32> to vector<1x128xf32>
    %c0_13 = arith.constant 0 : index
    %c0_14 = arith.constant 0 : index
    %17 = vector.load %arg7[%c0_13, %c0_14] : memref<1x1xf32, #tpu.memory_space<vmem>>, vector<1x1xf32>
    %18 = vector.broadcast %17 : vector<1x1xf32> to vector<1x128xf32>
    %19 = arith.addf %16, %18 : vector<1x128xf32>
    %c0_15 = arith.constant 0 : index
    %c0_16 = arith.constant 0 : index
    %20 = vector.load %arg8[%c0_15, %c0_16] : memref<1x128xf32, #tpu.memory_space<vmem>>, vector<1x128xf32>
    tpu.vector_store %arg8[%c0_15, %c0_16], %19 {strides = array<i32>} : memref<1x128xf32, #tpu.memory_space<vmem>>, vector<1x128xf32>,
    return
  }
  func.func @transform_0(%arg0: i32) -> (i32, i32) {
    %c0_i32 = arith.constant 0 : i32
    %c0_i32_0 = arith.constant 0 : i32
    return %c0_i32, %arg0 : i32, i32
  }
  func.func @transform_1(%arg0: i32) -> (i32, i32) {
    %c0_i32 = arith.constant 0 : i32
    %c0_i32_0 = arith.constant 0 : i32
    %c0_i32_1 = arith.constant 0 : i32
    return %c0_i32, %c0_i32_0 : i32, i32
  }
  func.func @transform_2(%arg0: i32) -> (i32, i32) {
    %c0_i32 = arith.constant 0 : i32
    %c0_i32_0 = arith.constant 0 : i32
    %c0_i32_1 = arith.constant 0 : i32
    return %c0_i32, %c0_i32_0 : i32, i32
  }
  func.func @transform_3(%arg0: i32) -> (i32, i32) {
    %c0_i32 = arith.constant 0 : i32
    %c0_i32_0 = arith.constant 0 : i32
    %c0_i32_1 = arith.constant 0 : i32
    return %c0_i32, %c0_i32_0 : i32, i32
  }
  func.func @transform_4(%arg0: i32) -> (i32, i32) {
    %c0_i32 = arith.constant 0 : i32
    %c0_i32_0 = arith.constant 0 : i32
    %c0_i32_1 = arith.constant 0 : i32
    return %c0_i32, %c0_i32_0 : i32, i32
  }
  func.func @transform_5(%arg0: i32) -> (i32, i32) {
    %c0_i32 = arith.constant 0 : i32
    %c0_i32_0 = arith.constant 0 : i32
    %c0_i32_1 = arith.constant 0 : i32
    return %c0_i32, %c0_i32_0 : i32, i32
  }
  func.func @transform_6(%arg0: i32) -> (i32, i32) {
    %c0_i32 = arith.constant 0 : i32
    %c0_i32_0 = arith.constant 0 : i32
    %c0_i32_1 = arith.constant 0 : i32
    return %c0_i32, %c0_i32_0 : i32, i32
  }
  func.func @transform_7(%arg0: i32) -> (i32, i32) {
    %c0_i32 = arith.constant 0 : i32
    %c0_i32_0 = arith.constant 0 : i32
    return %c0_i32, %arg0 : i32, i32
  }
}

</mosaic_0001>

<bundles_post_ra>
// kernel: aesthetic_predictor.1
= control target key start
LH: loop header
LB: loop body
LE: loop exit
PB: predicated region body
PF: predicated region fallthrough
CT: control target
= control target key end

     0   :  { %s15008_s0 = inlined_call_operand.vmem [shape: bf16[768,256], index: 0, kind: input, shape index: {}]   ;;  %s15009_s1 = inlined_call_operand.vmem [shape: bf16[1024,768], index: 1, kind: input, shape index: {}]   ;;  %s15010_s2 = inlined_call_operand.vmem [shape: f32[1024,1], index: 2, kind: input, shape index: {}]   ;;  %s15011_s3 = inlined_call_operand.vmem [shape: bf16[128,1024], index: 3, kind: input, shape index: {}]   ;;  %s15012_s4 = inlined_call_operand.vmem [shape: f32[128,1], index: 4, kind: input, shape index: {}]   ;;  %s15013_s5 = inlined_call_operand.vmem [shape: f32[128,1], index: 5, kind: input, shape index: {}]   ;;  %s15014_s6 = inlined_call_operand.<no memory space> [shape: f32[1,1], index: 6, kind: input, shape index: {}]   ;;  %s15015_s7 = inlined_call_operand.vmem [shape: f32[1,256], index: 7, kind: output, shape index: {}]  }
   0x1   :  { %v12_v0 = vstv %s15014_s6 }
   0x2   :  { %13 = vst [vmem:[#allocation2] sm:$0x1] %v12_v0 }
   0x3   :  { %s9863_s26 = smov 0   ;;  %s9865_s27 = smov 0  }
   0x4   :  { %s9867_s28 = smov 0  }
   0x5 LB: > { %s7261_s6 = sadd.s32 4294967295, %s9817_s28   ;;  %s9880_s29 = sadd.s32 1, %s9817_s28   ;;  %s9817_s28 = sphi %s9867_s28, %s15459_s28   ;;  %s9813_s27 = sphi %s9865_s27, %s15458_s27   ;;  %s9809_s26 = sphi %s9863_s26, %s15457_s26  }
   0x6   : > { %s23_s30 = ssub.s32 %s9817_s28, %s9880_s29  ;;  %s26_s8 = sadd.s32 1, %s9813_s27 }
   0x7   : > { %p24_p0 = scmp.eq.s32.totalorder %s23_s30, 0  ;;  %p33_p1 = scmp.ne.s32.totalorder %s9813_s27, %s9809_s26 }
   0x8   : > { %p34_p2 = scmp.eq.s32.totalorder %s9817_s28, 0  ;;  %p7264_p4 = scmp.ge.s32.totalorder %s9817_s28, 2 }
   0x9   : > { %s9889_s9 = scalar_select %p24_p0, %s9813_s27, %s26_s8  }
   0xa   : > { %p35_p3 = por %p34_p2, %p33_p1  ;;  %229 = sbr.rel (%p7264_p4) target bundleno = 116 (0x74), region = 40 }
   0xf   : > { %232 = sbr.rel (!%p35_p3) target bundleno = 116 (0x74), region = 44  ;;  %s234_s10 = sand.u32 (%p35_p3), 1, %s9813_s27  }
  0x10   : > { %s7265_s11 = sshll.u32 (%p35_p3), %s9817_s28, 2  ;;  %s9765_s12 = smul.u32 (%p35_p3), 384, %s234_s10 }
  0x11   : > { %s9897_s15 = scalar_lea.vmem (%p35_p3), %s15008_s0, %s7265_s11 }
  0x12   : > { %v255_v1 = vld [vmem:[%s9897_s15] sm:$0xf] (%p35_p3)  ;;  %v257_v2 = vld [vmem:[%s9897_s15 + $0x8] sm:$0xf] (%p35_p3)  ;;  %v259_v3 = vld [vmem:[%s9897_s15 + $0x10] sm:$0xf] (%p35_p3) }
  0x13   : > { %s9902_s16 = scalar_lea.vmem (%p35_p3), [#allocation3], %s9765_s12  ;;  %v261_v4 = vld [vmem:[%s9897_s15 + $0x18] sm:$0xf] (%p35_p3)  ;;  %v263_v5 = vld [vmem:[%s9897_s15 + $0x20] sm:$0xf] (%p35_p3) }
  0x14   : > { %256 = vst [vmem:[%s9902_s16] sm:$0xf] %v255_v1  ;;  %v265_v6 = vld [vmem:[%s9897_s15 + $0x28] sm:$0xf]  ;;  %v267_v7 = vld [vmem:[%s9897_s15 + $0x30] sm:$0xf] }
  0x15   : > { %258 = vst [vmem:[%s9902_s16 + $0x4] sm:$0xf] %v257_v2  ;;  %v269_v8 = vld [vmem:[%s9897_s15 + $0x38] sm:$0xf]  ;;  %v271_v9 = vld [vmem:[%s9897_s15 + $0x40] sm:$0xf] }
  0x16   : > { %260 = vst [vmem:[%s9902_s16 + $0x8] sm:$0xf] %v259_v3  ;;  %v273_v10 = vld [vmem:[%s9897_s15 + $0x48] sm:$0xf]  ;;  %v275_v11 = vld [vmem:[%s9897_s15 + $0x50] sm:$0xf] }
  0x17   : > { %262 = vst [vmem:[%s9902_s16 + $0xc] sm:$0xf] %v261_v4  ;;  %v277_v12 = vld [vmem:[%s9897_s15 + $0x58] sm:$0xf]  ;;  %v279_v13 = vld [vmem:[%s9897_s15 + $0x60] sm:$0xf] }
  0x18   : > { %264 = vst [vmem:[%s9902_s16 + $0x10] sm:$0xf] %v263_v5  ;;  %v281_v14 = vld [vmem:[%s9897_s15 + $0x68] sm:$0xf]  ;;  %v283_v15 = vld [vmem:[%s9897_s15 + $0x70] sm:$0xf] }
  0x19   : > { %266 = vst [vmem:[%s9902_s16 + $0x14] sm:$0xf] %v265_v6  ;;  %v285_v16 = vld [vmem:[%s9897_s15 + $0x78] sm:$0xf]  ;;  %v287_v17 = vld [vmem:[%s9897_s15 + $0x80] sm:$0xf] }
  0x1a   : > { %268 = vst [vmem:[%s9902_s16 + $0x18] sm:$0xf] %v267_v7  ;;  %v289_v18 = vld [vmem:[%s9897_s15 + $0x88] sm:$0xf]  ;;  %v291_v19 = vld [vmem:[%s9897_s15 + $0x90] sm:$0xf] }
  0x1b   : > { %270 = vst [vmem:[%s9902_s16 + $0x1c] sm:$0xf] %v269_v8  ;;  %v293_v20 = vld [vmem:[%s9897_s15 + $0x98] sm:$0xf]  ;;  %v295_v21 = vld [vmem:[%s9897_s15 + $0xa0] sm:$0xf] }
  0x1c   : > { %272 = vst [vmem:[%s9902_s16 + $0x20] sm:$0xf] %v271_v9  ;;  %v297_v22 = vld [vmem:[%s9897_s15 + $0xa8] sm:$0xf]  ;;  %v299_v23 = vld [vmem:[%s9897_s15 + $0xb0] sm:$0xf] }
  0x1d   : > { %274 = vst [vmem:[%s9902_s16 + $0x24] sm:$0xf] %v273_v10  ;;  %v301_v24 = vld [vmem:[%s9897_s15 + $0xb8] sm:$0xf]  ;;  %v303_v25 = vld [vmem:[%s9897_s15 + $0xc0] sm:$0xf] }
  0x1e   : > { %276 = vst [vmem:[%s9902_s16 + $0x28] sm:$0xf] %v275_v11  ;;  %v305_v26 = vld [vmem:[%s9897_s15 + $0xc8] sm:$0xf]  ;;  %v307_v27 = vld [vmem:[%s9897_s15 + $0xd0] sm:$0xf] }
  0x1f   : > { %278 = vst [vmem:[%s9902_s16 + $0x2c] sm:$0xf] %v277_v12  ;;  %v309_v28 = vld [vmem:[%s9897_s15 + $0xd8] sm:$0xf]  ;;  %v311_v29 = vld [vmem:[%s9897_s15 + $0xe0] sm:$0xf] }
  0x20   : > { %280 = vst [vmem:[%s9902_s16 + $0x30] sm:$0xf] %v279_v13  ;;  %v313_v30 = vld [vmem:[%s9897_s15 + $0xe8] sm:$0xf]  ;;  %v315_v31 = vld [vmem:[%s9897_s15 + $0xf0] sm:$0xf] }
  0x21   : > { %282 = vst [vmem:[%s9902_s16 + $0x34] sm:$0xf] %v281_v14  ;;  %v317_v32 = vld [vmem:[%s9897_s15 + $0xf8] sm:$0xf]  ;;  %v319_v33 = vld [vmem:[%s9897_s15 + $0x100] sm:$0xf] }
  0x22   : > { %284 = vst [vmem:[%s9902_s16 + $0x38] sm:$0xf] %v283_v15  ;;  %v321_v34 = vld [vmem:[%s9897_s15 + $0x108] sm:$0xf]  ;;  %v323_v35 = vld [vmem:[%s9897_s15 + $0x110] sm:$0xf] }
  0x23   : > { %286 = vst [vmem:[%s9902_s16 + $0x3c] sm:$0xf] %v285_v16  ;;  %v325_v36 = vld [vmem:[%s9897_s15 + $0x118] sm:$0xf]  ;;  %v327_v37 = vld [vmem:[%s9897_s15 + $0x120] sm:$0xf] }
  0x24   : > { %288 = vst [vmem:[%s9902_s16 + $0x40] sm:$0xf] %v287_v17  ;;  %v329_v38 = vld [vmem:[%s9897_s15 + $0x128] sm:$0xf]  ;;  %v331_v39 = vld [vmem:[%s9897_s15 + $0x130] sm:$0xf] }
  0x25   : > { %290 = vst [vmem:[%s9902_s16 + $0x44] sm:$0xf] %v289_v18  ;;  %v333_v40 = vld [vmem:[%s9897_s15 + $0x138] sm:$0xf]  ;;  %v335_v41 = vld [vmem:[%s9897_s15 + $0x140] sm:$0xf] }
  0x26   : > { %292 = vst [vmem:[%s9902_s16 + $0x48] sm:$0xf] %v291_v19  ;;  %v337_v42 = vld [vmem:[%s9897_s15 + $0x148] sm:$0xf]  ;;  %v339_v43 = vld [vmem:[%s9897_s15 + $0x150] sm:$0xf] }
  0x27   : > { %294 = vst [vmem:[%s9902_s16 + $0x4c] sm:$0xf] %v293_v20  ;;  %v341_v44 = vld [vmem:[%s9897_s15 + $0x158] sm:$0xf]  ;;  %v343_v45 = vld [vmem:[%s9897_s15 + $0x160] sm:$0xf] }
  0x28   : > { %296 = vst [vmem:[%s9902_s16 + $0x50] sm:$0xf] %v295_v21  ;;  %v345_v46 = vld [vmem:[%s9897_s15 + $0x168] sm:$0xf]  ;;  %v347_v47 = vld [vmem:[%s9897_s15 + $0x170] sm:$0xf] }
  0x29   : > { %298 = vst [vmem:[%s9902_s16 + $0x54] sm:$0xf] %v297_v22  ;;  %v349_v48 = vld [vmem:[%s9897_s15 + $0x178] sm:$0xf]  ;;  %v351_v49 = vld [vmem:[%s9897_s15 + $0x180] sm:$0xf] }
  0x2a   : > { %300 = vst [vmem:[%s9902_s16 + $0x58] sm:$0xf] %v299_v23  ;;  %v353_v50 = vld [vmem:[%s9897_s15 + $0x188] sm:$0xf]  ;;  %v355_v51 = vld [vmem:[%s9897_s15 + $0x190] sm:$0xf] }
  0x2b   : > { %302 = vst [vmem:[%s9902_s16 + $0x5c] sm:$0xf] %v301_v24  ;;  %v357_v52 = vld [vmem:[%s9897_s15 + $0x198] sm:$0xf]  ;;  %v359_v53 = vld [vmem:[%s9897_s15 + $0x1a0] sm:$0xf] }
  0x2c   : > { %304 = vst [vmem:[%s9902_s16 + $0x60] sm:$0xf] %v303_v25  ;;  %v361_v54 = vld [vmem:[%s9897_s15 + $0x1a8] sm:$0xf]  ;;  %v363_v55 = vld [vmem:[%s9897_s15 + $0x1b0] sm:$0xf] }
  0x2d   : > { %306 = vst [vmem:[%s9902_s16 + $0x64] sm:$0xf] %v305_v26  ;;  %v365_v56 = vld [vmem:[%s9897_s15 + $0x1b8] sm:$0xf]  ;;  %v367_v57 = vld [vmem:[%s9897_s15 + $0x1c0] sm:$0xf] }
  0x2e   : > { %308 = vst [vmem:[%s9902_s16 + $0x68] sm:$0xf] %v307_v27  ;;  %v369_v58 = vld [vmem:[%s9897_s15 + $0x1c8] sm:$0xf]  ;;  %v371_v59 = vld [vmem:[%s9897_s15 + $0x1d0] sm:$0xf] }
  0x2f   : > { %310 = vst [vmem:[%s9902_s16 + $0x6c] sm:$0xf] %v309_v28  ;;  %v373_v60 = vld [vmem:[%s9897_s15 + $0x1d8] sm:$0xf]  ;;  %v375_v61 = vld [vmem:[%s9897_s15 + $0x1e0] sm:$0xf] }
  0x30   : > { %312 = vst [vmem:[%s9902_s16 + $0x70] sm:$0xf] %v311_v29  ;;  %v377_v62 = vld [vmem:[%s9897_s15 + $0x1e8] sm:$0xf]  ;;  %v379_v63 = vld [vmem:[%s9897_s15 + $0x1f0] sm:$0xf] }
  0x31   : > { %314 = vst [vmem:[%s9902_s16 + $0x74] sm:$0xf] %v313_v30  ;;  %v381_v0 = vld [vmem:[%s9897_s15 + $0x1f8] sm:$0xf]  ;;  %v383_v1 = vld [vmem:[%s9897_s15 + $0x200] sm:$0xf] }
  0x32   : > { %316 = vst [vmem:[%s9902_s16 + $0x78] sm:$0xf] %v315_v31  ;;  %v385_v2 = vld [vmem:[%s9897_s15 + $0x208] sm:$0xf]  ;;  %v387_v3 = vld [vmem:[%s9897_s15 + $0x210] sm:$0xf] }
  0x33   : > { %318 = vst [vmem:[%s9902_s16 + $0x7c] sm:$0xf] %v317_v32  ;;  %v389_v4 = vld [vmem:[%s9897_s15 + $0x218] sm:$0xf]  ;;  %v391_v5 = vld [vmem:[%s9897_s15 + $0x220] sm:$0xf] }
  0x34   : > { %320 = vst [vmem:[%s9902_s16 + $0x80] sm:$0xf] %v319_v33  ;;  %v393_v6 = vld [vmem:[%s9897_s15 + $0x228] sm:$0xf]  ;;  %v395_v7 = vld [vmem:[%s9897_s15 + $0x230] sm:$0xf] }
  0x35   : > { %322 = vst [vmem:[%s9902_s16 + $0x84] sm:$0xf] %v321_v34  ;;  %v397_v8 = vld [vmem:[%s9897_s15 + $0x238] sm:$0xf]  ;;  %v399_v9 = vld [vmem:[%s9897_s15 + $0x240] sm:$0xf] }
  0x36   : > { %324 = vst [vmem:[%s9902_s16 + $0x88] sm:$0xf] %v323_v35  ;;  %v401_v10 = vld [vmem:[%s9897_s15 + $0x248] sm:$0xf]  ;;  %v403_v11 = vld [vmem:[%s9897_s15 + $0x250] sm:$0xf] }
  0x37   : > { %326 = vst [vmem:[%s9902_s16 + $0x8c] sm:$0xf] %v325_v36  ;;  %v405_v12 = vld [vmem:[%s9897_s15 + $0x258] sm:$0xf]  ;;  %v407_v13 = vld [vmem:[%s9897_s15 + $0x260] sm:$0xf] }
  0x38   : > { %328 = vst [vmem:[%s9902_s16 + $0x90] sm:$0xf] %v327_v37  ;;  %v409_v14 = vld [vmem:[%s9897_s15 + $0x268] sm:$0xf]  ;;  %v411_v15 = vld [vmem:[%s9897_s15 + $0x270] sm:$0xf] }
  0x39   : > { %330 = vst [vmem:[%s9902_s16 + $0x94] sm:$0xf] %v329_v38  ;;  %v413_v16 = vld [vmem:[%s9897_s15 + $0x278] sm:$0xf]  ;;  %v415_v17 = vld [vmem:[%s9897_s15 + $0x280] sm:$0xf] }
  0x3a   : > { %332 = vst [vmem:[%s9902_s16 + $0x98] sm:$0xf] %v331_v39  ;;  %v417_v18 = vld [vmem:[%s9897_s15 + $0x288] sm:$0xf]  ;;  %v419_v19 = vld [vmem:[%s9897_s15 + $0x290] sm:$0xf] }
  0x3b   : > { %334 = vst [vmem:[%s9902_s16 + $0x9c] sm:$0xf] %v333_v40  ;;  %v421_v20 = vld [vmem:[%s9897_s15 + $0x298] sm:$0xf]  ;;  %v423_v21 = vld [vmem:[%s9897_s15 + $0x2a0] sm:$0xf] }
  0x3c   : > { %336 = vst [vmem:[%s9902_s16 + $0xa0] sm:$0xf] %v335_v41  ;;  %v425_v22 = vld [vmem:[%s9897_s15 + $0x2a8] sm:$0xf]  ;;  %v427_v23 = vld [vmem:[%s9897_s15 + $0x2b0] sm:$0xf] }
  0x3d   : > { %338 = vst [vmem:[%s9902_s16 + $0xa4] sm:$0xf] %v337_v42  ;;  %v429_v24 = vld [vmem:[%s9897_s15 + $0x2b8] sm:$0xf]  ;;  %v431_v25 = vld [vmem:[%s9897_s15 + $0x2c0] sm:$0xf] }
  0x3e   : > { %340 = vst [vmem:[%s9902_s16 + $0xa8] sm:$0xf] %v339_v43  ;;  %v433_v26 = vld [vmem:[%s9897_s15 + $0x2c8] sm:$0xf]  ;;  %v435_v27 = vld [vmem:[%s9897_s15 + $0x2d0] sm:$0xf] }
  0x3f   : > { %342 = vst [vmem:[%s9902_s16 + $0xac] sm:$0xf] %v341_v44  ;;  %v437_v28 = vld [vmem:[%s9897_s15 + $0x2d8] sm:$0xf]  ;;  %v439_v29 = vld [vmem:[%s9897_s15 + $0x2e0] sm:$0xf] }
  0x40   : > { %344 = vst [vmem:[%s9902_s16 + $0xb0] sm:$0xf] %v343_v45  ;;  %v441_v30 = vld [vmem:[%s9897_s15 + $0x2e8] sm:$0xf]  ;;  %v443_v31 = vld [vmem:[%s9897_s15 + $0x2f0] sm:$0xf] }
  0x41   : > { %346 = vst [vmem:[%s9902_s16 + $0xb4] sm:$0xf] %v345_v46  ;;  %v445_v32 = vld [vmem:[%s9897_s15 + $0x2f8] sm:$0xf] }
  0x42   : > { %348 = vst [vmem:[%s9902_s16 + $0xb8] sm:$0xf] %v347_v47 }
  0x43   : > { %350 = vst [vmem:[%s9902_s16 + $0xbc] sm:$0xf] %v349_v48 }
  0x44   : > { %352 = vst [vmem:[%s9902_s16 + $0xc0] sm:$0xf] %v351_v49 }
  0x45   : > { %354 = vst [vmem:[%s9902_s16 + $0xc4] sm:$0xf] %v353_v50 }
  0x46   : > { %356 = vst [vmem:[%s9902_s16 + $0xc8] sm:$0xf] %v355_v51 }
  0x47   : > { %358 = vst [vmem:[%s9902_s16 + $0xcc] sm:$0xf] %v357_v52 }
  0x48   : > { %360 = vst [vmem:[%s9902_s16 + $0xd0] sm:$0xf] %v359_v53 }
  0x49   : > { %362 = vst [vmem:[%s9902_s16 + $0xd4] sm:$0xf] %v361_v54 }
  0x4a   : > { %364 = vst [vmem:[%s9902_s16 + $0xd8] sm:$0xf] %v363_v55 }
  0x4b   : > { %366 = vst [vmem:[%s9902_s16 + $0xdc] sm:$0xf] %v365_v56 }
  0x4c   : > { %368 = vst [vmem:[%s9902_s16 + $0xe0] sm:$0xf] %v367_v57 }
  0x4d   : > { %370 = vst [vmem:[%s9902_s16 + $0xe4] sm:$0xf] %v369_v58 }
  0x4e   : > { %372 = vst [vmem:[%s9902_s16 + $0xe8] sm:$0xf] %v371_v59 }
  0x4f   : > { %374 = vst [vmem:[%s9902_s16 + $0xec] sm:$0xf] %v373_v60 }
  0x50   : > { %376 = vst [vmem:[%s9902_s16 + $0xf0] sm:$0xf] %v375_v61 }
  0x51   : > { %378 = vst [vmem:[%s9902_s16 + $0xf4] sm:$0xf] %v377_v62 }
  0x52   : > { %380 = vst [vmem:[%s9902_s16 + $0xf8] sm:$0xf] %v379_v63 }
  0x53   : > { %382 = vst [vmem:[%s9902_s16 + $0xfc] sm:$0xf] %v381_v0 }
  0x54   : > { %384 = vst [vmem:[%s9902_s16 + $0x100] sm:$0xf] %v383_v1 }
  0x55   : > { %386 = vst [vmem:[%s9902_s16 + $0x104] sm:$0xf] %v385_v2 }
  0x56   : > { %388 = vst [vmem:[%s9902_s16 + $0x108] sm:$0xf] %v387_v3 }
  0x57   : > { %390 = vst [vmem:[%s9902_s16 + $0x10c] sm:$0xf] %v389_v4 }
  0x58   : > { %392 = vst [vmem:[%s9902_s16 + $0x110] sm:$0xf] %v391_v5 }
  0x59   : > { %394 = vst [vmem:[%s9902_s16 + $0x114] sm:$0xf] %v393_v6 }
  0x5a   : > { %396 = vst [vmem:[%s9902_s16 + $0x118] sm:$0xf] %v395_v7 }
  0x5b   : > { %398 = vst [vmem:[%s9902_s16 + $0x11c] sm:$0xf] %v397_v8 }
  0x5c   : > { %400 = vst [vmem:[%s9902_s16 + $0x120] sm:$0xf] %v399_v9 }
  0x5d   : > { %402 = vst [vmem:[%s9902_s16 + $0x124] sm:$0xf] %v401_v10 }
  0x5e   : > { %404 = vst [vmem:[%s9902_s16 + $0x128] sm:$0xf] %v403_v11 }
  0x5f   : > { %406 = vst [vmem:[%s9902_s16 + $0x12c] sm:$0xf] %v405_v12 }
  0x60   : > { %408 = vst [vmem:[%s9902_s16 + $0x130] sm:$0xf] %v407_v13 }
  0x61   : > { %410 = vst [vmem:[%s9902_s16 + $0x134] sm:$0xf] %v409_v14 }
  0x62   : > { %412 = vst [vmem:[%s9902_s16 + $0x138] sm:$0xf] %v411_v15 }
  0x63   : > { %414 = vst [vmem:[%s9902_s16 + $0x13c] sm:$0xf] %v413_v16 }
  0x64   : > { %416 = vst [vmem:[%s9902_s16 + $0x140] sm:$0xf] %v415_v17 }
  0x65   : > { %418 = vst [vmem:[%s9902_s16 + $0x144] sm:$0xf] %v417_v18 }
  0x66   : > { %420 = vst [vmem:[%s9902_s16 + $0x148] sm:$0xf] %v419_v19 }
  0x67   : > { %422 = vst [vmem:[%s9902_s16 + $0x14c] sm:$0xf] %v421_v20 }
  0x68   : > { %424 = vst [vmem:[%s9902_s16 + $0x150] sm:$0xf] %v423_v21 }
  0x69   : > { %426 = vst [vmem:[%s9902_s16 + $0x154] sm:$0xf] %v425_v22 }
  0x6a   : > { %428 = vst [vmem:[%s9902_s16 + $0x158] sm:$0xf] %v427_v23 }
  0x6b   : > { %430 = vst [vmem:[%s9902_s16 + $0x15c] sm:$0xf] %v429_v24 }
  0x6c   : > { %432 = vst [vmem:[%s9902_s16 + $0x160] sm:$0xf] %v431_v25 }
  0x6d   : > { %434 = vst [vmem:[%s9902_s16 + $0x164] sm:$0xf] %v433_v26 }
  0x6e   : > { %436 = vst [vmem:[%s9902_s16 + $0x168] sm:$0xf] %v435_v27 }
  0x6f   : > { %438 = vst [vmem:[%s9902_s16 + $0x16c] sm:$0xf] %v437_v28 }
  0x70   : > { %440 = vst [vmem:[%s9902_s16 + $0x170] sm:$0xf] %v439_v29 }
  0x71   : > { %442 = vst [vmem:[%s9902_s16 + $0x174] sm:$0xf] %v441_v30 }
  0x72   : > { %444 = vst [vmem:[%s9902_s16 + $0x178] sm:$0xf] %v443_v31 }
  0x73   : > { %446 = vst [vmem:[%s9902_s16 + $0x17c] sm:$0xf] %v445_v32 }
  0x74 PF: > { %p7266_p5 = scmp.ge.s32.totalorder %s9817_s28, 1  ;;  %p661_p6 = scmp.lt.s32.totalorder %s9817_s28, 3 }
  0x76   : > { %p662_p7 = pnand %p7266_p5, %p661_p6 }
  0x78   : > { %665 = sbr.rel (%p662_p7) target bundleno = 2381 (0x94d), region = 85 }
  0x7d   : > { %s668_s17 = sand.u32 1, %s9809_s26   ;;  %v9819_v37 = vmov 0   ;;  %v1180_v40 = vld [vmem:[%s15010_s2] sm:$0xff]  ;;  %v1181_v46 = vld [vmem:[%s15010_s2 + $0x8] sm:$0xff]  ;;  %v1182_v47 = vld [vmem:[%s15010_s2 + $0x10] sm:$0xff]  ;;  %p697_p8 = scmp.lt.s32.totalorder %s7261_s6, 1 }
  0x7e   : > { %s9766_s18 = smul.u32 384, %s668_s17  ;;  %9792 = vset.pattern.permute.xlu0 %v9819_v37  ;;  %9793 = vset.pattern.permute.xlu1 %v9819_v37  ;;  %v7269_v51 = vld [vmem:[%s15009_s1] sm:$0xf]  ;;  %v9304_v54 = vld [vmem:[%s15009_s1 + $0x14] sm:$0xf0]  ;;  %v1186_v14 = vld [vmem:[%s15010_s2 + $0x30] sm:$0xff] }
  0x7f   : > { %9794 = vset.pattern.permute.xlu2 %v9819_v37  ;;  %1310 = vperm.xlu0 %9792, %v1180_v40   ;;  %v8421_v55 = vld [vmem:[%s15009_s1 + $0x900] sm:$0xf]  ;;  %v9592_v56 = vld [vmem:[%s15009_s1 + $0x914] sm:$0xf0]  ;;  %v9301_v57 = vld [vmem:[%s15009_s1 + $0x4] sm:$0xf]  ;;  %v7270_v61 = vor.u32 %v9304_v54, %v7269_v51 }
  0x80   : > { %s10096_s19 = scalar_lea.vmem [#allocation3], %s9766_s18  ;;  %1320 = vperm.xlu1 %9793, %v1182_v47   ;;  %v7271_v58 = vld [vmem:[%s15009_s1 + $0x18] sm:$0xf0]  ;;  %v9589_v59 = vld [vmem:[%s15009_s1 + $0x904] sm:$0xf]  ;;  %v8422_v62 = vor.u32 %v9592_v56, %v8421_v55  ;;  %v1190_v25 = vld [vmem:[%s15010_s2 + $0x50] sm:$0xff] }
  0x81   : > { %v9260_v33 = vld [vmem:[%s10096_s19 + $0x38] sm:$0xff]  ;;  %v9259_v35 = vld [vmem:[%s10096_s19 + $0x30] sm:$0xff]  ;;  %v9258_v38 = vld [vmem:[%s10096_s19 + $0x28] sm:$0xff]  ;;  %v7274_v63 = vor.u32 %v9301_v57, %v7271_v58  ;;  %s15461_s6 = smov (!%p697_p8, %s7261_s6), 1 }
  0x82   : > { %v9268_v34 = vld [vmem:[%s10096_s19 + $0x78] sm:$0xff]  ;;  %4156 = vmatpush.bf16.msra.mxu0 %v9260_v33  ;;  %9749 = vmatpush.bf16.msra.mxu2 %v9260_v33  ;;  %v9267_v36 = vld [vmem:[%s10096_s19 + $0x70] sm:$0xff]  ;;  %v9266_v39 = vld [vmem:[%s10096_s19 + $0x68] sm:$0xff]  ;;  %s699_s23 = scalar_lea.vmem %s15015_s7, %s15461_s6 }
  0x83   : > { %4485 = vmatpush.bf16.msra.mxu1 %v9268_v34  ;;  %9757 = vmatpush.bf16.msra.mxu3 %v9268_v34  ;;  %v9257_v41 = vld [vmem:[%s10096_s19 + $0x20] sm:$0xff]  ;;  %v9256_v43 = vld [vmem:[%s10096_s19 + $0x18] sm:$0xff]  ;;  %v9255_v45 = vld [vmem:[%s10096_s19 + $0x10] sm:$0xff] }
  0x84   : > { %v9265_v42 = vld [vmem:[%s10096_s19 + $0x60] sm:$0xff]  ;;  %v9264_v44 = vld [vmem:[%s10096_s19 + $0x58] sm:$0xff]  ;;  %v9263_v48 = vld [vmem:[%s10096_s19 + $0x50] sm:$0xff] }
  0x85   : > { %v9254_v49 = vld [vmem:[%s10096_s19 + $0x8] sm:$0xff]  ;;  %v9253_v52 = vld [vmem:[%s10096_s19] sm:$0xff]  ;;  %v8423_v60 = vld [vmem:[%s15009_s1 + $0x918] sm:$0xf0] }
  0x86   : > { %4157 = vmatpush.bf16.msra.mxu0 %v9259_v35  ;;  %9750 = vmatpush.bf16.msra.mxu2 %v9259_v35  ;;  %v9262_v50 = vld [vmem:[%s10096_s19 + $0x48] sm:$0xff]  ;;  %v9261_v53 = vld [vmem:[%s10096_s19 + $0x40] sm:$0xff]  ;;  %v8426_v0 = vor.u32 %v9589_v59, %v8423_v60  ;;  %v1183_v1 = vld [vmem:[%s15010_s2 + $0x18] sm:$0xff] }
  0x87   : > { %4486 = vmatpush.bf16.msra.mxu1 %v9267_v36  ;;  %9758 = vmatpush.bf16.msra.mxu3 %v9267_v36  ;;  %v7293_v2 = vld [vmem:[%s15009_s1 + $0x30] sm:$0xf]  ;;  %v9310_v3 = vld [vmem:[%s15009_s1 + $0x44] sm:$0xf0]  ;;  %v9307_v6 = vld [vmem:[%s15009_s1 + $0x34] sm:$0xf] }
  0x88   : > { %1315 = vperm.xlu0 %9792, %v1181_v46   ;;  %1325 = vperm.xlu1 %9793, %v1183_v1   ;;  %v8445_v4 = vld [vmem:[%s15009_s1 + $0x930] sm:$0xf]  ;;  %v9598_v5 = vld [vmem:[%s15009_s1 + $0x944] sm:$0xf0]  ;;  %v7295_v7 = vld [vmem:[%s15009_s1 + $0x48] sm:$0xf0]  ;;  %v7294_v10 = vor.u32 %v9310_v3, %v7293_v2 }
  0x89   : > { %v9595_v8 = vld [vmem:[%s15009_s1 + $0x934] sm:$0xf]  ;;  %v8447_v9 = vld [vmem:[%s15009_s1 + $0x948] sm:$0xf0]  ;;  %v8446_v11 = vor.u32 %v9598_v5, %v8445_v4  ;;  %v7298_v12 = vor.u32 %v9307_v6, %v7295_v7  ;;  %v1187_v15 = vld [vmem:[%s15010_s2 + $0x38] sm:$0xff] }
  0x8a   : > { %4158 = vmatpush.bf16.msra.mxu0 %v9258_v38  ;;  %9751 = vmatpush.bf16.msra.mxu2 %v9258_v38  ;;  %v8450_v13 = vor.u32 %v9595_v8, %v8447_v9  ;;  %v7317_v16 = vld [vmem:[%s15009_s1 + $0x60] sm:$0xf]  ;;  %v9316_v17 = vld [vmem:[%s15009_s1 + $0x74] sm:$0xf0]  ;;  %v9313_v20 = vld [vmem:[%s15009_s1 + $0x64] sm:$0xf] }
  0x8b   : > { %4487 = vmatpush.bf16.msra.mxu1 %v9266_v39  ;;  %9759 = vmatpush.bf16.msra.mxu3 %v9266_v39  ;;  %v8469_v18 = vld [vmem:[%s15009_s1 + $0x960] sm:$0xf]  ;;  %v9604_v19 = vld [vmem:[%s15009_s1 + $0x974] sm:$0xf0]  ;;  %v7319_v21 = vld [vmem:[%s15009_s1 + $0x78] sm:$0xf0]  ;;  %v7318_v26 = vor.u32 %v9316_v17, %v7317_v16 }
  0x8c   : > { %v9601_v22 = vld [vmem:[%s15009_s1 + $0x964] sm:$0xf]  ;;  %v8471_v23 = vld [vmem:[%s15009_s1 + $0x978] sm:$0xf0]  ;;  %v8470_v27 = vor.u32 %v9604_v19, %v8469_v18  ;;  %v7322_v28 = vor.u32 %v9313_v20, %v7319_v21  ;;  %v1185_v30 = vld [vmem:[%s15010_s2 + $0x28] sm:$0xff] }
  0x8d   : > { %v1184_v24 = vld [vmem:[%s15010_s2 + $0x20] sm:$0xff]  ;;  %v8474_v29 = vor.u32 %v9601_v22, %v8471_v23  ;;  %v1189_v31 = vld [vmem:[%s15010_s2 + $0x48] sm:$0xff]  ;;  %v7341_v33 = vld [vmem:[%s15009_s1 + $0x90] sm:$0xf] }
  0x8e   : > { %4159 = vmatpush.bf16.msra.mxu0 %v9257_v41  ;;  %9752 = vmatpush.bf16.msra.mxu2 %v9257_v41  ;;  %v1193_v32 = vld [vmem:[%s15010_s2 + $0x68] sm:$0xff]  ;;  %v8493_v35 = vld [vmem:[%s15009_s1 + $0x990] sm:$0xf]  ;;  %v9319_v37 = vld [vmem:[%s15009_s1 + $0x94] sm:$0xf] }
  0x8f   : > { %4488 = vmatpush.bf16.msra.mxu1 %v9265_v42  ;;  %9760 = vmatpush.bf16.msra.mxu3 %v9265_v42  ;;  %v9322_v34 = vld [vmem:[%s15009_s1 + $0xa4] sm:$0xf0]  ;;  %v7343_v38 = vld [vmem:[%s15009_s1 + $0xa8] sm:$0xf0]  ;;  %v9607_v39 = vld [vmem:[%s15009_s1 + $0x994] sm:$0xf] }
  0x90   : > { %1340 = vperm.xlu0 %9792, %v1186_v14   ;;  %1345 = vperm.xlu1 %9793, %v1187_v15   ;;  %v9610_v36 = vld [vmem:[%s15009_s1 + $0x9a4] sm:$0xf0]  ;;  %v8495_v40 = vld [vmem:[%s15009_s1 + $0x9a8] sm:$0xf0]  ;;  %v1188_v41 = vld [vmem:[%s15010_s2 + $0x40] sm:$0xff]  ;;  %v7346_v46 = vor.u32 %v9319_v37, %v7343_v38 }
  0x91   : > { %1330 = vperm.xlu2 %9794, %v1184_v24   ;;  %v1192_v42 = vld [vmem:[%s15010_s2 + $0x60] sm:$0xff]  ;;  %v8498_v47 = vor.u32 %v9607_v39, %v8495_v40  ;;  %v9616_v54 = vld [vmem:[%s15009_s1 + $0x9d4] sm:$0xf0]  ;;  %v7367_v56 = vld [vmem:[%s15009_s1 + $0xd8] sm:$0xf0] }
  0x92   : > { %4160 = vmatpush.bf16.msra.mxu0 %v9256_v43  ;;  %9753 = vmatpush.bf16.msra.mxu2 %v9256_v43  ;;  %v1196_v43 = vld [vmem:[%s15010_s2 + $0x80] sm:$0xff]  ;;  %v8519_v58 = vld [vmem:[%s15009_s1 + $0x9d8] sm:$0xf0]  ;;  %v1194_v59 = vld [vmem:[%s15010_s2 + $0x70] sm:$0xff] }
  0x93   : > { %4489 = vmatpush.bf16.msra.mxu1 %v9264_v44  ;;  %9761 = vmatpush.bf16.msra.mxu3 %v9264_v44  ;;  %v7342_v44 = vor.u32 %v9322_v34, %v7341_v33  ;;  %v7365_v51 = vld [vmem:[%s15009_s1 + $0xc0] sm:$0xf]  ;;  %v9325_v55 = vld [vmem:[%s15009_s1 + $0xc4] sm:$0xf]  ;;  %v1198_v60 = vld [vmem:[%s15010_s2 + $0x90] sm:$0xff] }
  0x94   : > { %v9613_v57 = vld [vmem:[%s15009_s1 + $0x9c4] sm:$0xf]  ;;  %v1197_v2 = vld [vmem:[%s15010_s2 + $0x88] sm:$0xff]  ;;  %v7389_v5 = vld [vmem:[%s15009_s1 + $0xf0] sm:$0xf] }
  0x95   : > { %v8522_v1 = vor.u32 %v9613_v57, %v8519_v58  ;;  %v1201_v3 = vld [vmem:[%s15010_s2 + $0xa8] sm:$0xff]  ;;  %v8541_v7 = vld [vmem:[%s15009_s1 + $0x9f0] sm:$0xf]  ;;  %v9331_v9 = vld [vmem:[%s15009_s1 + $0xf4] sm:$0xf] }
  0x96   : > { %4161 = vmatpush.bf16.msra.mxu0 %v9255_v45  ;;  %9754 = vmatpush.bf16.msra.mxu2 %v9255_v45  ;;  %v8494_v45 = vor.u32 %v9610_v36, %v8493_v35  ;;  %v1205_v4 = vld [vmem:[%s15010_s2 + $0xc8] sm:$0xff]  ;;  %v1204_v14 = vld [vmem:[%s15010_s2 + $0xc0] sm:$0xff]  ;;  %v1203_v20 = vld [vmem:[%s15010_s2 + $0xb8] sm:$0xff] }
  0x97   : > { %4490 = vmatpush.bf16.msra.mxu1 %v9263_v48  ;;  %9762 = vmatpush.bf16.msra.mxu3 %v9263_v48  ;;  %v1191_v48 = vld [vmem:[%s15010_s2 + $0x58] sm:$0xff]  ;;  %v9334_v6 = vld [vmem:[%s15009_s1 + $0x104] sm:$0xf0]  ;;  %v1208_v15 = vld [vmem:[%s15010_s2 + $0xe0] sm:$0xff] }
  0x98   : > { %1360 = vperm.xlu1 %9793, %v1190_v25   ;;  %1355 = vperm.xlu0 %9792, %v1189_v31   ;;  %v9622_v8 = vld [vmem:[%s15009_s1 + $0xa04] sm:$0xf0]  ;;  %v7390_v16 = vor.u32 %v9334_v6, %v7389_v5  ;;  %v1207_v21 = vld [vmem:[%s15010_s2 + $0xd8] sm:$0xff]  ;;  %v7413_v23 = vld [vmem:[%s15009_s1 + $0x120] sm:$0xf] }
  0x99   : > { %1335 = vperm.xlu2 %9794, %v1185_v30   ;;  %v8542_v17 = vor.u32 %v9622_v8, %v8541_v7  ;;  %v1211_v22 = vld [vmem:[%s15010_s2 + $0xf8] sm:$0xff]  ;;  %v8565_v25 = vld [vmem:[%s15009_s1 + $0xa20] sm:$0xf]  ;;  %v1206_v31 = vld [vmem:[%s15010_s2 + $0xd0] sm:$0xff] }
  0x9a   : > { %4162 = vmatpush.bf16.msra.mxu0 %v9254_v49  ;;  %9755 = vmatpush.bf16.msra.mxu2 %v9254_v49  ;;  %v1195_v49 = vld [vmem:[%s15010_s2 + $0x78] sm:$0xff]  ;;  %v1214_v33 = vld [vmem:[%s15010_s2 + $0x110] sm:$0xff]  ;;  %v1209_v38 = vld [vmem:[%s15010_s2 + $0xe8] sm:$0xff] }
  0x9b   : > { %4491 = vmatpush.bf16.msra.mxu1 %v9262_v50  ;;  %9763 = vmatpush.bf16.msra.mxu3 %v9262_v50  ;;  %v1199_v50 = vld [vmem:[%s15010_s2 + $0x98] sm:$0xff]  ;;  %v1213_v39 = vld [vmem:[%s15010_s2 + $0x108] sm:$0xff]  ;;  %v1222_v5 = vld [vmem:[%s15010_s2 + $0x150] sm:$0xff] }
  0x9c   : > { %v9340_v24 = vld [vmem:[%s15009_s1 + $0x134] sm:$0xf0]  ;;  %v8567_v30 = vld [vmem:[%s15009_s1 + $0xa38] sm:$0xf0]  ;;  %v1217_v40 = vld [vmem:[%s15010_s2 + $0x128] sm:$0xff] }
  0x9d   : > { %v7414_v34 = vor.u32 %v9340_v24, %v7413_v23  ;;  %v1219_v57 = vld [vmem:[%s15010_s2 + $0x138] sm:$0xff]  ;;  %v1226_v6 = vld [vmem:[%s15010_s2 + $0x170] sm:$0xff] }
  0x9e   : > { %4163 = vmatpush.bf16.msra.mxu0 %v9253_v52  ;;  %9756 = vmatpush.bf16.msra.mxu2 %v9253_v52  ;;  %v9328_v52 = vld [vmem:[%s15009_s1 + $0xd4] sm:$0xf0]  ;;  %v7485_v24 = vld [vmem:[%s15009_s1 + $0x1b0] sm:$0xf] }
  0x9f   : > { %4492 = vmatpush.bf16.msra.mxu1 %v9261_v53  ;;  %9764 = vmatpush.bf16.msra.mxu3 %v9261_v53  ;;  %v8517_v53 = vld [vmem:[%s15009_s1 + $0x9c0] sm:$0xf]  ;;  %v1223_v58 = vld [vmem:[%s15010_s2 + $0x158] sm:$0xff] }
  0xa0   : > { %1375 = vperm.xlu1 %9793, %v1193_v32   ;;  %1370 = vperm.xlu0 %9792, %v1192_v42   ;;  %v1210_v32 = vld [vmem:[%s15010_s2 + $0xf0] sm:$0xff]  ;;  %v9346_v42 = vld [vmem:[%s15009_s1 + $0x164] sm:$0xf0] }
  0xa1   : > { %4164 = vmatmul.bf16.vlgmr.msra.gmra.mxu0 %v7270_v61  ;;  %4404 = vmatmul.bf16.vlgmr.msra.gmra.mxu2 %v8422_v62  ;;  %v1202_v61 = vld [vmem:[%s15010_s2 + $0xb0] sm:$0xff]  ;;  %v7366_v62 = vor.u32 %v9328_v52, %v7365_v51  ;;  %v1220_v51 = vld [vmem:[%s15010_s2 + $0x140] sm:$0xff] }
  0xa2   : > { %4493 = vmatmul.bf16.vlgmr.msra.gmra.mxu1 %v7274_v63  ;;  %4733 = vmatmul.bf16.vlgmr.msra.gmra.mxu3 %v8426_v0  ;;  %v8518_v63 = vor.u32 %v9616_v54, %v8517_v53  ;;  %v7370_v0 = vor.u32 %v9325_v55, %v7367_v56  ;;  %v1215_v56 = vld [vmem:[%s15010_s2 + $0x118] sm:$0xff] }
  0xa3   : > { %1350 = vperm.xlu2 %9794, %v1188_v41   ;;  %v7437_v41 = vld [vmem:[%s15009_s1 + $0x150] sm:$0xf] }
  0xa4   : > { %v7438_v52 = vor.u32 %v9346_v42, %v7437_v41 }
  0xa8   : > { %1390 = vperm.xlu1 %9793, %v1196_v43   ;;  %1385 = vperm.xlu0 %9792, %v1195_v49   ;;  %v8589_v43 = vld [vmem:[%s15009_s1 + $0xa50] sm:$0xf]  ;;  %v1212_v49 = vld [vmem:[%s15010_s2 + $0x100] sm:$0xff] }
  0xab   : > { %1365 = vperm.xlu2 %9794, %v1191_v48   ;;  %v8591_v48 = vld [vmem:[%s15009_s1 + $0xa68] sm:$0xf0] }
  0xb0   : > { %1405 = vperm.xlu1 %9793, %v1199_v50   ;;  %1400 = vperm.xlu0 %9792, %v1198_v60   ;;  %v1216_v50 = vld [vmem:[%s15010_s2 + $0x120] sm:$0xff]  ;;  %v9352_v60 = vld [vmem:[%s15009_s1 + $0x194] sm:$0xf0] }
  0xb1   : > { %4169 = vmatmul.bf16.gmra.mxu0 %v7294_v10  ;;  %4409 = vmatmul.bf16.gmra.mxu2 %v8446_v11  ;;  %v7391_v10 = vld [vmem:[%s15009_s1 + $0x108] sm:$0xf0]  ;;  %v9619_v11 = vld [vmem:[%s15009_s1 + $0x9f4] sm:$0xf] }
  0xb2   : > { %4498 = vmatmul.bf16.gmra.mxu1 %v7298_v12  ;;  %4738 = vmatmul.bf16.gmra.mxu3 %v8450_v13  ;;  %v8543_v12 = vld [vmem:[%s15009_s1 + $0xa08] sm:$0xf0]  ;;  %v1200_v13 = vld [vmem:[%s15010_s2 + $0xa0] sm:$0xff]  ;;  %v7394_v18 = vor.u32 %v9331_v9, %v7391_v10 }
  0xb3   : > { %1380 = vperm.xlu2 %9794, %v1194_v59   ;;  %v8546_v19 = vor.u32 %v9619_v11, %v8543_v12  ;;  %v7461_v59 = vld [vmem:[%s15009_s1 + $0x180] sm:$0xf] }
  0xb4   : > { %v7462_v7 = vor.u32 %v9352_v60, %v7461_v59  ;;  %v8661_v59 = vld [vmem:[%s15009_s1 + $0xae0] sm:$0xf]  ;;  %v9652_v60 = vld [vmem:[%s15009_s1 + $0xaf4] sm:$0xf0] }
  0xb8   : > { %1420 = vperm.xlu1 %9793, %v1202_v61   ;;  %1415 = vperm.xlu0 %9792, %v1201_v3   ;;  %v8613_v61 = vld [vmem:[%s15009_s1 + $0xa80] sm:$0xf]  ;;  %v8615_v3 = vld [vmem:[%s15009_s1 + $0xa98] sm:$0xf0] }
  0xbb   : > { %1395 = vperm.xlu2 %9794, %v1197_v2   ;;  %v9637_v2 = vld [vmem:[%s15009_s1 + $0xa84] sm:$0xf] }
  0xbc   : > { %v8618_v11 = vor.u32 %v9637_v2, %v8615_v3  ;;  %v1238_v2 = vld [vmem:[%s15010_s2 + $0x1d0] sm:$0xff] }
  0xbd   : > { %v1234_v3 = vld [vmem:[%s15010_s2 + $0x1b0] sm:$0xff] }
  0xc0   : > { %1435 = vperm.xlu1 %9793, %v1205_v4   ;;  %1430 = vperm.xlu0 %9792, %v1204_v14   ;;  %v1218_v4 = vld [vmem:[%s15010_s2 + $0x130] sm:$0xff] }
  0xc1   : > { %4174 = vmatmul.bf16.gmra.mxu0 %v7318_v26  ;;  %4414 = vmatmul.bf16.gmra.mxu2 %v8470_v27  ;;  %v9628_v26 = vld [vmem:[%s15009_s1 + $0xa34] sm:$0xf0]  ;;  %v9337_v27 = vld [vmem:[%s15009_s1 + $0x124] sm:$0xf] }
  0xc2   : > { %4503 = vmatmul.bf16.gmra.mxu1 %v7322_v28  ;;  %4743 = vmatmul.bf16.gmra.mxu3 %v8474_v29  ;;  %v7415_v28 = vld [vmem:[%s15009_s1 + $0x138] sm:$0xf0]  ;;  %v9625_v29 = vld [vmem:[%s15009_s1 + $0xa24] sm:$0xf]  ;;  %v8566_v35 = vor.u32 %v9628_v26, %v8565_v25  ;;  %v9358_v25 = vld [vmem:[%s15009_s1 + $0x1c4] sm:$0xf0] }
  0xc3   : > { %1410 = vperm.xlu2 %9794, %v1200_v13   ;;  %v7418_v36 = vor.u32 %v9337_v27, %v7415_v28  ;;  %v8570_v37 = vor.u32 %v9625_v29, %v8567_v30  ;;  %v8637_v27 = vld [vmem:[%s15009_s1 + $0xab0] sm:$0xf]  ;;  %v9646_v28 = vld [vmem:[%s15009_s1 + $0xac4] sm:$0xf0]  ;;  %v9355_v29 = vld [vmem:[%s15009_s1 + $0x1b4] sm:$0xf] }
  0xc8   : > { %1450 = vperm.xlu1 %9793, %v1208_v15   ;;  %1445 = vperm.xlu0 %9792, %v1207_v21   ;;  %v1221_v15 = vld [vmem:[%s15010_s2 + $0x148] sm:$0xff] }
  0xcb   : > { %1425 = vperm.xlu2 %9794, %v1203_v20  }
  0xd0   : > { %1465 = vperm.xlu1 %9793, %v1211_v22   ;;  %1460 = vperm.xlu0 %9792, %v1210_v32   ;;  %v9643_v32 = vld [vmem:[%s15009_s1 + $0xab4] sm:$0xf] }
  0xd1   : > { %4179 = vmatmul.bf16.gmra.mxu0 %v7342_v44  ;;  %4419 = vmatmul.bf16.gmra.mxu2 %v8494_v45  ;;  %v9634_v44 = vld [vmem:[%s15009_s1 + $0xa64] sm:$0xf0]  ;;  %v9343_v45 = vld [vmem:[%s15009_s1 + $0x154] sm:$0xf] }
  0xd2   : > { %4508 = vmatmul.bf16.gmra.mxu1 %v7346_v46  ;;  %4748 = vmatmul.bf16.gmra.mxu3 %v8498_v47  ;;  %v7439_v46 = vld [vmem:[%s15009_s1 + $0x168] sm:$0xf0]  ;;  %v9631_v47 = vld [vmem:[%s15009_s1 + $0xa54] sm:$0xf]  ;;  %v8590_v53 = vor.u32 %v9634_v44, %v8589_v43 }
  0xd3   : > { %1440 = vperm.xlu2 %9794, %v1206_v31   ;;  %v7442_v54 = vor.u32 %v9343_v45, %v7439_v46  ;;  %v8594_v55 = vor.u32 %v9631_v47, %v8591_v48  ;;  %v7487_v31 = vld [vmem:[%s15009_s1 + $0x1c8] sm:$0xf0]  ;;  %v1227_v47 = vld [vmem:[%s15010_s2 + $0x178] sm:$0xff] }
  0xd4   : > { %v7490_v42 = vor.u32 %v9355_v29, %v7487_v31  ;;  %v1235_v48 = vld [vmem:[%s15010_s2 + $0x1b8] sm:$0xff]  ;;  %v9370_v29 = vld [vmem:[%s15009_s1 + $0x224] sm:$0xf0]  ;;  %v8685_v31 = vld [vmem:[%s15009_s1 + $0xb10] sm:$0xf] }
  0xd8   : > { %1480 = vperm.xlu1 %9793, %v1214_v33   ;;  %1475 = vperm.xlu0 %9792, %v1213_v39   ;;  %v8639_v33 = vld [vmem:[%s15009_s1 + $0xac8] sm:$0xf0]  ;;  %v7486_v39 = vor.u32 %v9358_v25, %v7485_v24 }
  0xd9   : > { %v8642_v43 = vor.u32 %v9643_v32, %v8639_v33  ;;  %v9658_v32 = vld [vmem:[%s15009_s1 + $0xb24] sm:$0xf0]  ;;  %v9367_v33 = vld [vmem:[%s15009_s1 + $0x214] sm:$0xf] }
  0xdb   : > { %1455 = vperm.xlu2 %9794, %v1209_v38  }
  0xe0   : > { %1495 = vperm.xlu1 %9793, %v1217_v40   ;;  %1490 = vperm.xlu0 %9792, %v1216_v50   ;;  %v8638_v40 = vor.u32 %v9646_v28, %v8637_v27  ;;  %v7533_v28 = vld [vmem:[%s15009_s1 + $0x210] sm:$0xf] }
  0xe1   : > { %4184 = vmatmul.bf16.gmra.mxu0 %v7366_v62  ;;  %4424 = vmatmul.bf16.gmra.mxu2 %v8518_v63  ;;  %v9640_v62 = vld [vmem:[%s15009_s1 + $0xa94] sm:$0xf0]  ;;  %v9349_v63 = vld [vmem:[%s15009_s1 + $0x184] sm:$0xf] }
  0xe2   : > { %4513 = vmatmul.bf16.gmra.mxu1 %v7370_v0  ;;  %4753 = vmatmul.bf16.gmra.mxu3 %v8522_v1  ;;  %v7463_v1 = vld [vmem:[%s15009_s1 + $0x198] sm:$0xf0]  ;;  %v8614_v8 = vor.u32 %v9640_v62, %v8613_v61  ;;  %v9361_v61 = vld [vmem:[%s15009_s1 + $0x1e4] sm:$0xf] }
  0xe3   : > { %1470 = vperm.xlu2 %9794, %v1212_v49   ;;  %v7466_v10 = vor.u32 %v9349_v63, %v7463_v1  ;;  %v1231_v49 = vld [vmem:[%s15010_s2 + $0x198] sm:$0xff]  ;;  %v9649_v63 = vld [vmem:[%s15009_s1 + $0xae4] sm:$0xf]  ;;  %v1230_v1 = vld [vmem:[%s15010_s2 + $0x190] sm:$0xff] }
  0xe4   : > { %v7511_v62 = vld [vmem:[%s15009_s1 + $0x1f8] sm:$0xf0] }
  0xe8   : > { %1510 = vperm.xlu1 %9793, %v1220_v51   ;;  %1505 = vperm.xlu0 %9792, %v1219_v57   ;;  %v9364_v57 = vld [vmem:[%s15009_s1 + $0x1f4] sm:$0xf0] }
  0xeb   : > { %1485 = vperm.xlu2 %9794, %v1215_v56   ;;  %v7509_v56 = vld [vmem:[%s15009_s1 + $0x1e0] sm:$0xf] }
  0xf0   : > { %1525 = vperm.xlu1 %9793, %v1223_v58   ;;  %1520 = vperm.xlu0 %9792, %v1222_v5   ;;  %v1331_v5 = vpop.permute.xlu2 %1330 }
  0xf1   : > { %4189 = vmatmul.bf16.gmra.mxu0 %v7390_v16  ;;  %4429 = vmatmul.bf16.gmra.mxu2 %v8542_v17  ;;  %v1311_v0 = vpop.permute.xlu0 %1310  ;;  %v1225_v16 = vld [vmem:[%s15010_s2 + $0x168] sm:$0xff] }
  0xf2   : > { %4518 = vmatmul.bf16.gmra.mxu1 %v7394_v18  ;;  %4758 = vmatmul.bf16.gmra.mxu3 %v8546_v19  ;;  %v1229_v17 = vld [vmem:[%s15010_s2 + $0x188] sm:$0xff]  ;;  %v1321_v30 = vpop.permute.xlu1 %1320 }
  0xf3   : > { %1500 = vperm.xlu2 %9794, %v1218_v4  }
  0xf8   : > { %1540 = vperm.xlu1 %9793, %v1226_v6   ;;  %1535 = vperm.xlu0 %9792, %v1225_v16   ;;  %v1233_v16 = vld [vmem:[%s15010_s2 + $0x1a8] sm:$0xff] }
  0xfa   : > { %v1316_v19 = vpop.permute.xlu0 %1315  ;;  %v1326_v51 = vpop.permute.xlu1 %1325 }
  0xfb   : > { %1515 = vperm.xlu2 %9794, %v1221_v15  }
 0x100   : > { %1555 = vperm.xlu1 %9793, %v1229_v17   ;;  %v1240_v17 = vld [vmem:[%s15010_s2 + $0x1e0] sm:$0xff] }
 0x101   : > { %4194 = vmatmul.bf16.gmra.mxu0 %v7414_v34  ;;  %4434 = vmatmul.bf16.gmra.mxu2 %v8566_v35  ;;  %v1224_v34 = vld [vmem:[%s15010_s2 + $0x160] sm:$0xff] }
 0x102   : > { %4523 = vmatmul.bf16.gmra.mxu1 %v7418_v36  ;;  %4763 = vmatmul.bf16.gmra.mxu3 %v8570_v37  ;;  %v1232_v35 = vld [vmem:[%s15010_s2 + $0x1a0] sm:$0xff] }
 0x103   : > { %v1228_v36 = vld [vmem:[%s15010_s2 + $0x180] sm:$0xff]  ;;  %1530 = vperm.xlu2 %9794, %v1224_v34   ;;  %v7535_v34 = vld [vmem:[%s15009_s1 + $0x228] sm:$0xf0] }
 0x104   : > { %1550 = vperm.xlu0 %9792, %v1228_v36   ;;  %v8687_v36 = vld [vmem:[%s15009_s1 + $0xb28] sm:$0xf0] }
 0x108   : > { %1570 = vperm.xlu1 %9793, %v1232_v35   ;;  %v9655_v35 = vld [vmem:[%s15009_s1 + $0xb14] sm:$0xf] }
 0x10b   : > { %1545 = vperm.xlu2 %9794, %v1227_v47   ;;  %v8686_v47 = vor.u32 %v9658_v32, %v8685_v31 }
 0x10c   : > { %1565 = vperm.xlu0 %9792, %v1231_v49   ;;  %v7538_v49 = vor.u32 %v9367_v33, %v7535_v34 }
 0x110   : > { %1585 = vperm.xlu1 %9793, %v1235_v48  }
 0x111   : > { %4199 = vmatmul.bf16.gmra.mxu0 %v7438_v52  ;;  %4439 = vmatmul.bf16.gmra.mxu2 %v8590_v53 }
 0x112   : > { %4528 = vmatmul.bf16.gmra.mxu1 %v7442_v54  ;;  %4768 = vmatmul.bf16.gmra.mxu3 %v8594_v55 }
 0x113   : > { %1560 = vperm.xlu2 %9794, %v1230_v1  }
 0x114   : > { %1580 = vperm.xlu0 %9792, %v1234_v3   ;;  %v9376_v3 = vld [vmem:[%s15009_s1 + $0x254] sm:$0xf0] }
 0x118   : > { %1600 = vperm.xlu1 %9793, %v1238_v2   ;;  %v7557_v2 = vld [vmem:[%s15009_s1 + $0x240] sm:$0xf] }
 0x11b   : > { %1575 = vperm.xlu2 %9794, %v1233_v16   ;;  %v1250_v16 = vld [vmem:[%s15010_s2 + $0x230] sm:$0xff] }
 0x11e   : > { %v4165_v9 = vpop.f32.mrf.mxu0 }
 0x11f   : > { %v4166_v12 = vadd.f32 %v4165_v9, %v1311_v0  ;;  %v4494_v13 = vpop.f32.mrf.mxu1  ;;  %v8663_v0 = vld [vmem:[%s15009_s1 + $0xaf8] sm:$0xf0] }
 0x120   : > { %1610 = vperm.xlu1 %9793, %v1240_v17   ;;  %v1246_v17 = vld [vmem:[%s15010_s2 + $0x210] sm:$0xff] }
 0x121   : > { %v10462_v14 = vadd.f32 %v4494_v13, %v4166_v12  ;;  %4204 = vmatmul.bf16.gmra.mxu0 %v7462_v7  ;;  %4444 = vmatmul.bf16.gmra.mxu2 %v8614_v8  ;;  %v7510_v7 = vor.u32 %v9364_v57, %v7509_v56  ;;  %v8662_v8 = vor.u32 %v9652_v60, %v8661_v59  ;;  %v1242_v56 = vld [vmem:[%s15010_s2 + $0x1f0] sm:$0xff]  ;;  %v1247_v57 = vld [vmem:[%s15010_s2 + $0x218] sm:$0xff] }
 0x122   : > { %4533 = vmatmul.bf16.gmra.mxu1 %v7466_v10  ;;  %4773 = vmatmul.bf16.gmra.mxu3 %v8618_v11  ;;  %v7514_v10 = vor.u32 %v9361_v61, %v7511_v62  ;;  %v8666_v11 = vor.u32 %v9649_v63, %v8663_v0  ;;  %v1239_v59 = vld [vmem:[%s15010_s2 + $0x1d8] sm:$0xff]  ;;  %v1346_v62 = vpop.permute.xlu1 %1345 }
 0x124   : > { %v10473_v18 = vpop.f32.mrf.mxu2 }
 0x125   : > { %15016 = vst [vmem:[#allocation4_spill] sm:$0xff] %v10473_v18  ;;  %v10475_v20 = vpop.f32.mrf.mxu3 }
 0x126   : > { %15017 = vst [vmem:[#allocation5_spill] sm:$0xff] %v10475_v20  ;;  %v4167_v21 = vpop.f32.mrf.mxu0 }
 0x127   : > { %v4168_v22 = vadd.f32 %v4167_v21, %v1316_v19  ;;  %v4496_v23 = vpop.f32.mrf.mxu1  ;;  %v1237_v19 = vld [vmem:[%s15010_s2 + $0x1c8] sm:$0xff] }
 0x128   : > { %1595 = vperm.xlu0 %9792, %v1237_v19  }
 0x129   : > { %v10483_v26 = vadd.f32 %v4496_v23, %v4168_v22  ;;  %v1336_v23 = vpop.permute.xlu2 %1335 }
 0x12c   : > { %v10512_v37 = vpop.f32.mrf.mxu2 }
 0x12d   : > { %15018 = vst [vmem:[#allocation6_spill] sm:$0xff] %v10512_v37  ;;  %v10514_v38 = vpop.f32.mrf.mxu3 }
 0x12e   : > { %15019 = vst [vmem:[#allocation7_spill] sm:$0xff] %v10514_v38  ;;  %v4170_v41 = vpop.f32.mrf.mxu0 }
 0x12f   : > { %v4171_v44 = vadd.f32 %v4170_v41, %v1321_v30  ;;  %v4499_v45 = vpop.f32.mrf.mxu1  ;;  %v1243_v41 = vld [vmem:[%s15010_s2 + $0x1f8] sm:$0xff] }
 0x130   : > { %1625 = vperm.xlu0 %9792, %v1243_v41  }
 0x131   : > { %v10516_v46 = vadd.f32 %v4499_v45, %v4171_v44  ;;  %4209 = vmatmul.bf16.gmra.mxu0 %v7486_v39  ;;  %4449 = vmatmul.bf16.gmra.mxu2 %v8638_v40  ;;  %v1236_v39 = vld [vmem:[%s15010_s2 + $0x1c0] sm:$0xff]  ;;  %v7534_v45 = vor.u32 %v9370_v29, %v7533_v28 }
 0x132   : > { %4538 = vmatmul.bf16.gmra.mxu1 %v7490_v42  ;;  %4778 = vmatmul.bf16.gmra.mxu3 %v8642_v43  ;;  %v1244_v40 = vld [vmem:[%s15010_s2 + $0x200] sm:$0xff]  ;;  %v1341_v43 = vpop.permute.xlu0 %1340 }
 0x133   : > { %1590 = vperm.xlu2 %9794, %v1236_v39   ;;  %1630 = vperm.xlu1 %9793, %v1244_v40   ;;  %v1245_v39 = vld [vmem:[%s15010_s2 + $0x208] sm:$0xff] }
 0x134   : > { %v10527_v50 = vpop.f32.mrf.mxu2  ;;  %v1253_v40 = vld [vmem:[%s15010_s2 + $0x248] sm:$0xff] }
 0x135   : > { %15020 = vst [vmem:[#allocation8_spill] sm:$0xff] %v10527_v50  ;;  %v10529_v52 = vpop.f32.mrf.mxu3 }
 0x136   : > { %15021 = vst [vmem:[#allocation9_spill] sm:$0xff] %v10529_v52  ;;  %v4172_v53 = vpop.f32.mrf.mxu0 }
 0x137   : > { %v4173_v54 = vadd.f32 %v4172_v53, %v1326_v51  ;;  %v4501_v55 = vpop.f32.mrf.mxu1  ;;  %v8690_v51 = vor.u32 %v9655_v35, %v8687_v36  ;;  %v9276_v35 = vld [vmem:[%s10096_s19 + $0xb8] sm:$0xff] }
 0x138   : > { %1605 = vperm.xlu0 %9792, %v1239_v59   ;;  %4814 = vmatpush.bf16.msrb.mxu2 %v9276_v35  ;;  %v9284_v36 = vld [vmem:[%s10096_s19 + $0xf8] sm:$0xff]  ;;  %v8733_v59 = vld [vmem:[%s15009_s1 + $0xb70] sm:$0xf] }
 0x139   : > { %v10537_v58 = vadd.f32 %v4501_v55, %v4173_v54  ;;  %5143 = vmatpush.bf16.msrb.mxu3 %v9284_v36  ;;  %v9272_v36 = vld [vmem:[%s10096_s19 + $0x98] sm:$0xff] }
 0x13b   : > { %1620 = vperm.xlu2 %9794, %v1242_v56   ;;  %1645 = vperm.xlu1 %9793, %v1247_v57   ;;  %v7581_v56 = vld [vmem:[%s15009_s1 + $0x270] sm:$0xf]  ;;  %v9382_v57 = vld [vmem:[%s15009_s1 + $0x284] sm:$0xf0] }
 0x13c   : > { %v10566_v4 = vpop.f32.mrf.mxu2 }
 0x13d   : > { %15022 = vst [vmem:[#allocation10_spill] sm:$0xff] %v10566_v4  ;;  %v10568_v6 = vpop.f32.mrf.mxu3 }
 0x13e   : > { %15023 = vst [vmem:[#allocation11_spill] sm:$0xff] %v10568_v6  ;;  %v4175_v9 = vpop.f32.mrf.mxu0 }
 0x13f   : > { %v4176_v12 = vadd.f32 %v4175_v9, %v1331_v5  ;;  %v4504_v13 = vpop.f32.mrf.mxu1  ;;  %v9373_v9 = vld [vmem:[%s15009_s1 + $0x244] sm:$0xf] }
 0x140   : > { %1640 = vperm.xlu0 %9792, %v1246_v17  }
 0x141   : > { %v10570_v15 = vadd.f32 %v4504_v13, %v4176_v12  ;;  %4214 = vmatmul.bf16.gmra.mxu0 %v7510_v7  ;;  %4454 = vmatmul.bf16.gmra.mxu2 %v8662_v8  ;;  %v8709_v7 = vld [vmem:[%s15009_s1 + $0xb40] sm:$0xf]  ;;  %v9664_v8 = vld [vmem:[%s15009_s1 + $0xb54] sm:$0xf0]  ;;  %v8711_v12 = vld [vmem:[%s15009_s1 + $0xb58] sm:$0xf0] }
 0x142   : > { %4543 = vmatmul.bf16.gmra.mxu1 %v7514_v10  ;;  %4783 = vmatmul.bf16.gmra.mxu3 %v8666_v11  ;;  %v7559_v10 = vld [vmem:[%s15009_s1 + $0x258] sm:$0xf0]  ;;  %v9661_v11 = vld [vmem:[%s15009_s1 + $0xb44] sm:$0xf]  ;;  %v1241_v13 = vld [vmem:[%s15010_s2 + $0x1e8] sm:$0xff] }
 0x143   : > { %1615 = vperm.xlu2 %9794, %v1241_v13   ;;  %1660 = vperm.xlu1 %9793, %v1250_v16   ;;  %v7562_v29 = vor.u32 %v9373_v9, %v7559_v10  ;;  %v8714_v31 = vor.u32 %v9661_v11, %v8711_v12  ;;  %v1248_v9 = vld [vmem:[%s15010_s2 + $0x220] sm:$0xff]  ;;  %v7582_v16 = vor.u32 %v9382_v57, %v7581_v56 }
 0x144   : > { %v10581_v21 = vpop.f32.mrf.mxu2  ;;  %v1256_v10 = vld [vmem:[%s15010_s2 + $0x260] sm:$0xff] }
 0x145   : > { %15024 = vst [vmem:[#allocation12_spill] sm:$0xff] %v10581_v21  ;;  %v10583_v22 = vpop.f32.mrf.mxu3  ;;  %v1252_v12 = vld [vmem:[%s15010_s2 + $0x240] sm:$0xff] }
 0x146   : > { %15025 = vst [vmem:[#allocation13_spill] sm:$0xff] %v10583_v22  ;;  %v4177_v24 = vpop.f32.mrf.mxu0 }
 0x147   : > { %v4178_v25 = vadd.f32 %v4177_v24, %v1336_v23  ;;  %v4506_v27 = vpop.f32.mrf.mxu1  ;;  %v7558_v24 = vor.u32 %v9376_v3, %v7557_v2  ;;  %v7583_v2 = vld [vmem:[%s15009_s1 + $0x288] sm:$0xf0]  ;;  %v9667_v3 = vld [vmem:[%s15009_s1 + $0xb74] sm:$0xf] }
 0x149   : > { %v10591_v30 = vadd.f32 %v4506_v27, %v4178_v25  ;;  %v8710_v25 = vor.u32 %v9664_v8, %v8709_v7  ;;  %v1351_v27 = vpop.permute.xlu2 %1350  ;;  %v8735_v7 = vld [vmem:[%s15009_s1 + $0xb88] sm:$0xf0] }
 0x14a   : > { %v9282_v8 = vld [vmem:[%s10096_s19 + $0xe8] sm:$0xff] }
 0x14b   : > { %1635 = vperm.xlu2 %9794, %v1245_v39   ;;  %1675 = vperm.xlu1 %9793, %v1253_v40   ;;  %v9280_v39 = vld [vmem:[%s10096_s19 + $0xd8] sm:$0xff] }
 0x14c   : > { %v10620_v42 = vpop.f32.mrf.mxu2  ;;  %v1251_v40 = vld [vmem:[%s15010_s2 + $0x238] sm:$0xff] }
 0x14d   : > { %15026 = vst [vmem:[#allocation14_spill] sm:$0xff] %v10620_v42  ;;  %v10622_v44 = vpop.f32.mrf.mxu3 }
 0x14e   : > { %15027 = vst [vmem:[#allocation15_spill] sm:$0xff] %v10622_v44  ;;  %v4180_v48 = vpop.f32.mrf.mxu0 }
 0x14f   : > { %v4181_v53 = vadd.f32 %v4180_v48, %v1341_v43  ;;  %v4509_v54 = vpop.f32.mrf.mxu1  ;;  %v1249_v43 = vld [vmem:[%s15010_s2 + $0x228] sm:$0xff]  ;;  %v1356_v48 = vpop.permute.xlu0 %1355 }
 0x150   : > { %1655 = vperm.xlu0 %9792, %v1249_v43   ;;  %v1259_v43 = vld [vmem:[%s15010_s2 + $0x278] sm:$0xff] }
 0x151   : > { %v10624_v55 = vadd.f32 %v4509_v54, %v4181_v53  ;;  %4219 = vmatmul.bf16.gmra.mxu0 %v7534_v45  ;;  %4459 = vmatmul.bf16.gmra.mxu2 %v8686_v47  ;;  %v9275_v47 = vld [vmem:[%s10096_s19 + $0xb0] sm:$0xff] }
 0x152   : > { %4548 = vmatmul.bf16.gmra.mxu1 %v7538_v49  ;;  %4788 = vmatmul.bf16.gmra.mxu3 %v8690_v51  ;;  %v9283_v54 = vld [vmem:[%s10096_s19 + $0xf0] sm:$0xff] }
 0x153   : > { %4815 = vmatpush.bf16.msrb.mxu2 %v9275_v47  ;;  %5144 = vmatpush.bf16.msrb.mxu3 %v9283_v54 }
 0x154   : > { %v10635_v60 = vpop.f32.mrf.mxu2  ;;  %1650 = vperm.xlu2 %9794, %v1248_v9   ;;  %1690 = vperm.xlu1 %9793, %v1256_v10   ;;  %v7607_v9 = vld [vmem:[%s15009_s1 + $0x2b8] sm:$0xf0]  ;;  %v9673_v10 = vld [vmem:[%s15009_s1 + $0xba4] sm:$0xf] }
 0x155   : > { %15028 = vst [vmem:[#allocation16_spill] sm:$0xff] %v10635_v60  ;;  %v10637_v61 = vpop.f32.mrf.mxu3 }
 0x156   : > { %15029 = vst [vmem:[#allocation17_spill] sm:$0xff] %v10637_v61  ;;  %v4182_v63 = vpop.f32.mrf.mxu0 }
 0x157   : > { %v4183_v0 = vadd.f32 %v4182_v63, %v1346_v62  ;;  %v4511_v1 = vpop.f32.mrf.mxu1  ;;  %v9670_v63 = vld [vmem:[%s15009_s1 + $0xb84] sm:$0xf0]  ;;  %5145 = vmatpush.bf16.msrb.mxu3 %v9282_v8 }
 0x158   : > { %v8734_v17 = vor.u32 %v9670_v63, %v8733_v59  ;;  %1670 = vperm.xlu0 %9792, %v1252_v12   ;;  %v9279_v59 = vld [vmem:[%s10096_s19 + $0xd0] sm:$0xff]  ;;  %v7605_v63 = vld [vmem:[%s15009_s1 + $0x2a0] sm:$0xf]  ;;  %v9270_v8 = vld [vmem:[%s10096_s19 + $0x88] sm:$0xff] }
 0x159   : > { %v10645_v5 = vadd.f32 %v4511_v1, %v4183_v0  ;;  %v9379_v0 = vld [vmem:[%s15009_s1 + $0x274] sm:$0xf]  ;;  %v9274_v1 = vld [vmem:[%s10096_s19 + $0xa8] sm:$0xff]  ;;  %v8759_v12 = vld [vmem:[%s15009_s1 + $0xbb8] sm:$0xf0] }
 0x15a   : > { %4816 = vmatpush.bf16.msrb.mxu2 %v9274_v1  ;;  %v8757_v1 = vld [vmem:[%s15009_s1 + $0xba0] sm:$0xf] }
 0x15c   : > { %v10674_v19 = vpop.f32.mrf.mxu2  ;;  %1665 = vperm.xlu2 %9794, %v1251_v40   ;;  %1705 = vperm.xlu1 %9793, %v1259_v43   ;;  %v8762_v40 = vor.u32 %v9673_v10, %v8759_v12  ;;  %v8781_v12 = vld [vmem:[%s15009_s1 + $0xbd0] sm:$0xf] }
 0x15d   : > { %15030 = vst [vmem:[#allocation18_spill] sm:$0xff] %v10674_v19  ;;  %v10676_v23 = vpop.f32.mrf.mxu3 }
 0x15e   : > { %15031 = vst [vmem:[#allocation19_spill] sm:$0xff] %v10676_v23  ;;  %v4185_v28 = vpop.f32.mrf.mxu0 }
 0x15f   : > { %v4186_v32 = vadd.f32 %v4185_v28, %v1351_v27  ;;  %v4514_v33 = vpop.f32.mrf.mxu1  ;;  %v7586_v28 = vor.u32 %v9379_v0, %v7583_v2  ;;  %v9388_v0 = vld [vmem:[%s15009_s1 + $0x2b4] sm:$0xf0] }
 0x161   : > { %v10678_v34 = vadd.f32 %v4514_v33, %v4186_v32  ;;  %4224 = vmatmul.bf16.gmra.mxu0 %v7558_v24  ;;  %4464 = vmatmul.bf16.gmra.mxu2 %v8710_v25  ;;  %v9273_v24 = vld [vmem:[%s10096_s19 + $0xa0] sm:$0xff]  ;;  %v1361_v25 = vpop.permute.xlu1 %1360 }
 0x162   : > { %4553 = vmatmul.bf16.gmra.mxu1 %v7562_v29  ;;  %4793 = vmatmul.bf16.gmra.mxu3 %v8714_v31  ;;  %v8738_v29 = vor.u32 %v9667_v3, %v8735_v7  ;;  %v9281_v33 = vld [vmem:[%s10096_s19 + $0xe0] sm:$0xff]  ;;  %v9676_v3 = vld [vmem:[%s15009_s1 + $0xbb4] sm:$0xf0] }
 0x163   : > { %4817 = vmatpush.bf16.msrb.mxu2 %v9273_v24  ;;  %5146 = vmatpush.bf16.msrb.mxu3 %v9281_v33  ;;  %v9385_v7 = vld [vmem:[%s15009_s1 + $0x2a4] sm:$0xf]  ;;  %v1275_v24 = vld [vmem:[%s15010_s2 + $0x2f8] sm:$0xff]  ;;  %v1371_v33 = vpop.permute.xlu0 %1370 }
 0x164   : > { %v10688_v41 = vpop.f32.mrf.mxu2  ;;  %1785 = vperm.xlu1 %9793, %v1275_v24   ;;  %v7631_v24 = vld [vmem:[%s15009_s1 + $0x2e8] sm:$0xf0] }
 0x165   : > { %15032 = vst [vmem:[#allocation20_spill] sm:$0xff] %v10688_v41  ;;  %v10693_v45 = vpop.f32.mrf.mxu3 }
 0x166   : > { %15033 = vst [vmem:[#allocation21_spill] sm:$0xff] %v10693_v45  ;;  %v4187_v49 = vpop.f32.mrf.mxu0 }
 0x167   : > { %v4188_v51 = vadd.f32 %v4187_v49, %v1356_v48  ;;  %v4516_v53 = vpop.f32.mrf.mxu1  ;;  %4818 = vmatpush.bf16.msrb.mxu2 %v9272_v36  ;;  %v1255_v48 = vld [vmem:[%s15010_s2 + $0x258] sm:$0xff]  ;;  %5147 = vmatpush.bf16.msrb.mxu3 %v9280_v39  ;;  %v7610_v39 = vor.u32 %v9385_v7, %v7607_v9  ;;  %v9394_v9 = vld [vmem:[%s15009_s1 + $0x2e4] sm:$0xf0] }
 0x168   : > { %1685 = vperm.xlu0 %9792, %v1255_v48  }
 0x169   : > { %v10706_v62 = vadd.f32 %v4516_v53, %v4188_v51  ;;  %v9271_v51 = vld [vmem:[%s10096_s19 + $0x90] sm:$0xff]  ;;  %v1366_v53 = vpop.permute.xlu2 %1365 }
 0x16b   : > { %4819 = vmatpush.bf16.msrb.mxu2 %v9271_v51  ;;  %5148 = vmatpush.bf16.msrb.mxu3 %v9279_v59  ;;  %v9277_v51 = vld [vmem:[%s10096_s19 + $0xc0] sm:$0xff] }
 0x16c   : > { %v10731_v11 = vpop.f32.mrf.mxu2 }
 0x16d   : > { %15034 = vst [vmem:[#allocation22_spill] sm:$0xff] %v10731_v11  ;;  %v10736_v13 = vpop.f32.mrf.mxu3 }
 0x16e   : > { %15035 = vst [vmem:[#allocation23_spill] sm:$0xff] %v10736_v13  ;;  %v4190_v27 = vpop.f32.mrf.mxu0 }
 0x16f   : > { %v4191_v31 = vadd.f32 %v4190_v27, %v1361_v25  ;;  %v4519_v32 = vpop.f32.mrf.mxu1  ;;  %4820 = vmatpush.bf16.msrb.mxu2 %v9270_v8  ;;  %v1258_v27 = vld [vmem:[%s15010_s2 + $0x270] sm:$0xff] }
 0x170   : > { %1700 = vperm.xlu0 %9792, %v1258_v27   ;;  %v7629_v8 = vld [vmem:[%s15009_s1 + $0x2d0] sm:$0xf]  ;;  %v9679_v27 = vld [vmem:[%s15009_s1 + $0xbd4] sm:$0xf] }
 0x171   : > { %v10740_v35 = vadd.f32 %v4519_v32, %v4191_v31  ;;  %4229 = vmatmul.bf16.gmra.mxu0 %v7582_v16  ;;  %4469 = vmatmul.bf16.gmra.mxu2 %v8734_v17  ;;  %v9278_v16 = vld [vmem:[%s10096_s19 + $0xc8] sm:$0xff]  ;;  %v8758_v31 = vor.u32 %v9676_v3, %v8757_v1  ;;  %v9269_v32 = vld [vmem:[%s10096_s19 + $0x80] sm:$0xff] }
 0x172   : > { %4558 = vmatmul.bf16.gmra.mxu1 %v7586_v28  ;;  %4798 = vmatmul.bf16.gmra.mxu3 %v8738_v29  ;;  %v1254_v17 = vld [vmem:[%s15010_s2 + $0x250] sm:$0xff]  ;;  %v7606_v29 = vor.u32 %v9388_v0, %v7605_v63  ;;  %v1376_v0 = vpop.permute.xlu1 %1375 }
 0x173   : > { %1680 = vperm.xlu2 %9794, %v1254_v17   ;;  %5149 = vmatpush.bf16.msrb.mxu3 %v9278_v16  ;;  %v9682_v16 = vld [vmem:[%s15009_s1 + $0xbe4] sm:$0xf0]  ;;  %v9391_v17 = vld [vmem:[%s15009_s1 + $0x2d4] sm:$0xf] }
 0x174   : > { %v10750_v47 = vpop.f32.mrf.mxu2  ;;  %4821 = vmatpush.bf16.msrb.mxu2 %v9269_v32  ;;  %v1269_v32 = vld [vmem:[%s15010_s2 + $0x2c8] sm:$0xff] }
 0x175   : > { %15036 = vst [vmem:[#allocation24_spill] sm:$0xff] %v10750_v47  ;;  %v10755_v49 = vpop.f32.mrf.mxu3 }
 0x176   : > { %15037 = vst [vmem:[#allocation25_spill] sm:$0xff] %v10755_v49  ;;  %v4192_v54 = vpop.f32.mrf.mxu0 }
 0x177   : > { %v4193_v56 = vadd.f32 %v4192_v54, %v1366_v53  ;;  %v4521_v57 = vpop.f32.mrf.mxu1  ;;  %5150 = vmatpush.bf16.msrb.mxu3 %v9277_v51  ;;  %v1257_v54 = vld [vmem:[%s15010_s2 + $0x268] sm:$0xff] }
 0x179   : > { %v10768_v2 = vadd.f32 %v4521_v57, %v4193_v56  ;;  %v1270_v56 = vld [vmem:[%s15010_s2 + $0x2d0] sm:$0xff] }
 0x17a   : > { %v1274_v57 = vld [vmem:[%s15010_s2 + $0x2f0] sm:$0xff]  ;;  %1760 = vperm.xlu1 %9793, %v1270_v56  }
 0x17b   : > { %1695 = vperm.xlu2 %9794, %v1257_v54   ;;  %1780 = vperm.xlu0 %9792, %v1274_v57   ;;  %v7634_v54 = vor.u32 %v9391_v17, %v7631_v24 }
 0x17c   : > { %v10793_v25 = vpop.f32.mrf.mxu2 }
 0x17d   : > { %15038 = vst [vmem:[#allocation26_spill] sm:$0xff] %v10793_v25  ;;  %v10798_v28 = vpop.f32.mrf.mxu3 }
 0x17e   : > { %15039 = vst [vmem:[#allocation27_spill] sm:$0xff] %v10798_v28  ;;  %v4195_v36 = vpop.f32.mrf.mxu0 }
 0x17f   : > { %v4196_v43 = vadd.f32 %v4195_v36, %v1371_v33  ;;  %v4524_v48 = vpop.f32.mrf.mxu1  ;;  %v1273_v33 = vld [vmem:[%s15010_s2 + $0x2e8] sm:$0xff] }
 0x181   : > { %v10802_v53 = vadd.f32 %v4524_v48, %v4196_v43  ;;  %4234 = vmatmul.bf16.gmra.mxu0 %v7606_v29  ;;  %4474 = vmatmul.bf16.gmra.mxu2 %v8758_v31  ;;  %v8783_v29 = vld [vmem:[%s15009_s1 + $0xbe8] sm:$0xf0]  ;;  %v1260_v31 = vld [vmem:[%s15010_s2 + $0x280] sm:$0xff]  ;;  %v8782_v43 = vor.u32 %v9682_v16, %v8781_v12  ;;  %v1381_v48 = vpop.permute.xlu2 %1380  ;;  %v1386_v16 = vpop.permute.xlu0 %1385 }
 0x182   : > { %4563 = vmatmul.bf16.gmra.mxu1 %v7610_v39  ;;  %4803 = vmatmul.bf16.gmra.mxu3 %v8762_v40  ;;  %v7630_v40 = vor.u32 %v9394_v9, %v7629_v8  ;;  %v8786_v56 = vor.u32 %v9679_v27, %v8783_v29  ;;  %v1268_v8 = vld [vmem:[%s15010_s2 + $0x2c0] sm:$0xff] }
 0x183   : > { %1710 = vperm.xlu2 %9794, %v1260_v31   ;;  %1755 = vperm.xlu1 %9793, %v1269_v32   ;;  %v7653_v29 = vld [vmem:[%s15009_s1 + $0x300] sm:$0xf]  ;;  %v9400_v31 = vld [vmem:[%s15009_s1 + $0x314] sm:$0xf0] }
 0x184   : > { %v10813_v59 = vpop.f32.mrf.mxu2  ;;  %1775 = vperm.xlu0 %9792, %v1273_v33   ;;  %v9397_v33 = vld [vmem:[%s15009_s1 + $0x304] sm:$0xf] }
 0x185   : > { %15040 = vst [vmem:[#allocation28_spill] sm:$0xff] %v10813_v59  ;;  %v10815_v63 = vpop.f32.mrf.mxu3 }
 0x186   : > { %15041 = vst [vmem:[#allocation29_spill] sm:$0xff] %v10815_v63  ;;  %v4197_v1 = vpop.f32.mrf.mxu0 }
 0x187   : > { %v4198_v3 = vadd.f32 %v4197_v1, %v1376_v0  ;;  %v4526_v7 = vpop.f32.mrf.mxu1 }
 0x189   : > { %v10823_v10 = vadd.f32 %v4526_v7, %v4198_v3  ;;  %v1272_v3 = vld [vmem:[%s15010_s2 + $0x2e0] sm:$0xff] }
 0x18a   : > { %v1264_v7 = vld [vmem:[%s15010_s2 + $0x2a0] sm:$0xff] }
 0x18b   : > { %1770 = vperm.xlu2 %9794, %v1272_v3   ;;  %1730 = vperm.xlu1 %9793, %v1264_v7  }
 0x18c   : > { %v10852_v36 = vpop.f32.mrf.mxu2  ;;  %1750 = vperm.xlu0 %9792, %v1268_v8   ;;  %v7654_v8 = vor.u32 %v9400_v31, %v7653_v29  ;;  %v1277_v29 = vld [vmem:[%s15010_s2 + $0x308] sm:$0xff]  ;;  %v1262_v31 = vld [vmem:[%s15010_s2 + $0x290] sm:$0xff] }
 0x18d   : > { %15042 = vst [vmem:[#allocation30_spill] sm:$0xff] %v10852_v36  ;;  %v10854_v39 = vpop.f32.mrf.mxu3 }
 0x18e   : > { %15043 = vst [vmem:[#allocation31_spill] sm:$0xff] %v10854_v39  ;;  %v4200_v51 = vpop.f32.mrf.mxu0 }
 0x18f   : > { %v4201_v57 = vadd.f32 %v4200_v51, %v1381_v48  ;;  %v4529_v0 = vpop.f32.mrf.mxu1  ;;  %v9305_v48 = vld [vmem:[%s15009_s1 + $0x1c] sm:$0xf0]  ;;  %v9302_v51 = vld [vmem:[%s15009_s1 + $0xc] sm:$0xf] }
 0x191   : > { %v10856_v1 = vadd.f32 %v4529_v0, %v4201_v57  ;;  %4239 = vmatmul.bf16.gmra.mxu0 %v7630_v40  ;;  %4479 = vmatmul.bf16.gmra.mxu2 %v8782_v43  ;;  %v7655_v40 = vld [vmem:[%s15009_s1 + $0x318] sm:$0xf0]  ;;  %v7277_v43 = vld [vmem:[%s15009_s1 + $0x8] sm:$0xf] }
 0x192   : > { %4568 = vmatmul.bf16.gmra.mxu1 %v7634_v54  ;;  %4808 = vmatmul.bf16.gmra.mxu3 %v8786_v56  ;;  %v7279_v54 = vld [vmem:[%s15009_s1 + $0x20] sm:$0xf0]  ;;  %v1271_v56 = vld [vmem:[%s15010_s2 + $0x2d8] sm:$0xff] }
 0x193   : > { %v1263_v57 = vld [vmem:[%s15010_s2 + $0x298] sm:$0xff]  ;;  %1765 = vperm.xlu2 %9794, %v1271_v56   ;;  %v1266_v56 = vld [vmem:[%s15010_s2 + $0x2b0] sm:$0xff] }
 0x194   : > { %v10867_v9 = vpop.f32.mrf.mxu2  ;;  %v1267_v0 = vld [vmem:[%s15010_s2 + $0x2b8] sm:$0xff]  ;;  %1725 = vperm.xlu1 %9793, %v1263_v57   ;;  %v9403_v57 = vld [vmem:[%s15009_s1 + $0x334] sm:$0xf] }
 0x195   : > { %15044 = vst [vmem:[#allocation32_spill] sm:$0xff] %v10867_v9  ;;  %v10869_v12 = vpop.f32.mrf.mxu3  ;;  %1745 = vperm.xlu0 %9792, %v1267_v0   ;;  %v7679_v0 = vld [vmem:[%s15009_s1 + $0x348] sm:$0xf0] }
 0x196   : > { %15045 = vst [vmem:[#allocation33_spill] sm:$0xff] %v10869_v12  ;;  %v4202_v17 = vpop.f32.mrf.mxu0  ;;  %v7282_v12 = vor.u32 %v9302_v51, %v7279_v54  ;;  %v9406_v51 = vld [vmem:[%s15009_s1 + $0x344] sm:$0xf0] }
 0x197   : > { %v4203_v24 = vadd.f32 %v4202_v17, %v1386_v16  ;;  %v4531_v27 = vpop.f32.mrf.mxu1  ;;  %v7278_v16 = vor.u32 %v9305_v48, %v7277_v43  ;;  %v1391_v17 = vpop.permute.xlu1 %1390  ;;  %v7677_v48 = vld [vmem:[%s15009_s1 + $0x330] sm:$0xf] }
 0x199   : > { %v10877_v32 = vadd.f32 %v4531_v27, %v4203_v24  ;;  %v7658_v27 = vor.u32 %v9397_v33, %v7655_v40 }
 0x19b   : > { %1740 = vperm.xlu2 %9794, %v1266_v56   ;;  %v1280_v56 = vld [vmem:[%s15010_s2 + $0x320] sm:$0xff] }
 0x19c   : > { %v10906_v3 = vpop.f32.mrf.mxu2  ;;  %1795 = vperm.xlu1 %9793, %v1277_v29   ;;  %v1276_v29 = vld [vmem:[%s15010_s2 + $0x300] sm:$0xff] }
 0x19d   : > { %15046 = vst [vmem:[#allocation34_spill] sm:$0xff] %v10906_v3  ;;  %v10908_v7 = vpop.f32.mrf.mxu3  ;;  %1720 = vperm.xlu0 %9792, %v1262_v31  }
 0x19e   : > { %15047 = vst [vmem:[#allocation35_spill] sm:$0xff] %v10908_v7  ;;  %v4205_v24 = vpop.f32.mrf.mxu0 }
 0x19f   : > { %v4206_v9 = vadd.f32 %v4205_v24, %v1391_v17  ;;  %v4534_v39 = vpop.f32.mrf.mxu1  ;;  %v9308_v17 = vld [vmem:[%s15009_s1 + $0x3c] sm:$0xf]  ;;  %v7303_v24 = vld [vmem:[%s15009_s1 + $0x50] sm:$0xf0] }
 0x1a0   : > { %v7306_v7 = vor.u32 %v9308_v17, %v7303_v24  ;;  %v7703_v17 = vld [vmem:[%s15009_s1 + $0x378] sm:$0xf0]  ;;  %v7325_v24 = vld [vmem:[%s15009_s1 + $0x68] sm:$0xf] }
 0x1a1   : > { %v10910_v36 = vadd.f32 %v4534_v39, %v4206_v9  ;;  %4244 = vmatmul.bf16.gmra.mxu0 %v7654_v8  ;;  %4822 = vmatmul.bf16.vlgmr.msrb.gmra.mxu2 %v7278_v16  ;;  %v1396_v9 = vpop.permute.xlu2 %1395  ;;  %v7301_v8 = vld [vmem:[%s15009_s1 + $0x38] sm:$0xf]  ;;  %v9311_v16 = vld [vmem:[%s15009_s1 + $0x4c] sm:$0xf0] }
 0x1a2   : > { %4573 = vmatmul.bf16.gmra.mxu1 %v7658_v27  ;;  %5151 = vmatmul.bf16.vlgmr.msrb.gmra.mxu3 %v7282_v12  ;;  %v1265_v27 = vld [vmem:[%s15010_s2 + $0x2a8] sm:$0xff] }
 0x1a3   : > { %1735 = vperm.xlu2 %9794, %v1265_v27   ;;  %v1261_v27 = vld [vmem:[%s15010_s2 + $0x288] sm:$0xff] }
 0x1a4   : > { %v10921_v33 = vpop.f32.mrf.mxu2  ;;  %1810 = vperm.xlu1 %9793, %v1280_v56   ;;  %v9317_v56 = vld [vmem:[%s15009_s1 + $0x7c] sm:$0xf0] }
 0x1a5   : > { %15048 = vst [vmem:[#allocation36_spill] sm:$0xff] %v10921_v33  ;;  %v10923_v39 = vpop.f32.mrf.mxu3  ;;  %v7682_v33 = vor.u32 %v9403_v57, %v7679_v0  ;;  %1790 = vperm.xlu0 %9792, %v1276_v29   ;;  %v9314_v29 = vld [vmem:[%s15009_s1 + $0x6c] sm:$0xf] }
 0x1a6   : > { %15049 = vst [vmem:[#allocation37_spill] sm:$0xff] %v10923_v39  ;;  %v4207_v12 = vpop.f32.mrf.mxu0 }
 0x1a7   : > { %v4208_v40 = vadd.f32 %v4207_v12, %v1396_v9  ;;  %v4536_v43 = vpop.f32.mrf.mxu1  ;;  %v7678_v12 = vor.u32 %v9406_v51, %v7677_v48  ;;  %v1291_v48 = vld [vmem:[%s15010_s2 + $0x378] sm:$0xff] }
 0x1a9   : > { %v10931_v54 = vadd.f32 %v4536_v43, %v4208_v40  ;;  %v7302_v40 = vor.u32 %v9311_v16, %v7301_v8  ;;  %v1401_v43 = vpop.permute.xlu0 %1400  ;;  %v9409_v16 = vld [vmem:[%s15009_s1 + $0x364] sm:$0xf] }
 0x1ab   : > { %1715 = vperm.xlu2 %9794, %v1261_v27   ;;  %v1279_v27 = vld [vmem:[%s15010_s2 + $0x318] sm:$0xff] }
 0x1ac   : > { %v10960_v31 = vpop.f32.mrf.mxu2  ;;  %1865 = vperm.xlu1 %9793, %v1291_v48  }
 0x1ad   : > { %15050 = vst [vmem:[#allocation38_spill] sm:$0xff] %v10960_v31  ;;  %v10962_v9 = vpop.f32.mrf.mxu3  ;;  %1805 = vperm.xlu0 %9792, %v1279_v27   ;;  %v9320_v27 = vld [vmem:[%s15009_s1 + $0x9c] sm:$0xf] }
 0x1ae   : > { %15051 = vst [vmem:[#allocation39_spill] sm:$0xff] %v10962_v9  ;;  %v4210_v39 = vpop.f32.mrf.mxu0 }
 0x1af   : > { %v4211_v3 = vadd.f32 %v4210_v39, %v1401_v43  ;;  %v4539_v63 = vpop.f32.mrf.mxu1  ;;  %v1288_v43 = vld [vmem:[%s15010_s2 + $0x360] sm:$0xff] }
 0x1b1   : > { %v10964_v59 = vadd.f32 %v4539_v63, %v4211_v3  ;;  %4249 = vmatmul.bf16.gmra.mxu0 %v7678_v12  ;;  %4827 = vmatmul.bf16.gmra.mxu2 %v7302_v40  ;;  %v1406_v63 = vpop.permute.xlu1 %1405  ;;  %v7327_v12 = vld [vmem:[%s15009_s1 + $0x80] sm:$0xf0]  ;;  %v1278_v40 = vld [vmem:[%s15010_s2 + $0x310] sm:$0xff] }
 0x1b2   : > { %4578 = vmatmul.bf16.gmra.mxu1 %v7682_v33  ;;  %5156 = vmatmul.bf16.gmra.mxu3 %v7306_v7  ;;  %v7701_v7 = vld [vmem:[%s15009_s1 + $0x360] sm:$0xf]  ;;  %v9412_v33 = vld [vmem:[%s15009_s1 + $0x374] sm:$0xf0]  ;;  %v7330_v9 = vor.u32 %v9314_v29, %v7327_v12  ;;  %v7727_v29 = vld [vmem:[%s15009_s1 + $0x3a8] sm:$0xf0] }
 0x1b3   : > { %1800 = vperm.xlu2 %9794, %v1278_v40   ;;  %v1281_v40 = vld [vmem:[%s15010_s2 + $0x328] sm:$0xff]  ;;  %v7349_v12 = vld [vmem:[%s15009_s1 + $0x98] sm:$0xf] }
 0x1b4   : > { %v10972_v51 = vpop.f32.mrf.mxu2  ;;  %1850 = vperm.xlu1 %9793, %v1288_v43   ;;  %v9323_v43 = vld [vmem:[%s15009_s1 + $0xac] sm:$0xf0] }
 0x1b5   : > { %15052 = vst [vmem:[#allocation40_spill] sm:$0xff] %v10972_v51  ;;  %v10974_v57 = vpop.f32.mrf.mxu3  ;;  %v7706_v51 = vor.u32 %v9409_v16, %v7703_v17 }
 0x1b6   : > { %15053 = vst [vmem:[#allocation41_spill] sm:$0xff] %v10974_v57  ;;  %v4212_v3 = vpop.f32.mrf.mxu0 }
 0x1b7   : > { %v4213_v39 = vadd.f32 %v4212_v3, %v1406_v63  ;;  %v4541_v0 = vpop.f32.mrf.mxu1  ;;  %v7702_v3 = vor.u32 %v9412_v33, %v7701_v7  ;;  %v1305_v7 = vld [vmem:[%s15010_s2 + $0x3e8] sm:$0xff] }
 0x1b9   : > { %v10982_v8 = vadd.f32 %v4541_v0, %v4213_v39  ;;  %v7326_v39 = vor.u32 %v9317_v56, %v7325_v24  ;;  %v1411_v0 = vpop.permute.xlu2 %1410  ;;  %v9415_v56 = vld [vmem:[%s15009_s1 + $0x394] sm:$0xf] }
 0x1bb   : > { %1815 = vperm.xlu2 %9794, %v1281_v40   ;;  %v1290_v40 = vld [vmem:[%s15010_s2 + $0x370] sm:$0xff] }
 0x1bc   : > { %v11011_v48 = vpop.f32.mrf.mxu2  ;;  %1935 = vperm.xlu1 %9793, %v1305_v7   ;;  %1860 = vperm.xlu0 %9792, %v1290_v40   ;;  %v9329_v40 = vld [vmem:[%s15009_s1 + $0xdc] sm:$0xf0] }
 0x1bd   : > { %15054 = vst [vmem:[#allocation42_spill] sm:$0xff] %v11011_v48  ;;  %v11013_v63 = vpop.f32.mrf.mxu3 }
 0x1be   : > { %15055 = vst [vmem:[#allocation43_spill] sm:$0xff] %v11013_v63  ;;  %v4215_v57 = vpop.f32.mrf.mxu0 }
 0x1bf   : > { %v4216_v31 = vadd.f32 %v4215_v57, %v1411_v0  ;;  %v4544_v28 = vpop.f32.mrf.mxu1  ;;  %v1302_v0 = vld [vmem:[%s15010_s2 + $0x3d0] sm:$0xff] }
 0x1c1   : > { %v11015_v25 = vadd.f32 %v4544_v28, %v4216_v31  ;;  %4254 = vmatmul.bf16.gmra.mxu0 %v7702_v3  ;;  %4832 = vmatmul.bf16.gmra.mxu2 %v7326_v39  ;;  %v1416_v28 = vpop.permute.xlu0 %1415  ;;  %v7351_v3 = vld [vmem:[%s15009_s1 + $0xb0] sm:$0xf0] }
 0x1c2   : > { %4583 = vmatmul.bf16.gmra.mxu1 %v7706_v51  ;;  %5161 = vmatmul.bf16.gmra.mxu3 %v7330_v9  ;;  %v7725_v9 = vld [vmem:[%s15009_s1 + $0x390] sm:$0xf]  ;;  %v9418_v51 = vld [vmem:[%s15009_s1 + $0x3a4] sm:$0xf0]  ;;  %v7354_v63 = vor.u32 %v9320_v27, %v7351_v3  ;;  %v9421_v27 = vld [vmem:[%s15009_s1 + $0x3c4] sm:$0xf] }
 0x1c3   : > { %v1306_v39 = vld [vmem:[%s15010_s2 + $0x3f0] sm:$0xff]  ;;  %v7751_v3 = vld [vmem:[%s15009_s1 + $0x3d8] sm:$0xf0] }
 0x1c4   : > { %v11023_v33 = vpop.f32.mrf.mxu2  ;;  %1940 = vperm.xlu2 %9794, %v1306_v39   ;;  %1920 = vperm.xlu1 %9793, %v1302_v0   ;;  %v1289_v39 = vld [vmem:[%s15010_s2 + $0x368] sm:$0xff] }
 0x1c5   : > { %15056 = vst [vmem:[#allocation44_spill] sm:$0xff] %v11023_v33  ;;  %v11025_v16 = vpop.f32.mrf.mxu3  ;;  %v7730_v33 = vor.u32 %v9415_v56, %v7727_v29  ;;  %v7749_v29 = vld [vmem:[%s15009_s1 + $0x3c0] sm:$0xf]  ;;  %v7373_v0 = vld [vmem:[%s15009_s1 + $0xc8] sm:$0xf] }
 0x1c6   : > { %15057 = vst [vmem:[#allocation45_spill] sm:$0xff] %v11025_v16  ;;  %v4217_v31 = vpop.f32.mrf.mxu0 }
 0x1c7   : > { %v4218_v57 = vadd.f32 %v4217_v31, %v1416_v28  ;;  %v4546_v17 = vpop.f32.mrf.mxu1  ;;  %v7726_v31 = vor.u32 %v9418_v51, %v7725_v9  ;;  %v1285_v9 = vld [vmem:[%s15010_s2 + $0x348] sm:$0xff]  ;;  %v1307_v51 = vld [vmem:[%s15010_s2 + $0x3f8] sm:$0xff] }
 0x1c8   : > { %1945 = vperm.xlu0 %9792, %v1307_v51  }
 0x1c9   : > { %v11033_v24 = vadd.f32 %v4546_v17, %v4218_v57  ;;  %v7350_v57 = vor.u32 %v9323_v43, %v7349_v12  ;;  %v1421_v17 = vpop.permute.xlu1 %1420  ;;  %v9424_v12 = vld [vmem:[%s15009_s1 + $0x3d4] sm:$0xf0] }
 0x1cc   : > { %v11062_v7 = vpop.f32.mrf.mxu2  ;;  %1855 = vperm.xlu2 %9794, %v1289_v39   ;;  %1835 = vperm.xlu1 %9793, %v1285_v9   ;;  %v1282_v39 = vld [vmem:[%s15010_s2 + $0x330] sm:$0xff]  ;;  %v1304_v9 = vld [vmem:[%s15010_s2 + $0x3e0] sm:$0xff] }
 0x1cd   : > { %15058 = vst [vmem:[#allocation46_spill] sm:$0xff] %v11062_v7  ;;  %v11064_v28 = vpop.f32.mrf.mxu3 }
 0x1ce   : > { %15059 = vst [vmem:[#allocation47_spill] sm:$0xff] %v11064_v28  ;;  %v4220_v16 = vpop.f32.mrf.mxu0 }
 0x1cf   : > { %v4221_v48 = vadd.f32 %v4220_v16, %v1421_v17  ;;  %v4549_v49 = vpop.f32.mrf.mxu1  ;;  %v1286_v17 = vld [vmem:[%s15010_s2 + $0x350] sm:$0xff] }
 0x1d0   : > { %1930 = vperm.xlu0 %9792, %v1304_v9   ;;  %v9332_v9 = vld [vmem:[%s15009_s1 + $0xfc] sm:$0xf] }
 0x1d1   : > { %v11066_v47 = vadd.f32 %v4549_v49, %v4221_v48  ;;  %4259 = vmatmul.bf16.gmra.mxu0 %v7726_v31  ;;  %4837 = vmatmul.bf16.gmra.mxu2 %v7350_v57  ;;  %v1426_v48 = vpop.permute.xlu2 %1425  ;;  %v9326_v31 = vld [vmem:[%s15009_s1 + $0xcc] sm:$0xf]  ;;  %v7375_v57 = vld [vmem:[%s15009_s1 + $0xe0] sm:$0xf0] }
 0x1d2   : > { %4588 = vmatmul.bf16.gmra.mxu1 %v7730_v33  ;;  %5166 = vmatmul.bf16.gmra.mxu3 %v7354_v63  ;;  %v7378_v28 = vor.u32 %v9326_v31, %v7375_v57  ;;  %v7775_v31 = vld [vmem:[%s15009_s1 + $0x408] sm:$0xf0]  ;;  %v7397_v57 = vld [vmem:[%s15009_s1 + $0xf8] sm:$0xf] }
 0x1d4   : > { %v11077_v16 = vpop.f32.mrf.mxu2  ;;  %1840 = vperm.xlu2 %9794, %v1286_v17   ;;  %1820 = vperm.xlu1 %9793, %v1282_v39   ;;  %v1303_v17 = vld [vmem:[%s15010_s2 + $0x3d8] sm:$0xff]  ;;  %v9335_v39 = vld [vmem:[%s15009_s1 + $0x10c] sm:$0xf0] }
 0x1d5   : > { %15060 = vst [vmem:[#allocation48_spill] sm:$0xff] %v11077_v16  ;;  %v11079_v49 = vpop.f32.mrf.mxu3  ;;  %v7754_v16 = vor.u32 %v9421_v27, %v7751_v3 }
 0x1d6   : > { %15061 = vst [vmem:[#allocation49_spill] sm:$0xff] %v11079_v49  ;;  %v4222_v63 = vpop.f32.mrf.mxu0 }
 0x1d7   : > { %v4223_v33 = vadd.f32 %v4222_v63, %v1426_v48  ;;  %v4551_v56 = vpop.f32.mrf.mxu1  ;;  %v7750_v63 = vor.u32 %v9424_v12, %v7749_v29  ;;  %v1287_v29 = vld [vmem:[%s15010_s2 + $0x358] sm:$0xff] }
 0x1d8   : > { %1845 = vperm.xlu0 %9792, %v1287_v29  }
 0x1d9   : > { %v11087_v43 = vadd.f32 %v4551_v56, %v4223_v33  ;;  %v7374_v33 = vor.u32 %v9329_v40, %v7373_v0  ;;  %v1431_v56 = vpop.permute.xlu0 %1430  ;;  %v9430_v0 = vld [vmem:[%s15009_s1 + $0x404] sm:$0xf0]  ;;  %v9427_v40 = vld [vmem:[%s15009_s1 + $0x3f4] sm:$0xf] }
 0x1dc   : > { %v11116_v51 = vpop.f32.mrf.mxu2  ;;  %1925 = vperm.xlu2 %9794, %v1303_v17  }
 0x1dd   : > { %15062 = vst [vmem:[#allocation50_spill] sm:$0xff] %v11116_v51  ;;  %v11118_v48 = vpop.f32.mrf.mxu3 }
 0x1de   : > { %15063 = vst [vmem:[#allocation51_spill] sm:$0xff] %v11118_v48  ;;  %v4225_v49 = vpop.f32.mrf.mxu0 }
 0x1df   : > { %v4226_v7 = vadd.f32 %v4225_v49, %v1431_v56  ;;  %v4554_v13 = vpop.f32.mrf.mxu1  ;;  %v1284_v56 = vld [vmem:[%s15010_s2 + $0x340] sm:$0xff] }
 0x1e0   : > { %1830 = vperm.xlu0 %9792, %v1284_v56  }
 0x1e1   : > { %v11120_v11 = vadd.f32 %v4554_v13, %v4226_v7  ;;  %4264 = vmatmul.bf16.gmra.mxu0 %v7750_v63  ;;  %4842 = vmatmul.bf16.gmra.mxu2 %v7374_v33  ;;  %v1436_v13 = vpop.permute.xlu1 %1435  ;;  %v7399_v63 = vld [vmem:[%s15009_s1 + $0x110] sm:$0xf0]  ;;  %v1300_v33 = vld [vmem:[%s15010_s2 + $0x3c0] sm:$0xff] }
 0x1e2   : > { %4593 = vmatmul.bf16.gmra.mxu1 %v7754_v16  ;;  %5171 = vmatmul.bf16.gmra.mxu3 %v7378_v28  ;;  %v7773_v28 = vld [vmem:[%s15009_s1 + $0x3f0] sm:$0xf] }
 0x1e4   : > { %v11128_v12 = vpop.f32.mrf.mxu2  ;;  %1910 = vperm.xlu2 %9794, %v1300_v33   ;;  %v1283_v33 = vld [vmem:[%s15010_s2 + $0x338] sm:$0xff] }
 0x1e5   : > { %15064 = vst [vmem:[#allocation52_spill] sm:$0xff] %v11128_v12  ;;  %v11130_v49 = vpop.f32.mrf.mxu3  ;;  %v7402_v12 = vor.u32 %v9332_v9, %v7399_v63  ;;  %v9341_v9 = vld [vmem:[%s15009_s1 + $0x13c] sm:$0xf0]  ;;  %v7799_v63 = vld [vmem:[%s15009_s1 + $0x438] sm:$0xf0] }
 0x1e6   : > { %15065 = vst [vmem:[#allocation53_spill] sm:$0xff] %v11130_v49  ;;  %v4227_v7 = vpop.f32.mrf.mxu0  ;;  %v7778_v49 = vor.u32 %v9427_v40, %v7775_v31 }
 0x1e7   : > { %v4228_v27 = vadd.f32 %v4227_v7, %v1436_v13  ;;  %v4556_v3 = vpop.f32.mrf.mxu1  ;;  %v7774_v13 = vor.u32 %v9430_v0, %v7773_v28  ;;  %v7398_v7 = vor.u32 %v9335_v39, %v7397_v57  ;;  %v1446_v0 = vpop.permute.xlu0 %1445 }
 0x1e9   : > { %v11135_v16 = vadd.f32 %v4556_v3, %v4228_v27  ;;  %v1441_v27 = vpop.permute.xlu2 %1440 }
 0x1ec   : > { %v11164_v17 = vpop.f32.mrf.mxu2  ;;  %1825 = vperm.xlu2 %9794, %v1283_v33  }
 0x1ed   : > { %15066 = vst [vmem:[#allocation54_spill] sm:$0xff] %v11164_v17  ;;  %v11166_v29 = vpop.f32.mrf.mxu3 }
 0x1ee   : > { %15067 = vst [vmem:[#allocation55_spill] sm:$0xff] %v11166_v29  ;;  %v4230_v3 = vpop.f32.mrf.mxu0 }
 0x1ef   : > { %v4231_v48 = vadd.f32 %v4230_v3, %v1441_v27  ;;  %v4559_v51 = vpop.f32.mrf.mxu1 }
 0x1f1   : > { %v11168_v45 = vadd.f32 %v4559_v51, %v4231_v48  ;;  %4269 = vmatmul.bf16.gmra.mxu0 %v7774_v13  ;;  %4847 = vmatmul.bf16.gmra.mxu2 %v7398_v7  ;;  %v7797_v51 = vld [vmem:[%s15009_s1 + $0x420] sm:$0xf]  ;;  %v9436_v48 = vld [vmem:[%s15009_s1 + $0x434] sm:$0xf0]  ;;  %v9338_v13 = vld [vmem:[%s15009_s1 + $0x12c] sm:$0xf] }
 0x1f2   : > { %4598 = vmatmul.bf16.gmra.mxu1 %v7778_v49  ;;  %5176 = vmatmul.bf16.gmra.mxu3 %v7402_v12  ;;  %v9433_v12 = vld [vmem:[%s15009_s1 + $0x424] sm:$0xf]  ;;  %v7421_v49 = vld [vmem:[%s15009_s1 + $0x128] sm:$0xf]  ;;  %v7798_v33 = vor.u32 %v9436_v48, %v7797_v51 }
 0x1f3   : > { %v7423_v7 = vld [vmem:[%s15009_s1 + $0x140] sm:$0xf0] }
 0x1f4   : > { %v11173_v56 = vpop.f32.mrf.mxu2  ;;  %v7426_v29 = vor.u32 %v9338_v13, %v7423_v7  ;;  %v9344_v13 = vld [vmem:[%s15009_s1 + $0x15c] sm:$0xf]  ;;  %v7447_v7 = vld [vmem:[%s15009_s1 + $0x170] sm:$0xf0] }
 0x1f5   : > { %15068 = vst [vmem:[#allocation56_spill] sm:$0xff] %v11173_v56  ;;  %v11175_v28 = vpop.f32.mrf.mxu3 }
 0x1f6   : > { %15069 = vst [vmem:[#allocation57_spill] sm:$0xff] %v11175_v28  ;;  %v4232_v40 = vpop.f32.mrf.mxu0 }
 0x1f7   : > { %v4233_v31 = vadd.f32 %v4232_v40, %v1446_v0  ;;  %v4561_v57 = vpop.f32.mrf.mxu1  ;;  %v7422_v0 = vor.u32 %v9341_v9, %v7421_v49  ;;  %v1451_v40 = vpop.permute.xlu1 %1450  ;;  %v9347_v9 = vld [vmem:[%s15009_s1 + $0x16c] sm:$0xf0] }
 0x1f9   : > { %v11177_v39 = vadd.f32 %v4561_v57, %v4233_v31  ;;  %v7802_v57 = vor.u32 %v9433_v12, %v7799_v63  ;;  %v7821_v12 = vld [vmem:[%s15009_s1 + $0x450] sm:$0xf]  ;;  %v7823_v63 = vld [vmem:[%s15009_s1 + $0x468] sm:$0xf0] }
 0x1fc   : > { %v11203_v27 = vpop.f32.mrf.mxu2 }
 0x1fd   : > { %15070 = vst [vmem:[#allocation58_spill] sm:$0xff] %v11203_v27  ;;  %v11205_v3 = vpop.f32.mrf.mxu3  ;;  %v1456_v27 = vpop.permute.xlu2 %1455 }
 0x1fe   : > { %15071 = vst [vmem:[#allocation59_spill] sm:$0xff] %v11205_v3  ;;  %v4235_v31 = vpop.f32.mrf.mxu0 }
 0x1ff   : > { %v4236_v17 = vadd.f32 %v4235_v31, %v1451_v40  ;;  %v4564_v28 = vpop.f32.mrf.mxu1  ;;  %v1461_v40 = vpop.permute.xlu0 %1460 }
 0x201   : > { %v11207_v56 = vadd.f32 %v4564_v28, %v4236_v17  ;;  %4274 = vmatmul.bf16.gmra.mxu0 %v7798_v33  ;;  %4852 = vmatmul.bf16.gmra.mxu2 %v7422_v0  ;;  %v9442_v17 = vld [vmem:[%s15009_s1 + $0x464] sm:$0xf0]  ;;  %v7445_v28 = vld [vmem:[%s15009_s1 + $0x158] sm:$0xf] }
 0x202   : > { %4603 = vmatmul.bf16.gmra.mxu1 %v7802_v57  ;;  %5181 = vmatmul.bf16.gmra.mxu3 %v7426_v29  ;;  %v9439_v29 = vld [vmem:[%s15009_s1 + $0x454] sm:$0xf]  ;;  %v7822_v33 = vor.u32 %v9442_v17, %v7821_v12  ;;  %v7446_v0 = vor.u32 %v9347_v9, %v7445_v28  ;;  %v1466_v17 = vpop.permute.xlu1 %1465 }
 0x203   : > { %v7826_v57 = vor.u32 %v9439_v29, %v7823_v63 }
 0x204   : > { %v11209_v41 = vpop.f32.mrf.mxu2 }
 0x205   : > { %15072 = vst [vmem:[#allocation60_spill] sm:$0xff] %v11209_v41  ;;  %v11211_v23 = vpop.f32.mrf.mxu3 }
 0x206   : > { %15073 = vst [vmem:[#allocation61_spill] sm:$0xff] %v11211_v23  ;;  %v4237_v3 = vpop.f32.mrf.mxu0 }
 0x207   : > { %v4238_v51 = vadd.f32 %v4237_v3, %v1456_v27  ;;  %v4566_v48 = vpop.f32.mrf.mxu1 }
 0x209   : > { %v11213_v49 = vadd.f32 %v4566_v48, %v4238_v51  ;;  %v7450_v51 = vor.u32 %v9344_v13, %v7447_v7  ;;  %v9448_v13 = vld [vmem:[%s15009_s1 + $0x494] sm:$0xf0]  ;;  %v9445_v7 = vld [vmem:[%s15009_s1 + $0x484] sm:$0xf] }
 0x20c   : > { %v11239_v27 = vpop.f32.mrf.mxu2 }
 0x20d   : > { %15074 = vst [vmem:[#allocation62_spill] sm:$0xff] %v11239_v27  ;;  %v11241_v3 = vpop.f32.mrf.mxu3  ;;  %v1301_v27 = vld [vmem:[%s15010_s2 + $0x3c8] sm:$0xff] }
 0x20e   : > { %15075 = vst [vmem:[#allocation63_spill] sm:$0xff] %v11241_v3  ;;  %v4240_v31 = vpop.f32.mrf.mxu0  ;;  %1915 = vperm.xlu0 %9792, %v1301_v27   ;;  %v7847_v27 = vld [vmem:[%s15009_s1 + $0x498] sm:$0xf0] }
 0x20f   : > { %v4241_v48 = vadd.f32 %v4240_v31, %v1461_v40  ;;  %v4569_v23 = vpop.f32.mrf.mxu1  ;;  %v9350_v40 = vld [vmem:[%s15009_s1 + $0x18c] sm:$0xf]  ;;  %v7471_v31 = vld [vmem:[%s15009_s1 + $0x1a0] sm:$0xf0] }
 0x211   : > { %v11243_v41 = vadd.f32 %v4569_v23, %v4241_v48  ;;  %4279 = vmatmul.bf16.gmra.mxu0 %v7822_v33  ;;  %4857 = vmatmul.bf16.gmra.mxu2 %v7446_v0  ;;  %v7845_v23 = vld [vmem:[%s15009_s1 + $0x480] sm:$0xf]  ;;  %v7469_v33 = vld [vmem:[%s15009_s1 + $0x188] sm:$0xf] }
 0x212   : > { %4608 = vmatmul.bf16.gmra.mxu1 %v7826_v57  ;;  %5186 = vmatmul.bf16.gmra.mxu3 %v7450_v51  ;;  %v9353_v0 = vld [vmem:[%s15009_s1 + $0x19c] sm:$0xf0]  ;;  %v1299_v57 = vld [vmem:[%s15010_s2 + $0x3b8] sm:$0xff]  ;;  %v1298_v51 = vld [vmem:[%s15010_s2 + $0x3b0] sm:$0xff] }
 0x213   : > { %1905 = vperm.xlu1 %9793, %v1299_v57   ;;  %v1294_v57 = vld [vmem:[%s15010_s2 + $0x390] sm:$0xff] }
 0x214   : > { %v11248_v19 = vpop.f32.mrf.mxu2 }
 0x215   : > { %15076 = vst [vmem:[#allocation64_spill] sm:$0xff] %v11248_v19  ;;  %v11250_v12 = vpop.f32.mrf.mxu3  ;;  %v7474_v19 = vor.u32 %v9350_v40, %v7471_v31  ;;  %v9454_v40 = vld [vmem:[%s15009_s1 + $0x4c4] sm:$0xf0]  ;;  %v7871_v31 = vld [vmem:[%s15009_s1 + $0x4c8] sm:$0xf0] }
 0x216   : > { %15077 = vst [vmem:[#allocation65_spill] sm:$0xff] %v11250_v12  ;;  %v4242_v29 = vpop.f32.mrf.mxu0  ;;  %1900 = vperm.xlu0 %9792, %v1298_v51   ;;  %v7850_v12 = vor.u32 %v9445_v7, %v7847_v27  ;;  %v7493_v51 = vld [vmem:[%s15009_s1 + $0x1b8] sm:$0xf] }
 0x217   : > { %v4243_v28 = vadd.f32 %v4242_v29, %v1466_v17  ;;  %v4571_v9 = vpop.f32.mrf.mxu1  ;;  %v7846_v29 = vor.u32 %v9448_v13, %v7845_v23  ;;  %v1297_v23 = vld [vmem:[%s15010_s2 + $0x3a8] sm:$0xff] }
 0x219   : > { %v11255_v63 = vadd.f32 %v4571_v9, %v4243_v28  ;;  %v7470_v28 = vor.u32 %v9353_v0, %v7469_v33  ;;  %v1471_v9 = vpop.permute.xlu2 %1470 }
 0x21b   : > { %1880 = vperm.xlu1 %9793, %v1294_v57   ;;  %v1293_v57 = vld [vmem:[%s15010_s2 + $0x388] sm:$0xff] }
 0x21c   : > { %v11284_v48 = vpop.f32.mrf.mxu2 }
 0x21d   : > { %15078 = vst [vmem:[#allocation66_spill] sm:$0xff] %v11284_v48  ;;  %v11286_v17 = vpop.f32.mrf.mxu3 }
 0x21e   : > { %15079 = vst [vmem:[#allocation67_spill] sm:$0xff] %v11286_v17  ;;  %v4245_v3 = vpop.f32.mrf.mxu0  ;;  %1895 = vperm.xlu0 %9792, %v1297_v23   ;;  %v1292_v23 = vld [vmem:[%s15010_s2 + $0x380] sm:$0xff] }
 0x21f   : > { %v4246_v61 = vadd.f32 %v4245_v3, %v1471_v9  ;;  %v4574_v60 = vpop.f32.mrf.mxu1  ;;  %v7495_v9 = vld [vmem:[%s15009_s1 + $0x1d0] sm:$0xf0] }
 0x221   : > { %v11288_v44 = vadd.f32 %v4574_v60, %v4246_v61  ;;  %4284 = vmatmul.bf16.gmra.mxu0 %v7846_v29  ;;  %4862 = vmatmul.bf16.gmra.mxu2 %v7470_v28  ;;  %v1476_v60 = vpop.permute.xlu0 %1475  ;;  %v9359_v29 = vld [vmem:[%s15009_s1 + $0x1cc] sm:$0xf0]  ;;  %v9356_v28 = vld [vmem:[%s15009_s1 + $0x1bc] sm:$0xf] }
 0x222   : > { %4613 = vmatmul.bf16.gmra.mxu1 %v7850_v12  ;;  %5191 = vmatmul.bf16.gmra.mxu3 %v7474_v19  ;;  %v7869_v19 = vld [vmem:[%s15009_s1 + $0x4b0] sm:$0xf]  ;;  %v7498_v48 = vor.u32 %v9356_v28, %v7495_v9  ;;  %v7895_v28 = vld [vmem:[%s15009_s1 + $0x4f8] sm:$0xf0]  ;;  %v9362_v9 = vld [vmem:[%s15009_s1 + $0x1ec] sm:$0xf] }
 0x223   : > { %1875 = vperm.xlu1 %9793, %v1293_v57  }
 0x224   : > { %v4823_v13 = vpop.f32.mrf.mxu2 }
 0x225   : > { %v4824_v3 = vadd.f32 %v4823_v13, %v10462_v14  ;;  %v5152_v7 = vpop.f32.mrf.mxu3  ;;  %v9451_v14 = vld [vmem:[%s15009_s1 + $0x4b4] sm:$0xf] }
 0x226   : > { %v4247_v61 = vpop.f32.mrf.mxu0  ;;  %1870 = vperm.xlu0 %9792, %v1292_v23   ;;  %v7874_v17 = vor.u32 %v9451_v14, %v7871_v31 }
 0x227   : > { %v4248_v27 = vadd.f32 %v4247_v61, %v1476_v60  ;;  %v4576_v33 = vpop.f32.mrf.mxu1  ;;  %v11297_v12 = vadd.f32 %v5152_v7, %v4824_v3  ;;  %v7870_v60 = vor.u32 %v9454_v40, %v7869_v19  ;;  %v7494_v61 = vor.u32 %v9359_v29, %v7493_v51  ;;  %v1486_v19 = vpop.permute.xlu2 %1485 }
 0x229   : > { %v11302_v0 = vadd.f32 %v4576_v33, %v4248_v27  ;;  %v1481_v27 = vpop.permute.xlu1 %1480 }
 0x22c   : > { %v4825_v13 = vpop.f32.mrf.mxu2 }
 0x22d   : > { %v4826_v3 = vadd.f32 %v4825_v13, %v10483_v26  ;;  %v5154_v7 = vpop.f32.mrf.mxu3  ;;  %v7519_v13 = vld [vmem:[%s15009_s1 + $0x200] sm:$0xf0] }
 0x22e   : > { %v4250_v33 = vpop.f32.mrf.mxu0 }
 0x22f   : > { %v4251_v42 = vadd.f32 %v4250_v33, %v1481_v27  ;;  %v4579_v22 = vpop.f32.mrf.mxu1  ;;  %v11332_v21 = vadd.f32 %v5154_v7, %v4826_v3  ;;  %v1491_v33 = vpop.permute.xlu0 %1490 }
 0x231   : > { %v11334_v6 = vadd.f32 %v4579_v22, %v4251_v42  ;;  %4289 = vmatmul.bf16.gmra.mxu0 %v7870_v60  ;;  %4867 = vmatmul.bf16.gmra.mxu2 %v7494_v61  ;;  %v7893_v22 = vld [vmem:[%s15009_s1 + $0x4e0] sm:$0xf]  ;;  %v9460_v42 = vld [vmem:[%s15009_s1 + $0x4f4] sm:$0xf0] }
 0x232   : > { %4618 = vmatmul.bf16.gmra.mxu1 %v7874_v17  ;;  %5196 = vmatmul.bf16.gmra.mxu3 %v7498_v48  ;;  %v7517_v48 = vld [vmem:[%s15009_s1 + $0x1e8] sm:$0xf]  ;;  %v9365_v17 = vld [vmem:[%s15009_s1 + $0x1fc] sm:$0xf0]  ;;  %v7894_v61 = vor.u32 %v9460_v42, %v7893_v22  ;;  %v1496_v22 = vpop.permute.xlu1 %1495 }
 0x233   : > { %v7518_v27 = vor.u32 %v9365_v17, %v7517_v48 }
 0x234   : > { %v4828_v57 = vpop.f32.mrf.mxu2 }
 0x235   : > { %v4829_v26 = vadd.f32 %v4828_v57, %v10516_v46  ;;  %v5157_v23 = vpop.f32.mrf.mxu3  ;;  %v9457_v46 = vld [vmem:[%s15009_s1 + $0x4e4] sm:$0xf] }
 0x236   : > { %v4252_v40 = vpop.f32.mrf.mxu0 }
 0x237   : > { %v4253_v51 = vadd.f32 %v4252_v40, %v1486_v19  ;;  %v4581_v29 = vpop.f32.mrf.mxu1  ;;  %v11337_v14 = vadd.f32 %v5157_v23, %v4829_v26  ;;  %v7898_v26 = vor.u32 %v9457_v46, %v7895_v28  ;;  %v7522_v23 = vor.u32 %v9362_v9, %v7519_v13  ;;  %v7917_v9 = vld [vmem:[%s15009_s1 + $0x510] sm:$0xf]  ;;  %v9466_v13 = vld [vmem:[%s15009_s1 + $0x524] sm:$0xf0] }
 0x239   : > { %v11339_v31 = vadd.f32 %v4581_v29, %v4253_v51 }
 0x23c   : > { %v4830_v3 = vpop.f32.mrf.mxu2 }
 0x23d   : > { %v4831_v7 = vadd.f32 %v4830_v3, %v10537_v58  ;;  %v5159_v60 = vpop.f32.mrf.mxu3 }
 0x23e   : > { %v4255_v57 = vpop.f32.mrf.mxu0 }
 0x23f   : > { %v4256_v19 = vadd.f32 %v4255_v57, %v1491_v33  ;;  %v4584_v40 = vpop.f32.mrf.mxu1  ;;  %v11366_v51 = vadd.f32 %v5159_v60, %v4831_v7  ;;  %v7541_v7 = vld [vmem:[%s15009_s1 + $0x218] sm:$0xf]  ;;  %v9371_v60 = vld [vmem:[%s15009_s1 + $0x22c] sm:$0xf0]  ;;  %v1296_v33 = vld [vmem:[%s15010_s2 + $0x3a0] sm:$0xff] }
 0x240   : > { %1890 = vperm.xlu2 %9794, %v1296_v33  }
 0x241   : > { %v11368_v29 = vadd.f32 %v4584_v40, %v4256_v19  ;;  %4294 = vmatmul.bf16.gmra.mxu0 %v7894_v61  ;;  %4872 = vmatmul.bf16.gmra.mxu2 %v7518_v27  ;;  %v9368_v61 = vld [vmem:[%s15009_s1 + $0x21c] sm:$0xf]  ;;  %v7543_v27 = vld [vmem:[%s15009_s1 + $0x230] sm:$0xf0]  ;;  %v7918_v19 = vor.u32 %v9466_v13, %v7917_v9  ;;  %v7542_v40 = vor.u32 %v9371_v60, %v7541_v7 }
 0x242   : > { %4623 = vmatmul.bf16.gmra.mxu1 %v7898_v26  ;;  %5201 = vmatmul.bf16.gmra.mxu3 %v7522_v23 }
 0x244   : > { %v4833_v4 = vpop.f32.mrf.mxu2 }
 0x245   : > { %v4834_v58 = vadd.f32 %v4833_v4, %v10570_v15  ;;  %v5162_v3 = vpop.f32.mrf.mxu3  ;;  %v9463_v4 = vld [vmem:[%s15009_s1 + $0x514] sm:$0xf]  ;;  %v7919_v15 = vld [vmem:[%s15009_s1 + $0x528] sm:$0xf0] }
 0x246   : > { %v4257_v42 = vpop.f32.mrf.mxu0 }
 0x247   : > { %v4258_v48 = vadd.f32 %v4257_v42, %v1496_v22  ;;  %v4586_v17 = vpop.f32.mrf.mxu1  ;;  %v11371_v46 = vadd.f32 %v5162_v3, %v4834_v58  ;;  %v1501_v58 = vpop.permute.xlu2 %1500  ;;  %v7922_v22 = vor.u32 %v9463_v4, %v7919_v15  ;;  %v7546_v42 = vor.u32 %v9368_v61, %v7543_v27 }
 0x248   : > { %v1506_v15 = vpop.permute.xlu0 %1505 }
 0x249   : > { %v11373_v28 = vadd.f32 %v4586_v17, %v4258_v48 }
 0x24c   : > { %v4835_v57 = vpop.f32.mrf.mxu2 }
 0x24d   : > { %v4836_v26 = vadd.f32 %v4835_v57, %v10591_v30  ;;  %v5164_v23 = vpop.f32.mrf.mxu3  ;;  %v1295_v30 = vld [vmem:[%s15010_s2 + $0x398] sm:$0xff]  ;;  %v7941_v57 = vld [vmem:[%s15009_s1 + $0x540] sm:$0xf] }
 0x24e   : > { %v4260_v3 = vpop.f32.mrf.mxu0  ;;  %1885 = vperm.xlu2 %9794, %v1295_v30  }
 0x24f   : > { %v4261_v48 = vadd.f32 %v4260_v3, %v1501_v58  ;;  %v4589_v17 = vpop.f32.mrf.mxu1  ;;  %v11403_v52 = vadd.f32 %v5164_v23, %v4836_v26  ;;  %v9472_v26 = vld [vmem:[%s15009_s1 + $0x554] sm:$0xf0]  ;;  %v7565_v23 = vld [vmem:[%s15009_s1 + $0x248] sm:$0xf]  ;;  %v9374_v58 = vld [vmem:[%s15009_s1 + $0x24c] sm:$0xf] }
 0x250   : > { %v7567_v3 = vld [vmem:[%s15009_s1 + $0x260] sm:$0xf0] }
 0x251   : > { %v11405_v50 = vadd.f32 %v4589_v17, %v4261_v48  ;;  %4299 = vmatmul.bf16.gmra.mxu0 %v7918_v19  ;;  %4877 = vmatmul.bf16.gmra.mxu2 %v7542_v40  ;;  %v9377_v19 = vld [vmem:[%s15009_s1 + $0x25c] sm:$0xf0]  ;;  %v7943_v40 = vld [vmem:[%s15009_s1 + $0x558] sm:$0xf0]  ;;  %v7942_v17 = vor.u32 %v9472_v26, %v7941_v57  ;;  %v1516_v57 = vpop.permute.xlu2 %1515 }
 0x252   : > { %4628 = vmatmul.bf16.gmra.mxu1 %v7922_v22  ;;  %5206 = vmatmul.bf16.gmra.mxu3 %v7546_v42  ;;  %v7566_v30 = vor.u32 %v9377_v19, %v7565_v23 }
 0x254   : > { %v4838_v9 = vpop.f32.mrf.mxu2 }
 0x255   : > { %v4839_v13 = vadd.f32 %v4838_v9, %v10624_v55  ;;  %v5167_v4 = vpop.f32.mrf.mxu3  ;;  %v9469_v55 = vld [vmem:[%s15009_s1 + $0x544] sm:$0xf]  ;;  %v1511_v9 = vpop.permute.xlu1 %1510 }
 0x256   : > { %v4262_v7 = vpop.f32.mrf.mxu0 }
 0x257   : > { %v4263_v60 = vadd.f32 %v4262_v7, %v1506_v15  ;;  %v4591_v61 = vpop.f32.mrf.mxu1  ;;  %v11411_v27 = vadd.f32 %v5167_v4, %v4839_v13  ;;  %v7946_v4 = vor.u32 %v9469_v55, %v7943_v40  ;;  %v7570_v15 = vor.u32 %v9374_v58, %v7567_v3  ;;  %v7965_v58 = vld [vmem:[%s15009_s1 + $0x570] sm:$0xf]  ;;  %v9478_v3 = vld [vmem:[%s15009_s1 + $0x584] sm:$0xf0] }
 0x259   : > { %v11413_v33 = vadd.f32 %v4591_v61, %v4263_v60 }
 0x25c   : > { %v4840_v22 = vpop.f32.mrf.mxu2 }
 0x25d   : > { %v4841_v42 = vadd.f32 %v4840_v22, %v10645_v5  ;;  %v5169_v48 = vpop.f32.mrf.mxu3 }
 0x25e   : > { %v4265_v13 = vpop.f32.mrf.mxu0 }
 0x25f   : > { %v4266_v7 = vadd.f32 %v4265_v13, %v1511_v9  ;;  %v4594_v60 = vpop.f32.mrf.mxu1  ;;  %v11440_v61 = vadd.f32 %v5169_v48, %v4841_v42  ;;  %v9383_v42 = vld [vmem:[%s15009_s1 + $0x28c] sm:$0xf0]  ;;  %v7967_v48 = vld [vmem:[%s15009_s1 + $0x588] sm:$0xf0] }
 0x261   : > { %15080 = vst [vmem:[#allocation68_spill] sm:$0xff] %v11440_v61  ;;  %v11442_v38 = vadd.f32 %v4594_v60, %v4266_v7  ;;  %4304 = vmatmul.bf16.gmra.mxu0 %v7942_v17  ;;  %4882 = vmatmul.bf16.gmra.mxu2 %v7566_v30  ;;  %v9380_v17 = vld [vmem:[%s15009_s1 + $0x27c] sm:$0xf]  ;;  %v7591_v30 = vld [vmem:[%s15009_s1 + $0x290] sm:$0xf0]  ;;  %v1521_v60 = vpop.permute.xlu0 %1520 }
 0x262   : > { %4633 = vmatmul.bf16.gmra.mxu1 %v7946_v4  ;;  %5211 = vmatmul.bf16.gmra.mxu3 %v7570_v15  ;;  %v7966_v15 = vor.u32 %v9478_v3, %v7965_v58  ;;  %v1526_v58 = vpop.permute.xlu1 %1525 }
 0x264   : > { %v4843_v37 = vpop.f32.mrf.mxu2 }
 0x265   : > { %v4844_v5 = vadd.f32 %v4843_v37, %v10678_v34  ;;  %v5172_v22 = vpop.f32.mrf.mxu3  ;;  %v9475_v37 = vld [vmem:[%s15009_s1 + $0x574] sm:$0xf]  ;;  %v7589_v34 = vld [vmem:[%s15009_s1 + $0x278] sm:$0xf] }
 0x266   : > { %v4267_v26 = vpop.f32.mrf.mxu0  ;;  %v7590_v7 = vor.u32 %v9383_v42, %v7589_v34 }
 0x267   : > { %v4268_v23 = vadd.f32 %v4267_v26, %v1516_v57  ;;  %v4596_v19 = vpop.f32.mrf.mxu1  ;;  %v11445_v55 = vadd.f32 %v5172_v22, %v4844_v5  ;;  %v7970_v22 = vor.u32 %v9475_v37, %v7967_v48  ;;  %v7594_v57 = vor.u32 %v9380_v17, %v7591_v30  ;;  %v7989_v17 = vld [vmem:[%s15009_s1 + $0x5a0] sm:$0xf]  ;;  %v9484_v30 = vld [vmem:[%s15009_s1 + $0x5b4] sm:$0xf0] }
 0x269   : > { %15081 = vst [vmem:[#allocation69_spill] sm:$0xff] %v11445_v55  ;;  %v11447_v40 = vadd.f32 %v4596_v19, %v4268_v23 }
 0x26c   : > { %v4845_v9 = vpop.f32.mrf.mxu2 }
 0x26d   : > { %v4846_v13 = vadd.f32 %v4845_v9, %v10706_v62  ;;  %v5174_v4 = vpop.f32.mrf.mxu3 }
 0x26e   : > { %v4270_v5 = vpop.f32.mrf.mxu0 }
 0x26f   : > { %v4271_v26 = vadd.f32 %v4270_v5, %v1521_v60  ;;  %v4599_v23 = vpop.f32.mrf.mxu1  ;;  %v11474_v19 = vadd.f32 %v5174_v4, %v4846_v13  ;;  %v9389_v13 = vld [vmem:[%s15009_s1 + $0x2bc] sm:$0xf0]  ;;  %v7991_v4 = vld [vmem:[%s15009_s1 + $0x5b8] sm:$0xf0] }
 0x271   : > { %15082 = vst [vmem:[#allocation70_spill] sm:$0xff] %v11474_v19  ;;  %v11476_v20 = vadd.f32 %v4599_v23, %v4271_v26  ;;  %4309 = vmatmul.bf16.gmra.mxu0 %v7966_v15  ;;  %4887 = vmatmul.bf16.gmra.mxu2 %v7590_v7  ;;  %v9386_v15 = vld [vmem:[%s15009_s1 + $0x2ac] sm:$0xf]  ;;  %v7615_v7 = vld [vmem:[%s15009_s1 + $0x2c0] sm:$0xf0]  ;;  %v1531_v23 = vpop.permute.xlu2 %1530 }
 0x272   : > { %4638 = vmatmul.bf16.gmra.mxu1 %v7970_v22  ;;  %5216 = vmatmul.bf16.gmra.mxu3 %v7594_v57  ;;  %v7990_v57 = vor.u32 %v9484_v30, %v7989_v17  ;;  %v1536_v17 = vpop.permute.xlu0 %1535 }
 0x274   : > { %v4848_v18 = vpop.f32.mrf.mxu2 }
 0x275   : > { %v4849_v62 = vadd.f32 %v4848_v18, %v10740_v35  ;;  %v5177_v9 = vpop.f32.mrf.mxu3  ;;  %v9481_v18 = vld [vmem:[%s15009_s1 + $0x5a4] sm:$0xf]  ;;  %v7613_v35 = vld [vmem:[%s15009_s1 + $0x2a8] sm:$0xf] }
 0x276   : > { %v4272_v3 = vpop.f32.mrf.mxu0  ;;  %v7614_v26 = vor.u32 %v9389_v13, %v7613_v35 }
 0x277   : > { %v4273_v34 = vadd.f32 %v4272_v3, %v1526_v58  ;;  %v4601_v42 = vpop.f32.mrf.mxu1  ;;  %v11479_v37 = vadd.f32 %v5177_v9, %v4849_v62  ;;  %v7994_v9 = vor.u32 %v9481_v18, %v7991_v4  ;;  %v7618_v58 = vor.u32 %v9386_v15, %v7615_v7  ;;  %v8013_v15 = vld [vmem:[%s15009_s1 + $0x5d0] sm:$0xf]  ;;  %v9490_v7 = vld [vmem:[%s15009_s1 + $0x5e4] sm:$0xf0] }
 0x279   : > { %15083 = vst [vmem:[#allocation71_spill] sm:$0xff] %v11479_v37  ;;  %v11481_v48 = vadd.f32 %v4601_v42, %v4273_v34 }
 0x27c   : > { %v4850_v60 = vpop.f32.mrf.mxu2 }
 0x27d   : > { %v4851_v5 = vadd.f32 %v4850_v60, %v10768_v2  ;;  %v5179_v22 = vpop.f32.mrf.mxu3 }
 0x27e   : > { %v4275_v62 = vpop.f32.mrf.mxu0 }
 0x27f   : > { %v4276_v3 = vadd.f32 %v4275_v62, %v1531_v23  ;;  %v4604_v34 = vpop.f32.mrf.mxu1  ;;  %v11508_v42 = vadd.f32 %v5179_v22, %v4851_v5  ;;  %v9395_v5 = vld [vmem:[%s15009_s1 + $0x2ec] sm:$0xf0]  ;;  %v8015_v22 = vld [vmem:[%s15009_s1 + $0x5e8] sm:$0xf0] }
 0x281   : > { %15084 = vst [vmem:[#allocation72_spill] sm:$0xff] %v11508_v42  ;;  %v11510_v37 = vadd.f32 %v4604_v34, %v4276_v3  ;;  %4314 = vmatmul.bf16.gmra.mxu0 %v7990_v57  ;;  %4892 = vmatmul.bf16.gmra.mxu2 %v7614_v26  ;;  %v9392_v57 = vld [vmem:[%s15009_s1 + $0x2dc] sm:$0xf]  ;;  %v7639_v26 = vld [vmem:[%s15009_s1 + $0x2f0] sm:$0xf0]  ;;  %v1541_v34 = vpop.permute.xlu1 %1540 }
 0x282   : > { %4643 = vmatmul.bf16.gmra.mxu1 %v7994_v9  ;;  %5221 = vmatmul.bf16.gmra.mxu3 %v7618_v58  ;;  %v8014_v58 = vor.u32 %v9490_v7, %v8013_v15  ;;  %v1546_v15 = vpop.permute.xlu2 %1545 }
 0x284   : > { %v4853_v19 = vpop.f32.mrf.mxu2 }
 0x285   : > { %v4854_v2 = vadd.f32 %v4853_v19, %v10802_v53  ;;  %v5182_v60 = vpop.f32.mrf.mxu3  ;;  %v9487_v53 = vld [vmem:[%s15009_s1 + $0x5d4] sm:$0xf]  ;;  %v7637_v19 = vld [vmem:[%s15009_s1 + $0x2d8] sm:$0xf] }
 0x286   : > { %v4277_v30 = vpop.f32.mrf.mxu0  ;;  %v7638_v3 = vor.u32 %v9395_v5, %v7637_v19 }
 0x287   : > { %v4278_v35 = vadd.f32 %v4277_v30, %v1536_v17  ;;  %v4606_v13 = vpop.f32.mrf.mxu1  ;;  %v11513_v18 = vadd.f32 %v5182_v60, %v4854_v2  ;;  %v8018_v60 = vor.u32 %v9487_v53, %v8015_v22  ;;  %v7642_v17 = vor.u32 %v9392_v57, %v7639_v26  ;;  %v8037_v57 = vld [vmem:[%s15009_s1 + $0x600] sm:$0xf]  ;;  %v9496_v26 = vld [vmem:[%s15009_s1 + $0x614] sm:$0xf0] }
 0x289   : > { %15085 = vst [vmem:[#allocation73_spill] sm:$0xff] %v11513_v18  ;;  %v11515_v4 = vadd.f32 %v4606_v13, %v4278_v35 }
 0x28c   : > { %v4855_v23 = vpop.f32.mrf.mxu2 }
 0x28d   : > { %v4856_v62 = vadd.f32 %v4855_v23, %v10823_v10  ;;  %v5184_v9 = vpop.f32.mrf.mxu3 }
 0x28e   : > { %v4280_v2 = vpop.f32.mrf.mxu0 }
 0x28f   : > { %v4281_v30 = vadd.f32 %v4280_v2, %v1541_v34  ;;  %v4609_v35 = vpop.f32.mrf.mxu1  ;;  %v11542_v13 = vadd.f32 %v5184_v9, %v4856_v62  ;;  %v9401_v62 = vld [vmem:[%s15009_s1 + $0x31c] sm:$0xf0]  ;;  %v8039_v9 = vld [vmem:[%s15009_s1 + $0x618] sm:$0xf0] }
 0x291   : > { %15086 = vst [vmem:[#allocation74_spill] sm:$0xff] %v11542_v13  ;;  %v11544_v18 = vadd.f32 %v4609_v35, %v4281_v30  ;;  %4319 = vmatmul.bf16.gmra.mxu0 %v8014_v58  ;;  %4897 = vmatmul.bf16.gmra.mxu2 %v7638_v3  ;;  %v9398_v58 = vld [vmem:[%s15009_s1 + $0x30c] sm:$0xf]  ;;  %v7663_v3 = vld [vmem:[%s15009_s1 + $0x320] sm:$0xf0]  ;;  %v1551_v35 = vpop.permute.xlu0 %1550 }
 0x292   : > { %4648 = vmatmul.bf16.gmra.mxu1 %v8018_v60  ;;  %5226 = vmatmul.bf16.gmra.mxu3 %v7642_v17  ;;  %v8038_v17 = vor.u32 %v9496_v26, %v8037_v57  ;;  %v1556_v57 = vpop.permute.xlu1 %1555 }
 0x294   : > { %v4858_v42 = vpop.f32.mrf.mxu2 }
 0x295   : > { %v4859_v10 = vadd.f32 %v4858_v42, %v10856_v1  ;;  %v5187_v23 = vpop.f32.mrf.mxu3  ;;  %v9493_v1 = vld [vmem:[%s15009_s1 + $0x604] sm:$0xf]  ;;  %v7661_v42 = vld [vmem:[%s15009_s1 + $0x308] sm:$0xf] }
 0x296   : > { %v4282_v7 = vpop.f32.mrf.mxu0  ;;  %v7662_v30 = vor.u32 %v9401_v62, %v7661_v42 }
 0x297   : > { %v4283_v19 = vadd.f32 %v4282_v7, %v1546_v15  ;;  %v4611_v5 = vpop.f32.mrf.mxu1  ;;  %v11547_v53 = vadd.f32 %v5187_v23, %v4859_v10  ;;  %v8042_v23 = vor.u32 %v9493_v1, %v8039_v9  ;;  %v7666_v15 = vor.u32 %v9398_v58, %v7663_v3  ;;  %v8061_v58 = vld [vmem:[%s15009_s1 + $0x630] sm:$0xf]  ;;  %v9502_v3 = vld [vmem:[%s15009_s1 + $0x644] sm:$0xf0] }
 0x299   : > { %15087 = vst [vmem:[#allocation75_spill] sm:$0xff] %v11547_v53  ;;  %v11549_v22 = vadd.f32 %v4611_v5, %v4283_v19 }
 0x29c   : > { %v4860_v34 = vpop.f32.mrf.mxu2 }
 0x29d   : > { %v4861_v2 = vadd.f32 %v4860_v34, %v10877_v32  ;;  %v5189_v60 = vpop.f32.mrf.mxu3 }
 0x29e   : > { %v4285_v10 = vpop.f32.mrf.mxu0 }
 0x29f   : > { %v4286_v7 = vadd.f32 %v4285_v10, %v1551_v35  ;;  %v4614_v19 = vpop.f32.mrf.mxu1  ;;  %v11576_v5 = vadd.f32 %v5189_v60, %v4861_v2  ;;  %v9407_v2 = vld [vmem:[%s15009_s1 + $0x34c] sm:$0xf0]  ;;  %v8063_v60 = vld [vmem:[%s15009_s1 + $0x648] sm:$0xf0] }
 0x2a1   : > { %15088 = vst [vmem:[#allocation76_spill] sm:$0xff] %v11576_v5  ;;  %v11578_v53 = vadd.f32 %v4614_v19, %v4286_v7  ;;  %4324 = vmatmul.bf16.gmra.mxu0 %v8038_v17  ;;  %4902 = vmatmul.bf16.gmra.mxu2 %v7662_v30  ;;  %v9404_v17 = vld [vmem:[%s15009_s1 + $0x33c] sm:$0xf]  ;;  %v7687_v30 = vld [vmem:[%s15009_s1 + $0x350] sm:$0xf0]  ;;  %v1561_v19 = vpop.permute.xlu2 %1560 }
 0x2a2   : > { %4653 = vmatmul.bf16.gmra.mxu1 %v8042_v23  ;;  %5231 = vmatmul.bf16.gmra.mxu3 %v7666_v15  ;;  %v8062_v15 = vor.u32 %v9502_v3, %v8061_v58  ;;  %v1566_v58 = vpop.permute.xlu0 %1565 }
 0x2a4   : > { %v4863_v13 = vpop.f32.mrf.mxu2 }
 0x2a5   : > { %v4864_v32 = vadd.f32 %v4863_v13, %v10910_v36  ;;  %v5192_v34 = vpop.f32.mrf.mxu3  ;;  %v9499_v36 = vld [vmem:[%s15009_s1 + $0x634] sm:$0xf]  ;;  %v7685_v13 = vld [vmem:[%s15009_s1 + $0x338] sm:$0xf] }
 0x2a6   : > { %v4287_v26 = vpop.f32.mrf.mxu0  ;;  %v7686_v7 = vor.u32 %v9407_v2, %v7685_v13 }
 0x2a7   : > { %v4288_v42 = vadd.f32 %v4287_v26, %v1556_v57  ;;  %v4616_v62 = vpop.f32.mrf.mxu1  ;;  %v11581_v1 = vadd.f32 %v5192_v34, %v4864_v32  ;;  %v8066_v34 = vor.u32 %v9499_v36, %v8063_v60  ;;  %v7690_v57 = vor.u32 %v9404_v17, %v7687_v30  ;;  %v8085_v17 = vld [vmem:[%s15009_s1 + $0x660] sm:$0xf]  ;;  %v9508_v30 = vld [vmem:[%s15009_s1 + $0x674] sm:$0xf0] }
 0x2a9   : > { %15089 = vst [vmem:[#allocation77_spill] sm:$0xff] %v11581_v1  ;;  %v11583_v9 = vadd.f32 %v4616_v62, %v4288_v42 }
 0x2ac   : > { %v4865_v35 = vpop.f32.mrf.mxu2 }
 0x2ad   : > { %v4866_v10 = vadd.f32 %v4865_v35, %v10931_v54  ;;  %v5194_v23 = vpop.f32.mrf.mxu3 }
 0x2ae   : > { %v4290_v32 = vpop.f32.mrf.mxu0 }
 0x2af   : > { %v4291_v26 = vadd.f32 %v4290_v32, %v1561_v19  ;;  %v4619_v42 = vpop.f32.mrf.mxu1  ;;  %v11610_v62 = vadd.f32 %v5194_v23, %v4866_v10  ;;  %v9413_v10 = vld [vmem:[%s15009_s1 + $0x37c] sm:$0xf0]  ;;  %v8087_v23 = vld [vmem:[%s15009_s1 + $0x678] sm:$0xf0] }
 0x2b1   : > { %15090 = vst [vmem:[#allocation78_spill] sm:$0xff] %v11610_v62  ;;  %v11612_v1 = vadd.f32 %v4619_v42, %v4291_v26  ;;  %4329 = vmatmul.bf16.gmra.mxu0 %v8062_v15  ;;  %4907 = vmatmul.bf16.gmra.mxu2 %v7686_v7  ;;  %v9410_v15 = vld [vmem:[%s15009_s1 + $0x36c] sm:$0xf]  ;;  %v7711_v7 = vld [vmem:[%s15009_s1 + $0x380] sm:$0xf0]  ;;  %v1571_v42 = vpop.permute.xlu1 %1570 }
 0x2b2   : > { %4658 = vmatmul.bf16.gmra.mxu1 %v8066_v34  ;;  %5236 = vmatmul.bf16.gmra.mxu3 %v7690_v57  ;;  %v8086_v57 = vor.u32 %v9508_v30, %v8085_v17  ;;  %v1576_v17 = vpop.permute.xlu2 %1575 }
 0x2b4   : > { %v4868_v5 = vpop.f32.mrf.mxu2 }
 0x2b5   : > { %v4869_v54 = vadd.f32 %v4868_v5, %v10964_v59  ;;  %v5197_v35 = vpop.f32.mrf.mxu3  ;;  %v9505_v59 = vld [vmem:[%s15009_s1 + $0x664] sm:$0xf]  ;;  %v7709_v5 = vld [vmem:[%s15009_s1 + $0x368] sm:$0xf] }
 0x2b6   : > { %v4292_v3 = vpop.f32.mrf.mxu0  ;;  %v7710_v26 = vor.u32 %v9413_v10, %v7709_v5 }
 0x2b7   : > { %v4293_v13 = vadd.f32 %v4292_v3, %v1566_v58  ;;  %v4621_v2 = vpop.f32.mrf.mxu1  ;;  %v11615_v36 = vadd.f32 %v5197_v35, %v4869_v54  ;;  %v8090_v35 = vor.u32 %v9505_v59, %v8087_v23  ;;  %v7714_v58 = vor.u32 %v9410_v15, %v7711_v7  ;;  %v8109_v15 = vld [vmem:[%s15009_s1 + $0x690] sm:$0xf]  ;;  %v9514_v7 = vld [vmem:[%s15009_s1 + $0x6a4] sm:$0xf0] }
 0x2b9   : > { %15091 = vst [vmem:[#allocation79_spill] sm:$0xff] %v11615_v36  ;;  %v11617_v60 = vadd.f32 %v4621_v2, %v4293_v13 }
 0x2bc   : > { %v4870_v19 = vpop.f32.mrf.mxu2 }
 0x2bd   : > { %v4871_v32 = vadd.f32 %v4870_v19, %v10982_v8  ;;  %v5199_v34 = vpop.f32.mrf.mxu3 }
 0x2be   : > { %v4295_v54 = vpop.f32.mrf.mxu0 }
 0x2bf   : > { %v4296_v3 = vadd.f32 %v4295_v54, %v1571_v42  ;;  %v4624_v13 = vpop.f32.mrf.mxu1  ;;  %v11644_v2 = vadd.f32 %v5199_v34, %v4871_v32  ;;  %v9419_v32 = vld [vmem:[%s15009_s1 + $0x3ac] sm:$0xf0]  ;;  %v8111_v34 = vld [vmem:[%s15009_s1 + $0x6a8] sm:$0xf0] }
 0x2c1   : > { %15092 = vst [vmem:[#allocation80_spill] sm:$0xff] %v11644_v2  ;;  %v11646_v36 = vadd.f32 %v4624_v13, %v4296_v3  ;;  %4334 = vmatmul.bf16.gmra.mxu0 %v8086_v57  ;;  %4912 = vmatmul.bf16.gmra.mxu2 %v7710_v26  ;;  %v9416_v57 = vld [vmem:[%s15009_s1 + $0x39c] sm:$0xf]  ;;  %v7735_v26 = vld [vmem:[%s15009_s1 + $0x3b0] sm:$0xf0]  ;;  %v1581_v13 = vpop.permute.xlu0 %1580 }
 0x2c2   : > { %4663 = vmatmul.bf16.gmra.mxu1 %v8090_v35  ;;  %5241 = vmatmul.bf16.gmra.mxu3 %v7714_v58  ;;  %v8110_v58 = vor.u32 %v9514_v7, %v8109_v15  ;;  %v1586_v15 = vpop.permute.xlu1 %1585 }
 0x2c4   : > { %v4873_v62 = vpop.f32.mrf.mxu2 }
 0x2c5   : > { %v4874_v8 = vadd.f32 %v4873_v62, %v11015_v25  ;;  %v5202_v19 = vpop.f32.mrf.mxu3  ;;  %v9511_v25 = vld [vmem:[%s15009_s1 + $0x694] sm:$0xf]  ;;  %v7733_v62 = vld [vmem:[%s15009_s1 + $0x398] sm:$0xf] }
 0x2c6   : > { %v4297_v30 = vpop.f32.mrf.mxu0  ;;  %v7734_v3 = vor.u32 %v9419_v32, %v7733_v62 }
 0x2c7   : > { %v4298_v5 = vadd.f32 %v4297_v30, %v1576_v17  ;;  %v4626_v10 = vpop.f32.mrf.mxu1  ;;  %v11649_v59 = vadd.f32 %v5202_v19, %v4874_v8  ;;  %v8114_v19 = vor.u32 %v9511_v25, %v8111_v34  ;;  %v7738_v17 = vor.u32 %v9416_v57, %v7735_v26  ;;  %v8133_v57 = vld [vmem:[%s15009_s1 + $0x6c0] sm:$0xf]  ;;  %v9520_v26 = vld [vmem:[%s15009_s1 + $0x6d4] sm:$0xf0] }
 0x2c9   : > { %15093 = vst [vmem:[#allocation81_spill] sm:$0xff] %v11649_v59  ;;  %v11651_v23 = vadd.f32 %v4626_v10, %v4298_v5 }
 0x2cc   : > { %v4875_v42 = vpop.f32.mrf.mxu2 }
 0x2cd   : > { %v4876_v54 = vadd.f32 %v4875_v42, %v11033_v24  ;;  %v5204_v35 = vpop.f32.mrf.mxu3 }
 0x2ce   : > { %v4300_v8 = vpop.f32.mrf.mxu0 }
 0x2cf   : > { %v4301_v30 = vadd.f32 %v4300_v8, %v1581_v13  ;;  %v4629_v5 = vpop.f32.mrf.mxu1  ;;  %v11678_v10 = vadd.f32 %v5204_v35, %v4876_v54  ;;  %v9425_v54 = vld [vmem:[%s15009_s1 + $0x3dc] sm:$0xf0]  ;;  %v8135_v35 = vld [vmem:[%s15009_s1 + $0x6d8] sm:$0xf0] }
 0x2d1   : > { %15094 = vst [vmem:[#allocation82_spill] sm:$0xff] %v11678_v10  ;;  %v11680_v59 = vadd.f32 %v4629_v5, %v4301_v30  ;;  %4339 = vmatmul.bf16.gmra.mxu0 %v8110_v58  ;;  %4917 = vmatmul.bf16.gmra.mxu2 %v7734_v3  ;;  %v9422_v58 = vld [vmem:[%s15009_s1 + $0x3cc] sm:$0xf]  ;;  %v7759_v3 = vld [vmem:[%s15009_s1 + $0x3e0] sm:$0xf0]  ;;  %v1591_v5 = vpop.permute.xlu2 %1590  ;;  %v1596_v10 = vpop.permute.xlu0 %1595 }
 0x2d2   : > { %4668 = vmatmul.bf16.gmra.mxu1 %v8114_v19  ;;  %5246 = vmatmul.bf16.gmra.mxu3 %v7738_v17  ;;  %v8134_v17 = vor.u32 %v9520_v26, %v8133_v57 }
 0x2d4   : > { %v4878_v2 = vpop.f32.mrf.mxu2 }
 0x2d5   : > { %v4879_v24 = vadd.f32 %v4878_v2, %v11066_v47  ;;  %v5207_v42 = vpop.f32.mrf.mxu3  ;;  %v9517_v47 = vld [vmem:[%s15009_s1 + $0x6c4] sm:$0xf]  ;;  %v7757_v2 = vld [vmem:[%s15009_s1 + $0x3c8] sm:$0xf] }
 0x2d6   : > { %v4302_v7 = vpop.f32.mrf.mxu0  ;;  %v7758_v30 = vor.u32 %v9425_v54, %v7757_v2 }
 0x2d7   : > { %v4303_v62 = vadd.f32 %v4302_v7, %v1586_v15  ;;  %v4631_v32 = vpop.f32.mrf.mxu1  ;;  %v11683_v25 = vadd.f32 %v5207_v42, %v4879_v24  ;;  %v8138_v42 = vor.u32 %v9517_v47, %v8135_v35  ;;  %v7762_v15 = vor.u32 %v9422_v58, %v7759_v3  ;;  %v9300_v47 = vld [vmem:[%s10096_s19 + $0x178] sm:$0xff] }
 0x2d8   : > { %5801 = vmatpush.bf16.msrb.mxu1 %v9300_v47 }
 0x2d9   : > { %15095 = vst [vmem:[#allocation83_spill] sm:$0xff] %v11683_v25  ;;  %v11685_v34 = vadd.f32 %v4631_v32, %v4303_v62 }
 0x2dc   : > { %v4880_v13 = vpop.f32.mrf.mxu2 }
 0x2dd   : > { %v4881_v8 = vadd.f32 %v4880_v13, %v11087_v43  ;;  %v5209_v19 = vpop.f32.mrf.mxu3  ;;  %v9292_v43 = vld [vmem:[%s10096_s19 + $0x138] sm:$0xff] }
 0x2de   : > { %v4305_v24 = vpop.f32.mrf.mxu0  ;;  %5472 = vmatpush.bf16.msrb.mxu0 %v9292_v43 }
 0x2df   : > { %v4306_v7 = vadd.f32 %v4305_v24, %v1591_v5  ;;  %v4634_v62 = vpop.f32.mrf.mxu1  ;;  %v11712_v32 = vadd.f32 %v5209_v19, %v4881_v8  ;;  %v8157_v8 = vld [vmem:[%s15009_s1 + $0x6f0] sm:$0xf]  ;;  %v9526_v19 = vld [vmem:[%s15009_s1 + $0x704] sm:$0xf0]  ;;  %v9428_v5 = vld [vmem:[%s15009_s1 + $0x3fc] sm:$0xf] }
 0x2e0   : > { %v7783_v24 = vld [vmem:[%s15009_s1 + $0x410] sm:$0xf0]  ;;  %v8158_v43 = vor.u32 %v9526_v19, %v8157_v8 }
 0x2e1   : > { %15096 = vst [vmem:[#allocation84_spill] sm:$0xff] %v11712_v32  ;;  %v11714_v25 = vadd.f32 %v4634_v62, %v4306_v7  ;;  %4344 = vmatmul.bf16.gmra.mxu0 %v8134_v17  ;;  %4922 = vmatmul.bf16.gmra.mxu2 %v7758_v30  ;;  %v9431_v17 = vld [vmem:[%s15009_s1 + $0x40c] sm:$0xf0]  ;;  %v8159_v30 = vld [vmem:[%s15009_s1 + $0x708] sm:$0xf0] }
 0x2e2   : > { %4673 = vmatmul.bf16.gmra.mxu1 %v8138_v42  ;;  %5251 = vmatmul.bf16.gmra.mxu3 %v7762_v15  ;;  %v11747_v42 = vpop.permute.xlu0 %1625 }
 0x2e4   : > { %v4883_v13 = vpop.f32.mrf.mxu2 }
 0x2e5   : > { %v4884_v57 = vadd.f32 %v4883_v13, %v11120_v11  ;;  %v5212_v26 = vpop.f32.mrf.mxu3  ;;  %v9523_v11 = vld [vmem:[%s15009_s1 + $0x6f4] sm:$0xf] }
 0x2e6   : > { %v4307_v2 = vpop.f32.mrf.mxu0  ;;  %v8162_v47 = vor.u32 %v9523_v11, %v8159_v30 }
 0x2e7   : > { %v4308_v54 = vadd.f32 %v4307_v2, %v1596_v10  ;;  %v4636_v35 = vpop.f32.mrf.mxu1  ;;  %v11719_v58 = vadd.f32 %v5212_v26, %v4884_v57  ;;  %v7781_v10 = vld [vmem:[%s15009_s1 + $0x3f8] sm:$0xf]  ;;  %v1601_v57 = vpop.permute.xlu1 %1600  ;;  %v7786_v2 = vor.u32 %v9428_v5, %v7783_v24  ;;  %v8181_v5 = vld [vmem:[%s15009_s1 + $0x720] sm:$0xf] }
 0x2e8   : > { %v7782_v13 = vor.u32 %v9431_v17, %v7781_v10  ;;  %v9532_v24 = vld [vmem:[%s15009_s1 + $0x734] sm:$0xf0] }
 0x2e9   : > { %15097 = vst [vmem:[#allocation85_spill] sm:$0xff] %v11719_v58  ;;  %v11721_v3 = vadd.f32 %v4636_v35, %v4308_v54 }
 0x2ea   : > { %v1606_v8 = vpop.permute.xlu0 %1605 }
 0x2ec   : > { %v4885_v15 = vpop.f32.mrf.mxu2 }
 0x2ed   : > { %v4886_v7 = vadd.f32 %v4885_v15, %v11135_v16  ;;  %v5214_v62 = vpop.f32.mrf.mxu3 }
 0x2ee   : > { %v4310_v26 = vpop.f32.mrf.mxu0 }
 0x2ef   : > { %v4311_v54 = vadd.f32 %v4310_v26, %v1601_v57  ;;  %v4639_v35 = vpop.f32.mrf.mxu1  ;;  %v11750_v58 = vadd.f32 %v5214_v62, %v4886_v7  ;;  %v9437_v7 = vld [vmem:[%s15009_s1 + $0x43c] sm:$0xf0]  ;;  %v8183_v62 = vld [vmem:[%s15009_s1 + $0x738] sm:$0xf0]  ;;  %v1621_v57 = vpop.permute.xlu2 %1620 }
 0x2f1   : > { %15098 = vst [vmem:[#allocation86_spill] sm:$0xff] %v11750_v58  ;;  %v11752_v32 = vadd.f32 %v4639_v35, %v4311_v54  ;;  %4349 = vmatmul.bf16.gmra.mxu0 %v8158_v43  ;;  %4927 = vmatmul.bf16.gmra.mxu2 %v7782_v13  ;;  %v9434_v43 = vld [vmem:[%s15009_s1 + $0x42c] sm:$0xf]  ;;  %v7807_v13 = vld [vmem:[%s15009_s1 + $0x440] sm:$0xf0]  ;;  %v8182_v54 = vor.u32 %v9532_v24, %v8181_v5 }
 0x2f2   : > { %4678 = vmatmul.bf16.gmra.mxu1 %v8162_v47  ;;  %5256 = vmatmul.bf16.gmra.mxu3 %v7786_v2 }
 0x2f4   : > { %v4888_v55 = vpop.f32.mrf.mxu2 }
 0x2f5   : > { %v4889_v16 = vadd.f32 %v4888_v55, %v11168_v45  ;;  %v5217_v15 = vpop.f32.mrf.mxu3  ;;  %v9529_v45 = vld [vmem:[%s15009_s1 + $0x724] sm:$0xf]  ;;  %v7805_v55 = vld [vmem:[%s15009_s1 + $0x428] sm:$0xf] }
 0x2f6   : > { %v4312_v19 = vpop.f32.mrf.mxu0  ;;  %v7806_v35 = vor.u32 %v9437_v7, %v7805_v55 }
 0x2f7   : > { %v4313_v10 = vadd.f32 %v4312_v19, %v1606_v8  ;;  %v4641_v17 = vpop.f32.mrf.mxu1  ;;  %v11755_v11 = vadd.f32 %v5217_v15, %v4889_v16  ;;  %v1611_v16 = vpop.permute.xlu1 %1610  ;;  %v8186_v8 = vor.u32 %v9529_v45, %v8183_v62  ;;  %v7810_v19 = vor.u32 %v9434_v43, %v7807_v13  ;;  %v8205_v43 = vld [vmem:[%s15009_s1 + $0x750] sm:$0xf]  ;;  %v9538_v13 = vld [vmem:[%s15009_s1 + $0x764] sm:$0xf0] }
 0x2f8   : > { %v1616_v5 = vpop.permute.xlu2 %1615 }
 0x2f9   : > { %15099 = vst [vmem:[#allocation87_spill] sm:$0xff] %v11755_v11  ;;  %v11757_v30 = vadd.f32 %v4641_v17, %v4313_v10 }
 0x2fc   : > { %v4890_v26 = vpop.f32.mrf.mxu2 }
 0x2fd   : > { %v4891_v47 = vadd.f32 %v4890_v26, %v11177_v39  ;;  %v5219_v2 = vpop.f32.mrf.mxu3 }
 0x2fe   : > { %v4315_v15 = vpop.f32.mrf.mxu0 }
 0x2ff   : > { %v4316_v10 = vadd.f32 %v4315_v15, %v1611_v16  ;;  %v4644_v17 = vpop.f32.mrf.mxu1  ;;  %v11784_v11 = vadd.f32 %v5219_v2, %v4891_v47  ;;  %v9443_v47 = vld [vmem:[%s15009_s1 + $0x46c] sm:$0xf0]  ;;  %v8207_v2 = vld [vmem:[%s15009_s1 + $0x768] sm:$0xf0] }
 0x301   : > { %15100 = vst [vmem:[#allocation88_spill] sm:$0xff] %v11784_v11  ;;  %v11786_v58 = vadd.f32 %v4644_v17, %v4316_v10  ;;  %4354 = vmatmul.bf16.gmra.mxu0 %v8182_v54  ;;  %4932 = vmatmul.bf16.gmra.mxu2 %v7806_v35  ;;  %v9440_v54 = vld [vmem:[%s15009_s1 + $0x45c] sm:$0xf]  ;;  %v7831_v35 = vld [vmem:[%s15009_s1 + $0x470] sm:$0xf0] }
 0x302   : > { %4683 = vmatmul.bf16.gmra.mxu1 %v8186_v8  ;;  %5261 = vmatmul.bf16.gmra.mxu3 %v7810_v19  ;;  %v8206_v19 = vor.u32 %v9538_v13, %v8205_v43 }
 0x304   : > { %v4893_v61 = vpop.f32.mrf.mxu2 }
 0x305   : > { %v4894_v39 = vadd.f32 %v4893_v61, %v11207_v56  ;;  %v5222_v26 = vpop.f32.mrf.mxu3  ;;  %v9535_v56 = vld [vmem:[%s15009_s1 + $0x754] sm:$0xf]  ;;  %v7829_v61 = vld [vmem:[%s15009_s1 + $0x458] sm:$0xf] }
 0x306   : > { %v4317_v24 = vpop.f32.mrf.mxu0  ;;  %v7830_v10 = vor.u32 %v9443_v47, %v7829_v61  ;;  %v8229_v61 = vld [vmem:[%s15009_s1 + $0x780] sm:$0xf]  ;;  %v9544_v47 = vld [vmem:[%s15009_s1 + $0x794] sm:$0xf0] }
 0x307   : > { %v4318_v55 = vadd.f32 %v4317_v24, %v1616_v5  ;;  %v4646_v7 = vpop.f32.mrf.mxu1  ;;  %v11789_v45 = vadd.f32 %v5222_v26, %v4894_v39  ;;  %v8210_v39 = vor.u32 %v9535_v56, %v8207_v2  ;;  %v7834_v26 = vor.u32 %v9440_v54, %v7831_v35  ;;  %v9446_v2 = vld [vmem:[%s15009_s1 + $0x48c] sm:$0xf]  ;;  %v7855_v54 = vld [vmem:[%s15009_s1 + $0x4a0] sm:$0xf0] }
 0x309   : > { %15101 = vst [vmem:[#allocation89_spill] sm:$0xff] %v11789_v45  ;;  %v11791_v62 = vadd.f32 %v4646_v7, %v4318_v55 }
 0x30c   : > { %v4895_v16 = vpop.f32.mrf.mxu2 }
 0x30d   : > { %v4896_v15 = vadd.f32 %v4895_v16, %v11213_v49  ;;  %v5224_v8 = vpop.f32.mrf.mxu3 }
 0x30e   : > { %v4320_v17 = vpop.f32.mrf.mxu0 }
 0x30f   : > { %v4321_v5 = vadd.f32 %v4320_v17, %v1621_v57  ;;  %v4649_v24 = vpop.f32.mrf.mxu1  ;;  %v11818_v55 = vadd.f32 %v5224_v8, %v4896_v15  ;;  %v1631_v17 = vpop.permute.xlu1 %1630 }
 0x311   : > { %15102 = vst [vmem:[#allocation90_spill] sm:$0xff] %v11818_v55  ;;  %v11820_v7 = vadd.f32 %v4649_v24, %v4321_v5  ;;  %4359 = vmatmul.bf16.gmra.mxu0 %v8206_v19  ;;  %4937 = vmatmul.bf16.gmra.mxu2 %v7830_v10  ;;  %v8230_v19 = vor.u32 %v9544_v47, %v8229_v61  ;;  %v1636_v61 = vpop.permute.xlu2 %1635 }
 0x312   : > { %4688 = vmatmul.bf16.gmra.mxu1 %v8210_v39  ;;  %5266 = vmatmul.bf16.gmra.mxu3 %v7834_v26  ;;  %v7858_v5 = vor.u32 %v9446_v2, %v7855_v54  ;;  %v8253_v2 = vld [vmem:[%s15009_s1 + $0x7b0] sm:$0xf]  ;;  %v9550_v54 = vld [vmem:[%s15009_s1 + $0x7c4] sm:$0xf0] }
 0x314   : > { %v4898_v45 = vpop.f32.mrf.mxu2 }
 0x315   : > { %v4899_v11 = vadd.f32 %v4898_v45, %v11243_v41  ;;  %v5227_v49 = vpop.f32.mrf.mxu3  ;;  %v9541_v41 = vld [vmem:[%s15009_s1 + $0x784] sm:$0xf]  ;;  %v8231_v45 = vld [vmem:[%s15009_s1 + $0x798] sm:$0xf0] }
 0x316   : > { %v4322_v16 = vpop.f32.mrf.mxu0  ;;  %v8234_v26 = vor.u32 %v9541_v41, %v8231_v45 }
 0x317   : > { %v4323_v43 = vadd.f32 %v4322_v16, %v11747_v42  ;;  %v4651_v13 = vpop.f32.mrf.mxu1  ;;  %v11824_v56 = vadd.f32 %v5227_v49, %v4899_v11  ;;  %v7853_v42 = vld [vmem:[%s15009_s1 + $0x488] sm:$0xf]  ;;  %v9449_v11 = vld [vmem:[%s15009_s1 + $0x49c] sm:$0xf0] }
 0x318   : > { %v7854_v10 = vor.u32 %v9449_v11, %v7853_v42 }
 0x319   : > { %15103 = vst [vmem:[#allocation91_spill] sm:$0xff] %v11824_v56  ;;  %v11826_v57 = vadd.f32 %v4651_v13, %v4323_v43 }
 0x31c   : > { %v4900_v35 = vpop.f32.mrf.mxu2 }
 0x31d   : > { %v4901_v15 = vadd.f32 %v4900_v35, %v11255_v63  ;;  %v5229_v8 = vpop.f32.mrf.mxu3 }
 0x31e   : > { %v4325_v39 = vpop.f32.mrf.mxu0 }
 0x31f   : > { %v4326_v24 = vadd.f32 %v4325_v39, %v1631_v17  ;;  %v4654_v49 = vpop.f32.mrf.mxu1  ;;  %v11853_v16 = vadd.f32 %v5229_v8, %v4901_v15  ;;  %v7877_v15 = vld [vmem:[%s15009_s1 + $0x4b8] sm:$0xf]  ;;  %v9455_v8 = vld [vmem:[%s15009_s1 + $0x4cc] sm:$0xf0]  ;;  %v7879_v17 = vld [vmem:[%s15009_s1 + $0x4d0] sm:$0xf0] }
 0x321   : > { %15104 = vst [vmem:[#allocation92_spill] sm:$0xff] %v11853_v16  ;;  %v11855_v43 = vadd.f32 %v4654_v49, %v4326_v24  ;;  %4364 = vmatmul.bf16.gmra.mxu0 %v8230_v19  ;;  %4942 = vmatmul.bf16.gmra.mxu2 %v7854_v10  ;;  %v8255_v19 = vld [vmem:[%s15009_s1 + $0x7c8] sm:$0xf0]  ;;  %v9452_v10 = vld [vmem:[%s15009_s1 + $0x4bc] sm:$0xf]  ;;  %v8254_v24 = vor.u32 %v9550_v54, %v8253_v2  ;;  %v1646_v2 = vpop.permute.xlu1 %1645 }
 0x322   : > { %4693 = vmatmul.bf16.gmra.mxu1 %v8234_v26  ;;  %5271 = vmatmul.bf16.gmra.mxu3 %v7858_v5  ;;  %v7878_v49 = vor.u32 %v9455_v8, %v7877_v15 }
 0x324   : > { %v4903_v13 = vpop.f32.mrf.mxu2 }
 0x325   : > { %v4904_v63 = vadd.f32 %v4903_v13, %v11288_v44  ;;  %v5232_v35 = vpop.f32.mrf.mxu3  ;;  %v9547_v44 = vld [vmem:[%s15009_s1 + $0x7b4] sm:$0xf]  ;;  %v1641_v13 = vpop.permute.xlu0 %1640 }
 0x326   : > { %v4327_v47 = vpop.f32.mrf.mxu0 }
 0x327   : > { %v4328_v42 = vadd.f32 %v4327_v47, %v1636_v61  ;;  %v4656_v11 = vpop.f32.mrf.mxu1  ;;  %v11858_v41 = vadd.f32 %v5232_v35, %v4904_v63  ;;  %v8258_v35 = vor.u32 %v9547_v44, %v8255_v19  ;;  %v7882_v61 = vor.u32 %v9452_v10, %v7879_v17  ;;  %v8277_v10 = vld [vmem:[%s15009_s1 + $0x7e0] sm:$0xf]  ;;  %v9556_v17 = vld [vmem:[%s15009_s1 + $0x7f4] sm:$0xf0] }
 0x329   : > { %15105 = vst [vmem:[#allocation93_spill] sm:$0xff] %v11858_v41  ;;  %v11860_v45 = vadd.f32 %v4656_v11, %v4328_v42 }
 0x32c   : > { %v4905_v39 = vpop.f32.mrf.mxu2 }
 0x32d   : > { %v4906_v26 = vadd.f32 %v4905_v39, %v11302_v0  ;;  %v5234_v5 = vpop.f32.mrf.mxu3 }
 0x32e   : > { %v4330_v63 = vpop.f32.mrf.mxu0 }
 0x32f   : > { %v4331_v47 = vadd.f32 %v4330_v63, %v1641_v13  ;;  %v4659_v42 = vpop.f32.mrf.mxu1  ;;  %v11887_v11 = vadd.f32 %v5234_v5, %v4906_v26  ;;  %v9461_v26 = vld [vmem:[%s15009_s1 + $0x4fc] sm:$0xf0]  ;;  %v8279_v5 = vld [vmem:[%s15009_s1 + $0x7f8] sm:$0xf0] }
 0x331   : > { %15106 = vst [vmem:[#allocation94_spill] sm:$0xff] %v11887_v11  ;;  %v11889_v41 = vadd.f32 %v4659_v42, %v4331_v47  ;;  %4369 = vmatmul.bf16.gmra.mxu0 %v8254_v24  ;;  %4947 = vmatmul.bf16.gmra.mxu2 %v7878_v49  ;;  %v9458_v24 = vld [vmem:[%s15009_s1 + $0x4ec] sm:$0xf]  ;;  %v7903_v49 = vld [vmem:[%s15009_s1 + $0x500] sm:$0xf0]  ;;  %v1651_v42 = vpop.permute.xlu2 %1650 }
 0x332   : > { %4698 = vmatmul.bf16.gmra.mxu1 %v8258_v35  ;;  %5276 = vmatmul.bf16.gmra.mxu3 %v7882_v61  ;;  %v8278_v61 = vor.u32 %v9556_v17, %v8277_v10 }
 0x334   : > { %v4908_v16 = vpop.f32.mrf.mxu2 }
 0x335   : > { %v4909_v0 = vadd.f32 %v4908_v16, %v11334_v6  ;;  %v5237_v39 = vpop.f32.mrf.mxu3  ;;  %v9553_v6 = vld [vmem:[%s15009_s1 + $0x7e4] sm:$0xf]  ;;  %v7901_v16 = vld [vmem:[%s15009_s1 + $0x4e8] sm:$0xf] }
 0x336   : > { %v4332_v54 = vpop.f32.mrf.mxu0  ;;  %v7902_v47 = vor.u32 %v9461_v26, %v7901_v16  ;;  %v9299_v16 = vld [vmem:[%s10096_s19 + $0x170] sm:$0xff]  ;;  %v1656_v26 = vpop.permute.xlu0 %1655 }
 0x337   : > { %v4333_v15 = vadd.f32 %v4332_v54, %v1646_v2  ;;  %v4661_v8 = vpop.f32.mrf.mxu1  ;;  %v11892_v44 = vadd.f32 %v5237_v39, %v4909_v0  ;;  %v8282_v39 = vor.u32 %v9553_v6, %v8279_v5  ;;  %v7906_v2 = vor.u32 %v9458_v24, %v7903_v49  ;;  %5802 = vmatpush.bf16.msrb.mxu1 %v9299_v16 }
 0x339   : > { %15107 = vst [vmem:[#allocation95_spill] sm:$0xff] %v11892_v44  ;;  %v11894_v19 = vadd.f32 %v4661_v8, %v4333_v15 }
 0x33c   : > { %v4910_v13 = vpop.f32.mrf.mxu2 }
 0x33d   : > { %v4911_v63 = vadd.f32 %v4910_v13, %v11339_v31  ;;  %v5239_v35 = vpop.f32.mrf.mxu3  ;;  %v9291_v31 = vld [vmem:[%s10096_s19 + $0x130] sm:$0xff] }
 0x33e   : > { %v4335_v0 = vpop.f32.mrf.mxu0  ;;  %5473 = vmatpush.bf16.msrb.mxu0 %v9291_v31 }
 0x33f   : > { %v4336_v54 = vadd.f32 %v4335_v0, %v1651_v42  ;;  %v4664_v15 = vpop.f32.mrf.mxu1  ;;  %v11921_v8 = vadd.f32 %v5239_v35, %v4911_v63  ;;  %v8301_v35 = vld [vmem:[%s15009_s1 + $0x810] sm:$0xf]  ;;  %v8303_v0 = vld [vmem:[%s15009_s1 + $0x828] sm:$0xf0] }
 0x340   : > { %v9467_v42 = vld [vmem:[%s15009_s1 + $0x52c] sm:$0xf0] }
 0x341   : > { %15108 = vst [vmem:[#allocation96_spill] sm:$0xff] %v11921_v8  ;;  %v11923_v44 = vadd.f32 %v4664_v15, %v4336_v54  ;;  %4374 = vmatmul.bf16.gmra.mxu0 %v8278_v61  ;;  %4952 = vmatmul.bf16.gmra.mxu2 %v7902_v47  ;;  %v9562_v61 = vld [vmem:[%s15009_s1 + $0x824] sm:$0xf0]  ;;  %v7925_v47 = vld [vmem:[%s15009_s1 + $0x518] sm:$0xf] }
 0x342   : > { %4703 = vmatmul.bf16.gmra.mxu1 %v8282_v39  ;;  %5281 = vmatmul.bf16.gmra.mxu3 %v7906_v2  ;;  %v9464_v39 = vld [vmem:[%s15009_s1 + $0x51c] sm:$0xf]  ;;  %v7927_v2 = vld [vmem:[%s15009_s1 + $0x530] sm:$0xf0] }
 0x344   : > { %v4913_v13 = vpop.f32.mrf.mxu2 }
 0x345   : > { %v4914_v10 = vadd.f32 %v4913_v13, %v11368_v29  ;;  %v5242_v17 = vpop.f32.mrf.mxu3  ;;  %v9559_v29 = vld [vmem:[%s15009_s1 + $0x814] sm:$0xf]  ;;  %v8302_v13 = vor.u32 %v9562_v61, %v8301_v35  ;;  %v1666_v35 = vpop.permute.xlu2 %1665 }
 0x346   : > { %v4337_v6 = vpop.f32.mrf.mxu0 }
 0x347   : > { %v4338_v5 = vadd.f32 %v4337_v6, %v1656_v26  ;;  %v4666_v24 = vpop.f32.mrf.mxu1  ;;  %v11928_v49 = vadd.f32 %v5242_v17, %v4914_v10  ;;  %v7926_v10 = vor.u32 %v9467_v42, %v7925_v47  ;;  %v1661_v17 = vpop.permute.xlu1 %1660  ;;  %v8306_v26 = vor.u32 %v9559_v29, %v8303_v0 }
 0x348   : > { %v7930_v6 = vor.u32 %v9464_v39, %v7927_v2  ;;  %v8325_v39 = vld [vmem:[%s15009_s1 + $0x840] sm:$0xf]  ;;  %v9568_v2 = vld [vmem:[%s15009_s1 + $0x854] sm:$0xf0] }
 0x349   : > { %15109 = vst [vmem:[#allocation97_spill] sm:$0xff] %v11928_v49  ;;  %v11930_v63 = vadd.f32 %v4666_v24, %v4338_v5 }
 0x34c   : > { %v4915_v54 = vpop.f32.mrf.mxu2 }
 0x34d   : > { %v4916_v15 = vadd.f32 %v4915_v54, %v11373_v28  ;;  %v5244_v31 = vpop.f32.mrf.mxu3 }
 0x34e   : > { %v4340_v16 = vpop.f32.mrf.mxu0 }
 0x34f   : > { %v4341_v5 = vadd.f32 %v4340_v16, %v1661_v17  ;;  %v4669_v24 = vpop.f32.mrf.mxu1  ;;  %v11957_v49 = vadd.f32 %v5244_v31, %v4916_v15  ;;  %v9473_v15 = vld [vmem:[%s15009_s1 + $0x55c] sm:$0xf0]  ;;  %v8327_v31 = vld [vmem:[%s15009_s1 + $0x858] sm:$0xf0] }
 0x351   : > { %15110 = vst [vmem:[#allocation98_spill] sm:$0xff] %v11957_v49  ;;  %v11959_v8 = vadd.f32 %v4669_v24, %v4341_v5  ;;  %4379 = vmatmul.bf16.gmra.mxu0 %v8302_v13  ;;  %4957 = vmatmul.bf16.gmra.mxu2 %v7926_v10  ;;  %v9470_v13 = vld [vmem:[%s15009_s1 + $0x54c] sm:$0xf]  ;;  %v7951_v10 = vld [vmem:[%s15009_s1 + $0x560] sm:$0xf0]  ;;  %v1671_v24 = vpop.permute.xlu0 %1670 }
 0x352   : > { %4708 = vmatmul.bf16.gmra.mxu1 %v8306_v26  ;;  %5286 = vmatmul.bf16.gmra.mxu3 %v7930_v6  ;;  %v8326_v6 = vor.u32 %v9568_v2, %v8325_v39 }
 0x354   : > { %v4918_v11 = vpop.f32.mrf.mxu2 }
 0x355   : > { %v4919_v28 = vadd.f32 %v4918_v11, %v11405_v50  ;;  %v5247_v54 = vpop.f32.mrf.mxu3  ;;  %v9565_v50 = vld [vmem:[%s15009_s1 + $0x844] sm:$0xf]  ;;  %v7949_v11 = vld [vmem:[%s15009_s1 + $0x548] sm:$0xf] }
 0x356   : > { %v4342_v61 = vpop.f32.mrf.mxu0  ;;  %v7950_v5 = vor.u32 %v9473_v15, %v7949_v11  ;;  %v1676_v11 = vpop.permute.xlu1 %1675 }
 0x357   : > { %v4343_v47 = vadd.f32 %v4342_v61, %v1666_v35  ;;  %v4671_v42 = vpop.f32.mrf.mxu1  ;;  %v11962_v29 = vadd.f32 %v5247_v54, %v4919_v28  ;;  %v8330_v54 = vor.u32 %v9565_v50, %v8327_v31  ;;  %v7954_v35 = vor.u32 %v9470_v13, %v7951_v10  ;;  %v8349_v10 = vld [vmem:[%s15009_s1 + $0x870] sm:$0xf] }
 0x359   : > { %15111 = vst [vmem:[#allocation99_spill] sm:$0xff] %v11962_v29  ;;  %v11964_v0 = vadd.f32 %v4671_v42, %v4343_v47  ;;  %v1681_v29 = vpop.permute.xlu2 %1680 }
 0x35c   : > { %v4920_v17 = vpop.f32.mrf.mxu2 }
 0x35d   : > { %v4921_v16 = vadd.f32 %v4920_v17, %v11413_v33  ;;  %v5249_v26 = vpop.f32.mrf.mxu3 }
 0x35e   : > { %v4345_v28 = vpop.f32.mrf.mxu0 }
 0x35f   : > { %v4346_v61 = vadd.f32 %v4345_v28, %v1671_v24  ;;  %v4674_v47 = vpop.f32.mrf.mxu1  ;;  %v11991_v42 = vadd.f32 %v5249_v26, %v4921_v16  ;;  %v9574_v16 = vld [vmem:[%s15009_s1 + $0x884] sm:$0xf0]  ;;  %v7973_v24 = vld [vmem:[%s15009_s1 + $0x578] sm:$0xf]  ;;  %v9479_v28 = vld [vmem:[%s15009_s1 + $0x58c] sm:$0xf0] }
 0x360   : > { %v9290_v26 = vld [vmem:[%s10096_s19 + $0x128] sm:$0xff] }
 0x361   : > { %15112 = vst [vmem:[#allocation100_spill] sm:$0xff] %v11991_v42  ;;  %v11993_v49 = vadd.f32 %v4674_v47, %v4346_v61  ;;  %4384 = vmatmul.bf16.gmra.mxu0 %v8326_v6  ;;  %4962 = vmatmul.bf16.gmra.mxu2 %v7950_v5  ;;  %v12008_v6 = vpop.permute.xlu2 %1695  ;;  %v9571_v5 = vld [vmem:[%s15009_s1 + $0x874] sm:$0xf] }
 0x362   : > { %4713 = vmatmul.bf16.gmra.mxu1 %v8330_v54  ;;  %5291 = vmatmul.bf16.gmra.mxu3 %v7954_v35  ;;  %v8351_v54 = vld [vmem:[%s15009_s1 + $0x888] sm:$0xf0]  ;;  %v9476_v35 = vld [vmem:[%s15009_s1 + $0x57c] sm:$0xf]  ;;  %v7975_v61 = vld [vmem:[%s15009_s1 + $0x590] sm:$0xf0] }
 0x363   : > { %15113 = vst [vmem:[#allocation101_spill] sm:$0xff] %v11993_v49  ;;  %5474 = vmatpush.bf16.msrb.mxu0 %v9290_v26  ;;  %v7978_v42 = vor.u32 %v9476_v35, %v7975_v61 }
 0x364   : > { %v4923_v33 = vpop.f32.mrf.mxu2 }
 0x365   : > { %v4924_v39 = vadd.f32 %v4923_v33, %v11442_v38  ;;  %v5252_v2 = vpop.f32.mrf.mxu3  ;;  %v9298_v38 = vld [vmem:[%s10096_s19 + $0x168] sm:$0xff] }
 0x366   : > { %v4347_v50 = vpop.f32.mrf.mxu0  ;;  %5803 = vmatpush.bf16.msrb.mxu1 %v9298_v38 }
 0x367   : > { %v4348_v15 = vadd.f32 %v4347_v50, %v1676_v11  ;;  %v4676_v31 = vpop.f32.mrf.mxu1  ;;  %v11996_v13 = vadd.f32 %v5252_v2, %v4924_v39  ;;  %v8350_v2 = vor.u32 %v9574_v16, %v8349_v10  ;;  %v7974_v11 = vor.u32 %v9479_v28, %v7973_v24  ;;  %v9289_v50 = vld [vmem:[%s10096_s19 + $0x120] sm:$0xff]  ;;  %v9296_v10 = vld [vmem:[%s10096_s19 + $0x158] sm:$0xff]  ;;  %v1686_v16 = vpop.permute.xlu0 %1685  ;;  %v9287_v28 = vld [vmem:[%s10096_s19 + $0x110] sm:$0xff] }
 0x368   : > { %5475 = vmatpush.bf16.msrb.mxu0 %v9289_v50  ;;  %v9485_v50 = vld [vmem:[%s15009_s1 + $0x5bc] sm:$0xf0] }
 0x369   : > { %15114 = vst [vmem:[#allocation102_spill] sm:$0xff] %v11996_v13  ;;  %v12001_v17 = vadd.f32 %v4676_v31, %v4348_v15  ;;  %v9297_v15 = vld [vmem:[%s10096_s19 + $0x160] sm:$0xff]  ;;  %v8354_v13 = vor.u32 %v9571_v5, %v8351_v54 }
 0x36a   : > { %5804 = vmatpush.bf16.msrb.mxu1 %v9297_v15  ;;  %v8375_v15 = vld [vmem:[%s15009_s1 + $0x8b8] sm:$0xf0] }
 0x36b   : > { %15115 = vst [vmem:[#allocation103_spill] sm:$0xff] %v12001_v17 }
 0x36c   : > { %v4925_v47 = vpop.f32.mrf.mxu2 }
 0x36d   : > { %v4926_v33 = vadd.f32 %v4925_v47, %v11447_v40  ;;  %v5254_v39 = vpop.f32.mrf.mxu3  ;;  %v9288_v40 = vld [vmem:[%s10096_s19 + $0x118] sm:$0xff]  ;;  %v9286_v47 = vld [vmem:[%s10096_s19 + $0x108] sm:$0xff] }
 0x36e   : > { %v4350_v31 = vpop.f32.mrf.mxu0  ;;  %5476 = vmatpush.bf16.msrb.mxu0 %v9288_v40  ;;  %5805 = vmatpush.bf16.msrb.mxu1 %v9296_v10  ;;  %v7999_v40 = vld [vmem:[%s15009_s1 + $0x5c0] sm:$0xf0] }
 0x36f   : > { %v4351_v56 = vadd.f32 %v4350_v31, %v1681_v29  ;;  %v4679_v55 = vpop.f32.mrf.mxu1  ;;  %v12031_v17 = vadd.f32 %v5254_v39, %v4926_v33  ;;  %v12037_v29 = vpop.permute.xlu2 %1710  ;;  %v9294_v33 = vld [vmem:[%s10096_s19 + $0x148] sm:$0xff] }
 0x370   : > { %v1691_v39 = vpop.permute.xlu1 %1690  ;;  %v9482_v31 = vld [vmem:[%s15009_s1 + $0x5ac] sm:$0xf]  ;;  %v1701_v10 = vpop.permute.xlu0 %1700 }
 0x371   : > { %15116 = vst [vmem:[#allocation104_spill] sm:$0xff] %v12031_v17  ;;  %v12033_v26 = vadd.f32 %v4679_v55, %v4351_v56  ;;  %4389 = vmatmul.bf16.gmra.mxu0 %v8350_v2  ;;  %4967 = vmatmul.bf16.gmra.mxu2 %v7974_v11  ;;  %v9295_v55 = vld [vmem:[%s10096_s19 + $0x150] sm:$0xff]  ;;  %v9577_v2 = vld [vmem:[%s15009_s1 + $0x8a4] sm:$0xf]  ;;  %v7997_v11 = vld [vmem:[%s15009_s1 + $0x5a8] sm:$0xf]  ;;  %v8002_v17 = vor.u32 %v9482_v31, %v7999_v40 }
 0x372   : > { %4718 = vmatmul.bf16.gmra.mxu1 %v8354_v13  ;;  %5296 = vmatmul.bf16.gmra.mxu3 %v7978_v42  ;;  %v8373_v42 = vld [vmem:[%s15009_s1 + $0x8a0] sm:$0xf]  ;;  %v8399_v40 = vld [vmem:[%s15009_s1 + $0x8e8] sm:$0xf0] }
 0x373   : > { %15117 = vst [vmem:[#allocation105_spill] sm:$0xff] %v12033_v26  ;;  %5477 = vmatpush.bf16.msrb.mxu0 %v9287_v28  ;;  %5806 = vmatpush.bf16.msrb.mxu1 %v9295_v55  ;;  %v7998_v28 = vor.u32 %v9485_v50, %v7997_v11  ;;  %v9285_v55 = vld [vmem:[%s10096_s19 + $0x100] sm:$0xff] }
 0x374   : > { %v4928_v38 = vpop.f32.mrf.mxu2 }
 0x375   : > { %v4929_v5 = vadd.f32 %v4928_v38, %v11476_v20  ;;  %v5257_v24 = vpop.f32.mrf.mxu3  ;;  %v9580_v20 = vld [vmem:[%s15009_s1 + $0x8b4] sm:$0xf0] }
 0x376   : > { %v4352_v56 = vpop.f32.mrf.mxu0 }
 0x377   : > { %v4353_v54 = vadd.f32 %v4352_v56, %v1686_v16  ;;  %v4681_v35 = vpop.f32.mrf.mxu1  ;;  %v12042_v61 = vadd.f32 %v5257_v24, %v4929_v5  ;;  %5478 = vmatpush.bf16.msrb.mxu0 %v9286_v47  ;;  %5807 = vmatpush.bf16.msrb.mxu1 %v9294_v33  ;;  %v8374_v24 = vor.u32 %v9580_v20, %v8373_v42  ;;  %v9293_v56 = vld [vmem:[%s10096_s19 + $0x140] sm:$0xff] }
 0x378   : > { %v12082_v11 = vpop.permute.xlu0 %1780 }
 0x379   : > { %15118 = vst [vmem:[#allocation106_spill] sm:$0xff] %v12042_v61  ;;  %v12047_v13 = vadd.f32 %v4681_v35, %v4353_v54  ;;  %v12075_v54 = vpop.permute.xlu2 %1770  ;;  %v8378_v61 = vor.u32 %v9577_v2, %v8375_v15 }
 0x37b   : > { %15119 = vst [vmem:[#allocation107_spill] sm:$0xff] %v12047_v13  ;;  %5479 = vmatpush.bf16.msrb.mxu0 %v9285_v55  ;;  %5808 = vmatpush.bf16.msrb.mxu1 %v9293_v56 }
 0x37c   : > { %v4930_v16 = vpop.f32.mrf.mxu2 }
 0x37d   : > { %v4931_v38 = vadd.f32 %v4930_v16, %v11481_v48  ;;  %v5259_v5 = vpop.f32.mrf.mxu3  ;;  %v1706_v48 = vpop.permute.xlu1 %1705  ;;  %v9488_v16 = vld [vmem:[%s15009_s1 + $0x5dc] sm:$0xf] }
 0x37e   : > { %v4355_v35 = vpop.f32.mrf.mxu0 }
 0x37f   : > { %v4356_v13 = vadd.f32 %v4355_v35, %v1691_v39  ;;  %v4684_v26 = vpop.f32.mrf.mxu1  ;;  %v12077_v49 = vadd.f32 %v5259_v5, %v4931_v38  ;;  %v8023_v38 = vld [vmem:[%s15009_s1 + $0x5f0] sm:$0xf0] }
 0x381   : > { %15120 = vst [vmem:[#allocation108_spill] sm:$0xff] %v12077_v49  ;;  %v12079_v47 = vadd.f32 %v4684_v26, %v4356_v13  ;;  %4394 = vmatmul.bf16.gmra.mxu0 %v8374_v24  ;;  %4972 = vmatmul.bf16.gmra.mxu2 %v7998_v28  ;;  %v12087_v31 = vpop.permute.xlu2 %1765  ;;  %v9491_v13 = vld [vmem:[%s15009_s1 + $0x5ec] sm:$0xf0] }
 0x382   : > { %4723 = vmatmul.bf16.gmra.mxu1 %v8378_v61  ;;  %5301 = vmatmul.bf16.gmra.mxu3 %v8002_v17  ;;  %v8397_v17 = vld [vmem:[%s15009_s1 + $0x8d0] sm:$0xf]  ;;  %v9583_v61 = vld [vmem:[%s15009_s1 + $0x8d4] sm:$0xf] }
 0x383   : > { %15121 = vst [vmem:[#allocation109_spill] sm:$0xff] %v12079_v47 }
 0x384   : > { %v4933_v42 = vpop.f32.mrf.mxu2 }
 0x385   : > { %v4934_v20 = vadd.f32 %v4933_v42, %v11510_v37  ;;  %v5262_v33 = vpop.f32.mrf.mxu3  ;;  %v9586_v37 = vld [vmem:[%s15009_s1 + $0x8e4] sm:$0xf0]  ;;  %v12116_v35 = vpop.permute.xlu1 %1785 }
 0x386   : > { %v4357_v2 = vpop.f32.mrf.mxu0  ;;  %v8398_v55 = vor.u32 %v9586_v37, %v8397_v17 }
 0x387   : > { %v4358_v39 = vadd.f32 %v4357_v2, %v12008_v6  ;;  %v4686_v50 = vpop.f32.mrf.mxu1  ;;  %v12085_v15 = vadd.f32 %v5262_v33, %v4934_v20  ;;  %v8021_v6 = vld [vmem:[%s15009_s1 + $0x5d8] sm:$0xf]  ;;  %v8402_v20 = vor.u32 %v9583_v61, %v8399_v40  ;;  %v8026_v33 = vor.u32 %v9488_v16, %v8023_v38  ;;  %v8045_v38 = vld [vmem:[%s15009_s1 + $0x608] sm:$0xf] }
 0x388   : > { %v8022_v56 = vor.u32 %v9491_v13, %v8021_v6 }
 0x389   : > { %15122 = vst [vmem:[#allocation110_spill] sm:$0xff] %v12085_v15  ;;  %v12089_v26 = vadd.f32 %v4686_v50, %v4358_v39  ;;  %v12120_v15 = vpop.permute.xlu0 %1775 }
 0x38b   : > { %15123 = vst [vmem:[#allocation111_spill] sm:$0xff] %v12089_v26  ;;  %v12124_v26 = vpop.permute.xlu2 %1740 }
 0x38c   : > { %v4935_v5 = vpop.f32.mrf.mxu2 }
 0x38d   : > { %v4936_v24 = vadd.f32 %v4935_v5, %v11515_v4  ;;  %v5264_v28 = vpop.f32.mrf.mxu3  ;;  %v12129_v40 = vpop.permute.xlu1 %1760  ;;  %v9497_v5 = vld [vmem:[%s15009_s1 + $0x61c] sm:$0xf0] }
 0x38e   : > { %v4360_v42 = vpop.f32.mrf.mxu0 }
 0x38f   : > { %v4361_v2 = vadd.f32 %v4360_v42, %v1701_v10  ;;  %v4689_v39 = vpop.f32.mrf.mxu1  ;;  %v12118_v50 = vadd.f32 %v5264_v28, %v4936_v24  ;;  %v9303_v28 = vld [vmem:[%s15009_s1 + $0x14] sm:$0xf]  ;;  %v8047_v42 = vld [vmem:[%s15009_s1 + $0x620] sm:$0xf0] }
 0x391   : > { %15124 = vst [vmem:[#allocation112_spill] sm:$0xff] %v12118_v50  ;;  %v12122_v49 = vadd.f32 %v4689_v39, %v4361_v2  ;;  %4399 = vmatmul.bf16.gmra.mxu0 %v8398_v55  ;;  %4977 = vmatmul.bf16.gmra.mxu2 %v8022_v56  ;;  %v12139_v24 = vpop.permute.xlu0 %1750  ;;  %v7287_v55 = vld [vmem:[%s15009_s1 + $0x28] sm:$0xf0] }
 0x392   : > { %4728 = vmatmul.bf16.gmra.mxu1 %v8402_v20  ;;  %5306 = vmatmul.bf16.gmra.mxu3 %v8026_v33  ;;  %v9494_v56 = vld [vmem:[%s15009_s1 + $0x60c] sm:$0xf] }
 0x393   : > { %15125 = vst [vmem:[#allocation113_spill] sm:$0xff] %v12122_v49  ;;  %v12159_v20 = vpop.permute.xlu2 %1735 }
 0x394   : > { %v4938_v4 = vpop.f32.mrf.mxu2 }
 0x395   : > { %v4939_v17 = vadd.f32 %v4938_v4, %v11544_v18  ;;  %v5267_v37 = vpop.f32.mrf.mxu3  ;;  %v7285_v18 = vld [vmem:[%s15009_s1 + $0x10] sm:$0xf]  ;;  %v8046_v4 = vor.u32 %v9497_v5, %v8045_v38  ;;  %v12167_v49 = vpop.permute.xlu1 %1755 }
 0x396   : > { %v4362_v61 = vpop.f32.mrf.mxu0 }
 0x397   : > { %v4363_v6 = vadd.f32 %v4362_v61, %v1706_v48  ;;  %v4691_v10 = vpop.f32.mrf.mxu1  ;;  %v12127_v13 = vadd.f32 %v5267_v37, %v4939_v17  ;;  %v9306_v48 = vld [vmem:[%s15009_s1 + $0x24] sm:$0xf0]  ;;  %v7290_v61 = vor.u32 %v9303_v28, %v7287_v55 }
 0x398   : > { %v7286_v17 = vor.u32 %v9306_v48, %v7285_v18 }
 0x399   : > { %15126 = vst [vmem:[#allocation114_spill] sm:$0xff] %v12127_v13  ;;  %v12131_v16 = vadd.f32 %v4691_v10, %v4363_v6  ;;  %v8050_v6 = vor.u32 %v9494_v56, %v8047_v42  ;;  %v8069_v42 = vld [vmem:[%s15009_s1 + $0x638] sm:$0xf] }
 0x39b   : > { %15127 = vst [vmem:[#allocation115_spill] sm:$0xff] %v12131_v16  ;;  %v1716_v48 = vpop.permute.xlu2 %1715 }
 0x39c   : > { %v4940_v33 = vpop.f32.mrf.mxu2 }
 0x39d   : > { %v4941_v2 = vadd.f32 %v4940_v33, %v11549_v22  ;;  %v5269_v39 = vpop.f32.mrf.mxu3  ;;  %v12169_v22 = vpop.permute.xlu0 %1745  ;;  %v9503_v33 = vld [vmem:[%s15009_s1 + $0x64c] sm:$0xf0] }
 0x39e   : > { %v4365_v37 = vpop.f32.mrf.mxu0 }
 0x39f   : > { %v4366_v10 = vadd.f32 %v4365_v37, %v12037_v29  ;;  %v4694_v13 = vpop.f32.mrf.mxu1  ;;  %v12163_v50 = vadd.f32 %v5269_v39, %v4941_v2  ;;  %v9312_v2 = vld [vmem:[%s15009_s1 + $0x54] sm:$0xf0]  ;;  %v9309_v39 = vld [vmem:[%s15009_s1 + $0x44] sm:$0xf]  ;;  %v8071_v37 = vld [vmem:[%s15009_s1 + $0x650] sm:$0xf0] }
 0x3a1   : > { %15128 = vst [vmem:[#allocation116_spill] sm:$0xff] %v12163_v50  ;;  %v12165_v16 = vadd.f32 %v4694_v13, %v4366_v10  ;;  %4982 = vmatmul.bf16.gmra.mxu2 %v8046_v4  ;;  %5480 = vmatmul.bf16.vlgmr.msrb.gmra.mxu0 %v7286_v17  ;;  %v7311_v4 = vld [vmem:[%s15009_s1 + $0x58] sm:$0xf0] }
 0x3a2   : > { %5809 = vmatmul.bf16.vlgmr.msrb.gmra.mxu1 %v7290_v61  ;;  %5311 = vmatmul.bf16.gmra.mxu3 %v8050_v6  ;;  %v9500_v17 = vld [vmem:[%s15009_s1 + $0x63c] sm:$0xf]  ;;  %v1731_v61 = vpop.permute.xlu1 %1730 }
 0x3a3   : > { %15129 = vst [vmem:[#allocation117_spill] sm:$0xff] %v12165_v16 }
 0x3a4   : > { %v4943_v38 = vpop.f32.mrf.mxu2 }
 0x3a5   : > { %v4944_v5 = vadd.f32 %v4943_v38, %v11578_v53  ;;  %v5272_v18 = vpop.f32.mrf.mxu3  ;;  %v7309_v53 = vld [vmem:[%s15009_s1 + $0x40] sm:$0xf] }
 0x3a6   : > { %v4367_v28 = vpop.f32.mrf.mxu0 }
 0x3a7   : > { %v4368_v29 = vadd.f32 %v4367_v28, %v1716_v48  ;;  %v4696_v55 = vpop.f32.mrf.mxu1  ;;  %v12172_v56 = vadd.f32 %v5272_v18, %v4944_v5  ;;  %v8070_v5 = vor.u32 %v9503_v33, %v8069_v42  ;;  %v7310_v18 = vor.u32 %v9312_v2, %v7309_v53  ;;  %v1721_v48 = vpop.permute.xlu0 %1720 }
 0x3a9   : > { %15130 = vst [vmem:[#allocation118_spill] sm:$0xff] %v12172_v56  ;;  %v12174_v13 = vadd.f32 %v4696_v55, %v4368_v29  ;;  %v7314_v29 = vor.u32 %v9309_v39, %v7311_v4  ;;  %v8074_v55 = vor.u32 %v9500_v17, %v8071_v37  ;;  %v9315_v17 = vld [vmem:[%s15009_s1 + $0x74] sm:$0xf]  ;;  %v7335_v37 = vld [vmem:[%s15009_s1 + $0x88] sm:$0xf0] }
 0x3aa   : > { %v1726_v42 = vpop.permute.xlu1 %1725 }
 0x3ab   : > { %15131 = vst [vmem:[#allocation119_spill] sm:$0xff] %v12174_v13 }
 0x3ac   : > { %v4945_v6 = vpop.f32.mrf.mxu2 }
 0x3ad   : > { %v4946_v10 = vadd.f32 %v4945_v6, %v11583_v9  ;;  %v5274_v38 = vpop.f32.mrf.mxu3 }
 0x3ae   : > { %v4370_v28 = vpop.f32.mrf.mxu0 }
 0x3af   : > { %v4371_v56 = vadd.f32 %v4370_v28, %v1721_v48  ;;  %v4699_v50 = vpop.f32.mrf.mxu1  ;;  %v12201_v13 = vadd.f32 %v5274_v38, %v4946_v10  ;;  %v9506_v10 = vld [vmem:[%s15009_s1 + $0x66c] sm:$0xf]  ;;  %v8095_v38 = vld [vmem:[%s15009_s1 + $0x680] sm:$0xf0] }
 0x3b1   : > { %15132 = vst [vmem:[#allocation120_spill] sm:$0xff] %v12201_v13  ;;  %v12203_v16 = vadd.f32 %v4699_v50, %v4371_v56  ;;  %4987 = vmatmul.bf16.gmra.mxu2 %v8070_v5  ;;  %5485 = vmatmul.bf16.gmra.mxu0 %v7310_v18  ;;  %v8093_v50 = vld [vmem:[%s15009_s1 + $0x668] sm:$0xf]  ;;  %v9509_v56 = vld [vmem:[%s15009_s1 + $0x67c] sm:$0xf0] }
 0x3b2   : > { %5814 = vmatmul.bf16.gmra.mxu1 %v7314_v29  ;;  %5316 = vmatmul.bf16.gmra.mxu3 %v8074_v55  ;;  %v8094_v28 = vor.u32 %v9509_v56, %v8093_v50 }
 0x3b4   : > { %v4948_v47 = vpop.f32.mrf.mxu2 }
 0x3b5   : > { %v4949_v9 = vadd.f32 %v4948_v47, %v11612_v1  ;;  %v5277_v6 = vpop.f32.mrf.mxu3  ;;  %v7333_v1 = vld [vmem:[%s15009_s1 + $0x70] sm:$0xf]  ;;  %v9318_v47 = vld [vmem:[%s15009_s1 + $0x84] sm:$0xf0] }
 0x3b6   : > { %v4372_v33 = vpop.f32.mrf.mxu0  ;;  %v7334_v29 = vor.u32 %v9318_v47, %v7333_v1  ;;  %v8117_v47 = vld [vmem:[%s15009_s1 + $0x698] sm:$0xf] }
 0x3b7   : > { %v4373_v53 = vadd.f32 %v4372_v33, %v1726_v42  ;;  %v4701_v2 = vpop.f32.mrf.mxu1  ;;  %v12206_v39 = vadd.f32 %v5277_v6, %v4949_v9  ;;  %v7338_v9 = vor.u32 %v9315_v17, %v7335_v37  ;;  %v8098_v6 = vor.u32 %v9506_v10, %v8095_v38  ;;  %v9515_v17 = vld [vmem:[%s15009_s1 + $0x6ac] sm:$0xf0]  ;;  %v9512_v37 = vld [vmem:[%s15009_s1 + $0x69c] sm:$0xf]  ;;  %v8119_v10 = vld [vmem:[%s15009_s1 + $0x6b0] sm:$0xf0] }
 0x3b9   : > { %15133 = vst [vmem:[#allocation121_spill] sm:$0xff] %v12206_v39  ;;  %v12208_v4 = vadd.f32 %v4701_v2, %v4373_v53 }
 0x3bc   : > { %v4950_v5 = vpop.f32.mrf.mxu2 }
 0x3bd   : > { %v4951_v18 = vadd.f32 %v4950_v5, %v11617_v60  ;;  %v5279_v48 = vpop.f32.mrf.mxu3 }
 0x3be   : > { %v4375_v55 = vpop.f32.mrf.mxu0 }
 0x3bf   : > { %v4376_v42 = vadd.f32 %v4375_v55, %v1731_v61  ;;  %v4704_v33 = vpop.f32.mrf.mxu1  ;;  %v12235_v53 = vadd.f32 %v5279_v48, %v4951_v18 }
 0x3c1   : > { %v12237_v2 = vadd.f32 %v4704_v33, %v4376_v42  ;;  %4992 = vmatmul.bf16.gmra.mxu2 %v8094_v28  ;;  %5490 = vmatmul.bf16.gmra.mxu0 %v7334_v29  ;;  %v8118_v28 = vor.u32 %v9515_v17, %v8117_v47 }
 0x3c2   : > { %5819 = vmatmul.bf16.gmra.mxu1 %v7338_v9  ;;  %5321 = vmatmul.bf16.gmra.mxu3 %v8098_v6  ;;  %v8122_v6 = vor.u32 %v9512_v37, %v8119_v10  ;;  %v7381_v37 = vld [vmem:[%s15009_s1 + $0xd0] sm:$0xf]  ;;  %v9330_v10 = vld [vmem:[%s15009_s1 + $0xe4] sm:$0xf0] }
 0x3c4   : > { %v4953_v39 = vpop.f32.mrf.mxu2 }
 0x3c5   : > { %v4954_v13 = vadd.f32 %v4953_v39, %v11646_v36  ;;  %v5282_v60 = vpop.f32.mrf.mxu3  ;;  %v7357_v36 = vld [vmem:[%s15009_s1 + $0xa0] sm:$0xf]  ;;  %v7359_v39 = vld [vmem:[%s15009_s1 + $0xb8] sm:$0xf0] }
 0x3c6   : > { %v4377_v5 = vpop.f32.mrf.mxu0 }
 0x3c7   : > { %v4378_v50 = vadd.f32 %v4377_v5, %v12159_v20  ;;  %v4706_v56 = vpop.f32.mrf.mxu1  ;;  %v12241_v1 = vadd.f32 %v5282_v60, %v4954_v13  ;;  %v9324_v20 = vld [vmem:[%s15009_s1 + $0xb4] sm:$0xf0]  ;;  %v9321_v13 = vld [vmem:[%s15009_s1 + $0xa4] sm:$0xf] }
 0x3c8   : > { %v7358_v29 = vor.u32 %v9324_v20, %v7357_v36  ;;  %v7362_v9 = vor.u32 %v9321_v13, %v7359_v39  ;;  %v9521_v39 = vld [vmem:[%s15009_s1 + $0x6dc] sm:$0xf0] }
 0x3c9   : > { %v12243_v61 = vadd.f32 %v4706_v56, %v4378_v50 }
 0x3cc   : > { %v4955_v38 = vpop.f32.mrf.mxu2 }
 0x3cd   : > { %v4956_v18 = vadd.f32 %v4955_v38, %v11651_v23  ;;  %v5284_v48 = vpop.f32.mrf.mxu3  ;;  %v9327_v38 = vld [vmem:[%s15009_s1 + $0xd4] sm:$0xf] }
 0x3ce   : > { %v4380_v55 = vpop.f32.mrf.mxu0 }
 0x3cf   : > { %v4381_v42 = vadd.f32 %v4380_v55, %v12124_v26  ;;  %v4709_v33 = vpop.f32.mrf.mxu1  ;;  %v12271_v60 = vadd.f32 %v5284_v48, %v4956_v18  ;;  %v8141_v26 = vld [vmem:[%s15009_s1 + $0x6c8] sm:$0xf]  ;;  %v7383_v18 = vld [vmem:[%s15009_s1 + $0xe8] sm:$0xf0] }
 0x3d0   : > { %v9518_v48 = vld [vmem:[%s15009_s1 + $0x6cc] sm:$0xf] }
 0x3d1   : > { %v12273_v5 = vadd.f32 %v4709_v33, %v4381_v42  ;;  %4997 = vmatmul.bf16.gmra.mxu2 %v8118_v28  ;;  %5495 = vmatmul.bf16.gmra.mxu0 %v7358_v29  ;;  %v8143_v28 = vld [vmem:[%s15009_s1 + $0x6e0] sm:$0xf0]  ;;  %v7382_v42 = vor.u32 %v9330_v10, %v7381_v37 }
 0x3d2   : > { %5824 = vmatmul.bf16.gmra.mxu1 %v7362_v9  ;;  %5326 = vmatmul.bf16.gmra.mxu3 %v8122_v6  ;;  %v8142_v6 = vor.u32 %v9521_v39, %v8141_v26  ;;  %v6262_v26 = vld [vmem:[%s15012_s4 + $0x20] sm:$0xff] }
 0x3d4   : > { %v4958_v50 = vpop.f32.mrf.mxu2 }
 0x3d5   : > { %v4959_v23 = vadd.f32 %v4958_v50, %v11680_v59  ;;  %v5287_v56 = vpop.f32.mrf.mxu3  ;;  %v6260_v59 = vld [vmem:[%s15012_s4 + $0x10] sm:$0xff]  ;;  %v7386_v50 = vor.u32 %v9327_v38, %v7383_v18  ;;  %v8165_v18 = vld [vmem:[%s15009_s1 + $0x6f8] sm:$0xf] }
 0x3d6   : > { %v4382_v47 = vpop.f32.mrf.mxu0  ;;  %6286 = vperm.xlu1 %9793, %v6260_v59  }
 0x3d7   : > { %v4383_v17 = vadd.f32 %v4382_v47, %v12169_v22  ;;  %v4711_v36 = vpop.f32.mrf.mxu1  ;;  %v12277_v20 = vadd.f32 %v5287_v56, %v4959_v23  ;;  %v6259_v22 = vld [vmem:[%s15012_s4 + $0x8] sm:$0xff]  ;;  %v8146_v23 = vor.u32 %v9518_v48, %v8143_v28  ;;  %v9527_v28 = vld [vmem:[%s15009_s1 + $0x70c] sm:$0xf0] }
 0x3d8   : > { %6281 = vperm.xlu0 %9792, %v6259_v22  }
 0x3d9   : > { %v12282_v13 = vadd.f32 %v4711_v36, %v4383_v17 }
 0x3dc   : > { %v4960_v29 = vpop.f32.mrf.mxu2 }
 0x3dd   : > { %v4961_v55 = vadd.f32 %v4960_v29, %v11685_v34  ;;  %v5289_v9 = vpop.f32.mrf.mxu3  ;;  %v6263_v34 = vld [vmem:[%s15012_s4 + $0x28] sm:$0xff]  ;;  %v7405_v29 = vld [vmem:[%s15009_s1 + $0x100] sm:$0xf] }
 0x3de   : > { %v4385_v33 = vpop.f32.mrf.mxu0  ;;  %6301 = vperm.xlu1 %9793, %v6263_v34  }
 0x3df   : > { %v4386_v56 = vadd.f32 %v4385_v33, %v12139_v24  ;;  %v4714_v47 = vpop.f32.mrf.mxu1  ;;  %v12313_v17 = vadd.f32 %v5289_v9, %v4961_v55  ;;  %v9336_v55 = vld [vmem:[%s15009_s1 + $0x114] sm:$0xf0]  ;;  %v9333_v9 = vld [vmem:[%s15009_s1 + $0x104] sm:$0xf]  ;;  %v8167_v33 = vld [vmem:[%s15009_s1 + $0x710] sm:$0xf0] }
 0x3e0   : > { %6296 = vperm.xlu0 %9792, %v6262_v26   ;;  %v7406_v34 = vor.u32 %v9336_v55, %v7405_v29 }
 0x3e1   : > { %v12315_v36 = vadd.f32 %v4714_v47, %v4386_v56  ;;  %5002 = vmatmul.bf16.gmra.mxu2 %v8142_v6  ;;  %5500 = vmatmul.bf16.gmra.mxu0 %v7382_v42  ;;  %v7407_v6 = vld [vmem:[%s15009_s1 + $0x118] sm:$0xf0]  ;;  %v8166_v47 = vor.u32 %v9527_v28, %v8165_v18  ;;  %v6268_v18 = vld [vmem:[%s15012_s4 + $0x50] sm:$0xff] }
 0x3e2   : > { %5829 = vmatmul.bf16.gmra.mxu1 %v7386_v50  ;;  %5331 = vmatmul.bf16.gmra.mxu3 %v8146_v23  ;;  %v9524_v42 = vld [vmem:[%s15009_s1 + $0x6fc] sm:$0xf] }
 0x3e4   : > { %v4963_v24 = vpop.f32.mrf.mxu2 }
 0x3e5   : > { %v4964_v39 = vadd.f32 %v4963_v24, %v11714_v25  ;;  %v5292_v59 = vpop.f32.mrf.mxu3  ;;  %v6266_v25 = vld [vmem:[%s15012_s4 + $0x40] sm:$0xff]  ;;  %v7410_v24 = vor.u32 %v9333_v9, %v7407_v6  ;;  %v8189_v6 = vld [vmem:[%s15009_s1 + $0x728] sm:$0xf] }
 0x3e6   : > { %v4387_v22 = vpop.f32.mrf.mxu0  ;;  %6316 = vperm.xlu1 %9793, %v6266_v25  }
 0x3e7   : > { %v4388_v37 = vadd.f32 %v4387_v22, %v12167_v49  ;;  %v4716_v10 = vpop.f32.mrf.mxu1  ;;  %v12325_v38 = vadd.f32 %v5292_v59, %v4964_v39  ;;  %v6265_v49 = vld [vmem:[%s15012_s4 + $0x38] sm:$0xff]  ;;  %v8170_v39 = vor.u32 %v9524_v42, %v8167_v33  ;;  %v9533_v33 = vld [vmem:[%s15009_s1 + $0x73c] sm:$0xf0] }
 0x3e8   : > { %6311 = vperm.xlu0 %9792, %v6265_v49  }
 0x3e9   : > { %v12330_v48 = vadd.f32 %v4716_v10, %v4388_v37 }
 0x3ec   : > { %v4965_v50 = vpop.f32.mrf.mxu2 }
 0x3ed   : > { %v4966_v23 = vadd.f32 %v4965_v50, %v11721_v3  ;;  %v5294_v56 = vpop.f32.mrf.mxu3  ;;  %v6269_v3 = vld [vmem:[%s15012_s4 + $0x58] sm:$0xff]  ;;  %v7429_v50 = vld [vmem:[%s15009_s1 + $0x130] sm:$0xf] }
 0x3ee   : > { %v4390_v26 = vpop.f32.mrf.mxu0  ;;  %6331 = vperm.xlu1 %9793, %v6269_v3  }
 0x3ef   : > { %v4391_v59 = vadd.f32 %v4390_v26, %v12129_v40  ;;  %v4719_v22 = vpop.f32.mrf.mxu1  ;;  %v12361_v37 = vadd.f32 %v5294_v56, %v4966_v23  ;;  %v9342_v23 = vld [vmem:[%s15009_s1 + $0x144] sm:$0xf0]  ;;  %v9339_v56 = vld [vmem:[%s15009_s1 + $0x134] sm:$0xf]  ;;  %v8191_v26 = vld [vmem:[%s15009_s1 + $0x740] sm:$0xf0] }
 0x3f0   : > { %6326 = vperm.xlu0 %9792, %v6268_v18   ;;  %v7430_v3 = vor.u32 %v9342_v23, %v7429_v50 }
 0x3f1   : > { %v12363_v10 = vadd.f32 %v4719_v22, %v4391_v59  ;;  %5007 = vmatmul.bf16.gmra.mxu2 %v8166_v47  ;;  %5505 = vmatmul.bf16.gmra.mxu0 %v7406_v34  ;;  %v7431_v47 = vld [vmem:[%s15009_s1 + $0x148] sm:$0xf0]  ;;  %v8190_v22 = vor.u32 %v9533_v33, %v8189_v6  ;;  %v7066_v6 = vld [vmem:[%s15013_s5] sm:$0xff] }
 0x3f2   : > { %5834 = vmatmul.bf16.gmra.mxu1 %v7410_v24  ;;  %5336 = vmatmul.bf16.gmra.mxu3 %v8170_v39  ;;  %v9530_v34 = vld [vmem:[%s15009_s1 + $0x72c] sm:$0xf] }
 0x3f4   : > { %v4968_v40 = vpop.f32.mrf.mxu2 }
 0x3f5   : > { %v4969_v28 = vadd.f32 %v4968_v40, %v11752_v32  ;;  %v5297_v25 = vpop.f32.mrf.mxu3  ;;  %v6272_v32 = vld [vmem:[%s15012_s4 + $0x70] sm:$0xff]  ;;  %v7434_v40 = vor.u32 %v9339_v56, %v7431_v47  ;;  %v8213_v47 = vld [vmem:[%s15009_s1 + $0x758] sm:$0xf] }
 0x3f6   : > { %v4392_v49 = vpop.f32.mrf.mxu0  ;;  %6346 = vperm.xlu1 %9793, %v6272_v32  }
 0x3f7   : > { %v4393_v29 = vadd.f32 %v4392_v49, %v12087_v31  ;;  %v4721_v55 = vpop.f32.mrf.mxu1  ;;  %v12373_v9 = vadd.f32 %v5297_v25, %v4969_v28  ;;  %v6271_v31 = vld [vmem:[%s15012_s4 + $0x68] sm:$0xff]  ;;  %v8194_v28 = vor.u32 %v9530_v34, %v8191_v26  ;;  %v9539_v26 = vld [vmem:[%s15009_s1 + $0x76c] sm:$0xf0] }
 0x3f8   : > { %6341 = vperm.xlu0 %9792, %v6271_v31  }
 0x3f9   : > { %v12378_v42 = vadd.f32 %v4721_v55, %v4393_v29 }
 0x3fc   : > { %v4970_v24 = vpop.f32.mrf.mxu2 }
 0x3fd   : > { %v4971_v39 = vadd.f32 %v4970_v24, %v11757_v30  ;;  %v5299_v59 = vpop.f32.mrf.mxu3  ;;  %v7067_v30 = vld [vmem:[%s15013_s5 + $0x8] sm:$0xff]  ;;  %v9345_v24 = vld [vmem:[%s15009_s1 + $0x164] sm:$0xf] }
 0x3fe   : > { %v4395_v18 = vpop.f32.mrf.mxu0  ;;  %7089 = vperm.xlu1 %9793, %v7067_v30  }
 0x3ff   : > { %v4396_v25 = vadd.f32 %v4395_v18, %v12075_v54  ;;  %v4724_v49 = vpop.f32.mrf.mxu1  ;;  %v12409_v29 = vadd.f32 %v5299_v59, %v4971_v39  ;;  %v7455_v39 = vld [vmem:[%s15009_s1 + $0x178] sm:$0xf0] }
 0x400   : > { %7084 = vperm.xlu0 %9792, %v7066_v6   ;;  %v9536_v59 = vld [vmem:[%s15009_s1 + $0x75c] sm:$0xf] }
 0x401   : > { %v12411_v55 = vadd.f32 %v4724_v49, %v4396_v25  ;;  %5012 = vmatmul.bf16.gmra.mxu2 %v8190_v22  ;;  %5510 = vmatmul.bf16.gmra.mxu0 %v7430_v3  ;;  %v8215_v22 = vld [vmem:[%s15009_s1 + $0x770] sm:$0xf0]  ;;  %v7070_v3 = vld [vmem:[%s15013_s5 + $0x20] sm:$0xff]  ;;  %v7069_v18 = vld [vmem:[%s15013_s5 + $0x18] sm:$0xff]  ;;  %v8214_v49 = vor.u32 %v9539_v26, %v8213_v47 }
 0x402   : > { %5839 = vmatmul.bf16.gmra.mxu1 %v7434_v40  ;;  %5341 = vmatmul.bf16.gmra.mxu3 %v8194_v28  ;;  %v7072_v47 = vld [vmem:[%s15013_s5 + $0x30] sm:$0xff] }
 0x404   : > { %v4973_v54 = vpop.f32.mrf.mxu2 }
 0x405   : > { %v4974_v33 = vadd.f32 %v4973_v54, %v11786_v58  ;;  %v5302_v32 = vpop.f32.mrf.mxu3  ;;  %v7453_v58 = vld [vmem:[%s15009_s1 + $0x160] sm:$0xf]  ;;  %v7458_v54 = vor.u32 %v9345_v24, %v7455_v39 }
 0x406   : > { %v4397_v31 = vpop.f32.mrf.mxu0  ;;  %7104 = vperm.xlu1 %9793, %v7070_v3  }
 0x407   : > { %v4398_v50 = vadd.f32 %v4397_v31, %v12120_v15  ;;  %v4726_v23 = vpop.f32.mrf.mxu1  ;;  %v12421_v56 = vadd.f32 %v5302_v32, %v4974_v33  ;;  %v9348_v15 = vld [vmem:[%s15009_s1 + $0x174] sm:$0xf0]  ;;  %v8218_v33 = vor.u32 %v9536_v59, %v8215_v22  ;;  %v8237_v22 = vld [vmem:[%s15009_s1 + $0x788] sm:$0xf] }
 0x408   : > { %7099 = vperm.xlu0 %9792, %v7069_v18   ;;  %v7454_v30 = vor.u32 %v9348_v15, %v7453_v58  ;;  %v9545_v18 = vld [vmem:[%s15009_s1 + $0x79c] sm:$0xf0] }
 0x409   : > { %v12426_v34 = vadd.f32 %v4726_v23, %v4398_v50 }
 0x40c   : > { %v4975_v40 = vpop.f32.mrf.mxu2 }
 0x40d   : > { %v4976_v28 = vadd.f32 %v4975_v40, %v11791_v62  ;;  %v5304_v25 = vpop.f32.mrf.mxu3  ;;  %v7073_v62 = vld [vmem:[%s15013_s5 + $0x38] sm:$0xff]  ;;  %v9351_v40 = vld [vmem:[%s15009_s1 + $0x194] sm:$0xf] }
 0x40e   : > { %v4400_v6 = vpop.f32.mrf.mxu0  ;;  %7119 = vperm.xlu1 %9793, %v7073_v62  }
 0x40f   : > { %v4401_v32 = vadd.f32 %v4400_v6, %v12082_v11  ;;  %v4729_v31 = vpop.f32.mrf.mxu1  ;;  %v12457_v50 = vadd.f32 %v5304_v25, %v4976_v28  ;;  %v7479_v28 = vld [vmem:[%s15009_s1 + $0x1a8] sm:$0xf0] }
 0x410   : > { %7114 = vperm.xlu0 %9792, %v7072_v47   ;;  %v9542_v25 = vld [vmem:[%s15009_s1 + $0x78c] sm:$0xf] }
 0x411   : > { %v12459_v23 = vadd.f32 %v4729_v31, %v4401_v32  ;;  %5017 = vmatmul.bf16.gmra.mxu2 %v8214_v49  ;;  %5515 = vmatmul.bf16.gmra.mxu0 %v7454_v30  ;;  %v8239_v49 = vld [vmem:[%s15009_s1 + $0x7a0] sm:$0xf0]  ;;  %v7076_v30 = vld [vmem:[%s15013_s5 + $0x50] sm:$0xff]  ;;  %v7075_v6 = vld [vmem:[%s15013_s5 + $0x48] sm:$0xff]  ;;  %v8238_v31 = vor.u32 %v9545_v18, %v8237_v22 }
 0x412   : > { %5844 = vmatmul.bf16.gmra.mxu1 %v7458_v54  ;;  %5346 = vmatmul.bf16.gmra.mxu3 %v8218_v33  ;;  %v7079_v22 = vld [vmem:[%s15013_s5 + $0x68] sm:$0xff]  ;;  %v7078_v18 = vld [vmem:[%s15013_s5 + $0x60] sm:$0xff] }
 0x414   : > { %v4978_v26 = vpop.f32.mrf.mxu2 }
 0x415   : > { %v4979_v11 = vadd.f32 %v4978_v26, %v11820_v7  ;;  %v5307_v58 = vpop.f32.mrf.mxu3  ;;  %v7477_v7 = vld [vmem:[%s15009_s1 + $0x190] sm:$0xf]  ;;  %v7482_v26 = vor.u32 %v9351_v40, %v7479_v28 }
 0x416   : > { %v4402_v15 = vpop.f32.mrf.mxu0  ;;  %7134 = vperm.xlu1 %9793, %v7076_v30   ;;  %v8261_v30 = vld [vmem:[%s15009_s1 + $0x7b8] sm:$0xf] }
 0x417   : > { %v4403_v24 = vadd.f32 %v4402_v15, %v12116_v35  ;;  %v4731_v39 = vpop.f32.mrf.mxu1  ;;  %v12469_v59 = vadd.f32 %v5307_v58, %v4979_v11  ;;  %v9354_v35 = vld [vmem:[%s15009_s1 + $0x1a4] sm:$0xf0]  ;;  %v8242_v11 = vor.u32 %v9542_v25, %v8239_v49 }
 0x418   : > { %7129 = vperm.xlu0 %9792, %v7075_v6   ;;  %v7478_v62 = vor.u32 %v9354_v35, %v7477_v7  ;;  %v9551_v6 = vld [vmem:[%s15009_s1 + $0x7cc] sm:$0xf0] }
 0x419   : > { %v12474_v3 = vadd.f32 %v4731_v39, %v4403_v24 }
 0x41c   : > { %v4980_v54 = vpop.f32.mrf.mxu2 }
 0x41d   : > { %v4981_v33 = vadd.f32 %v4980_v54, %v11826_v57  ;;  %v5309_v32 = vpop.f32.mrf.mxu3  ;;  %v6258_v57 = vld [vmem:[%s15012_s4] sm:$0xff] }
 0x41e   : > { %v5481_v47 = vpop.f32.mrf.mxu0  ;;  %6276 = vperm.xlu2 %9794, %v6258_v57   ;;  %7149 = vperm.xlu1 %9793, %v7079_v22  }
 0x41f   : > { %v12504_v58 = vadd.f32 %v5309_v32, %v4981_v33  ;;  %v5482_v15 = vadd.f32 %v5481_v47, %v11297_v12  ;;  %v5810_v24 = vpop.f32.mrf.mxu1  ;;  %v9360_v33 = vld [vmem:[%s15009_s1 + $0x1d4] sm:$0xf0]  ;;  %v7503_v32 = vld [vmem:[%s15009_s1 + $0x1d8] sm:$0xf0] }
 0x420   : > { %7144 = vperm.xlu0 %9792, %v7078_v18   ;;  %v8262_v18 = vor.u32 %v9551_v6, %v8261_v30 }
 0x421   : > { %15134 = vst [vmem:[#allocation122_spill] sm:$0xff] %v12504_v58  ;;  %v12507_v39 = vadd.f32 %v5810_v24, %v5482_v15  ;;  %5022 = vmatmul.bf16.gmra.mxu2 %v8238_v31  ;;  %5520 = vmatmul.bf16.gmra.mxu0 %v7478_v62  ;;  %v9548_v31 = vld [vmem:[%s15009_s1 + $0x7bc] sm:$0xf]  ;;  %v8263_v62 = vld [vmem:[%s15009_s1 + $0x7d0] sm:$0xf0] }
 0x422   : > { %5849 = vmatmul.bf16.gmra.mxu1 %v7482_v26  ;;  %5351 = vmatmul.bf16.gmra.mxu3 %v8242_v11  ;;  %v6261_v26 = vld [vmem:[%s15012_s4 + $0x18] sm:$0xff]  ;;  %v7199_v11 = vld [vmem:[#allocation2] sm:$0x1] }
 0x423   : > { %v7081_v15 = vld [vmem:[%s15013_s5 + $0x78] sm:$0xff] }
 0x424   : > { %v4983_v12 = vpop.f32.mrf.mxu2 }
 0x425   : > { %v4984_v7 = vadd.f32 %v4983_v12, %v11855_v43  ;;  %v5312_v35 = vpop.f32.mrf.mxu3  ;;  %v7501_v43 = vld [vmem:[%s15009_s1 + $0x1c0] sm:$0xf] }
 0x426   : > { %v5483_v40 = vpop.f32.mrf.mxu0  ;;  %6291 = vperm.xlu2 %9794, %v6261_v26   ;;  %7202 = vperm.xlu1 %9793, %v7199_v11   ;;  %v7502_v12 = vor.u32 %v9360_v33, %v7501_v43  ;;  %v9366_v26 = vld [vmem:[%s15009_s1 + $0x204] sm:$0xf0]  ;;  %v7527_v11 = vld [vmem:[%s15009_s1 + $0x208] sm:$0xf0] }
 0x427   : > { %v12519_v28 = vadd.f32 %v5312_v35, %v4984_v7  ;;  %v5484_v25 = vadd.f32 %v5483_v40, %v11332_v21  ;;  %v5812_v49 = vpop.f32.mrf.mxu1  ;;  %v9357_v21 = vld [vmem:[%s15009_s1 + $0x1c4] sm:$0xf]  ;;  %v8266_v40 = vor.u32 %v9548_v31, %v8263_v62  ;;  %v8285_v62 = vld [vmem:[%s15009_s1 + $0x7e8] sm:$0xf] }
 0x428   : > { %7159 = vperm.xlu0 %9792, %v7081_v15   ;;  %v7506_v35 = vor.u32 %v9357_v21, %v7503_v32 }
 0x429   : > { %15135 = vst [vmem:[#allocation123_spill] sm:$0xff] %v12519_v28  ;;  %v12528_v54 = vadd.f32 %v5812_v49, %v5484_v25 }
 0x42c   : > { %v4985_v24 = vpop.f32.mrf.mxu2 }
 0x42d   : > { %v4986_v57 = vadd.f32 %v4985_v24, %v11860_v45  ;;  %v5314_v22 = vpop.f32.mrf.mxu3  ;;  %v6264_v45 = vld [vmem:[%s15012_s4 + $0x30] sm:$0xff]  ;;  %v9554_v24 = vld [vmem:[%s15009_s1 + $0x7ec] sm:$0xf] }
 0x42e   : > { %v5486_v7 = vpop.f32.mrf.mxu0  ;;  %6306 = vperm.xlu2 %9794, %v6264_v45  }
 0x42f   : > { %v12557_v25 = vadd.f32 %v5314_v22, %v4986_v57  ;;  %v5487_v49 = vadd.f32 %v5486_v7, %v11337_v14  ;;  %v5815_v47 = vpop.f32.mrf.mxu1  ;;  %v8287_v57 = vld [vmem:[%s15009_s1 + $0x800] sm:$0xf0]  ;;  %v6267_v22 = vld [vmem:[%s15012_s4 + $0x48] sm:$0xff] }
 0x431   : > { %15136 = vst [vmem:[#allocation124_spill] sm:$0xff] %v12557_v25  ;;  %v12560_v28 = vadd.f32 %v5815_v47, %v5487_v49  ;;  %5027 = vmatmul.bf16.gmra.mxu2 %v8262_v18  ;;  %5525 = vmatmul.bf16.gmra.mxu0 %v7502_v12  ;;  %v9557_v47 = vld [vmem:[%s15009_s1 + $0x7fc] sm:$0xf0] }
 0x432   : > { %5854 = vmatmul.bf16.gmra.mxu1 %v7506_v35  ;;  %5356 = vmatmul.bf16.gmra.mxu3 %v8266_v40  ;;  %v8286_v35 = vor.u32 %v9557_v47, %v8285_v62 }
 0x434   : > { %v4988_v30 = vpop.f32.mrf.mxu2 }
 0x435   : > { %v4989_v6 = vadd.f32 %v4988_v30, %v11889_v41  ;;  %v5317_v43 = vpop.f32.mrf.mxu3  ;;  %v7525_v41 = vld [vmem:[%s15009_s1 + $0x1f0] sm:$0xf]  ;;  %v8290_v30 = vor.u32 %v9554_v24, %v8287_v57  ;;  %v8309_v24 = vld [vmem:[%s15009_s1 + $0x818] sm:$0xf] }
 0x436   : > { %v5488_v33 = vpop.f32.mrf.mxu0  ;;  %6321 = vperm.xlu2 %9794, %v6267_v22   ;;  %v7526_v40 = vor.u32 %v9366_v26, %v7525_v41  ;;  %v9563_v57 = vld [vmem:[%s15009_s1 + $0x82c] sm:$0xf0]  ;;  %v9372_v22 = vld [vmem:[%s15009_s1 + $0x234] sm:$0xf0] }
 0x437   : > { %v12566_v21 = vadd.f32 %v5317_v43, %v4989_v6  ;;  %v5489_v14 = vadd.f32 %v5488_v33, %v11366_v51  ;;  %v5817_v32 = vpop.f32.mrf.mxu1  ;;  %v9363_v51 = vld [vmem:[%s15009_s1 + $0x1f4] sm:$0xf] }
 0x438   : > { %v7530_v45 = vor.u32 %v9363_v51, %v7527_v11 }
 0x439   : > { %15137 = vst [vmem:[#allocation125_spill] sm:$0xff] %v12566_v21  ;;  %v12569_v31 = vadd.f32 %v5817_v32, %v5489_v14 }
 0x43c   : > { %v4990_v18 = vpop.f32.mrf.mxu2 }
 0x43d   : > { %v4991_v12 = vadd.f32 %v4990_v18, %v11894_v19  ;;  %v5319_v7 = vpop.f32.mrf.mxu3  ;;  %v6270_v19 = vld [vmem:[%s15012_s4 + $0x60] sm:$0xff]  ;;  %v7551_v18 = vld [vmem:[%s15009_s1 + $0x238] sm:$0xf0] }
 0x43e   : > { %v5491_v49 = vpop.f32.mrf.mxu0  ;;  %6336 = vperm.xlu2 %9794, %v6270_v19  }
 0x43f   : > { %v12601_v6 = vadd.f32 %v5319_v7, %v4991_v12  ;;  %v5492_v43 = vadd.f32 %v5491_v49, %v11371_v46  ;;  %v5820_v33 = vpop.f32.mrf.mxu1  ;;  %v9560_v7 = vld [vmem:[%s15009_s1 + $0x81c] sm:$0xf] }
 0x441   : > { %15138 = vst [vmem:[#allocation126_spill] sm:$0xff] %v12601_v6  ;;  %v12604_v14 = vadd.f32 %v5820_v33, %v5492_v43  ;;  %5032 = vmatmul.bf16.gmra.mxu2 %v8286_v35  ;;  %5530 = vmatmul.bf16.gmra.mxu0 %v7526_v40  ;;  %v8311_v35 = vld [vmem:[%s15009_s1 + $0x830] sm:$0xf0]  ;;  %v6273_v40 = vld [vmem:[%s15012_s4 + $0x78] sm:$0xff]  ;;  %v8310_v43 = vor.u32 %v9563_v57, %v8309_v24  ;;  %v15157_v6 = vld [vmem:[#allocation109_spill] sm:$0xff] }
 0x442   : > { %5859 = vmatmul.bf16.gmra.mxu1 %v7530_v45  ;;  %5361 = vmatmul.bf16.gmra.mxu3 %v8290_v30 }
 0x444   : > { %v4993_v32 = vpop.f32.mrf.mxu2 }
 0x445   : > { %v4994_v62 = vadd.f32 %v4993_v32, %v11923_v44  ;;  %v5322_v47 = vpop.f32.mrf.mxu3  ;;  %v7549_v44 = vld [vmem:[%s15009_s1 + $0x220] sm:$0xf] }
 0x446   : > { %v5493_v41 = vpop.f32.mrf.mxu0  ;;  %6351 = vperm.xlu2 %9794, %v6273_v40   ;;  %v7550_v33 = vor.u32 %v9372_v22, %v7549_v44  ;;  %v8333_v40 = vld [vmem:[%s15009_s1 + $0x848] sm:$0xf] }
 0x447   : > { %v12610_v26 = vadd.f32 %v5322_v47, %v4994_v62  ;;  %v5494_v46 = vadd.f32 %v5493_v41, %v11403_v52  ;;  %v5822_v51 = vpop.f32.mrf.mxu1  ;;  %v9369_v52 = vld [vmem:[%s15009_s1 + $0x224] sm:$0xf]  ;;  %v8314_v62 = vor.u32 %v9560_v7, %v8311_v35 }
 0x448   : > { %v7554_v32 = vor.u32 %v9369_v52, %v7551_v18 }
 0x449   : > { %15139 = vst [vmem:[#allocation127_spill] sm:$0xff] %v12610_v26  ;;  %v12613_v11 = vadd.f32 %v5822_v51, %v5494_v46 }
 0x44c   : > { %v4995_v49 = vpop.f32.mrf.mxu2 }
 0x44d   : > { %v4996_v45 = vadd.f32 %v4995_v49, %v11930_v63  ;;  %v5324_v30 = vpop.f32.mrf.mxu3  ;;  %v7068_v63 = vld [vmem:[%s15013_s5 + $0x10] sm:$0xff]  ;;  %v9569_v49 = vld [vmem:[%s15009_s1 + $0x85c] sm:$0xf0] }
 0x44e   : > { %v5496_v19 = vpop.f32.mrf.mxu0  ;;  %7094 = vperm.xlu2 %9794, %v7068_v63  }
 0x44f   : > { %v12645_v47 = vadd.f32 %v5324_v30, %v4996_v45  ;;  %v5497_v41 = vadd.f32 %v5496_v19, %v11411_v27  ;;  %v5825_v46 = vpop.f32.mrf.mxu1  ;;  %v15142_v27 = vld [vmem:[#allocation68_spill] sm:$0xff]  ;;  %v9375_v30 = vld [vmem:[%s15009_s1 + $0x254] sm:$0xf]  ;;  %v9566_v19 = vld [vmem:[%s15009_s1 + $0x84c] sm:$0xf] }
 0x450   : > { %v9378_v45 = vld [vmem:[%s15009_s1 + $0x264] sm:$0xf0] }
 0x451   : > { %15140 = vst [vmem:[#allocation128_spill] sm:$0xff] %v12645_v47  ;;  %v12648_v51 = vadd.f32 %v5825_v46, %v5497_v41  ;;  %5037 = vmatmul.bf16.gmra.mxu2 %v8310_v43  ;;  %5535 = vmatmul.bf16.gmra.mxu0 %v7550_v33  ;;  %v7575_v43 = vld [vmem:[%s15009_s1 + $0x268] sm:$0xf0] }
 0x452   : > { %5864 = vmatmul.bf16.gmra.mxu1 %v7554_v32  ;;  %5366 = vmatmul.bf16.gmra.mxu3 %v8314_v62  ;;  %v8335_v32 = vld [vmem:[%s15009_s1 + $0x860] sm:$0xf0]  ;;  %v7071_v62 = vld [vmem:[%s15013_s5 + $0x28] sm:$0xff] }
 0x453   : > { %v15156_v47 = vld [vmem:[#allocation73_spill] sm:$0xff] }
 0x454   : > { %v4998_v24 = vpop.f32.mrf.mxu2 }
 0x455   : > { %v4999_v57 = vadd.f32 %v4998_v24, %v11959_v8  ;;  %v5327_v44 = vpop.f32.mrf.mxu3  ;;  %v7573_v8 = vld [vmem:[%s15009_s1 + $0x250] sm:$0xf]  ;;  %v8334_v24 = vor.u32 %v9569_v49, %v8333_v40 }
 0x456   : > { %v5498_v22 = vpop.f32.mrf.mxu0  ;;  %7109 = vperm.xlu2 %9794, %v7071_v62   ;;  %v15145_v49 = vld [vmem:[#allocation101_spill] sm:$0xff]  ;;  %v8357_v62 = vld [vmem:[%s15009_s1 + $0x878] sm:$0xf] }
 0x457   : > { %v12654_v52 = vadd.f32 %v5327_v44, %v4999_v57  ;;  %v5499_v18 = vadd.f32 %v5498_v22, %v15142_v27  ;;  %v5827_v7 = vpop.f32.mrf.mxu1  ;;  %v7574_v57 = vor.u32 %v9378_v45, %v7573_v8  ;;  %v7578_v22 = vor.u32 %v9375_v30, %v7575_v43 }
 0x458   : > { %v8338_v27 = vor.u32 %v9566_v19, %v8335_v32  ;;  %v15147_v19 = vld [vmem:[#allocation70_spill] sm:$0xff] }
 0x459   : > { %15141 = vst [vmem:[#allocation129_spill] sm:$0xff] %v12654_v52  ;;  %v12657_v35 = vadd.f32 %v5827_v7, %v5499_v18  ;;  %v15144_v7 = vld [vmem:[#allocation69_spill] sm:$0xff] }
 0x45c   : > { %v5000_v41 = vpop.f32.mrf.mxu2 }
 0x45d   : > { %v5001_v46 = vadd.f32 %v5000_v41, %v11964_v0  ;;  %v5329_v63 = vpop.f32.mrf.mxu3  ;;  %v7074_v0 = vld [vmem:[%s15013_s5 + $0x40] sm:$0xff]  ;;  %v9575_v41 = vld [vmem:[%s15009_s1 + $0x88c] sm:$0xf0] }
 0x45e   : > { %v5501_v44 = vpop.f32.mrf.mxu0  ;;  %7124 = vperm.xlu2 %9794, %v7074_v0  }
 0x45f   : > { %v12689_v18 = vadd.f32 %v5329_v63, %v5001_v46  ;;  %v5502_v15 = vadd.f32 %v5501_v44, %v15144_v7  ;;  %v5830_v12 = vpop.f32.mrf.mxu1  ;;  %v7597_v46 = vld [vmem:[%s15009_s1 + $0x280] sm:$0xf]  ;;  %v9384_v63 = vld [vmem:[%s15009_s1 + $0x294] sm:$0xf0] }
 0x460   : > { %v7077_v7 = vld [vmem:[%s15013_s5 + $0x58] sm:$0xff] }
 0x461   : > { %15143 = vst [vmem:[#allocation68_spill] sm:$0xff] %v12689_v18  ;;  %v12692_v33 = vadd.f32 %v5830_v12, %v5502_v15  ;;  %5042 = vmatmul.bf16.gmra.mxu2 %v8334_v24  ;;  %5540 = vmatmul.bf16.gmra.mxu0 %v7574_v57  ;;  %v9381_v24 = vld [vmem:[%s15009_s1 + $0x284] sm:$0xf]  ;;  %v7599_v57 = vld [vmem:[%s15009_s1 + $0x298] sm:$0xf0]  ;;  %v7080_v18 = vld [vmem:[%s15013_s5 + $0x70] sm:$0xff] }
 0x462   : > { %5869 = vmatmul.bf16.gmra.mxu1 %v7578_v22  ;;  %5371 = vmatmul.bf16.gmra.mxu3 %v8338_v27  ;;  %v9572_v22 = vld [vmem:[%s15009_s1 + $0x87c] sm:$0xf]  ;;  %v8359_v27 = vld [vmem:[%s15009_s1 + $0x890] sm:$0xf0] }
 0x464   : > { %v5003_v40 = vpop.f32.mrf.mxu2 }
 0x465   : > { %v5004_v8 = vadd.f32 %v5003_v40, %v15145_v49  ;;  %v5332_v45 = vpop.f32.mrf.mxu3  ;;  %v15148_v40 = vld [vmem:[#allocation103_spill] sm:$0xff] }
 0x466   : > { %v5503_v30 = vpop.f32.mrf.mxu0  ;;  %7139 = vperm.xlu2 %9794, %v7077_v7  }
 0x467   : > { %v12698_v43 = vadd.f32 %v5332_v45, %v5004_v8  ;;  %v5504_v32 = vadd.f32 %v5503_v30, %v15147_v19  ;;  %v5832_v15 = vpop.f32.mrf.mxu1  ;;  %v8358_v45 = vor.u32 %v9575_v41, %v8357_v62  ;;  %v7598_v30 = vor.u32 %v9384_v63, %v7597_v46  ;;  %v15151_v62 = vld [vmem:[#allocation105_spill] sm:$0xff] }
 0x469   : > { %15146 = vst [vmem:[#allocation69_spill] sm:$0xff] %v12698_v43  ;;  %v12701_v12 = vadd.f32 %v5832_v15, %v5504_v32  ;;  %v7602_v32 = vor.u32 %v9381_v24, %v7599_v57  ;;  %v8362_v15 = vor.u32 %v9572_v22, %v8359_v27  ;;  %v15153_v57 = vld [vmem:[#allocation72_spill] sm:$0xff] }
 0x46c   : > { %v5005_v0 = vpop.f32.mrf.mxu2 }
 0x46d   : > { %v5006_v49 = vadd.f32 %v5005_v0, %v15148_v40  ;;  %v5334_v8 = vpop.f32.mrf.mxu3  ;;  %v15150_v0 = vld [vmem:[#allocation71_spill] sm:$0xff] }
 0x46e   : > { %v5506_v19 = vpop.f32.mrf.mxu0  ;;  %7154 = vperm.xlu2 %9794, %v7080_v18   ;;  %v9581_v18 = vld [vmem:[%s15009_s1 + $0x8bc] sm:$0xf0] }
 0x46f   : > { %v12733_v44 = vadd.f32 %v5334_v8, %v5006_v49  ;;  %v5835_v43 = vpop.f32.mrf.mxu1  ;;  %v5507_v40 = vadd.f32 %v5506_v19, %v15150_v0  ;;  %v9390_v19 = vld [vmem:[%s15009_s1 + $0x2c4] sm:$0xf0]  ;;  %v8383_v0 = vld [vmem:[%s15009_s1 + $0x8c0] sm:$0xf0] }
 0x471   : > { %15149 = vst [vmem:[#allocation101_spill] sm:$0xff] %v12733_v44  ;;  %5047 = vmatmul.bf16.gmra.mxu2 %v8358_v45  ;;  %5545 = vmatmul.bf16.gmra.mxu0 %v7598_v30  ;;  %v12743_v49 = vadd.f32 %v5835_v43, %v5507_v40  ;;  %v8381_v45 = vld [vmem:[%s15009_s1 + $0x8a8] sm:$0xf]  ;;  %v7621_v30 = vld [vmem:[%s15009_s1 + $0x2b0] sm:$0xf] }
 0x472   : > { %5874 = vmatmul.bf16.gmra.mxu1 %v7602_v32  ;;  %5376 = vmatmul.bf16.gmra.mxu3 %v8362_v15  ;;  %v9387_v43 = vld [vmem:[%s15009_s1 + $0x2b4] sm:$0xf]  ;;  %v7623_v15 = vld [vmem:[%s15009_s1 + $0x2c8] sm:$0xf0] }
 0x474   : > { %v5008_v7 = vpop.f32.mrf.mxu2 }
 0x475   : > { %v5009_v41 = vadd.f32 %v5008_v7, %v15151_v62  ;;  %v5337_v46 = vpop.f32.mrf.mxu3  ;;  %v9578_v7 = vld [vmem:[%s15009_s1 + $0x8ac] sm:$0xf]  ;;  %v15154_v62 = vld [vmem:[#allocation107_spill] sm:$0xff] }
 0x476   : > { %v5508_v63 = vpop.f32.mrf.mxu0  ;;  %v8386_v32 = vor.u32 %v9578_v7, %v8383_v0  ;;  %v15160_v0 = vld [vmem:[#allocation111_spill] sm:$0xff] }
 0x477   : > { %v12740_v24 = vadd.f32 %v5337_v46, %v5009_v41  ;;  %v5509_v22 = vadd.f32 %v5508_v63, %v15153_v57  ;;  %v5837_v27 = vpop.f32.mrf.mxu1  ;;  %v8382_v63 = vor.u32 %v9581_v18, %v8381_v45  ;;  %v7622_v57 = vor.u32 %v9390_v19, %v7621_v30  ;;  %v15159_v45 = vld [vmem:[#allocation74_spill] sm:$0xff] }
 0x479   : > { %15152 = vst [vmem:[#allocation70_spill] sm:$0xff] %v12740_v24  ;;  %v12745_v8 = vadd.f32 %v5837_v27, %v5509_v22  ;;  %v7626_v27 = vor.u32 %v9387_v43, %v7623_v15  ;;  %v8405_v15 = vld [vmem:[%s15009_s1 + $0x8d8] sm:$0xf] }
 0x47c   : > { %v5010_v40 = vpop.f32.mrf.mxu2 }
 0x47d   : > { %v5011_v41 = vadd.f32 %v5010_v40, %v15154_v62  ;;  %v5339_v46 = vpop.f32.mrf.mxu3 }
 0x47e   : > { %v5511_v22 = vpop.f32.mrf.mxu0 }
 0x47f   : > { %v12774_v24 = vadd.f32 %v5339_v46, %v5011_v41  ;;  %v5840_v44 = vpop.f32.mrf.mxu1  ;;  %v5512_v26 = vadd.f32 %v5511_v22, %v15156_v47  ;;  %v7647_v47 = vld [vmem:[%s15009_s1 + $0x2f8] sm:$0xf0] }
 0x481   : > { %15155 = vst [vmem:[#allocation103_spill] sm:$0xff] %v12774_v24  ;;  %5052 = vmatmul.bf16.gmra.mxu2 %v8382_v63  ;;  %5550 = vmatmul.bf16.gmra.mxu0 %v7622_v57  ;;  %v5841_v19 = vadd.f32 %v5840_v44, %v5512_v26  ;;  %v8407_v44 = vld [vmem:[%s15009_s1 + $0x8f0] sm:$0xf0] }
 0x482   : > { %5879 = vmatmul.bf16.gmra.mxu1 %v7626_v27  ;;  %5381 = vmatmul.bf16.gmra.mxu3 %v8386_v32  ;;  %v9587_v32 = vld [vmem:[%s15009_s1 + $0x8ec] sm:$0xf0] }
 0x483   : > { %v8406_v63 = vor.u32 %v9587_v32, %v8405_v15  ;;  %v15163_v15 = vld [vmem:[#allocation76_spill] sm:$0xff] }
 0x484   : > { %v5013_v52 = vpop.f32.mrf.mxu2 }
 0x485   : > { %v5014_v21 = vadd.f32 %v5013_v52, %v15157_v6  ;;  %v5342_v25 = vpop.f32.mrf.mxu3  ;;  %v7645_v6 = vld [vmem:[%s15009_s1 + $0x2e0] sm:$0xf]  ;;  %v9584_v52 = vld [vmem:[%s15009_s1 + $0x8dc] sm:$0xf] }
 0x486   : > { %v5513_v40 = vpop.f32.mrf.mxu0 }
 0x487   : > { %v12778_v62 = vadd.f32 %v5342_v25, %v5014_v21  ;;  %v5514_v18 = vadd.f32 %v5513_v40, %v15159_v45  ;;  %v5842_v30 = vpop.f32.mrf.mxu1  ;;  %v9396_v25 = vld [vmem:[%s15009_s1 + $0x2f4] sm:$0xf0]  ;;  %v9393_v21 = vld [vmem:[%s15009_s1 + $0x2e4] sm:$0xf]  ;;  %v8410_v40 = vor.u32 %v9584_v52, %v8407_v44  ;;  %v9593_v52 = vld [vmem:[%s15009_s1 + $0x91c] sm:$0xf0] }
 0x488   : > { %v7646_v57 = vor.u32 %v9396_v25, %v7645_v6  ;;  %v7650_v27 = vor.u32 %v9393_v21, %v7647_v47  ;;  %v8429_v47 = vld [vmem:[%s15009_s1 + $0x908] sm:$0xf]  ;;  %v9590_v44 = vld [vmem:[%s15009_s1 + $0x90c] sm:$0xf] }
 0x489   : > { %15158 = vst [vmem:[#allocation71_spill] sm:$0xff] %v12778_v62  ;;  %v5843_v43 = vadd.f32 %v5842_v30, %v5514_v18  ;;  %v15162_v62 = vld [vmem:[#allocation113_spill] sm:$0xff] }
 0x48b   : > { %v6200_v26 = vpack.c.bf16 %v5843_v43, %v5841_v19  ;;  %v15161_v19 = vld [vmem:[#allocation75_spill] sm:$0xff] }
 0x48c   : > { %v5015_v7 = vpop.f32.mrf.mxu2 }
 0x48d   : > { %v5016_v41 = vadd.f32 %v5015_v7, %v15160_v0  ;;  %v5344_v46 = vpop.f32.mrf.mxu3 }
 0x48e   : > { %v5516_v22 = vpop.f32.mrf.mxu0 }
 0x48f   : > { %v12806_v45 = vadd.f32 %v5344_v46, %v5016_v41  ;;  %v5845_v18 = vpop.f32.mrf.mxu1  ;;  %v5517_v43 = vadd.f32 %v5516_v22, %v15161_v19  ;;  %v8431_v41 = vld [vmem:[%s15009_s1 + $0x920] sm:$0xf0]  ;;  %v15164_v22 = vld [vmem:[#allocation115_spill] sm:$0xff] }
 0x491   : > { %5057 = vmatmul.bf16.gmra.mxu2 %v8406_v63  ;;  %5555 = vmatmul.bf16.gmra.mxu0 %v7646_v57  ;;  %v5846_v25 = vadd.f32 %v5845_v18, %v5517_v43  ;;  %v9399_v63 = vld [vmem:[%s15009_s1 + $0x314] sm:$0xf]  ;;  %v7671_v57 = vld [vmem:[%s15009_s1 + $0x328] sm:$0xf0]  ;;  %v8430_v18 = vor.u32 %v9593_v52, %v8429_v47  ;;  %v8434_v43 = vor.u32 %v9590_v44, %v8431_v41 }
 0x492   : > { %5884 = vmatmul.bf16.gmra.mxu1 %v7650_v27  ;;  %5386 = vmatmul.bf16.gmra.mxu3 %v8410_v40  ;;  %v15167_v52 = vpack.c.bf16 %v12745_v8, %v12743_v49  ;;  %v15168_v44 = vld [vmem:[#allocation78_spill] sm:$0xff]  ;;  %v7693_v8 = vld [vmem:[%s15009_s1 + $0x340] sm:$0xf] }
 0x493   : > { %v9599_v49 = vld [vmem:[%s15009_s1 + $0x94c] sm:$0xf0] }
 0x494   : > { %v5018_v30 = vpop.f32.mrf.mxu2 }
 0x495   : > { %v5019_v24 = vadd.f32 %v5018_v30, %v15162_v62  ;;  %v5347_v58 = vpop.f32.mrf.mxu3  ;;  %v7669_v62 = vld [vmem:[%s15009_s1 + $0x310] sm:$0xf] }
 0x496   : > { %v5518_v7 = vpop.f32.mrf.mxu0 }
 0x497   : > { %v12810_v0 = vadd.f32 %v5347_v58, %v5019_v24  ;;  %v5519_v32 = vadd.f32 %v5518_v7, %v15163_v15  ;;  %v5847_v6 = vpop.f32.mrf.mxu1  ;;  %v9402_v58 = vld [vmem:[%s15009_s1 + $0x324] sm:$0xf0] }
 0x498   : > { %v7670_v30 = vor.u32 %v9402_v58, %v7669_v62  ;;  %v15165_v15 = vld [vmem:[#allocation77_spill] sm:$0xff] }
 0x499   : > { %v5848_v21 = vadd.f32 %v5847_v6, %v5519_v32 }
 0x49b   : > { %v6201_v24 = vpack.c.bf16 %v5848_v21, %v5846_v25  ;;  %v7674_v25 = vor.u32 %v9399_v63, %v7671_v57 }
 0x49c   : > { %v5020_v46 = vpop.f32.mrf.mxu2 }
 0x49d   : > { %v5021_v27 = vadd.f32 %v5020_v46, %v15164_v22  ;;  %6674 = vmatpush.bf16.msra.mxu2 %v6201_v24  ;;  %v5349_v40 = vpop.f32.mrf.mxu3  ;;  %v15166_v24 = vld [vmem:[#allocation117_spill] sm:$0xff] }
 0x49e   : > { %v5521_v19 = vpop.f32.mrf.mxu0 }
 0x49f   : > { %v12838_v7 = vadd.f32 %v5349_v40, %v5021_v27  ;;  %v5522_v32 = vadd.f32 %v5521_v19, %v15165_v15  ;;  %v5850_v6 = vpop.f32.mrf.mxu1  ;;  %v15169_v27 = vpack.c.bf16 %v12701_v12, %v12692_v33  ;;  %v9408_v40 = vld [vmem:[%s15009_s1 + $0x354] sm:$0xf0]  ;;  %v9596_v33 = vld [vmem:[%s15009_s1 + $0x93c] sm:$0xf]  ;;  %v8455_v12 = vld [vmem:[%s15009_s1 + $0x950] sm:$0xf0] }
 0x4a0   : > { %v9405_v19 = vld [vmem:[%s15009_s1 + $0x344] sm:$0xf]  ;;  %v15170_v15 = vld [vmem:[#allocation119_spill] sm:$0xff] }
 0x4a1   : > { %v12841_v21 = vadd.f32 %v5850_v6, %v5522_v32  ;;  %5062 = vmatmul.bf16.gmra.mxu2 %v8430_v18  ;;  %5560 = vmatmul.bf16.gmra.mxu0 %v7670_v30 }
 0x4a2   : > { %6675 = vmatpush.bf16.msra.mxu2 %v6200_v26  ;;  %5391 = vmatmul.bf16.gmra.mxu3 %v8434_v43  ;;  %v8453_v26 = vld [vmem:[%s15009_s1 + $0x938] sm:$0xf]  ;;  %v7695_v43 = vld [vmem:[%s15009_s1 + $0x358] sm:$0xf0] }
 0x4a3   : > { %5889 = vmatmul.bf16.gmra.mxu1 %v7674_v25  ;;  %v8454_v25 = vor.u32 %v9599_v49, %v8453_v26  ;;  %v15173_v26 = vpack.c.bf16 %v12613_v11, %v12604_v14  ;;  %v8477_v14 = vld [vmem:[%s15009_s1 + $0x968] sm:$0xf] }
 0x4a4   : > { %v5023_v46 = vpop.f32.mrf.mxu2  ;;  %v9414_v11 = vld [vmem:[%s15009_s1 + $0x384] sm:$0xf0] }
 0x4a5   : > { %v5024_v22 = vadd.f32 %v5023_v46, %v15166_v24  ;;  %v5352_v47 = vpop.f32.mrf.mxu3  ;;  %v7694_v46 = vor.u32 %v9408_v40, %v7693_v8  ;;  %v15171_v24 = vpack.c.bf16 %v12657_v35, %v12648_v51  ;;  %v15174_v8 = vpack.c.bf16 %v12569_v31, %v12560_v28  ;;  %v9605_v28 = vld [vmem:[%s15009_s1 + $0x97c] sm:$0xf0]  ;;  %v7717_v31 = vld [vmem:[%s15009_s1 + $0x370] sm:$0xf] }
 0x4a6   : > { %6676 = vmatpush.bf16.msra.mxu2 %v15167_v52  ;;  %v5523_v62 = vpop.f32.mrf.mxu0 }
 0x4a7   : > { %v12847_v58 = vadd.f32 %v5352_v47, %v5024_v22  ;;  %v5524_v41 = vadd.f32 %v5523_v62, %v15168_v44  ;;  %v5852_v63 = vpop.f32.mrf.mxu1  ;;  %v8458_v47 = vor.u32 %v9596_v33, %v8455_v12  ;;  %v15172_v62 = vld [vmem:[#allocation79_spill] sm:$0xff]  ;;  %v15176_v12 = vld [vmem:[#allocation80_spill] sm:$0xff] }
 0x4a9   : > { %v12850_v57 = vadd.f32 %v5852_v63, %v5524_v41  ;;  %v7698_v63 = vor.u32 %v9405_v19, %v7695_v43 }
 0x4aa   : > { %6677 = vmatpush.bf16.msra.mxu2 %v15169_v27 }
 0x4ac   : > { %v5025_v30 = vpop.f32.mrf.mxu2 }
 0x4ad   : > { %v5026_v32 = vadd.f32 %v5025_v30, %v15170_v15  ;;  %v5354_v6 = vpop.f32.mrf.mxu3  ;;  %v15191_v15 = vld [vmem:[#allocation87_spill] sm:$0xff] }
 0x4ae   : > { %6678 = vmatpush.bf16.msra.mxu2 %v15171_v24  ;;  %v5526_v22 = vpop.f32.mrf.mxu0 }
 0x4af   : > { %v12885_v52 = vadd.f32 %v5354_v6, %v5026_v32  ;;  %v5527_v44 = vadd.f32 %v5526_v22, %v15172_v62  ;;  %v5855_v41 = vpop.f32.mrf.mxu1  ;;  %v9411_v6 = vld [vmem:[%s15009_s1 + $0x374] sm:$0xf]  ;;  %v8478_v22 = vor.u32 %v9605_v28, %v8477_v14 }
 0x4b1   : > { %v12888_v27 = vadd.f32 %v5855_v41, %v5527_v44  ;;  %5067 = vmatmul.bf16.gmra.mxu2 %v8454_v25  ;;  %5565 = vmatmul.bf16.gmra.mxu0 %v7694_v46  ;;  %v7719_v25 = vld [vmem:[%s15009_s1 + $0x388] sm:$0xf0] }
 0x4b2   : > { %6679 = vmatpush.bf16.msra.mxu2 %v15173_v26  ;;  %5396 = vmatmul.bf16.gmra.mxu3 %v8458_v47  ;;  %v7718_v47 = vor.u32 %v9414_v11, %v7717_v31  ;;  %v8501_v31 = vld [vmem:[%s15009_s1 + $0x998] sm:$0xf]  ;;  %v9611_v11 = vld [vmem:[%s15009_s1 + $0x9ac] sm:$0xf0] }
 0x4b3   : > { %5894 = vmatmul.bf16.gmra.mxu1 %v7698_v63  ;;  %v15179_v63 = vld [vmem:[#allocation81_spill] sm:$0xff] }
 0x4b4   : > { %v5028_v51 = vpop.f32.mrf.mxu2 }
 0x4b5   : > { %v5029_v35 = vadd.f32 %v5028_v51, %v12203_v16  ;;  %v5357_v49 = vpop.f32.mrf.mxu3  ;;  %v15177_v16 = vpack.c.bf16 %v12528_v54, %v12507_v39  ;;  %v9602_v39 = vld [vmem:[%s15009_s1 + $0x96c] sm:$0xf]  ;;  %v8479_v54 = vld [vmem:[%s15009_s1 + $0x980] sm:$0xf0] }
 0x4b6   : > { %6680 = vmatpush.bf16.msra.mxu2 %v15174_v8  ;;  %v5528_v40 = vpop.f32.mrf.mxu0  ;;  %v8482_v44 = vor.u32 %v9602_v39, %v8479_v54  ;;  %v9420_v39 = vld [vmem:[%s15009_s1 + $0x3b4] sm:$0xf0] }
 0x4b7   : > { %v12897_v33 = vadd.f32 %v5357_v49, %v5029_v35  ;;  %v5529_v30 = vadd.f32 %v5528_v40, %v15176_v12  ;;  %v5857_v19 = vpop.f32.mrf.mxu1  ;;  %v7722_v35 = vor.u32 %v9411_v6, %v7719_v25  ;;  %v8503_v6 = vld [vmem:[%s15009_s1 + $0x9b0] sm:$0xf0] }
 0x4b9   : > { %15175 = vst [vmem:[#allocation105_spill] sm:$0xff] %v12897_v33  ;;  %v12900_v43 = vadd.f32 %v5857_v19, %v5529_v30  ;;  %v15181_v19 = vld [vmem:[#allocation82_spill] sm:$0xff] }
 0x4ba   : > { %6681 = vmatpush.bf16.msra.mxu2 %v15177_v16 }
 0x4bc   : > { %v5030_v32 = vpop.f32.mrf.mxu2 }
 0x4bd   : > { %v5031_v46 = vadd.f32 %v5030_v32, %v12208_v4  ;;  %v5359_v24 = vpop.f32.mrf.mxu3  ;;  %v9608_v32 = vld [vmem:[%s15009_s1 + $0x99c] sm:$0xf] }
 0x4be   : > { %v5531_v62 = vpop.f32.mrf.mxu0 }
 0x4bf   : > { %v12932_v41 = vadd.f32 %v5359_v24, %v5031_v46  ;;  %v5532_v26 = vadd.f32 %v5531_v62, %v15179_v63  ;;  %v5860_v51 = vpop.f32.mrf.mxu1  ;;  %v9417_v46 = vld [vmem:[%s15009_s1 + $0x3a4] sm:$0xf]  ;;  %v7743_v24 = vld [vmem:[%s15009_s1 + $0x3b8] sm:$0xf0]  ;;  %v8502_v62 = vor.u32 %v9611_v11, %v8501_v31 }
 0x4c0   : > { %v15185_v11 = vld [vmem:[#allocation84_spill] sm:$0xff] }
 0x4c1   : > { %15178 = vst [vmem:[#allocation72_spill] sm:$0xff] %v12932_v41  ;;  %v12935_v49 = vadd.f32 %v5860_v51, %v5532_v26  ;;  %5072 = vmatmul.bf16.gmra.mxu2 %v8478_v22  ;;  %5570 = vmatmul.bf16.gmra.mxu0 %v7718_v47  ;;  %v8506_v26 = vor.u32 %v9608_v32, %v8503_v6  ;;  %v8525_v6 = vld [vmem:[%s15009_s1 + $0x9c8] sm:$0xf] }
 0x4c2   : > { %5401 = vmatmul.bf16.gmra.mxu3 %v8482_v44 }
 0x4c3   : > { %5899 = vmatmul.bf16.gmra.mxu1 %v7722_v35  ;;  %v15183_v35 = vld [vmem:[#allocation83_spill] sm:$0xff] }
 0x4c4   : > { %v5033_v8 = vpop.f32.mrf.mxu2 }
 0x4c5   : > { %v5034_v4 = vadd.f32 %v5033_v8, %v12237_v2  ;;  %v5362_v40 = vpop.f32.mrf.mxu3  ;;  %v7741_v2 = vld [vmem:[%s15009_s1 + $0x3a0] sm:$0xf] }
 0x4c6   : > { %v5533_v12 = vpop.f32.mrf.mxu0  ;;  %v7742_v44 = vor.u32 %v9420_v39, %v7741_v2 }
 0x4c7   : > { %v12938_v30 = vadd.f32 %v5362_v40, %v5034_v4  ;;  %v5534_v14 = vadd.f32 %v5533_v12, %v15181_v19  ;;  %v5862_v16 = vpop.f32.mrf.mxu1  ;;  %v7746_v40 = vor.u32 %v9417_v46, %v7743_v24  ;;  %v9426_v46 = vld [vmem:[%s15009_s1 + $0x3e4] sm:$0xf0] }
 0x4c9   : > { %15180 = vst [vmem:[#allocation107_spill] sm:$0xff] %v12938_v30  ;;  %v12941_v28 = vadd.f32 %v5862_v16, %v5534_v14 }
 0x4cc   : > { %v5035_v25 = vpop.f32.mrf.mxu2 }
 0x4cd   : > { %v5036_v22 = vadd.f32 %v5035_v25, %v12243_v61  ;;  %v5364_v47 = vpop.f32.mrf.mxu3  ;;  %v9617_v25 = vld [vmem:[%s15009_s1 + $0x9dc] sm:$0xf0] }
 0x4ce   : > { %v5536_v63 = vpop.f32.mrf.mxu0 }
 0x4cf   : > { %v12970_v51 = vadd.f32 %v5364_v47, %v5036_v22  ;;  %v5537_v8 = vadd.f32 %v5536_v63, %v15183_v35  ;;  %v5865_v4 = vpop.f32.mrf.mxu1  ;;  %v9614_v22 = vld [vmem:[%s15009_s1 + $0x9cc] sm:$0xf]  ;;  %v8527_v47 = vld [vmem:[%s15009_s1 + $0x9e0] sm:$0xf0] }
 0x4d0   : > { %v7767_v63 = vld [vmem:[%s15009_s1 + $0x3e8] sm:$0xf0] }
 0x4d1   : > { %15182 = vst [vmem:[#allocation73_spill] sm:$0xff] %v12970_v51  ;;  %v12973_v12 = vadd.f32 %v5865_v4, %v5537_v8  ;;  %5077 = vmatmul.bf16.gmra.mxu2 %v8502_v62  ;;  %5575 = vmatmul.bf16.gmra.mxu0 %v7742_v44  ;;  %v9423_v44 = vld [vmem:[%s15009_s1 + $0x3d4] sm:$0xf]  ;;  %v8526_v8 = vor.u32 %v9617_v25, %v8525_v6 }
 0x4d2   : > { %5406 = vmatmul.bf16.gmra.mxu3 %v8506_v26 }
 0x4d3   : > { %5904 = vmatmul.bf16.gmra.mxu1 %v7746_v40 }
 0x4d4   : > { %v5038_v19 = vpop.f32.mrf.mxu2 }
 0x4d5   : > { %v5039_v61 = vadd.f32 %v5038_v19, %v12273_v5  ;;  %v5367_v14 = vpop.f32.mrf.mxu3  ;;  %v7765_v5 = vld [vmem:[%s15009_s1 + $0x3d0] sm:$0xf]  ;;  %v8530_v19 = vor.u32 %v9614_v22, %v8527_v47 }
 0x4d6   : > { %v5538_v16 = vpop.f32.mrf.mxu0  ;;  %v7766_v4 = vor.u32 %v9426_v46, %v7765_v5  ;;  %v15189_v5 = vld [vmem:[#allocation86_spill] sm:$0xff] }
 0x4d7   : > { %v12976_v31 = vadd.f32 %v5367_v14, %v5039_v61  ;;  %v5539_v2 = vadd.f32 %v5538_v16, %v15185_v11  ;;  %v5867_v39 = vpop.f32.mrf.mxu1  ;;  %v15187_v14 = vld [vmem:[#allocation85_spill] sm:$0xff] }
 0x4d9   : > { %15184 = vst [vmem:[#allocation109_spill] sm:$0xff] %v12976_v31  ;;  %v12979_v32 = vadd.f32 %v5867_v39, %v5539_v2  ;;  %v7770_v2 = vor.u32 %v9423_v44, %v7767_v63  ;;  %v8549_v44 = vld [vmem:[%s15009_s1 + $0x9f8] sm:$0xf]  ;;  %v9623_v63 = vld [vmem:[%s15009_s1 + $0xa0c] sm:$0xf0] }
 0x4dc   : > { %v5040_v62 = vpop.f32.mrf.mxu2 }
 0x4dd   : > { %v5041_v26 = vadd.f32 %v5040_v62, %v12282_v13  ;;  %v5369_v35 = vpop.f32.mrf.mxu3 }
 0x4de   : > { %v5541_v40 = vpop.f32.mrf.mxu0 }
 0x4df   : > { %v13008_v61 = vadd.f32 %v5369_v35, %v5041_v26  ;;  %v5542_v16 = vadd.f32 %v5541_v40, %v15187_v14  ;;  %v5870_v11 = vpop.f32.mrf.mxu1  ;;  %v9620_v35 = vld [vmem:[%s15009_s1 + $0x9fc] sm:$0xf]  ;;  %v9429_v40 = vld [vmem:[%s15009_s1 + $0x404] sm:$0xf] }
 0x4e1   : > { %15186 = vst [vmem:[#allocation74_spill] sm:$0xff] %v13008_v61  ;;  %v13011_v39 = vadd.f32 %v5870_v11, %v5542_v16  ;;  %5082 = vmatmul.bf16.gmra.mxu2 %v8526_v8  ;;  %5580 = vmatmul.bf16.gmra.mxu0 %v7766_v4  ;;  %v8551_v8 = vld [vmem:[%s15009_s1 + $0xa10] sm:$0xf0]  ;;  %v8550_v11 = vor.u32 %v9623_v63, %v8549_v44  ;;  %v15193_v44 = vld [vmem:[#allocation88_spill] sm:$0xff] }
 0x4e2   : > { %5411 = vmatmul.bf16.gmra.mxu3 %v8530_v19  ;;  %v7791_v19 = vld [vmem:[%s15009_s1 + $0x418] sm:$0xf0] }
 0x4e3   : > { %5909 = vmatmul.bf16.gmra.mxu1 %v7770_v2 }
 0x4e4   : > { %v5043_v18 = vpop.f32.mrf.mxu2 }
 0x4e5   : > { %v5044_v13 = vadd.f32 %v5043_v18, %v12315_v36  ;;  %v5372_v62 = vpop.f32.mrf.mxu3  ;;  %v7789_v36 = vld [vmem:[%s15009_s1 + $0x400] sm:$0xf]  ;;  %v9432_v18 = vld [vmem:[%s15009_s1 + $0x414] sm:$0xf0] }
 0x4e6   : > { %v5543_v6 = vpop.f32.mrf.mxu0  ;;  %v7790_v2 = vor.u32 %v9432_v18, %v7789_v36 }
 0x4e7   : > { %v13014_v25 = vadd.f32 %v5372_v62, %v5044_v13  ;;  %v5544_v46 = vadd.f32 %v5543_v6, %v15189_v5  ;;  %v5872_v22 = vpop.f32.mrf.mxu1  ;;  %v8554_v62 = vor.u32 %v9620_v35, %v8551_v8  ;;  %v8573_v8 = vld [vmem:[%s15009_s1 + $0xa28] sm:$0xf] }
 0x4e9   : > { %15188 = vst [vmem:[#allocation111_spill] sm:$0xff] %v13014_v25  ;;  %v13017_v47 = vadd.f32 %v5872_v22, %v5544_v46  ;;  %v7794_v46 = vor.u32 %v9429_v40, %v7791_v19  ;;  %v8575_v40 = vld [vmem:[%s15009_s1 + $0xa40] sm:$0xf0] }
 0x4ec   : > { %v5045_v4 = vpop.f32.mrf.mxu2 }
 0x4ed   : > { %v5046_v14 = vadd.f32 %v5045_v4, %v12330_v48  ;;  %v5374_v16 = vpop.f32.mrf.mxu3 }
 0x4ee   : > { %v5546_v13 = vpop.f32.mrf.mxu0 }
 0x4ef   : > { %v13046_v6 = vadd.f32 %v5374_v16, %v5046_v14  ;;  %v5875_v5 = vpop.f32.mrf.mxu1  ;;  %v5547_v54 = vadd.f32 %v5546_v13, %v15191_v15  ;;  %v9629_v15 = vld [vmem:[%s15009_s1 + $0xa3c] sm:$0xf0]  ;;  %v9435_v14 = vld [vmem:[%s15009_s1 + $0x434] sm:$0xf]  ;;  %v7815_v16 = vld [vmem:[%s15009_s1 + $0x448] sm:$0xf0] }
 0x4f0   : > { %v8574_v13 = vor.u32 %v9629_v15, %v8573_v8 }
 0x4f1   : > { %15190 = vst [vmem:[#allocation75_spill] sm:$0xff] %v13046_v6  ;;  %5087 = vmatmul.bf16.gmra.mxu2 %v8550_v11  ;;  %5585 = vmatmul.bf16.gmra.mxu0 %v7790_v2  ;;  %v13053_v18 = vadd.f32 %v5875_v5, %v5547_v54  ;;  %v15195_v54 = vld [vmem:[#allocation89_spill] sm:$0xff] }
 0x4f2   : > { %5416 = vmatmul.bf16.gmra.mxu3 %v8554_v62 }
 0x4f3   : > { %5914 = vmatmul.bf16.gmra.mxu1 %v7794_v46 }
 0x4f4   : > { %v5048_v22 = vpop.f32.mrf.mxu2 }
 0x4f5   : > { %v5049_v24 = vadd.f32 %v5048_v22, %v12363_v10  ;;  %v5377_v26 = vpop.f32.mrf.mxu3  ;;  %v7813_v10 = vld [vmem:[%s15009_s1 + $0x430] sm:$0xf] }
 0x4f6   : > { %v5548_v48 = vpop.f32.mrf.mxu0 }
 0x4f7   : > { %v13050_v4 = vadd.f32 %v5377_v26, %v5049_v24  ;;  %v5549_v63 = vadd.f32 %v5548_v48, %v15193_v44  ;;  %v5877_v36 = vpop.f32.mrf.mxu1  ;;  %v9438_v24 = vld [vmem:[%s15009_s1 + $0x444] sm:$0xf0]  ;;  %v9626_v26 = vld [vmem:[%s15009_s1 + $0xa2c] sm:$0xf]  ;;  %v7818_v44 = vor.u32 %v9435_v14, %v7815_v16  ;;  %v8597_v16 = vld [vmem:[%s15009_s1 + $0xa58] sm:$0xf] }
 0x4f8   : > { %v7814_v62 = vor.u32 %v9438_v24, %v7813_v10  ;;  %v8578_v46 = vor.u32 %v9626_v26, %v8575_v40  ;;  %v15197_v10 = vld [vmem:[#allocation90_spill] sm:$0xff] }
 0x4f9   : > { %15192 = vst [vmem:[#allocation113_spill] sm:$0xff] %v13050_v4  ;;  %v13055_v35 = vadd.f32 %v5877_v36, %v5549_v63  ;;  %v13086_v36 = vpop.permute.xlu1 %1795 }
 0x4fc   : > { %v5050_v19 = vpop.f32.mrf.mxu2 }
 0x4fd   : > { %v5051_v11 = vadd.f32 %v5050_v19, %v12378_v42  ;;  %v5379_v2 = vpop.f32.mrf.mxu3 }
 0x4fe   : > { %v5551_v5 = vpop.f32.mrf.mxu0 }
 0x4ff   : > { %v13084_v22 = vadd.f32 %v5379_v2, %v5051_v11  ;;  %v5880_v48 = vpop.f32.mrf.mxu1  ;;  %v5552_v4 = vadd.f32 %v5551_v5, %v15195_v54  ;;  %v9635_v54 = vld [vmem:[%s15009_s1 + $0xa6c] sm:$0xf0]  ;;  %v9444_v11 = vld [vmem:[%s15009_s1 + $0x474] sm:$0xf0]  ;;  %v9632_v2 = vld [vmem:[%s15009_s1 + $0xa5c] sm:$0xf] }
 0x500   : > { %v9441_v5 = vld [vmem:[%s15009_s1 + $0x464] sm:$0xf] }
 0x501   : > { %15194 = vst [vmem:[#allocation76_spill] sm:$0xff] %v13084_v22  ;;  %5092 = vmatmul.bf16.gmra.mxu2 %v8574_v13  ;;  %5590 = vmatmul.bf16.gmra.mxu0 %v7814_v62  ;;  %v13093_v40 = vadd.f32 %v5880_v48, %v5552_v4  ;;  %v8599_v13 = vld [vmem:[%s15009_s1 + $0xa70] sm:$0xf0]  ;;  %v15199_v22 = vld [vmem:[#allocation91_spill] sm:$0xff] }
 0x502   : > { %5421 = vmatmul.bf16.gmra.mxu3 %v8578_v46  ;;  %v7839_v46 = vld [vmem:[%s15009_s1 + $0x478] sm:$0xf0] }
 0x503   : > { %5919 = vmatmul.bf16.gmra.mxu1 %v7818_v44 }
 0x504   : > { %v5053_v63 = vpop.f32.mrf.mxu2 }
 0x505   : > { %v5054_v42 = vadd.f32 %v5053_v63, %v12411_v55  ;;  %v5382_v19 = vpop.f32.mrf.mxu3  ;;  %v7837_v55 = vld [vmem:[%s15009_s1 + $0x460] sm:$0xf]  ;;  %v8598_v63 = vor.u32 %v9635_v54, %v8597_v16 }
 0x506   : > { %v5553_v8 = vpop.f32.mrf.mxu0 }
 0x507   : > { %v13090_v15 = vadd.f32 %v5382_v19, %v5054_v42  ;;  %v5554_v24 = vadd.f32 %v5553_v8, %v15197_v10  ;;  %v5882_v26 = vpop.f32.mrf.mxu1  ;;  %v7838_v42 = vor.u32 %v9444_v11, %v7837_v55  ;;  %v13124_v19 = vpop.permute.xlu2 %1800  ;;  %v8602_v10 = vor.u32 %v9632_v2, %v8599_v13  ;;  %v15201_v2 = vld [vmem:[#allocation92_spill] sm:$0xff] }
 0x509   : > { %15196 = vst [vmem:[#allocation115_spill] sm:$0xff] %v13090_v15  ;;  %v13095_v14 = vadd.f32 %v5882_v26, %v5554_v24  ;;  %v13126_v24 = vpop.permute.xlu1 %1810 }
 0x50b   : > { %v6208_v4 = vpack.c.bf16 %v13095_v14, %v13093_v40  ;;  %v7842_v14 = vor.u32 %v9441_v5, %v7839_v46 }
 0x50c   : > { %v5055_v62 = vpop.f32.mrf.mxu2 }
 0x50d   : > { %v5056_v48 = vadd.f32 %v5055_v62, %v12426_v34  ;;  %v5384_v44 = vpop.f32.mrf.mxu3 }
 0x50e   : > { %v5556_v8 = vpop.f32.mrf.mxu0 }
 0x50f   : > { %v13128_v26 = vadd.f32 %v5384_v44, %v5056_v48  ;;  %v5885_v40 = vpop.f32.mrf.mxu1  ;;  %v5557_v34 = vadd.f32 %v5556_v8, %v15199_v22  ;;  %v13135_v48 = vpop.permute.xlu2 %1815  ;;  %v7861_v22 = vld [vmem:[%s15009_s1 + $0x490] sm:$0xf] }
 0x511   : > { %15198 = vst [vmem:[#allocation77_spill] sm:$0xff] %v13128_v26  ;;  %5097 = vmatmul.bf16.gmra.mxu2 %v8598_v63  ;;  %5595 = vmatmul.bf16.gmra.mxu0 %v7838_v42  ;;  %v13137_v44 = vpop.permute.xlu1 %1865  ;;  %v5886_v5 = vadd.f32 %v5885_v40, %v5557_v34  ;;  %v8621_v63 = vld [vmem:[%s15009_s1 + $0xa88] sm:$0xf]  ;;  %v1791_v42 = vpop.permute.xlu0 %1790  ;;  %v8623_v34 = vld [vmem:[%s15009_s1 + $0xaa0] sm:$0xf0] }
 0x512   : > { %5426 = vmatmul.bf16.gmra.mxu3 %v8602_v10  ;;  %v9447_v10 = vld [vmem:[%s15009_s1 + $0x494] sm:$0xf]  ;;  %v15204_v26 = vld [vmem:[#allocation93_spill] sm:$0xff] }
 0x513   : > { %5924 = vmatmul.bf16.gmra.mxu1 %v7842_v14  ;;  %v9638_v14 = vld [vmem:[%s15009_s1 + $0xa8c] sm:$0xf] }
 0x514   : > { %v5058_v15 = vpop.f32.mrf.mxu2  ;;  %v8626_v25 = vor.u32 %v9638_v14, %v8623_v34  ;;  %v15210_v34 = vpack.c.bf16 %v13017_v47, %v13011_v39  ;;  %v9453_v39 = vld [vmem:[%s15009_s1 + $0x4c4] sm:$0xf] }
 0x515   : > { %v5059_v16 = vadd.f32 %v5058_v15, %v12459_v23  ;;  %v5387_v54 = vpop.f32.mrf.mxu3  ;;  %v9641_v23 = vld [vmem:[%s15009_s1 + $0xa9c] sm:$0xf0]  ;;  %v9450_v15 = vld [vmem:[%s15009_s1 + $0x4a4] sm:$0xf0] }
 0x516   : > { %v5558_v55 = vpop.f32.mrf.mxu0 }
 0x517   : > { %v13132_v11 = vadd.f32 %v5387_v54, %v5059_v16  ;;  %v5559_v13 = vadd.f32 %v5558_v55, %v15201_v2  ;;  %v5887_v62 = vpop.f32.mrf.mxu1  ;;  %v7863_v16 = vld [vmem:[%s15009_s1 + $0x4a8] sm:$0xf0]  ;;  %v8622_v2 = vor.u32 %v9641_v23, %v8621_v63  ;;  %v13170_v30 = vpop.permute.xlu2 %1940 }
 0x518   : > { %v7866_v61 = vor.u32 %v9447_v10, %v7863_v16  ;;  %v15205_v63 = vld [vmem:[#allocation5_spill] sm:$0xff]  ;;  %v15211_v16 = vld [vmem:[#allocation7_spill] sm:$0xff] }
 0x519   : > { %15200 = vst [vmem:[#allocation117_spill] sm:$0xff] %v13132_v11  ;;  %v5888_v46 = vadd.f32 %v5887_v62, %v5559_v13  ;;  %v7862_v13 = vor.u32 %v9450_v15, %v7861_v22  ;;  %v15202_v62 = vld [vmem:[#allocation4_spill] sm:$0xff] }
 0x51b   : > { %v6209_v8 = vpack.c.bf16 %v5888_v46, %v5886_v5  ;;  %v4406_v5 = vadd.f32 %v15202_v62, %v1791_v42  ;;  %v9644_v62 = vld [vmem:[%s15009_s1 + $0xabc] sm:$0xf] }
 0x51c   : > { %v5060_v40 = vpop.f32.mrf.mxu2 }
 0x51d   : > { %v5061_v54 = vadd.f32 %v5060_v40, %v12474_v3  ;;  %6723 = vmatpush.bf16.msra.mxu3 %v6209_v8  ;;  %v5389_v55 = vpop.f32.mrf.mxu3  ;;  %v13172_v3 = vpop.permute.xlu1 %1850  ;;  %v4735_v23 = vadd.f32 %v15205_v63, %v4406_v5  ;;  %v8647_v5 = vld [vmem:[%s15009_s1 + $0xad0] sm:$0xf0] }
 0x51e   : > { %v5561_v46 = vpop.f32.mrf.mxu0 }
 0x51f   : > { %v13165_v11 = vadd.f32 %v5389_v55, %v5061_v54  ;;  %v5562_v6 = vadd.f32 %v5561_v46, %v15204_v26  ;;  %v15206_v26 = vpack.c.bf16 %v13055_v35, %v13053_v18  ;;  %v9647_v18 = vld [vmem:[%s15009_s1 + $0xacc] sm:$0xf0]  ;;  %v7885_v35 = vld [vmem:[%s15009_s1 + $0x4c0] sm:$0xf]  ;;  %v1806_v55 = vpop.permute.xlu0 %1805  ;;  %v13206_v47 = vpop.permute.xlu2 %1855  ;;  %v7887_v46 = vld [vmem:[%s15009_s1 + $0x4d8] sm:$0xf0] }
 0x520   : > { %v5890_v31 = vpop.f32.mrf.mxu1 }
 0x521   : > { %15203 = vst [vmem:[#allocation78_spill] sm:$0xff] %v13165_v11  ;;  %v13168_v51 = vadd.f32 %v5890_v31, %v5562_v6  ;;  %5102 = vmatmul.bf16.gmra.mxu2 %v8622_v2  ;;  %5600 = vmatmul.bf16.gmra.mxu0 %v7862_v13  ;;  %v15207_v6 = vld [vmem:[#allocation6_spill] sm:$0xff] }
 0x522   : > { %6724 = vmatpush.bf16.msra.mxu3 %v6208_v4  ;;  %v4408_v8 = vadd.f32 %v15207_v6, %v13086_v36  ;;  %v15209_v4 = vld [vmem:[#allocation94_spill] sm:$0xff]  ;;  %v15214_v6 = vpack.c.bf16 %v12979_v32, %v12973_v12  ;;  %v15218_v12 = vld [vmem:[#allocation9_spill] sm:$0xff] }
 0x523   : > { %5431 = vmatmul.bf16.gmra.mxu3 %v8626_v25  ;;  %5929 = vmatmul.bf16.gmra.mxu1 %v7866_v61  ;;  %v8645_v61 = vld [vmem:[%s15009_s1 + $0xab8] sm:$0xf] }
 0x524   : > { %v5063_v22 = vpop.f32.mrf.mxu2  ;;  %v9456_v36 = vld [vmem:[%s15009_s1 + $0x4d4] sm:$0xf0]  ;;  %v4737_v54 = vadd.f32 %v15211_v16, %v4408_v8  ;;  %v7890_v16 = vor.u32 %v9453_v39, %v7887_v46 }
 0x525   : > { %v5064_v15 = vadd.f32 %v5063_v22, %v4735_v23  ;;  %v5392_v42 = vpop.f32.mrf.mxu3  ;;  %v13217_v63 = vpop.permute.xlu1 %1935 }
 0x526   : > { %6725 = vmatpush.bf16.msra.mxu3 %v15206_v26  ;;  %v5563_v31 = vpop.f32.mrf.mxu0  ;;  %15212 = vst [vmem:[#allocation79_spill] sm:$0xff] %v13217_v63  ;;  %v15213_v26 = vld [vmem:[#allocation8_spill] sm:$0xff] }
 0x527   : > { %v13180_v10 = vadd.f32 %v5392_v42, %v5064_v15  ;;  %v5564_v40 = vadd.f32 %v5563_v31, %v15209_v4  ;;  %v8646_v15 = vor.u32 %v9647_v18, %v8645_v61  ;;  %v7886_v42 = vor.u32 %v9456_v36, %v7885_v35 }
 0x528   : > { %v5892_v14 = vpop.f32.mrf.mxu1  ;;  %v4411_v31 = vadd.f32 %v15213_v26, %v13124_v19  ;;  %v15217_v61 = vpack.c.bf16 %v12941_v28, %v12935_v49  ;;  %v13232_v19 = vpop.permute.xlu0 %1860  ;;  %v15224_v26 = vld [vmem:[#allocation11_spill] sm:$0xff] }
 0x529   : > { %15208 = vst [vmem:[#allocation119_spill] sm:$0xff] %v13180_v10  ;;  %v13183_v25 = vadd.f32 %v5892_v14, %v5564_v40  ;;  %v15216_v40 = vld [vmem:[#allocation95_spill] sm:$0xff] }
 0x52a   : > { %6726 = vmatpush.bf16.msra.mxu3 %v15210_v34  ;;  %v8650_v34 = vor.u32 %v9644_v62, %v8647_v5  ;;  %v4740_v32 = vadd.f32 %v15218_v12, %v4411_v31  ;;  %v15222_v5 = vld [vmem:[#allocation96_spill] sm:$0xff] }
 0x52c   : > { %v5065_v13 = vpop.f32.mrf.mxu2 }
 0x52d   : > { %v5066_v23 = vadd.f32 %v5065_v13, %v4737_v54  ;;  %v5394_v22 = vpop.f32.mrf.mxu3  ;;  %v13235_v54 = vpop.permute.xlu2 %1840  ;;  %v15220_v13 = vld [vmem:[#allocation10_spill] sm:$0xff] }
 0x52e   : > { %6727 = vmatpush.bf16.msra.mxu3 %v15214_v6  ;;  %v5566_v8 = vpop.f32.mrf.mxu0  ;;  %v4413_v62 = vadd.f32 %v15220_v13, %v1806_v55  ;;  %v13241_v49 = vpop.permute.xlu1 %1920  ;;  %v7909_v55 = vld [vmem:[%s15009_s1 + $0x4f0] sm:$0xf]  ;;  %v15237_v6 = vld [vmem:[#allocation99_spill] sm:$0xff] }
 0x52f   : > { %v13224_v4 = vadd.f32 %v5394_v22, %v5066_v23  ;;  %v5567_v14 = vadd.f32 %v5566_v8, %v15216_v40  ;;  %v8671_v8 = vld [vmem:[%s15009_s1 + $0xb00] sm:$0xf0]  ;;  %v9459_v40 = vld [vmem:[%s15009_s1 + $0x4f4] sm:$0xf] }
 0x530   : > { %v5895_v2 = vpop.f32.mrf.mxu1  ;;  %v4742_v31 = vadd.f32 %v15224_v26, %v4413_v62 }
 0x531   : > { %15215 = vst [vmem:[#allocation80_spill] sm:$0xff] %v13224_v4  ;;  %v13227_v63 = vadd.f32 %v5895_v2, %v5567_v14  ;;  %5107 = vmatmul.bf16.gmra.mxu2 %v8646_v15  ;;  %5605 = vmatmul.bf16.gmra.mxu0 %v7886_v42  ;;  %v15219_v2 = vpack.c.bf16 %v12900_v43, %v12888_v27  ;;  %v8669_v15 = vld [vmem:[%s15009_s1 + $0xae8] sm:$0xf]  ;;  %v9653_v43 = vld [vmem:[%s15009_s1 + $0xafc] sm:$0xf0] }
 0x532   : > { %6728 = vmatpush.bf16.msra.mxu3 %v15217_v61  ;;  %v15223_v27 = vpack.c.bf16 %v12850_v57, %v12841_v21  ;;  %v9462_v42 = vld [vmem:[%s15009_s1 + $0x504] sm:$0xf0]  ;;  %v9650_v21 = vld [vmem:[%s15009_s1 + $0xaec] sm:$0xf]  ;;  %v8670_v12 = vor.u32 %v9653_v43, %v8669_v15 }
 0x533   : > { %5436 = vmatmul.bf16.gmra.mxu3 %v8650_v34  ;;  %5934 = vmatmul.bf16.gmra.mxu1 %v7890_v16  ;;  %v7911_v14 = vld [vmem:[%s15009_s1 + $0x508] sm:$0xf0]  ;;  %v13278_v34 = vpop.permute.xlu0 %1945  ;;  %v8674_v62 = vor.u32 %v9650_v21, %v8671_v8  ;;  %v15231_v21 = vld [vmem:[#allocation14_spill] sm:$0xff] }
 0x534   : > { %v5068_v18 = vpop.f32.mrf.mxu2  ;;  %15225 = vst [vmem:[#allocation82_spill] sm:$0xff] %v13278_v34  ;;  %v15230_v15 = vld [vmem:[#allocation13_spill] sm:$0xff] }
 0x535   : > { %v5069_v35 = vadd.f32 %v5068_v18, %v4740_v32  ;;  %v5397_v36 = vpop.f32.mrf.mxu3  ;;  %v7910_v32 = vor.u32 %v9462_v42, %v7909_v55  ;;  %v15226_v18 = vld [vmem:[#allocation12_spill] sm:$0xff] }
 0x536   : > { %6729 = vmatpush.bf16.msra.mxu3 %v15219_v2  ;;  %v5568_v39 = vpop.f32.mrf.mxu0 }
 0x537   : > { %v13243_v28 = vadd.f32 %v5397_v36, %v5069_v35  ;;  %v5569_v46 = vadd.f32 %v5568_v39, %v15222_v5  ;;  %v4416_v35 = vadd.f32 %v15226_v18, %v13126_v24  ;;  %v15228_v39 = vld [vmem:[#allocation97_spill] sm:$0xff]  ;;  %v7914_v5 = vor.u32 %v9459_v40, %v7911_v14  ;;  %v15233_v14 = vld [vmem:[#allocation98_spill] sm:$0xff] }
 0x538   : > { %v5897_v23 = vpop.f32.mrf.mxu1 }
 0x539   : > { %15221 = vst [vmem:[#allocation81_spill] sm:$0xff] %v13243_v28  ;;  %v13246_v22 = vadd.f32 %v5897_v23, %v5569_v46  ;;  %v13285_v46 = vpop.permute.xlu2 %1925  ;;  %v4745_v24 = vadd.f32 %v15230_v15, %v4416_v35  ;;  %v9659_v35 = vld [vmem:[%s15009_s1 + $0xb2c] sm:$0xf0] }
 0x53a   : > { %6730 = vmatpush.bf16.msra.mxu3 %v15223_v27  ;;  %15229 = vst [vmem:[#allocation84_spill] sm:$0xff] %v13285_v46  ;;  %v13287_v27 = vpop.permute.xlu1 %1835 }
 0x53b   : > { %v13294_v8 = vpop.permute.xlu0 %1930 }
 0x53c   : > { %v5070_v57 = vpop.f32.mrf.mxu2 }
 0x53d   : > { %v5071_v16 = vadd.f32 %v5070_v57, %v4742_v31  ;;  %v5399_v61 = vpop.f32.mrf.mxu3  ;;  %v4418_v57 = vadd.f32 %v15231_v21, %v13135_v48  ;;  %v7933_v48 = vld [vmem:[%s15009_s1 + $0x520] sm:$0xf] }
 0x53e   : > { %v5571_v36 = vpop.f32.mrf.mxu0 }
 0x53f   : > { %v13282_v2 = vadd.f32 %v5399_v61, %v5071_v16  ;;  %v5572_v13 = vadd.f32 %v5571_v36, %v15228_v39  ;;  %v9468_v36 = vld [vmem:[%s15009_s1 + $0x534] sm:$0xf0] }
 0x540   : > { %v5900_v23 = vpop.f32.mrf.mxu1  ;;  %v15234_v39 = vld [vmem:[#allocation15_spill] sm:$0xff] }
 0x541   : > { %15227 = vst [vmem:[#allocation83_spill] sm:$0xff] %v13282_v2  ;;  %v13289_v26 = vadd.f32 %v5900_v23, %v5572_v13  ;;  %5112 = vmatmul.bf16.gmra.mxu2 %v8670_v12  ;;  %5610 = vmatmul.bf16.gmra.mxu0 %v7910_v32  ;;  %v8693_v32 = vld [vmem:[%s15009_s1 + $0xb18] sm:$0xf]  ;;  %v13304_v18 = vpop.permute.xlu2 %1910  ;;  %v4747_v13 = vadd.f32 %v15234_v39, %v4418_v57  ;;  %v9656_v23 = vld [vmem:[%s15009_s1 + $0xb1c] sm:$0xf] }
 0x542   : > { %v8694_v21 = vor.u32 %v9659_v35, %v8693_v32  ;;  %v7934_v57 = vor.u32 %v9468_v36, %v7933_v48  ;;  %v15238_v32 = vld [vmem:[#allocation17_spill] sm:$0xff] }
 0x543   : > { %5441 = vmatmul.bf16.gmra.mxu3 %v8674_v62  ;;  %5939 = vmatmul.bf16.gmra.mxu1 %v7914_v5  ;;  %v1821_v62 = vpop.permute.xlu1 %1820  ;;  %v13334_v2 = vpop.permute.xlu0 %1845 }
 0x544   : > { %v5073_v43 = vpop.f32.mrf.mxu2 }
 0x545   : > { %v5074_v55 = vadd.f32 %v5073_v43, %v4745_v24  ;;  %v5402_v42 = vpop.f32.mrf.mxu3  ;;  %v8695_v24 = vld [vmem:[%s15009_s1 + $0xb30] sm:$0xf0]  ;;  %v9465_v43 = vld [vmem:[%s15009_s1 + $0x524] sm:$0xf] }
 0x546   : > { %v5573_v31 = vpop.f32.mrf.mxu0  ;;  %v8698_v34 = vor.u32 %v9656_v23, %v8695_v24  ;;  %v15241_v24 = vld [vmem:[#allocation100_spill] sm:$0xff] }
 0x547   : > { %v13296_v40 = vadd.f32 %v5402_v42, %v5074_v55  ;;  %v5574_v16 = vadd.f32 %v5573_v31, %v15233_v14  ;;  %v7935_v55 = vld [vmem:[%s15009_s1 + $0x538] sm:$0xf0]  ;;  %v15235_v14 = vld [vmem:[#allocation16_spill] sm:$0xff] }
 0x548   : > { %v5902_v61 = vpop.f32.mrf.mxu1  ;;  %v7938_v46 = vor.u32 %v9465_v43, %v7935_v55 }
 0x549   : > { %15232 = vst [vmem:[#allocation85_spill] sm:$0xff] %v13296_v40  ;;  %v13299_v12 = vadd.f32 %v5902_v61, %v5574_v16  ;;  %v4421_v16 = vadd.f32 %v15235_v14, %v1821_v62  ;;  %v1826_v48 = vpop.permute.xlu2 %1825 }
 0x54b   : > { %v4750_v35 = vadd.f32 %v15238_v32, %v4421_v16  ;;  %v1831_v14 = vpop.permute.xlu0 %1830 }
 0x54c   : > { %v5075_v15 = vpop.f32.mrf.mxu2 }
 0x54d   : > { %v5076_v42 = vadd.f32 %v5075_v15, %v4747_v13  ;;  %v5404_v31 = vpop.f32.mrf.mxu3 }
 0x54e   : > { %v5576_v61 = vpop.f32.mrf.mxu0 }
 0x54f   : > { %v13331_v39 = vadd.f32 %v5404_v31, %v5076_v42  ;;  %v5577_v5 = vadd.f32 %v5576_v61, %v15237_v6  ;;  %v15239_v42 = vld [vmem:[#allocation18_spill] sm:$0xff]  ;;  %v9474_v31 = vld [vmem:[%s15009_s1 + $0x564] sm:$0xf0]  ;;  %v9662_v61 = vld [vmem:[%s15009_s1 + $0xb4c] sm:$0xf] }
 0x550   : > { %v5905_v40 = vpop.f32.mrf.mxu1  ;;  %v4423_v6 = vadd.f32 %v15239_v42, %v1826_v48  ;;  %v9471_v48 = vld [vmem:[%s15009_s1 + $0x554] sm:$0xf] }
 0x551   : > { %15236 = vst [vmem:[#allocation86_spill] sm:$0xff] %v13331_v39  ;;  %v13336_v28 = vadd.f32 %v5905_v40, %v5577_v5  ;;  %5117 = vmatmul.bf16.gmra.mxu2 %v8694_v21  ;;  %5615 = vmatmul.bf16.gmra.mxu0 %v7934_v57  ;;  %v7957_v5 = vld [vmem:[%s15009_s1 + $0x550] sm:$0xf]  ;;  %v15242_v21 = vld [vmem:[#allocation19_spill] sm:$0xff] }
 0x552   : > { %v4752_v57 = vadd.f32 %v15242_v21, %v4423_v6  ;;  %v7958_v42 = vor.u32 %v9474_v31, %v7957_v5  ;;  %v15243_v6 = vld [vmem:[#allocation20_spill] sm:$0xff]  ;;  %v15245_v21 = vld [vmem:[#allocation102_spill] sm:$0xff] }
 0x553   : > { %5446 = vmatmul.bf16.gmra.mxu3 %v8698_v34  ;;  %5944 = vmatmul.bf16.gmra.mxu1 %v7938_v46  ;;  %v8717_v34 = vld [vmem:[%s15009_s1 + $0xb48] sm:$0xf]  ;;  %v9665_v46 = vld [vmem:[%s15009_s1 + $0xb5c] sm:$0xf0] }
 0x554   : > { %v5078_v36 = vpop.f32.mrf.mxu2 }
 0x555   : > { %v5079_v13 = vadd.f32 %v5078_v36, %v4750_v35  ;;  %v5407_v62 = vpop.f32.mrf.mxu3  ;;  %v8719_v35 = vld [vmem:[%s15009_s1 + $0xb60] sm:$0xf0]  ;;  %v7959_v36 = vld [vmem:[%s15009_s1 + $0x568] sm:$0xf0] }
 0x556   : > { %v5578_v15 = vpop.f32.mrf.mxu0  ;;  %v7962_v39 = vor.u32 %v9471_v48, %v7959_v36  ;;  %v15250_v36 = vld [vmem:[#allocation23_spill] sm:$0xff] }
 0x557   : > { %v13340_v23 = vadd.f32 %v5407_v62, %v5079_v13  ;;  %v5579_v43 = vadd.f32 %v5578_v15, %v15241_v24  ;;  %v8718_v15 = vor.u32 %v9665_v46, %v8717_v34  ;;  %v4426_v24 = vadd.f32 %v15243_v6, %v1831_v14  ;;  %v15247_v14 = vld [vmem:[#allocation22_spill] sm:$0xff]  ;;  %v9668_v6 = vld [vmem:[%s15009_s1 + $0xb7c] sm:$0xf] }
 0x558   : > { %v5907_v55 = vpop.f32.mrf.mxu1 }
 0x559   : > { %15240 = vst [vmem:[#allocation87_spill] sm:$0xff] %v13340_v23  ;;  %v13343_v40 = vadd.f32 %v5907_v55, %v5579_v43  ;;  %v8722_v23 = vor.u32 %v9662_v61, %v8719_v35  ;;  %v15249_v61 = vld [vmem:[#allocation104_spill] sm:$0xff] }
 0x55c   : > { %v5080_v32 = vpop.f32.mrf.mxu2 }
 0x55d   : > { %v5081_v13 = vadd.f32 %v5080_v32, %v4752_v57  ;;  %v5409_v62 = vpop.f32.mrf.mxu3  ;;  %v15246_v57 = vld [vmem:[#allocation21_spill] sm:$0xff] }
 0x55e   : > { %v5581_v43 = vpop.f32.mrf.mxu0  ;;  %v4755_v32 = vadd.f32 %v15246_v57, %v4426_v24  ;;  %v7983_v57 = vld [vmem:[%s15009_s1 + $0x598] sm:$0xf0] }
 0x55f   : > { %v13373_v55 = vadd.f32 %v5409_v62, %v5081_v13  ;;  %v5582_v16 = vadd.f32 %v5581_v43, %v15245_v21  ;;  %v4428_v13 = vadd.f32 %v15247_v14, %v13287_v27  ;;  %v9480_v27 = vld [vmem:[%s15009_s1 + $0x594] sm:$0xf0]  ;;  %v8743_v43 = vld [vmem:[%s15009_s1 + $0xb90] sm:$0xf0]  ;;  %v9477_v21 = vld [vmem:[%s15009_s1 + $0x584] sm:$0xf] }
 0x560   : > { %v5910_v4 = vpop.f32.mrf.mxu1  ;;  %v15251_v14 = vld [vmem:[#allocation24_spill] sm:$0xff] }
 0x561   : > { %15244 = vst [vmem:[#allocation88_spill] sm:$0xff] %v13373_v55  ;;  %v13376_v10 = vadd.f32 %v5910_v4, %v5582_v16  ;;  %5122 = vmatmul.bf16.gmra.mxu2 %v8718_v15  ;;  %5620 = vmatmul.bf16.gmra.mxu0 %v7958_v42  ;;  %v7981_v16 = vld [vmem:[%s15009_s1 + $0x580] sm:$0xf]  ;;  %v4757_v15 = vadd.f32 %v15250_v36, %v4428_v13  ;;  %v15253_v42 = vld [vmem:[#allocation25_spill] sm:$0xff] }
 0x562   : > { %v4431_v13 = vadd.f32 %v15251_v14, %v13235_v54  ;;  %v9674_v14 = vld [vmem:[%s15009_s1 + $0xbac] sm:$0xf] }
 0x563   : > { %5451 = vmatmul.bf16.gmra.mxu3 %v8722_v23  ;;  %5949 = vmatmul.bf16.gmra.mxu1 %v7962_v39  ;;  %v8741_v39 = vld [vmem:[%s15009_s1 + $0xb78] sm:$0xf]  ;;  %v9671_v23 = vld [vmem:[%s15009_s1 + $0xb8c] sm:$0xf0] }
 0x564   : > { %v5083_v34 = vpop.f32.mrf.mxu2 }
 0x565   : > { %v5084_v46 = vadd.f32 %v5083_v34, %v4755_v32  ;;  %v5412_v5 = vpop.f32.mrf.mxu3 }
 0x566   : > { %v5583_v31 = vpop.f32.mrf.mxu0 }
 0x567   : > { %v13381_v62 = vadd.f32 %v5412_v5, %v5084_v46  ;;  %v5584_v35 = vadd.f32 %v5583_v31, %v15249_v61  ;;  %v8742_v46 = vor.u32 %v9671_v23, %v8741_v39  ;;  %v7982_v5 = vor.u32 %v9480_v27, %v7981_v16  ;;  %v15255_v27 = vld [vmem:[#allocation26_spill] sm:$0xff] }
 0x568   : > { %v5912_v48 = vpop.f32.mrf.mxu1  ;;  %v4433_v54 = vadd.f32 %v15255_v27, %v13334_v2  ;;  %v8005_v2 = vld [vmem:[%s15009_s1 + $0x5b0] sm:$0xf] }
 0x569   : > { %15248 = vst [vmem:[#allocation89_spill] sm:$0xff] %v13381_v62  ;;  %v13384_v4 = vadd.f32 %v5912_v48, %v5584_v35  ;;  %v8746_v35 = vor.u32 %v9668_v6, %v8743_v43  ;;  %v7986_v48 = vor.u32 %v9477_v21, %v7983_v57  ;;  %v4760_v62 = vadd.f32 %v15253_v42, %v4431_v13  ;;  %v15257_v6 = vld [vmem:[#allocation108_spill] sm:$0xff] }
 0x56a   : > { %v8765_v42 = vld [vmem:[%s15009_s1 + $0xba8] sm:$0xf] }
 0x56c   : > { %v5085_v24 = vpop.f32.mrf.mxu2 }
 0x56d   : > { %v5086_v32 = vadd.f32 %v5085_v24, %v4757_v15  ;;  %v5414_v34 = vpop.f32.mrf.mxu3  ;;  %v15254_v15 = vld [vmem:[#allocation106_spill] sm:$0xff] }
 0x56e   : > { %v5586_v31 = vpop.f32.mrf.mxu0 }
 0x56f   : > { %v13415_v61 = vadd.f32 %v5414_v34, %v5086_v32  ;;  %v5587_v24 = vadd.f32 %v5586_v31, %v15254_v15  ;;  %v13455_v15 = vpop.permute.xlu0 %1915 }
 0x570   : > { %v5915_v36 = vpop.f32.mrf.mxu1  ;;  %15259 = vst [vmem:[#allocation92_spill] sm:$0xff] %v13455_v15 }
 0x571   : > { %15252 = vst [vmem:[#allocation90_spill] sm:$0xff] %v13415_v61  ;;  %5127 = vmatmul.bf16.gmra.mxu2 %v8742_v46  ;;  %5625 = vmatmul.bf16.gmra.mxu0 %v7982_v5  ;;  %v13424_v57 = vadd.f32 %v5915_v36, %v5587_v24  ;;  %v15258_v46 = vld [vmem:[#allocation27_spill] sm:$0xff]  ;;  %v8007_v36 = vld [vmem:[%s15009_s1 + $0x5c8] sm:$0xf0] }
 0x572   : > { %v4762_v5 = vadd.f32 %v15258_v46, %v4433_v54  ;;  %v15260_v54 = vld [vmem:[#allocation28_spill] sm:$0xff] }
 0x573   : > { %5456 = vmatmul.bf16.gmra.mxu3 %v8746_v35  ;;  %5954 = vmatmul.bf16.gmra.mxu1 %v7986_v48  ;;  %v8767_v35 = vld [vmem:[%s15009_s1 + $0xbc0] sm:$0xf0]  ;;  %v9483_v48 = vld [vmem:[%s15009_s1 + $0x5b4] sm:$0xf] }
 0x574   : > { %v5088_v55 = vpop.f32.mrf.mxu2  ;;  %v8010_v46 = vor.u32 %v9483_v48, %v8007_v36 }
 0x575   : > { %v5089_v39 = vadd.f32 %v5088_v55, %v4760_v62  ;;  %v5417_v23 = vpop.f32.mrf.mxu3  ;;  %v9677_v55 = vld [vmem:[%s15009_s1 + $0xbbc] sm:$0xf0]  ;;  %v9486_v62 = vld [vmem:[%s15009_s1 + $0x5c4] sm:$0xf0] }
 0x576   : > { %v5588_v16 = vpop.f32.mrf.mxu0 }
 0x577   : > { %v13421_v32 = vadd.f32 %v5417_v23, %v5089_v39  ;;  %v5589_v43 = vadd.f32 %v5588_v16, %v15257_v6  ;;  %v8766_v23 = vor.u32 %v9677_v55, %v8765_v42  ;;  %v8006_v16 = vor.u32 %v9486_v62, %v8005_v2  ;;  %v15264_v62 = vld [vmem:[#allocation30_spill] sm:$0xff] }
 0x578   : > { %v5917_v21 = vpop.f32.mrf.mxu1  ;;  %v4436_v6 = vadd.f32 %v15260_v54, %v13172_v3  ;;  %v4438_v3 = vadd.f32 %v15264_v62, %v13206_v47  ;;  %v8029_v47 = vld [vmem:[%s15009_s1 + $0x5e0] sm:$0xf]  ;;  %v9680_v54 = vld [vmem:[%s15009_s1 + $0xbdc] sm:$0xf] }
 0x579   : > { %15256 = vst [vmem:[#allocation91_spill] sm:$0xff] %v13421_v32  ;;  %v13426_v34 = vadd.f32 %v5917_v21, %v5589_v43  ;;  %v8770_v21 = vor.u32 %v9674_v14, %v8767_v35  ;;  %v15262_v32 = vld [vmem:[#allocation29_spill] sm:$0xff]  ;;  %v15266_v35 = vld [vmem:[#allocation112_spill] sm:$0xff] }
 0x57a   : > { %v4765_v61 = vadd.f32 %v15262_v32, %v4436_v6  ;;  %v9683_v32 = vld [vmem:[%s15009_s1 + $0xbec] sm:$0xf0] }
 0x57c   : > { %v5090_v13 = vpop.f32.mrf.mxu2 }
 0x57d   : > { %v5091_v24 = vadd.f32 %v5090_v13, %v4762_v5  ;;  %v5419_v39 = vpop.f32.mrf.mxu3  ;;  %v15263_v5 = vld [vmem:[#allocation110_spill] sm:$0xff] }
 0x57e   : > { %v5591_v27 = vpop.f32.mrf.mxu0 }
 0x57f   : > { %v13459_v43 = vadd.f32 %v5419_v39, %v5091_v24  ;;  %v5592_v13 = vadd.f32 %v5591_v27, %v15263_v5  ;;  %v13465_v24 = vpop.permute.xlu0 %1900  ;;  %v8031_v5 = vld [vmem:[%s15009_s1 + $0x5f8] sm:$0xf0] }
 0x580   : > { %v5920_v31 = vpop.f32.mrf.mxu1 }
 0x581   : > { %15261 = vst [vmem:[#allocation4_spill] sm:$0xff] %v13459_v43  ;;  %5132 = vmatmul.bf16.gmra.mxu2 %v8766_v23  ;;  %5630 = vmatmul.bf16.gmra.mxu0 %v8006_v16  ;;  %v13470_v39 = vadd.f32 %v5920_v31, %v5592_v13  ;;  %v15267_v31 = vld [vmem:[#allocation31_spill] sm:$0xff] }
 0x582   : > { %v4767_v16 = vadd.f32 %v15267_v31, %v4438_v3  ;;  %v15268_v3 = vld [vmem:[#allocation32_spill] sm:$0xff] }
 0x583   : > { %5461 = vmatmul.bf16.gmra.mxu3 %v8770_v21  ;;  %5959 = vmatmul.bf16.gmra.mxu1 %v8010_v46  ;;  %v8791_v21 = vld [vmem:[%s15009_s1 + $0xbf0] sm:$0xf0]  ;;  %v9489_v46 = vld [vmem:[%s15009_s1 + $0x5e4] sm:$0xf] }
 0x584   : > { %v5093_v15 = vpop.f32.mrf.mxu2 }
 0x585   : > { %v5094_v42 = vadd.f32 %v5093_v15, %v4765_v61  ;;  %v5422_v55 = vpop.f32.mrf.mxu3  ;;  %v8789_v61 = vld [vmem:[%s15009_s1 + $0xbd8] sm:$0xf] }
 0x586   : > { %v5593_v2 = vpop.f32.mrf.mxu0  ;;  %v9492_v15 = vld [vmem:[%s15009_s1 + $0x5f4] sm:$0xf0] }
 0x587   : > { %v13467_v14 = vadd.f32 %v5422_v55, %v5094_v42  ;;  %v5594_v48 = vadd.f32 %v5593_v2, %v15266_v35  ;;  %v8790_v55 = vor.u32 %v9683_v32, %v8789_v61  ;;  %v8030_v2 = vor.u32 %v9492_v15, %v8029_v47  ;;  %v15271_v47 = vld [vmem:[#allocation114_spill] sm:$0xff] }
 0x588   : > { %v5922_v36 = vpop.f32.mrf.mxu1  ;;  %v4441_v35 = vadd.f32 %v15268_v3, %v13232_v19 }
 0x589   : > { %15265 = vst [vmem:[#allocation93_spill] sm:$0xff] %v13467_v14  ;;  %v13472_v23 = vadd.f32 %v5922_v36, %v5594_v48  ;;  %v8794_v36 = vor.u32 %v9680_v54, %v8791_v21  ;;  %v13507_v14 = vpop.permute.xlu0 %1895  ;;  %v15272_v54 = vld [vmem:[#allocation34_spill] sm:$0xff] }
 0x58a   : > { %v4443_v21 = vadd.f32 %v15272_v54, %v13137_v44  ;;  %v8997_v44 = vld [vmem:[%s15011_s3] sm:$0xf] }
 0x58b   : > { %v6216_v27 = vpack.c.bf16 %v13472_v23, %v13470_v39  ;;  %v8034_v39 = vor.u32 %v9489_v46, %v8031_v5  ;;  %v13505_v23 = vpop.permute.xlu1 %1905  ;;  %v15274_v5 = vld [vmem:[#allocation116_spill] sm:$0xff] }
 0x58c   : > { %v5095_v6 = vpop.f32.mrf.mxu2 }
 0x58d   : > { %v5096_v13 = vadd.f32 %v5095_v6, %v4767_v16  ;;  %v5424_v42 = vpop.f32.mrf.mxu3  ;;  %v15270_v16 = vld [vmem:[#allocation33_spill] sm:$0xff] }
 0x58e   : > { %v5596_v62 = vpop.f32.mrf.mxu0  ;;  %v4770_v61 = vadd.f32 %v15270_v16, %v4441_v35  ;;  %v8053_v35 = vld [vmem:[%s15009_s1 + $0x610] sm:$0xf]  ;;  %v15275_v16 = vld [vmem:[#allocation35_spill] sm:$0xff] }
 0x58f   : > { %v13503_v48 = vadd.f32 %v5424_v42, %v5096_v13  ;;  %v5597_v15 = vadd.f32 %v5596_v62, %v15271_v47  ;;  %v9498_v62 = vld [vmem:[%s15009_s1 + $0x624] sm:$0xf0]  ;;  %v9495_v47 = vld [vmem:[%s15009_s1 + $0x614] sm:$0xf] }
 0x590   : > { %v5925_v31 = vpop.f32.mrf.mxu1 }
 0x591   : > { %15269 = vst [vmem:[#allocation5_spill] sm:$0xff] %v13503_v48  ;;  %5137 = vmatmul.bf16.gmra.mxu2 %v8790_v55  ;;  %5635 = vmatmul.bf16.gmra.mxu0 %v8030_v2  ;;  %v5926_v55 = vadd.f32 %v5925_v31, %v5597_v15  ;;  %v4772_v31 = vadd.f32 %v15275_v16, %v4443_v21 }
 0x593   : > { %5466 = vmatmul.bf16.gmra.mxu3 %v8794_v36  ;;  %5964 = vmatmul.bf16.gmra.mxu1 %v8034_v39  ;;  %v1881_v36 = vpop.permute.xlu1 %1880  ;;  %v9689_v39 = vld [vmem:[%s15011_s3 + $0x1c] sm:$0xf0] }
 0x594   : > { %v5098_v32 = vpop.f32.mrf.mxu2 }
 0x595   : > { %v5099_v6 = vadd.f32 %v5098_v32, %v4770_v61  ;;  %v5427_v19 = vpop.f32.mrf.mxu3  ;;  %v1871_v61 = vpop.permute.xlu0 %1870 }
 0x596   : > { %v5598_v13 = vpop.f32.mrf.mxu0 }
 0x597   : > { %v13513_v46 = vadd.f32 %v5427_v19, %v5099_v6  ;;  %v5599_v42 = vadd.f32 %v5598_v13, %v15274_v5  ;;  %v8055_v6 = vld [vmem:[%s15009_s1 + $0x628] sm:$0xf0]  ;;  %v9685_v19 = vld [vmem:[%s15011_s3 + $0x4] sm:$0xf]  ;;  %v8054_v5 = vor.u32 %v9498_v62, %v8053_v35 }
 0x598   : > { %v5927_v3 = vpop.f32.mrf.mxu1  ;;  %v8999_v13 = vld [vmem:[%s15011_s3 + $0x20] sm:$0xf0]  ;;  %v8058_v43 = vor.u32 %v9495_v47, %v8055_v6  ;;  %v15280_v47 = vld [vmem:[#allocation38_spill] sm:$0xff] }
 0x599   : > { %15273 = vst [vmem:[#allocation6_spill] sm:$0xff] %v13513_v46  ;;  %v5928_v2 = vadd.f32 %v5927_v3, %v5599_v42  ;;  %v8998_v42 = vor.u32 %v9689_v39, %v8997_v44  ;;  %v15276_v3 = vld [vmem:[#allocation36_spill] sm:$0xff]  ;;  %v15277_v46 = vld [vmem:[#allocation118_spill] sm:$0xff]  ;;  %v9002_v11 = vor.u32 %v9685_v19, %v8999_v13  ;;  %v1891_v19 = vpop.permute.xlu2 %1890 }
 0x59a   : > { %v9029_v13 = vld [vmem:[%s15011_s3 + $0x40] sm:$0xf] }
 0x59b   : > { %v6217_v32 = vpack.c.bf16 %v5928_v2, %v5926_v55  ;;  %v4446_v55 = vadd.f32 %v15276_v3, %v1871_v61  ;;  %v1876_v62 = vpop.permute.xlu1 %1875  ;;  %v15279_v61 = vpack.c.bf16 %v13426_v34, %v13424_v57  ;;  %v15282_v57 = vpack.c.bf16 %v13384_v4, %v13376_v10  ;;  %v9504_v34 = vld [vmem:[%s15009_s1 + $0x654] sm:$0xf0]  ;;  %v9501_v10 = vld [vmem:[%s15009_s1 + $0x644] sm:$0xf]  ;;  %v8079_v3 = vld [vmem:[%s15009_s1 + $0x658] sm:$0xf0] }
 0x59c   : > { %v5100_v15 = vpop.f32.mrf.mxu2 }
 0x59d   : > { %v5101_v54 = vadd.f32 %v5100_v15, %v4772_v31  ;;  %6772 = vmatpush.bf16.msrb.mxu2 %v6217_v32  ;;  %v5429_v21 = vpop.f32.mrf.mxu3  ;;  %v15278_v31 = vld [vmem:[#allocation37_spill] sm:$0xff]  ;;  %v4448_v15 = vadd.f32 %v15280_v47, %v1876_v62 }
 0x59e   : > { %v5601_v2 = vpop.f32.mrf.mxu0  ;;  %v4775_v35 = vadd.f32 %v15278_v31, %v4446_v55  ;;  %v9693_v55 = vld [vmem:[%s15011_s3 + $0x44] sm:$0xf] }
 0x59f   : > { %v13542_v16 = vadd.f32 %v5429_v21, %v5101_v54  ;;  %v5602_v48 = vadd.f32 %v5601_v2, %v15277_v46  ;;  %v9697_v54 = vld [vmem:[%s15011_s3 + $0x5c] sm:$0xf0]  ;;  %v9031_v2 = vld [vmem:[%s15011_s3 + $0x60] sm:$0xf0] }
 0x5a0   : > { %v5930_v41 = vpop.f32.mrf.mxu1  ;;  %v15283_v21 = vld [vmem:[#allocation39_spill] sm:$0xff]  ;;  %v9030_v62 = vor.u32 %v9697_v54, %v9029_v13  ;;  %v15289_v54 = vpack.c.bf16 %v13246_v22, %v13227_v63  ;;  %v9510_v63 = vld [vmem:[%s15009_s1 + $0x684] sm:$0xf0] }
 0x5a1   : > { %v13545_v33 = vadd.f32 %v5930_v41, %v5602_v48  ;;  %5640 = vmatmul.bf16.gmra.mxu0 %v8054_v5  ;;  %6682 = vmatmul.bf16.vlgmr.msra.gmra.mxu2 %v8998_v42  ;;  %v15281_v48 = vld [vmem:[#allocation120_spill] sm:$0xff]  ;;  %v4777_v5 = vadd.f32 %v15283_v21, %v4448_v15  ;;  %v15286_v15 = vld [vmem:[#allocation121_spill] sm:$0xff]  ;;  %v15310_v42 = vld [vmem:[#allocation122_spill] sm:$0xff] }
 0x5a2   : > { %6773 = vmatpush.bf16.msrb.mxu2 %v6216_v27  ;;  %v9061_v22 = vld [vmem:[%s15011_s3 + $0x80] sm:$0xf] }
 0x5a3   : > { %5969 = vmatmul.bf16.gmra.mxu1 %v8058_v43  ;;  %6731 = vmatmul.bf16.vlgmr.msra.gmra.mxu3 %v9002_v11  ;;  %v8077_v11 = vld [vmem:[%s15009_s1 + $0x640] sm:$0xf] }
 0x5a4   : > { %v5103_v44 = vpop.f32.mrf.mxu2 }
 0x5a5   : > { %v5104_v39 = vadd.f32 %v5103_v44, %v4775_v35  ;;  %v8078_v35 = vor.u32 %v9504_v34, %v8077_v11  ;;  %v15284_v44 = vld [vmem:[#allocation40_spill] sm:$0xff]  ;;  %v1886_v11 = vpop.permute.xlu2 %1885 }
 0x5a6   : > { %6774 = vmatpush.bf16.msrb.mxu2 %v15279_v61  ;;  %v5432_v46 = vpop.f32.mrf.mxu3  ;;  %v5603_v32 = vpop.f32.mrf.mxu0  ;;  %v15285_v61 = vpack.c.bf16 %v13343_v40, %v13336_v28  ;;  %v15288_v28 = vld [vmem:[#allocation41_spill] sm:$0xff] }
 0x5a7   : > { %v13552_v41 = vadd.f32 %v5432_v46, %v5104_v39  ;;  %v5604_v6 = vadd.f32 %v5603_v32, %v15281_v48  ;;  %v4451_v39 = vadd.f32 %v15284_v44, %v1881_v36  ;;  %v15287_v36 = vpack.c.bf16 %v13299_v12, %v13289_v26 }
 0x5a8   : > { %v5932_v27 = vpop.f32.mrf.mxu1 }
 0x5a9   : > { %v13555_v43 = vadd.f32 %v5932_v27, %v5604_v6  ;;  %v8082_v6 = vor.u32 %v9501_v10, %v8079_v3  ;;  %v9034_v27 = vor.u32 %v9693_v55, %v9031_v2  ;;  %v4780_v40 = vadd.f32 %v15288_v28, %v4451_v39 }
 0x5aa   : > { %6775 = vmatpush.bf16.msrb.mxu2 %v15282_v57 }
 0x5ac   : > { %v5105_v4 = vpop.f32.mrf.mxu2 }
 0x5ad   : > { %v5106_v31 = vadd.f32 %v5105_v4, %v4777_v5  ;;  %v15290_v4 = vld [vmem:[#allocation42_spill] sm:$0xff] }
 0x5ae   : > { %6776 = vmatpush.bf16.msrb.mxu2 %v15285_v61  ;;  %v5434_v46 = vpop.f32.mrf.mxu3  ;;  %v5606_v32 = vpop.f32.mrf.mxu0  ;;  %v4453_v3 = vadd.f32 %v15290_v4, %v1886_v11  ;;  %v8103_v61 = vld [vmem:[%s15009_s1 + $0x688] sm:$0xf0] }
 0x5af   : > { %v13591_v47 = vadd.f32 %v5434_v46, %v5106_v31  ;;  %v5607_v48 = vadd.f32 %v5606_v32, %v15286_v15  ;;  %v8101_v31 = vld [vmem:[%s15009_s1 + $0x670] sm:$0xf]  ;;  %v9701_v46 = vld [vmem:[%s15011_s3 + $0x84] sm:$0xf] }
 0x5b0   : > { %v5935_v57 = vpop.f32.mrf.mxu1  ;;  %v9063_v32 = vld [vmem:[%s15011_s3 + $0xa0] sm:$0xf0] }
 0x5b1   : > { %v13594_v21 = vadd.f32 %v5935_v57, %v5607_v48  ;;  %5645 = vmatmul.bf16.gmra.mxu0 %v8078_v35  ;;  %6687 = vmatmul.bf16.gmra.mxu2 %v9030_v62  ;;  %v15291_v35 = vpack.c.bf16 %v13183_v25, %v13168_v51  ;;  %v15292_v62 = vld [vmem:[#allocation43_spill] sm:$0xff]  ;;  %v9507_v51 = vld [vmem:[%s15009_s1 + $0x674] sm:$0xf]  ;;  %v8102_v48 = vor.u32 %v9510_v63, %v8101_v31 }
 0x5b2   : > { %6777 = vmatpush.bf16.msrb.mxu2 %v15287_v36  ;;  %v4782_v44 = vadd.f32 %v15292_v62, %v4453_v3  ;;  %v15295_v31 = vld [vmem:[#allocation46_spill] sm:$0xff]  ;;  %v8125_v62 = vld [vmem:[%s15009_s1 + $0x6a0] sm:$0xf] }
 0x5b3   : > { %5974 = vmatmul.bf16.gmra.mxu1 %v8082_v6  ;;  %6736 = vmatmul.bf16.gmra.mxu3 %v9034_v27  ;;  %v15293_v27 = vld [vmem:[#allocation44_spill] sm:$0xff] }
 0x5b4   : > { %v5108_v34 = vpop.f32.mrf.mxu2  ;;  %v4456_v57 = vadd.f32 %v15293_v27, %v1891_v19 }
 0x5b5   : > { %v5109_v13 = vadd.f32 %v5108_v34, %v4780_v40  ;;  %v8106_v34 = vor.u32 %v9507_v51, %v8103_v61  ;;  %v9093_v51 = vld [vmem:[%s15011_s3 + $0xc0] sm:$0xf] }
 0x5b6   : > { %6778 = vmatpush.bf16.msrb.mxu2 %v15289_v54  ;;  %v5437_v5 = vpop.f32.mrf.mxu3  ;;  %v5608_v10 = vpop.f32.mrf.mxu0 }
 0x5b7   : > { %v13604_v55 = vadd.f32 %v5437_v5, %v5109_v13  ;;  %v5609_v26 = vadd.f32 %v5608_v10, %v12235_v53  ;;  %v9705_v53 = vld [vmem:[%s15011_s3 + $0x9c] sm:$0xf0]  ;;  %v9066_v13 = vor.u32 %v9701_v46, %v9063_v32  ;;  %v15294_v10 = vld [vmem:[#allocation45_spill] sm:$0xff]  ;;  %v9513_v46 = vld [vmem:[%s15009_s1 + $0x6a4] sm:$0xf] }
 0x5b8   : > { %v5937_v12 = vpop.f32.mrf.mxu1  ;;  %v9062_v6 = vor.u32 %v9705_v53, %v9061_v22  ;;  %v4785_v4 = vadd.f32 %v15294_v10, %v4456_v57 }
 0x5b9   : > { %v13607_v2 = vadd.f32 %v5937_v12, %v5609_v26 }
 0x5ba   : > { %6779 = vmatpush.bf16.msrb.mxu2 %v15291_v35  ;;  %v4458_v35 = vadd.f32 %v15295_v31, %v13507_v14  ;;  %v9713_v14 = vld [vmem:[%s15011_s3 + $0xdc] sm:$0xf0] }
 0x5bc   : > { %v5110_v25 = vpop.f32.mrf.mxu2 }
 0x5bd   : > { %v5111_v15 = vadd.f32 %v5110_v25, %v4782_v44  ;;  %v9516_v44 = vld [vmem:[%s15009_s1 + $0x6b4] sm:$0xf0] }
 0x5be   : > { %v5439_v36 = vpop.f32.mrf.mxu3  ;;  %v5611_v28 = vpop.f32.mrf.mxu0  ;;  %v8126_v57 = vor.u32 %v9516_v44, %v8125_v62  ;;  %v15299_v62 = vld [vmem:[#allocation50_spill] sm:$0xff] }
 0x5bf   : > { %v13640_v40 = vadd.f32 %v5439_v36, %v5111_v15  ;;  %v5612_v11 = vadd.f32 %v5611_v28, %v12241_v1  ;;  %v8127_v15 = vld [vmem:[%s15009_s1 + $0x6b8] sm:$0xf0]  ;;  %v9094_v36 = vor.u32 %v9713_v14, %v9093_v51  ;;  %v15297_v28 = vld [vmem:[#allocation48_spill] sm:$0xff]  ;;  %v4463_v44 = vadd.f32 %v15299_v62, %v13505_v23  ;;  %v15302_v62 = vld [vmem:[#allocation53_spill] sm:$0xff] }
 0x5c0   : > { %v5940_v54 = vpop.f32.mrf.mxu1  ;;  %v9721_v23 = vld [vmem:[%s15011_s3 + $0x11c] sm:$0xf0] }
 0x5c1   : > { %v13643_v5 = vadd.f32 %v5940_v54, %v5612_v11  ;;  %5650 = vmatmul.bf16.gmra.mxu0 %v8102_v48  ;;  %6692 = vmatmul.bf16.gmra.mxu2 %v9062_v6  ;;  %v9709_v48 = vld [vmem:[%s15011_s3 + $0xc4] sm:$0xf]  ;;  %v4461_v11 = vadd.f32 %v15297_v28, %v13465_v24 }
 0x5c2   : > { %v9095_v6 = vld [vmem:[%s15011_s3 + $0xe0] sm:$0xf0] }
 0x5c3   : > { %5979 = vmatmul.bf16.gmra.mxu1 %v8106_v34  ;;  %6741 = vmatmul.bf16.gmra.mxu3 %v9066_v13  ;;  %v9127_v28 = vld [vmem:[%s15011_s3 + $0x120] sm:$0xf0] }
 0x5c4   : > { %v5113_v3 = vpop.f32.mrf.mxu2 }
 0x5c5   : > { %v5114_v26 = vadd.f32 %v5113_v3, %v4785_v4  ;;  %v8130_v4 = vor.u32 %v9513_v46, %v8127_v15  ;;  %v9098_v3 = vor.u32 %v9709_v48, %v9095_v6  ;;  %v9522_v46 = vld [vmem:[%s15009_s1 + $0x6e4] sm:$0xf0]  ;;  %v9519_v6 = vld [vmem:[%s15009_s1 + $0x6d4] sm:$0xf] }
 0x5c6   : > { %v5442_v19 = vpop.f32.mrf.mxu3  ;;  %v5613_v12 = vpop.f32.mrf.mxu0 }
 0x5c7   : > { %v13648_v63 = vadd.f32 %v5442_v19, %v5114_v26  ;;  %v5614_v1 = vadd.f32 %v5613_v12, %v12271_v60  ;;  %v15296_v60 = vld [vmem:[#allocation47_spill] sm:$0xff]  ;;  %v15298_v12 = vld [vmem:[#allocation49_spill] sm:$0xff] }
 0x5c8   : > { %v5942_v22 = vpop.f32.mrf.mxu1  ;;  %v4787_v25 = vadd.f32 %v15296_v60, %v4458_v35  ;;  %v4790_v31 = vadd.f32 %v15298_v12, %v4461_v11 }
 0x5c9   : > { %v13651_v53 = vadd.f32 %v5942_v22, %v5614_v1 }
 0x5cb   : > { %v6220_v61 = vpack.c.bf16 %v13651_v53, %v13643_v5  ;;  %v15319_v5 = vld [vmem:[#allocation126_spill] sm:$0xff] }
 0x5cc   : > { %v5115_v32 = vpop.f32.mrf.mxu2 }
 0x5cd   : > { %v5116_v27 = vadd.f32 %v5115_v32, %v4787_v25  ;;  %v8149_v25 = vld [vmem:[%s15009_s1 + $0x6d0] sm:$0xf]  ;;  %v9125_v32 = vld [vmem:[%s15011_s3 + $0x100] sm:$0xf] }
 0x5ce   : > { %v5444_v34 = vpop.f32.mrf.mxu3  ;;  %v5616_v13 = vpop.f32.mrf.mxu0 }
 0x5cf   : > { %v13682_v54 = vadd.f32 %v5444_v34, %v5116_v27  ;;  %v5617_v10 = vadd.f32 %v5616_v13, %v12277_v20  ;;  %v8150_v34 = vor.u32 %v9522_v46, %v8149_v25  ;;  %v9126_v13 = vor.u32 %v9721_v23, %v9125_v32 }
 0x5d0   : > { %v5945_v26 = vpop.f32.mrf.mxu1 }
 0x5d1   : > { %v13685_v19 = vadd.f32 %v5945_v26, %v5617_v10  ;;  %5655 = vmatmul.bf16.gmra.mxu0 %v8126_v57  ;;  %6697 = vmatmul.bf16.gmra.mxu2 %v9094_v36  ;;  %v8151_v57 = vld [vmem:[%s15009_s1 + $0x6e8] sm:$0xf0]  ;;  %v9717_v36 = vld [vmem:[%s15011_s3 + $0x104] sm:$0xf] }
 0x5d2   : > { %v15301_v10 = vld [vmem:[#allocation52_spill] sm:$0xff] }
 0x5d3   : > { %5984 = vmatmul.bf16.gmra.mxu1 %v8130_v4  ;;  %6746 = vmatmul.bf16.gmra.mxu3 %v9098_v3  ;;  %v4466_v4 = vadd.f32 %v15301_v10, %v13304_v18 }
 0x5d4   : > { %v5118_v35 = vpop.f32.mrf.mxu2 }
 0x5d5   : > { %v5119_v1 = vadd.f32 %v5118_v35, %v4790_v31  ;;  %v8154_v35 = vor.u32 %v9519_v6, %v8151_v57  ;;  %v9157_v6 = vld [vmem:[%s15011_s3 + $0x140] sm:$0xf]  ;;  %v9525_v57 = vld [vmem:[%s15009_s1 + $0x704] sm:$0xf] }
 0x5d6   : > { %v5447_v24 = vpop.f32.mrf.mxu3  ;;  %v5618_v22 = vpop.f32.mrf.mxu0 }
 0x5d7   : > { %v13690_v51 = vadd.f32 %v5447_v24, %v5119_v1  ;;  %v5619_v20 = vadd.f32 %v5618_v22, %v12313_v17  ;;  %v15300_v17 = vld [vmem:[#allocation51_spill] sm:$0xff]  ;;  %v9130_v1 = vor.u32 %v9717_v36, %v9127_v28 }
 0x5d8   : > { %v5947_v14 = vpop.f32.mrf.mxu1  ;;  %v4792_v15 = vadd.f32 %v15300_v17, %v4463_v44  ;;  %v4795_v44 = vadd.f32 %v15302_v62, %v4466_v4  ;;  %v8173_v17 = vld [vmem:[%s15009_s1 + $0x700] sm:$0xf]  ;;  %v8175_v28 = vld [vmem:[%s15009_s1 + $0x718] sm:$0xf0]  ;;  %v15304_v62 = vld [vmem:[#allocation57_spill] sm:$0xff] }
 0x5d9   : > { %v13693_v60 = vadd.f32 %v5947_v14, %v5619_v20 }
 0x5db   : > { %v6221_v48 = vpack.c.bf16 %v13693_v60, %v13685_v19  ;;  %v15318_v60 = vpack.c.bf16 %v13607_v2, %v13594_v21  ;;  %v8293_v21 = vld [vmem:[%s15009_s1 + $0x7f0] sm:$0xf]  ;;  %v13934_v2 = vpop.permute.xlu0 %6281 }
 0x5dc   : > { %v5120_v27 = vpop.f32.mrf.mxu2  ;;  %15320 = vst [vmem:[#allocation10_spill] sm:$0xff] %v13934_v2  ;;  %v15341_v2 = vld [vmem:[#allocation71_spill] sm:$0xff] }
 0x5dd   : > { %v5121_v11 = vadd.f32 %v5120_v27, %v4792_v15  ;;  %v9528_v15 = vld [vmem:[%s15009_s1 + $0x714] sm:$0xf0]  ;;  %v9729_v27 = vld [vmem:[%s15011_s3 + $0x15c] sm:$0xf0] }
 0x5de   : > { %v5449_v3 = vpop.f32.mrf.mxu3  ;;  %v5621_v26 = vpop.f32.mrf.mxu0  ;;  %v9158_v10 = vor.u32 %v9729_v27, %v9157_v6  ;;  %v8197_v27 = vld [vmem:[%s15009_s1 + $0x730] sm:$0xf] }
 0x5df   : > { %v13724_v12 = vadd.f32 %v5449_v3, %v5121_v11  ;;  %v5622_v31 = vadd.f32 %v5621_v26, %v12325_v38  ;;  %v9725_v11 = vld [vmem:[%s15011_s3 + $0x144] sm:$0xf] }
 0x5e0   : > { %v5950_v24 = vpop.f32.mrf.mxu1  ;;  %v15303_v26 = vld [vmem:[#allocation56_spill] sm:$0xff] }
 0x5e1   : > { %v13727_v22 = vadd.f32 %v5950_v24, %v5622_v31  ;;  %5660 = vmatmul.bf16.gmra.mxu0 %v8150_v34  ;;  %6702 = vmatmul.bf16.gmra.mxu2 %v9126_v13  ;;  %v9159_v34 = vld [vmem:[%s15011_s3 + $0x160] sm:$0xf0]  ;;  %v8174_v13 = vor.u32 %v9528_v15, %v8173_v17  ;;  %v4471_v31 = vadd.f32 %v15303_v26, %v13241_v49 }
 0x5e3   : > { %5989 = vmatmul.bf16.gmra.mxu1 %v8154_v35  ;;  %6751 = vmatmul.bf16.gmra.mxu3 %v9130_v1  ;;  %v8178_v35 = vor.u32 %v9525_v57, %v8175_v28  ;;  %v9162_v1 = vor.u32 %v9725_v11, %v9159_v34  ;;  %v9189_v57 = vld [vmem:[%s15011_s3 + $0x180] sm:$0xf]  ;;  %v9531_v11 = vld [vmem:[%s15009_s1 + $0x734] sm:$0xf] }
 0x5e4   : > { %v5123_v20 = vpop.f32.mrf.mxu2 }
 0x5e5   : > { %v5124_v14 = vadd.f32 %v5123_v20, %v4795_v44  ;;  %v4800_v44 = vadd.f32 %v15304_v62, %v4471_v31 }
 0x5e6   : > { %v5452_v18 = vpop.f32.mrf.mxu3  ;;  %v5623_v25 = vpop.f32.mrf.mxu0 }
 0x5e7   : > { %v13730_v46 = vadd.f32 %v5452_v18, %v5124_v14  ;;  %v5624_v32 = vadd.f32 %v5623_v25, %v12361_v37 }
 0x5e8   : > { %v5952_v38 = vpop.f32.mrf.mxu1 }
 0x5e9   : > { %v13733_v23 = vadd.f32 %v5952_v38, %v5624_v32 }
 0x5eb   : > { %v6222_v37 = vpack.c.bf16 %v13733_v23, %v13727_v22  ;;  %v9549_v22 = vld [vmem:[%s15009_s1 + $0x7c4] sm:$0xf]  ;;  %v8271_v23 = vld [vmem:[%s15009_s1 + $0x7d8] sm:$0xf0] }
 0x5ec   : > { %v13752_v36 = vpop.f32.mrf.mxu2 }
 0x5ee   : > { %v13763_v4 = vpop.f32.mrf.mxu3  ;;  %v5626_v3 = vpop.f32.mrf.mxu0 }
 0x5ef   : > { %v5627_v14 = vadd.f32 %v5626_v3, %v12373_v9  ;;  %v9534_v9 = vld [vmem:[%s15009_s1 + $0x744] sm:$0xf0]  ;;  %v9191_v3 = vld [vmem:[%s15011_s3 + $0x1a0] sm:$0xf0] }
 0x5f0   : > { %v5955_v24 = vpop.f32.mrf.mxu1  ;;  %v8198_v26 = vor.u32 %v9534_v9, %v8197_v27 }
 0x5f1   : > { %5665 = vmatmul.bf16.gmra.mxu0 %v8174_v13  ;;  %6707 = vmatmul.bf16.gmra.mxu2 %v9158_v10  ;;  %v13772_v15 = vadd.f32 %v5955_v24, %v5627_v14  ;;  %v8199_v13 = vld [vmem:[%s15009_s1 + $0x748] sm:$0xf0]  ;;  %v9733_v10 = vld [vmem:[%s15011_s3 + $0x184] sm:$0xf] }
 0x5f2   : > { %v15305_v24 = vld [vmem:[#allocation60_spill] sm:$0xff] }
 0x5f3   : > { %5994 = vmatmul.bf16.gmra.mxu1 %v8178_v35  ;;  %6756 = vmatmul.bf16.gmra.mxu3 %v9162_v1  ;;  %v4476_v62 = vadd.f32 %v15305_v24, %v13294_v8  ;;  %v8223_v24 = vld [vmem:[%s15009_s1 + $0x778] sm:$0xf0] }
 0x5f4   : > { %v5128_v20 = vpop.f32.mrf.mxu2 }
 0x5f5   : > { %v5129_v18 = vadd.f32 %v5128_v20, %v4800_v44  ;;  %v8202_v44 = vor.u32 %v9531_v11, %v8199_v13  ;;  %v9194_v20 = vor.u32 %v9733_v10, %v9191_v3  ;;  %v8221_v10 = vld [vmem:[%s15009_s1 + $0x760] sm:$0xf]  ;;  %v9540_v3 = vld [vmem:[%s15009_s1 + $0x774] sm:$0xf0] }
 0x5f6   : > { %v5457_v25 = vpop.f32.mrf.mxu3  ;;  %v5628_v32 = vpop.f32.mrf.mxu0 }
 0x5f7   : > { %v13769_v38 = vadd.f32 %v5457_v25, %v5129_v18  ;;  %v5629_v17 = vadd.f32 %v5628_v32, %v12409_v29  ;;  %v9737_v29 = vld [vmem:[%s15011_s3 + $0x19c] sm:$0xf0]  ;;  %v15306_v18 = vld [vmem:[#allocation61_spill] sm:$0xff] }
 0x5f8   : > { %v5957_v49 = vpop.f32.mrf.mxu1  ;;  %v9190_v31 = vor.u32 %v9737_v29, %v9189_v57  ;;  %v4805_v25 = vadd.f32 %v15306_v18, %v4476_v62  ;;  %v9741_v62 = vld [vmem:[%s15011_s3 + $0x1c4] sm:$0xf] }
 0x5f9   : > { %v13774_v6 = vadd.f32 %v5957_v49, %v5629_v17 }
 0x5fb   : > { %v6223_v28 = vpack.c.bf16 %v13774_v6, %v13772_v15  ;;  %v9552_v15 = vld [vmem:[%s15009_s1 + $0x7d4] sm:$0xf0]  ;;  %v9037_v6 = vld [vmem:[%s15011_s3 + $0x48] sm:$0xf] }
 0x5fc   : > { %v13793_v34 = vpop.f32.mrf.mxu2 }
 0x5fe   : > { %v13804_v35 = vpop.f32.mrf.mxu3  ;;  %v5631_v1 = vpop.f32.mrf.mxu0 }
 0x5ff   : > { %v5632_v17 = vadd.f32 %v5631_v1, %v12421_v56  ;;  %v9221_v56 = vld [vmem:[%s15011_s3 + $0x1c0] sm:$0xf] }
 0x600   : > { %v5960_v14 = vpop.f32.mrf.mxu1 }
 0x601   : > { %5670 = vmatmul.bf16.gmra.mxu0 %v8198_v26  ;;  %6712 = vmatmul.bf16.gmra.mxu2 %v9190_v31  ;;  %v5961_v11 = vadd.f32 %v5960_v14, %v5632_v17  ;;  %v9745_v26 = vld [vmem:[%s15011_s3 + $0x1dc] sm:$0xf0]  ;;  %v9537_v31 = vld [vmem:[%s15009_s1 + $0x764] sm:$0xf] }
 0x602   : > { %v9222_v14 = vor.u32 %v9745_v26, %v9221_v56 }
 0x603   : > { %5999 = vmatmul.bf16.gmra.mxu1 %v8202_v44  ;;  %6761 = vmatmul.bf16.gmra.mxu3 %v9194_v20  ;;  %v9223_v44 = vld [vmem:[%s15011_s3 + $0x1e0] sm:$0xf0]  ;;  %v8222_v20 = vor.u32 %v9540_v3, %v8221_v10 }
 0x604   : > { %v5133_v32 = vpop.f32.mrf.mxu2 }
 0x605   : > { %v5134_v49 = vadd.f32 %v5133_v32, %v4805_v25  ;;  %v15307_v32 = vld [vmem:[#allocation64_spill] sm:$0xff] }
 0x606   : > { %v5462_v27 = vpop.f32.mrf.mxu3  ;;  %v5633_v9 = vpop.f32.mrf.mxu0  ;;  %v4481_v17 = vadd.f32 %v15307_v32, %v13170_v30 }
 0x607   : > { %v13810_v57 = vadd.f32 %v5462_v27, %v5134_v49  ;;  %v5634_v29 = vadd.f32 %v5633_v9, %v12457_v50  ;;  %v8226_v49 = vor.u32 %v9537_v31, %v8223_v24  ;;  %v9226_v27 = vor.u32 %v9741_v62, %v9223_v44  ;;  %v8245_v62 = vld [vmem:[%s15009_s1 + $0x790] sm:$0xf]  ;;  %v9546_v44 = vld [vmem:[%s15009_s1 + $0x7a4] sm:$0xf0] }
 0x608   : > { %v5962_v8 = vpop.f32.mrf.mxu1  ;;  %v8246_v32 = vor.u32 %v9546_v44, %v8245_v62 }
 0x609   : > { %v5963_v13 = vadd.f32 %v5962_v8, %v5634_v29  ;;  %v15308_v29 = vld [vmem:[#allocation65_spill] sm:$0xff] }
 0x60a   : > { %v4810_v8 = vadd.f32 %v15308_v29, %v4481_v17 }
 0x60b   : > { %v6224_v50 = vpack.c.bf16 %v5963_v13, %v5961_v11 }
 0x60c   : > { %v13828_v1 = vpop.f32.mrf.mxu2 }
 0x60e   : > { %v13839_v18 = vpop.f32.mrf.mxu3  ;;  %v5636_v25 = vpop.f32.mrf.mxu0 }
 0x60f   : > { %v5637_v13 = vadd.f32 %v5636_v25, %v12469_v59  ;;  %v9005_v59 = vld [vmem:[%s15011_s3 + $0x8] sm:$0xf]  ;;  %v8247_v25 = vld [vmem:[%s15009_s1 + $0x7a8] sm:$0xf0] }
 0x610   : > { %v5965_v9 = vpop.f32.mrf.mxu1 }
 0x611   : > { %5675 = vmatmul.bf16.gmra.mxu0 %v8222_v20  ;;  %6717 = vmatmul.bf16.gmra.mxu2 %v9222_v14  ;;  %v5966_v31 = vadd.f32 %v5965_v9, %v5637_v13  ;;  %v9690_v20 = vld [vmem:[%s15011_s3 + $0x24] sm:$0xf0]  ;;  %v15313_v9 = vld [vmem:[#allocation123_spill] sm:$0xff] }
 0x612   : > { %v9006_v17 = vor.u32 %v9690_v20, %v9005_v59 }
 0x613   : > { %6004 = vmatmul.bf16.gmra.mxu1 %v8226_v49  ;;  %6766 = vmatmul.bf16.gmra.mxu3 %v9226_v27 }
 0x614   : > { %v5138_v11 = vpop.f32.mrf.mxu2 }
 0x615   : > { %v5139_v10 = vadd.f32 %v5138_v11, %v4810_v8 }
 0x616   : > { %v5467_v3 = vpop.f32.mrf.mxu3  ;;  %v5638_v56 = vpop.f32.mrf.mxu0 }
 0x617   : > { %v13845_v26 = vadd.f32 %v5467_v3, %v5139_v10  ;;  %v5639_v39 = vadd.f32 %v5638_v56, %v15310_v42  ;;  %v6277_v10 = vpop.permute.xlu2 %6276 }
 0x618   : > { %v5967_v30 = vpop.f32.mrf.mxu1 }
 0x619   : > { %15309 = vst [vmem:[#allocation94_spill] sm:$0xff] %v13845_v26  ;;  %v5968_v24 = vadd.f32 %v5967_v30, %v5639_v39  ;;  %v9543_v39 = vld [vmem:[%s15009_s1 + $0x794] sm:$0xf] }
 0x61a   : > { %v8250_v8 = vor.u32 %v9543_v39, %v8247_v25 }
 0x61b   : > { %v6225_v42 = vpack.c.bf16 %v5968_v24, %v5966_v31  ;;  %v15314_v24 = vld [vmem:[#allocation124_spill] sm:$0xff] }
 0x61c   : > { %v13860_v14 = vpop.f32.mrf.mxu2 }
 0x61d   : > { %15311 = vst [vmem:[#allocation7_spill] sm:$0xff] %v13860_v14  ;;  %6821 = vmatpush.bf16.msrb.mxu3 %v6225_v42 }
 0x61e   : > { %v13868_v49 = vpop.f32.mrf.mxu3  ;;  %v5641_v27 = vpop.f32.mrf.mxu0 }
 0x61f   : > { %15312 = vst [vmem:[#allocation8_spill] sm:$0xff] %v13868_v49  ;;  %v5642_v29 = vadd.f32 %v5641_v27, %v15313_v9  ;;  %v15317_v27 = vld [vmem:[#allocation125_spill] sm:$0xff] }
 0x620   : > { %v5970_v11 = vpop.f32.mrf.mxu1 }
 0x621   : > { %v13871_v13 = vadd.f32 %v5970_v11, %v5642_v29  ;;  %5680 = vmatmul.bf16.gmra.mxu0 %v8246_v32  ;;  %6780 = vmatmul.bf16.vlgmr.msrb.gmra.mxu2 %v9006_v17  ;;  %v8274_v29 = vor.u32 %v9549_v22, %v8271_v23 }
 0x622   : > { %6822 = vmatpush.bf16.msrb.mxu3 %v6224_v50  ;;  %v8269_v50 = vld [vmem:[%s15009_s1 + $0x7c0] sm:$0xf] }
 0x623   : > { %6009 = vmatmul.bf16.gmra.mxu1 %v8250_v8 }
 0x624   : > { %v6683_v3 = vpop.f32.mrf.mxu2 }
 0x625   : > { %v6684_v56 = vadd.f32 %v6683_v3, %v6277_v10  ;;  %v6287_v10 = vpop.permute.xlu1 %6286 }
 0x626   : > { %6823 = vmatpush.bf16.msrb.mxu3 %v6223_v28  ;;  %v5643_v30 = vpop.f32.mrf.mxu0  ;;  %v6732_v31 = vpop.f32.mrf.mxu3  ;;  %v9698_v28 = vld [vmem:[%s15011_s3 + $0x64] sm:$0xf0] }
 0x627   : > { %v5644_v62 = vadd.f32 %v5643_v30, %v15314_v24  ;;  %v13877_v44 = vadd.f32 %v6732_v31, %v6684_v56  ;;  %v9038_v25 = vor.u32 %v9698_v28, %v9037_v6  ;;  %v9686_v30 = vld [vmem:[%s15011_s3 + $0xc] sm:$0xf]  ;;  %v9069_v6 = vld [vmem:[%s15011_s3 + $0x88] sm:$0xf] }
 0x628   : > { %v5972_v59 = vpop.f32.mrf.mxu1  ;;  %v9007_v31 = vld [vmem:[%s15011_s3 + $0x28] sm:$0xf0]  ;;  %v9706_v28 = vld [vmem:[%s15011_s3 + $0xa4] sm:$0xf0] }
 0x629   : > { %v13879_v20 = vadd.f32 %v5972_v59, %v5644_v62  ;;  %v9010_v59 = vor.u32 %v9686_v30, %v9007_v31  ;;  %v9694_v31 = vld [vmem:[%s15011_s3 + $0x4c] sm:$0xf] }
 0x62a   : > { %6824 = vmatpush.bf16.msrb.mxu3 %v6222_v37  ;;  %v8270_v37 = vor.u32 %v9552_v15, %v8269_v50  ;;  %v15321_v50 = vpack.c.bf16 %v13555_v43, %v13545_v33  ;;  %v9558_v15 = vld [vmem:[%s15009_s1 + $0x804] sm:$0xf0]  ;;  %v9555_v33 = vld [vmem:[%s15009_s1 + $0x7f4] sm:$0xf]  ;;  %v8295_v43 = vld [vmem:[%s15009_s1 + $0x808] sm:$0xf0] }
 0x62c   : > { %v13898_v39 = vpop.f32.mrf.mxu2 }
 0x62d   : > { %15315 = vst [vmem:[#allocation95_spill] sm:$0xff] %v13898_v39 }
 0x62e   : > { %6825 = vmatpush.bf16.msrb.mxu3 %v6221_v48  ;;  %v5646_v32 = vpop.f32.mrf.mxu0  ;;  %v13909_v17 = vpop.f32.mrf.mxu3 }
 0x62f   : > { %15316 = vst [vmem:[#allocation9_spill] sm:$0xff] %v13909_v17  ;;  %v5647_v9 = vadd.f32 %v5646_v32, %v15317_v27 }
 0x630   : > { %v5975_v8 = vpop.f32.mrf.mxu1 }
 0x631   : > { %v13912_v11 = vadd.f32 %v5975_v8, %v5647_v9  ;;  %5685 = vmatmul.bf16.gmra.mxu0 %v8270_v37  ;;  %6785 = vmatmul.bf16.gmra.mxu2 %v9038_v25  ;;  %v8294_v37 = vor.u32 %v9558_v15, %v8293_v21  ;;  %v9070_v25 = vor.u32 %v9706_v28, %v9069_v6  ;;  %v15324_v9 = vld [vmem:[#allocation127_spill] sm:$0xff]  ;;  %v13977_v28 = vpop.permute.xlu2 %6291 }
 0x632   : > { %6826 = vmatpush.bf16.msrb.mxu3 %v6220_v61  ;;  %v8298_v8 = vor.u32 %v9555_v33, %v8295_v43  ;;  %v8317_v6 = vld [vmem:[%s15009_s1 + $0x820] sm:$0xf]  ;;  %15326 = vst [vmem:[#allocation12_spill] sm:$0xff] %v13977_v28  ;;  %v9564_v33 = vld [vmem:[%s15009_s1 + $0x834] sm:$0xf0] }
 0x633   : > { %6014 = vmatmul.bf16.gmra.mxu1 %v8274_v29  ;;  %v9101_v43 = vld [vmem:[%s15011_s3 + $0xc8] sm:$0xf] }
 0x634   : > { %v6688_v3 = vpop.f32.mrf.mxu2 }
 0x635   : > { %v6689_v19 = vadd.f32 %v6688_v3, %v6287_v10 }
 0x636   : > { %6827 = vmatpush.bf16.msrb.mxu3 %v15318_v60  ;;  %v5648_v48 = vpop.f32.mrf.mxu0  ;;  %v6737_v56 = vpop.f32.mrf.mxu3 }
 0x637   : > { %v5649_v53 = vadd.f32 %v5648_v48, %v15319_v5  ;;  %v13927_v61 = vadd.f32 %v6737_v56, %v6689_v19  ;;  %v6297_v19 = vpop.permute.xlu0 %6296  ;;  %v9039_v5 = vld [vmem:[%s15011_s3 + $0x68] sm:$0xf0] }
 0x638   : > { %v5977_v24 = vpop.f32.mrf.mxu1  ;;  %v9042_v15 = vor.u32 %v9694_v31, %v9039_v5 }
 0x639   : > { %v13929_v62 = vadd.f32 %v5977_v24, %v5649_v53  ;;  %v15325_v53 = vld [vmem:[#allocation128_spill] sm:$0xff] }
 0x63a   : > { %6828 = vmatpush.bf16.msrb.mxu3 %v15321_v50 }
 0x63c   : > { %v13950_v23 = vpop.f32.mrf.mxu2 }
 0x63d   : > { %15322 = vst [vmem:[#allocation96_spill] sm:$0xff] %v13950_v23  ;;  %6829 = vmatmul.bf16.vlgmr.msrb.gmra.mxu3 %v9010_v59 }
 0x63e   : > { %v5651_v32 = vpop.f32.mrf.mxu0  ;;  %v13958_v27 = vpop.f32.mrf.mxu3 }
 0x63f   : > { %15323 = vst [vmem:[#allocation11_spill] sm:$0xff] %v13958_v27  ;;  %v5652_v29 = vadd.f32 %v5651_v32, %v15324_v9  ;;  %v9561_v9 = vld [vmem:[%s15009_s1 + $0x824] sm:$0xf] }
 0x640   : > { %v5980_v10 = vpop.f32.mrf.mxu1 }
 0x641   : > { %v13961_v3 = vadd.f32 %v5980_v10, %v5652_v29  ;;  %5690 = vmatmul.bf16.gmra.mxu0 %v8294_v37  ;;  %6790 = vmatmul.bf16.gmra.mxu2 %v9070_v25  ;;  %v9714_v37 = vld [vmem:[%s15011_s3 + $0xe4] sm:$0xf0]  ;;  %v8319_v29 = vld [vmem:[%s15009_s1 + $0x838] sm:$0xf0] }
 0x642   : > { %v9102_v10 = vor.u32 %v9714_v37, %v9101_v43 }
 0x643   : > { %6019 = vmatmul.bf16.gmra.mxu1 %v8298_v8  ;;  %v8318_v8 = vor.u32 %v9564_v33, %v8317_v6  ;;  %v9071_v6 = vld [vmem:[%s15011_s3 + $0xa8] sm:$0xf0]  ;;  %v15330_v33 = vld [vmem:[#allocation68_spill] sm:$0xff] }
 0x644   : > { %v6693_v60 = vpop.f32.mrf.mxu2 }
 0x645   : > { %v6694_v48 = vadd.f32 %v6693_v60, %v6297_v19 }
 0x646   : > { %v5653_v56 = vpop.f32.mrf.mxu0  ;;  %v6742_v30 = vpop.f32.mrf.mxu3 }
 0x647   : > { %v5654_v24 = vadd.f32 %v5653_v56, %v15325_v53  ;;  %v13970_v59 = vadd.f32 %v6742_v30, %v6694_v48  ;;  %v15329_v48 = vld [vmem:[#allocation129_spill] sm:$0xff]  ;;  %v8322_v30 = vor.u32 %v9561_v9, %v8319_v29  ;;  %v6307_v53 = vpop.permute.xlu2 %6306 }
 0x648   : > { %v5982_v21 = vpop.f32.mrf.mxu1 }
 0x649   : > { %v13972_v50 = vadd.f32 %v5982_v21, %v5654_v24 }
 0x64c   : > { %v13990_v32 = vpop.f32.mrf.mxu2 }
 0x64d   : > { %15327 = vst [vmem:[#allocation97_spill] sm:$0xff] %v13990_v32  ;;  %6834 = vmatmul.bf16.gmra.mxu3 %v9042_v15  ;;  %v9702_v15 = vld [vmem:[%s15011_s3 + $0x8c] sm:$0xf] }
 0x64e   : > { %v5656_v19 = vpop.f32.mrf.mxu0  ;;  %v13998_v60 = vpop.f32.mrf.mxu3 }
 0x64f   : > { %15328 = vst [vmem:[#allocation13_spill] sm:$0xff] %v13998_v60  ;;  %v5657_v56 = vadd.f32 %v5656_v19, %v15329_v48  ;;  %v14017_v19 = vpop.permute.xlu1 %6301  ;;  %v9570_v48 = vld [vmem:[%s15009_s1 + $0x864] sm:$0xf0] }
 0x650   : > { %v5985_v31 = vpop.f32.mrf.mxu1  ;;  %15331 = vst [vmem:[#allocation14_spill] sm:$0xff] %v14017_v19 }
 0x651   : > { %v14001_v5 = vadd.f32 %v5985_v31, %v5657_v56  ;;  %5695 = vmatmul.bf16.gmra.mxu0 %v8318_v8  ;;  %6795 = vmatmul.bf16.gmra.mxu2 %v9102_v10  ;;  %v9074_v8 = vor.u32 %v9702_v15, %v9071_v6  ;;  %v8341_v10 = vld [vmem:[%s15009_s1 + $0x850] sm:$0xf]  ;;  %v9567_v31 = vld [vmem:[%s15009_s1 + $0x854] sm:$0xf] }
 0x653   : > { %6024 = vmatmul.bf16.gmra.mxu1 %v8322_v30 }
 0x654   : > { %v6698_v24 = vpop.f32.mrf.mxu2 }
 0x655   : > { %v6699_v21 = vadd.f32 %v6698_v24, %v6307_v53  ;;  %v8343_v53 = vld [vmem:[%s15009_s1 + $0x868] sm:$0xf0]  ;;  %v8342_v24 = vor.u32 %v9570_v48, %v8341_v10 }
 0x656   : > { %v5658_v42 = vpop.f32.mrf.mxu0  ;;  %v6747_v22 = vpop.f32.mrf.mxu3  ;;  %v9103_v10 = vld [vmem:[%s15011_s3 + $0xe8] sm:$0xf0] }
 0x657   : > { %v5659_v43 = vadd.f32 %v5658_v42, %v15330_v33  ;;  %v14010_v37 = vadd.f32 %v6747_v22, %v6699_v21  ;;  %v9133_v42 = vld [vmem:[%s15011_s3 + $0x108] sm:$0xf] }
 0x658   : > { %v5987_v9 = vpop.f32.mrf.mxu1  ;;  %v9722_v22 = vld [vmem:[%s15011_s3 + $0x124] sm:$0xf0] }
 0x659   : > { %v14012_v29 = vadd.f32 %v5987_v9, %v5659_v43  ;;  %v9134_v21 = vor.u32 %v9722_v22, %v9133_v42  ;;  %v15334_v33 = vld [vmem:[#allocation69_spill] sm:$0xff]  ;;  %v8346_v9 = vor.u32 %v9567_v31, %v8343_v53 }
 0x65a   : > { %v15335_v48 = vld [vmem:[#allocation101_spill] sm:$0xff] }
 0x65c   : > { %v14030_v30 = vpop.f32.mrf.mxu2 }
 0x65d   : > { %15332 = vst [vmem:[#allocation98_spill] sm:$0xff] %v14030_v30  ;;  %6839 = vmatmul.bf16.gmra.mxu3 %v9074_v8  ;;  %v6317_v30 = vpop.permute.xlu1 %6316  ;;  %v9710_v8 = vld [vmem:[%s15011_s3 + $0xcc] sm:$0xf] }
 0x65e   : > { %v5661_v15 = vpop.f32.mrf.mxu0  ;;  %v14038_v6 = vpop.f32.mrf.mxu3  ;;  %v9106_v53 = vor.u32 %v9710_v8, %v9103_v10 }
 0x65f   : > { %15333 = vst [vmem:[#allocation15_spill] sm:$0xff] %v14038_v6  ;;  %v5662_v43 = vadd.f32 %v5661_v15, %v15334_v33  ;;  %v9573_v15 = vld [vmem:[%s15009_s1 + $0x884] sm:$0xf]  ;;  %v8367_v33 = vld [vmem:[%s15009_s1 + $0x898] sm:$0xf0]  ;;  %v15337_v6 = vld [vmem:[#allocation70_spill] sm:$0xff] }
 0x660   : > { %v5990_v25 = vpop.f32.mrf.mxu1 }
 0x661   : > { %v14041_v56 = vadd.f32 %v5990_v25, %v5662_v43  ;;  %5700 = vmatmul.bf16.gmra.mxu0 %v8342_v24  ;;  %6800 = vmatmul.bf16.gmra.mxu2 %v9134_v21  ;;  %v9576_v24 = vld [vmem:[%s15009_s1 + $0x894] sm:$0xf0] }
 0x663   : > { %6029 = vmatmul.bf16.gmra.mxu1 %v8346_v9 }
 0x664   : > { %v6703_v60 = vpop.f32.mrf.mxu2 }
 0x665   : > { %v6704_v32 = vadd.f32 %v6703_v60, %v6317_v30  ;;  %v8365_v60 = vld [vmem:[%s15009_s1 + $0x880] sm:$0xf]  ;;  %v14057_v30 = vpop.permute.xlu0 %6311 }
 0x666   : > { %v5663_v19 = vpop.f32.mrf.mxu0  ;;  %v6752_v27 = vpop.f32.mrf.mxu3  ;;  %15336 = vst [vmem:[#allocation16_spill] sm:$0xff] %v14057_v30  ;;  %v8366_v43 = vor.u32 %v9576_v24, %v8365_v60  ;;  %v9135_v60 = vld [vmem:[%s15011_s3 + $0x128] sm:$0xf0]  ;;  %v15338_v24 = vld [vmem:[#allocation103_spill] sm:$0xff] }
 0x667   : > { %v5664_v42 = vadd.f32 %v5663_v19, %v15335_v48  ;;  %v14050_v25 = vadd.f32 %v6752_v27, %v6704_v32  ;;  %v9165_v19 = vld [vmem:[%s15011_s3 + $0x148] sm:$0xf]  ;;  %v8370_v48 = vor.u32 %v9573_v15, %v8367_v33 }
 0x668   : > { %v5992_v22 = vpop.f32.mrf.mxu1  ;;  %v9730_v27 = vld [vmem:[%s15011_s3 + $0x164] sm:$0xf0] }
 0x669   : > { %v14052_v31 = vadd.f32 %v5992_v22, %v5664_v42  ;;  %v9166_v9 = vor.u32 %v9730_v27, %v9165_v19 }
 0x66c   : > { %v14070_v21 = vpop.f32.mrf.mxu2 }
 0x66d   : > { %6844 = vmatmul.bf16.gmra.mxu3 %v9106_v53  ;;  %v6327_v22 = vpop.permute.xlu0 %6326  ;;  %v9718_v53 = vld [vmem:[%s15011_s3 + $0x10c] sm:$0xf] }
 0x66e   : > { %v5666_v8 = vpop.f32.mrf.mxu0  ;;  %v14078_v10 = vpop.f32.mrf.mxu3 }
 0x66f   : > { %v5667_v30 = vadd.f32 %v5666_v8, %v15337_v6  ;;  %v9138_v6 = vor.u32 %v9718_v53, %v9135_v60  ;;  %v9582_v8 = vld [vmem:[%s15009_s1 + $0x8c4] sm:$0xf0] }
 0x670   : > { %v5995_v42 = vpop.f32.mrf.mxu1 }
 0x671   : > { %5705 = vmatmul.bf16.gmra.mxu0 %v8366_v43  ;;  %6805 = vmatmul.bf16.gmra.mxu2 %v9166_v9  ;;  %v14090_v33 = vadd.f32 %v5995_v42, %v5667_v30  ;;  %v14097_v9 = vpop.permute.xlu2 %6321  ;;  %v8391_v42 = vld [vmem:[%s15009_s1 + $0x8c8] sm:$0xf0] }
 0x673   : > { %6034 = vmatmul.bf16.gmra.mxu1 %v8370_v48  ;;  %v9579_v48 = vld [vmem:[%s15009_s1 + $0x8b4] sm:$0xf] }
 0x674   : > { %v6708_v32 = vpop.f32.mrf.mxu2 }
 0x675   : > { %v6709_v23 = vadd.f32 %v6708_v32, %v6327_v22  ;;  %v8389_v32 = vld [vmem:[%s15009_s1 + $0x8b0] sm:$0xf] }
 0x676   : > { %v5668_v28 = vpop.f32.mrf.mxu0  ;;  %v6757_v17 = vpop.f32.mrf.mxu3  ;;  %v8390_v22 = vor.u32 %v9582_v8, %v8389_v32  ;;  %v9167_v32 = vld [vmem:[%s15011_s3 + $0x168] sm:$0xf0] }
 0x677   : > { %v5669_v19 = vadd.f32 %v5668_v28, %v15338_v24  ;;  %v14088_v27 = vadd.f32 %v6757_v17, %v6709_v23  ;;  %v9197_v17 = vld [vmem:[%s15011_s3 + $0x188] sm:$0xf] }
 0x678   : > { %v5997_v15 = vpop.f32.mrf.mxu1  ;;  %v9738_v23 = vld [vmem:[%s15011_s3 + $0x1a4] sm:$0xf0] }
 0x679   : > { %v14092_v43 = vadd.f32 %v5997_v15, %v5669_v19  ;;  %v9198_v53 = vor.u32 %v9738_v23, %v9197_v17  ;;  %v8394_v19 = vor.u32 %v9579_v48, %v8391_v42  ;;  %v6337_v28 = vpop.permute.xlu2 %6336 }
 0x67c   : > { %v14110_v30 = vpop.f32.mrf.mxu2 }
 0x67d   : > { %15339 = vst [vmem:[#allocation99_spill] sm:$0xff] %v14110_v30  ;;  %6849 = vmatmul.bf16.gmra.mxu3 %v9138_v6  ;;  %v9726_v6 = vld [vmem:[%s15011_s3 + $0x14c] sm:$0xf] }
 0x67e   : > { %v5671_v60 = vpop.f32.mrf.mxu0  ;;  %v14118_v24 = vpop.f32.mrf.mxu3 }
 0x67f   : > { %15340 = vst [vmem:[#allocation17_spill] sm:$0xff] %v14118_v24  ;;  %v5672_v26 = vadd.f32 %v5671_v60, %v15341_v2  ;;  %v14133_v2 = vpop.permute.xlu1 %6331 }
 0x680   : > { %v6000_v15 = vpop.f32.mrf.mxu1  ;;  %15342 = vst [vmem:[#allocation18_spill] sm:$0xff] %v14133_v2 }
 0x681   : > { %5710 = vmatmul.bf16.gmra.mxu0 %v8390_v22  ;;  %6810 = vmatmul.bf16.gmra.mxu2 %v9198_v53  ;;  %v6001_v48 = vadd.f32 %v6000_v15, %v5672_v26  ;;  %v9170_v22 = vor.u32 %v9726_v6, %v9167_v32  ;;  %v9746_v26 = vld [vmem:[%s15011_s3 + $0x1e4] sm:$0xf0]  ;;  %v8415_v53 = vld [vmem:[%s15009_s1 + $0x8f8] sm:$0xf0] }
 0x683   : > { %6039 = vmatmul.bf16.gmra.mxu1 %v8394_v19 }
 0x684   : > { %v6713_v39 = vpop.f32.mrf.mxu2 }
 0x685   : > { %v6714_v49 = vadd.f32 %v6713_v39, %v6337_v28  ;;  %v8413_v39 = vld [vmem:[%s15009_s1 + $0x8e0] sm:$0xf]  ;;  %v9588_v28 = vld [vmem:[%s15009_s1 + $0x8f4] sm:$0xf0] }
 0x686   : > { %v5673_v14 = vpop.f32.mrf.mxu0  ;;  %v6762_v30 = vpop.f32.mrf.mxu3  ;;  %v8414_v60 = vor.u32 %v9588_v28, %v8413_v39  ;;  %v9199_v39 = vld [vmem:[%s15011_s3 + $0x1a8] sm:$0xf0] }
 0x687   : > { %v5674_v8 = vadd.f32 %v5673_v14, %v12806_v45  ;;  %v14128_v17 = vadd.f32 %v6762_v30, %v6714_v49  ;;  %v9229_v45 = vld [vmem:[%s15011_s3 + $0x1c8] sm:$0xf]  ;;  %v9585_v30 = vld [vmem:[%s15009_s1 + $0x8e4] sm:$0xf] }
 0x688   : > { %v6002_v23 = vpop.f32.mrf.mxu1  ;;  %v9230_v19 = vor.u32 %v9746_v26, %v9229_v45  ;;  %v8418_v32 = vor.u32 %v9585_v30, %v8415_v53 }
 0x689   : > { %v6003_v42 = vadd.f32 %v6002_v23, %v5674_v8  ;;  %v6347_v23 = vpop.permute.xlu1 %6346 }
 0x68b   : > { %v6232_v14 = vpack.c.bf16 %v6003_v42, %v6001_v48 }
 0x68c   : > { %v14144_v49 = vpop.f32.mrf.mxu2 }
 0x68d   : > { %15343 = vst [vmem:[#allocation100_spill] sm:$0xff] %v14144_v49  ;;  %6854 = vmatmul.bf16.gmra.mxu3 %v9170_v22  ;;  %v9734_v22 = vld [vmem:[%s15011_s3 + $0x18c] sm:$0xf] }
 0x68e   : > { %v5676_v15 = vpop.f32.mrf.mxu0  ;;  %v14152_v6 = vpop.f32.mrf.mxu3 }
 0x68f   : > { %15344 = vst [vmem:[#allocation19_spill] sm:$0xff] %v14152_v6  ;;  %v5677_v42 = vadd.f32 %v5676_v15, %v12810_v0  ;;  %v8437_v0 = vld [vmem:[%s15009_s1 + $0x910] sm:$0xf] }
 0x690   : > { %v6005_v8 = vpop.f32.mrf.mxu1 }
 0x691   : > { %5715 = vmatmul.bf16.gmra.mxu0 %v8414_v60  ;;  %6815 = vmatmul.bf16.gmra.mxu2 %v9230_v19  ;;  %v6006_v30 = vadd.f32 %v6005_v8, %v5677_v42  ;;  %v9202_v60 = vor.u32 %v9734_v22, %v9199_v39  ;;  %v9594_v19 = vld [vmem:[%s15009_s1 + $0x924] sm:$0xf0] }
 0x693   : > { %6044 = vmatmul.bf16.gmra.mxu1 %v8418_v32 }
 0x694   : > { %v6718_v48 = vpop.f32.mrf.mxu2 }
 0x695   : > { %v6719_v49 = vadd.f32 %v6718_v48, %v6347_v23 }
 0x696   : > { %v5678_v24 = vpop.f32.mrf.mxu0  ;;  %v6767_v2 = vpop.f32.mrf.mxu3 }
 0x697   : > { %v5679_v28 = vadd.f32 %v5678_v24, %v12838_v7  ;;  %v14162_v45 = vadd.f32 %v6767_v2, %v6719_v49  ;;  %v9591_v7 = vld [vmem:[%s15009_s1 + $0x914] sm:$0xf]  ;;  %v8439_v24 = vld [vmem:[%s15009_s1 + $0x928] sm:$0xf0]  ;;  %v8438_v2 = vor.u32 %v9594_v19, %v8437_v0  ;;  %v9600_v0 = vld [vmem:[%s15009_s1 + $0x954] sm:$0xf0] }
 0x698   : > { %v6007_v26 = vpop.f32.mrf.mxu1  ;;  %v8442_v23 = vor.u32 %v9591_v7, %v8439_v24 }
 0x699   : > { %v6008_v53 = vadd.f32 %v6007_v26, %v5679_v28  ;;  %v15346_v28 = vpack.c.bf16 %v14092_v43, %v14090_v33  ;;  %v8461_v43 = vld [vmem:[%s15009_s1 + $0x940] sm:$0xf] }
 0x69a   : > { %v8462_v7 = vor.u32 %v9600_v0, %v8461_v43  ;;  %v9109_v43 = vld [vmem:[%s15011_s3 + $0xd0] sm:$0xf] }
 0x69b   : > { %v6233_v15 = vpack.c.bf16 %v6008_v53, %v6006_v30  ;;  %v9742_v30 = vld [vmem:[%s15011_s3 + $0x1cc] sm:$0xf] }
 0x69c   : > { %v14170_v32 = vpop.f32.mrf.mxu2 }
 0x69d   : > { %15345 = vst [vmem:[#allocation20_spill] sm:$0xff] %v14170_v32  ;;  %6859 = vmatmul.bf16.gmra.mxu3 %v9202_v60  ;;  %6870 = vmatpush.bf16.msra.mxu2 %v6233_v15  ;;  %v9597_v15 = vld [vmem:[%s15009_s1 + $0x944] sm:$0xf] }
 0x69e   : > { %v5681_v49 = vpop.f32.mrf.mxu0 }
 0x69f   : > { %v5682_v8 = vadd.f32 %v5681_v49, %v12847_v58  ;;  %v9231_v58 = vld [vmem:[%s15011_s3 + $0x1e8] sm:$0xf0] }
 0x6a0   : > { %v6010_v48 = vpop.f32.mrf.mxu1  ;;  %v9234_v33 = vor.u32 %v9742_v30, %v9231_v58  ;;  %v9691_v30 = vld [vmem:[%s15011_s3 + $0x2c] sm:$0xf0] }
 0x6a1   : > { %v14179_v42 = vadd.f32 %v6010_v48, %v5682_v8  ;;  %5720 = vmatmul.bf16.gmra.mxu0 %v8438_v2  ;;  %6871 = vmatpush.bf16.msra.mxu2 %v6232_v14  ;;  %v15350_v2 = vld [vmem:[#allocation105_spill] sm:$0xff] }
 0x6a3   : > { %6049 = vmatmul.bf16.gmra.mxu1 %v8442_v23 }
 0x6a4   : > { %v6781_v22 = vpop.f32.mrf.mxu2 }
 0x6a5   : > { %v6782_v39 = vadd.f32 %v6781_v22, %v13877_v44  ;;  %6872 = vmatpush.bf16.msra.mxu2 %v15346_v28  ;;  %v15347_v44 = vpack.c.bf16 %v14052_v31, %v14041_v56  ;;  %v8463_v56 = vld [vmem:[%s15009_s1 + $0x958] sm:$0xf0]  ;;  %v15349_v31 = vpack.c.bf16 %v14012_v29, %v14001_v5  ;;  %v15351_v22 = vpack.c.bf16 %v13972_v50, %v13961_v3  ;;  %v9013_v29 = vld [vmem:[%s15011_s3 + $0x10] sm:$0xf]  ;;  %v14233_v50 = vpop.f32.mrf.mxu3 }
 0x6a6   : > { %v5683_v26 = vpop.f32.mrf.mxu0  ;;  %v8466_v8 = vor.u32 %v9597_v15, %v8463_v56  ;;  %v15352_v5 = vpack.c.bf16 %v13929_v62, %v13912_v11  ;;  %15354 = vst [vmem:[#allocation21_spill] sm:$0xff] %v14233_v50  ;;  %v15355_v11 = vpack.c.bf16 %v13879_v20, %v13871_v13  ;;  %v8485_v62 = vld [vmem:[%s15009_s1 + $0x970] sm:$0xf]  ;;  %v9603_v15 = vld [vmem:[%s15009_s1 + $0x974] sm:$0xf] }
 0x6a7   : > { %v5684_v53 = vadd.f32 %v5683_v26, %v12885_v52  ;;  %v8487_v13 = vld [vmem:[%s15009_s1 + $0x988] sm:$0xf0]  ;;  %v9141_v50 = vld [vmem:[%s15011_s3 + $0x110] sm:$0xf] }
 0x6a8   : > { %v6012_v14 = vpop.f32.mrf.mxu1 }
 0x6a9   : > { %v14192_v60 = vadd.f32 %v6012_v14, %v5684_v53  ;;  %6873 = vmatpush.bf16.msra.mxu2 %v15347_v44  ;;  %v15353_v53 = vld [vmem:[#allocation72_spill] sm:$0xff]  ;;  %v9014_v44 = vor.u32 %v9691_v30, %v9013_v29  ;;  %v9699_v29 = vld [vmem:[%s15011_s3 + $0x6c] sm:$0xf0] }
 0x6ac   : > { %v14205_v52 = vpop.f32.mrf.mxu2 }
 0x6ad   : > { %15348 = vst [vmem:[#allocation102_spill] sm:$0xff] %v14205_v52  ;;  %6864 = vmatmul.bf16.gmra.mxu3 %v9234_v33  ;;  %6874 = vmatpush.bf16.msra.mxu2 %v15349_v31  ;;  %v9606_v33 = vld [vmem:[%s15009_s1 + $0x984] sm:$0xf0]  ;;  %v15357_v31 = vld [vmem:[#allocation107_spill] sm:$0xff] }
 0x6ae   : > { %v5686_v24 = vpop.f32.mrf.mxu0  ;;  %v8486_v20 = vor.u32 %v9606_v33, %v8485_v62 }
 0x6af   : > { %v5687_v49 = vadd.f32 %v5686_v24, %v15350_v2  ;;  %v8490_v24 = vor.u32 %v9603_v15, %v8487_v13  ;;  %v9609_v15 = vld [vmem:[%s15009_s1 + $0x9a4] sm:$0xf]  ;;  %v8511_v13 = vld [vmem:[%s15009_s1 + $0x9b8] sm:$0xf0] }
 0x6b0   : > { %v6015_v23 = vpop.f32.mrf.mxu1 }
 0x6b1   : > { %v14217_v48 = vadd.f32 %v6015_v23, %v5687_v49  ;;  %5725 = vmatmul.bf16.gmra.mxu0 %v8462_v7  ;;  %6875 = vmatpush.bf16.msra.mxu2 %v15351_v22 }
 0x6b3   : > { %6054 = vmatmul.bf16.gmra.mxu1 %v8466_v8 }
 0x6b4   : > { %v6786_v28 = vpop.f32.mrf.mxu2 }
 0x6b5   : > { %v6787_v26 = vadd.f32 %v6786_v28, %v13927_v61  ;;  %6876 = vmatpush.bf16.msra.mxu2 %v15352_v5  ;;  %v9045_v5 = vld [vmem:[%s15011_s3 + $0x50] sm:$0xf] }
 0x6b6   : > { %v5688_v58 = vpop.f32.mrf.mxu0 }
 0x6b7   : > { %v5689_v3 = vadd.f32 %v5688_v58, %v15353_v53  ;;  %v15358_v58 = vld [vmem:[#allocation73_spill] sm:$0xff] }
 0x6b8   : > { %v6017_v14 = vpop.f32.mrf.mxu1 }
 0x6b9   : > { %v14235_v61 = vadd.f32 %v6017_v14, %v5689_v3  ;;  %6877 = vmatpush.bf16.msra.mxu2 %v15355_v11  ;;  %v9046_v14 = vor.u32 %v9699_v29, %v9045_v5  ;;  %v9612_v11 = vld [vmem:[%s15009_s1 + $0x9b4] sm:$0xf0] }
 0x6bc   : > { %v14248_v0 = vpop.f32.mrf.mxu2  ;;  %6878 = vmatmul.bf16.vlgmr.msra.gmra.mxu2 %v9014_v44 }
 0x6bd   : > { %15356 = vst [vmem:[#allocation22_spill] sm:$0xff] %v14248_v0  ;;  %v9205_v0 = vld [vmem:[%s15011_s3 + $0x190] sm:$0xf] }
 0x6be   : > { %v5691_v56 = vpop.f32.mrf.mxu0 }
 0x6bf   : > { %v5692_v7 = vadd.f32 %v5691_v56, %v15357_v31  ;;  %v15361_v31 = vld [vmem:[#allocation109_spill] sm:$0xff] }
 0x6c0   : > { %v6830_v2 = vpop.f32.mrf.mxu3  ;;  %v6020_v49 = vpop.f32.mrf.mxu1 }
 0x6c1   : > { %v14257_v8 = vadd.f32 %v6830_v2, %v6782_v39  ;;  %v14259_v23 = vadd.f32 %v6020_v49, %v5692_v7  ;;  %5730 = vmatmul.bf16.gmra.mxu0 %v8486_v20 }
 0x6c3   : > { %6059 = vmatmul.bf16.gmra.mxu1 %v8490_v24  ;;  %v8514_v24 = vor.u32 %v9609_v15, %v8511_v13 }
 0x6c4   : > { %v6791_v22 = vpop.f32.mrf.mxu2 }
 0x6c5   : > { %v6792_v28 = vadd.f32 %v6791_v22, %v13970_v59  ;;  %v8509_v59 = vld [vmem:[%s15009_s1 + $0x9a0] sm:$0xf] }
 0x6c6   : > { %v5693_v30 = vpop.f32.mrf.mxu0  ;;  %v8510_v20 = vor.u32 %v9612_v11, %v8509_v59 }
 0x6c7   : > { %v5694_v53 = vadd.f32 %v5693_v30, %v15358_v58  ;;  %v9077_v58 = vld [vmem:[%s15011_s3 + $0x90] sm:$0xf] }
 0x6c8   : > { %v14269_v39 = vpop.f32.mrf.mxu3  ;;  %v6022_v3 = vpop.f32.mrf.mxu1 }
 0x6c9   : > { %15359 = vst [vmem:[#allocation104_spill] sm:$0xff] %v14269_v39  ;;  %v14271_v44 = vadd.f32 %v6022_v3, %v5694_v53  ;;  %v9707_v53 = vld [vmem:[%s15011_s3 + $0xac] sm:$0xf0] }
 0x6ca   : > { %v9078_v15 = vor.u32 %v9707_v53, %v9077_v58 }
 0x6cc   : > { %v14281_v33 = vpop.f32.mrf.mxu2  ;;  %6883 = vmatmul.bf16.gmra.mxu2 %v9046_v14  ;;  %v15362_v14 = vld [vmem:[#allocation74_spill] sm:$0xff] }
 0x6cd   : > { %15360 = vst [vmem:[#allocation23_spill] sm:$0xff] %v14281_v33 }
 0x6ce   : > { %v5696_v56 = vpop.f32.mrf.mxu0 }
 0x6cf   : > { %v5697_v7 = vadd.f32 %v5696_v56, %v15361_v31  ;;  %v15368_v56 = vld [vmem:[#allocation113_spill] sm:$0xff] }
 0x6d0   : > { %v6835_v2 = vpop.f32.mrf.mxu3  ;;  %v6025_v49 = vpop.f32.mrf.mxu1 }
 0x6d1   : > { %v14290_v22 = vadd.f32 %v6835_v2, %v6787_v26  ;;  %v14292_v5 = vadd.f32 %v6025_v49, %v5697_v7  ;;  %5735 = vmatmul.bf16.gmra.mxu0 %v8510_v20  ;;  %v9618_v20 = vld [vmem:[%s15009_s1 + $0x9e4] sm:$0xf0]  ;;  %v9615_v7 = vld [vmem:[%s15009_s1 + $0x9d4] sm:$0xf] }
 0x6d3   : > { %6064 = vmatmul.bf16.gmra.mxu1 %v8514_v24  ;;  %v8535_v24 = vld [vmem:[%s15009_s1 + $0x9e8] sm:$0xf0] }
 0x6d4   : > { %v6796_v29 = vpop.f32.mrf.mxu2  ;;  %v8538_v53 = vor.u32 %v9615_v7, %v8535_v24  ;;  %v15366_v7 = vld [vmem:[#allocation75_spill] sm:$0xff] }
 0x6d5   : > { %v6797_v30 = vadd.f32 %v6796_v29, %v14010_v37  ;;  %v8533_v37 = vld [vmem:[%s15009_s1 + $0x9d0] sm:$0xf]  ;;  %v15365_v29 = vld [vmem:[#allocation111_spill] sm:$0xff] }
 0x6d6   : > { %v5698_v3 = vpop.f32.mrf.mxu0  ;;  %v8534_v2 = vor.u32 %v9618_v20, %v8533_v37  ;;  %v9715_v37 = vld [vmem:[%s15011_s3 + $0xec] sm:$0xf0] }
 0x6d7   : > { %v5699_v59 = vadd.f32 %v5698_v3, %v15362_v14 }
 0x6d8   : > { %v14302_v26 = vpop.f32.mrf.mxu3  ;;  %v6027_v11 = vpop.f32.mrf.mxu1 }
 0x6d9   : > { %15363 = vst [vmem:[#allocation24_spill] sm:$0xff] %v14302_v26  ;;  %v14304_v13 = vadd.f32 %v6027_v11, %v5699_v59 }
 0x6dc   : > { %v14314_v31 = vpop.f32.mrf.mxu2  ;;  %6888 = vmatmul.bf16.gmra.mxu2 %v9078_v15 }
 0x6dd   : > { %15364 = vst [vmem:[#allocation25_spill] sm:$0xff] %v14314_v31 }
 0x6de   : > { %v5701_v49 = vpop.f32.mrf.mxu0 }
 0x6df   : > { %v5702_v58 = vadd.f32 %v5701_v49, %v15365_v29  ;;  %v9110_v29 = vor.u32 %v9715_v37, %v9109_v43  ;;  %v9621_v43 = vld [vmem:[%s15009_s1 + $0xa04] sm:$0xf] }
 0x6e0   : > { %v6840_v3 = vpop.f32.mrf.mxu3  ;;  %v6030_v14 = vpop.f32.mrf.mxu1 }
 0x6e1   : > { %v14323_v59 = vadd.f32 %v6840_v3, %v6792_v28  ;;  %v14325_v11 = vadd.f32 %v6030_v14, %v5702_v58  ;;  %5740 = vmatmul.bf16.gmra.mxu0 %v8534_v2  ;;  %v9624_v58 = vld [vmem:[%s15009_s1 + $0xa14] sm:$0xf0]  ;;  %v8559_v14 = vld [vmem:[%s15009_s1 + $0xa18] sm:$0xf0] }
 0x6e3   : > { %6069 = vmatmul.bf16.gmra.mxu1 %v8538_v53 }
 0x6e4   : > { %v6801_v15 = vpop.f32.mrf.mxu2 }
 0x6e5   : > { %v6802_v19 = vadd.f32 %v6801_v15, %v14050_v25  ;;  %v8557_v25 = vld [vmem:[%s15009_s1 + $0xa00] sm:$0xf] }
 0x6e6   : > { %v5703_v20 = vpop.f32.mrf.mxu0  ;;  %v8558_v15 = vor.u32 %v9624_v58, %v8557_v25  ;;  %v9723_v25 = vld [vmem:[%s15011_s3 + $0x12c] sm:$0xf0] }
 0x6e7   : > { %v5704_v24 = vadd.f32 %v5703_v20, %v15366_v7  ;;  %v8562_v20 = vor.u32 %v9621_v43, %v8559_v14  ;;  %v15369_v43 = vld [vmem:[#allocation76_spill] sm:$0xff] }
 0x6e8   : > { %v14335_v28 = vpop.f32.mrf.mxu3  ;;  %v6032_v49 = vpop.f32.mrf.mxu1 }
 0x6e9   : > { %15367 = vst [vmem:[#allocation106_spill] sm:$0xff] %v14335_v28  ;;  %v14337_v2 = vadd.f32 %v6032_v49, %v5704_v24  ;;  %v9173_v28 = vld [vmem:[%s15011_s3 + $0x150] sm:$0xf] }
 0x6ec   : > { %v14347_v3 = vpop.f32.mrf.mxu2  ;;  %6893 = vmatmul.bf16.gmra.mxu2 %v9110_v29 }
 0x6ee   : > { %v5706_v37 = vpop.f32.mrf.mxu0 }
 0x6ef   : > { %v5707_v29 = vadd.f32 %v5706_v37, %v15368_v56 }
 0x6f0   : > { %v6845_v7 = vpop.f32.mrf.mxu3  ;;  %v6035_v24 = vpop.f32.mrf.mxu1 }
 0x6f1   : > { %v14355_v49 = vadd.f32 %v6845_v7, %v6797_v30  ;;  %5745 = vmatmul.bf16.gmra.mxu0 %v8558_v15  ;;  %v14368_v7 = vadd.f32 %v6035_v24, %v5707_v29  ;;  %v8583_v24 = vld [vmem:[%s15009_s1 + $0xa48] sm:$0xf0] }
 0x6f3   : > { %6074 = vmatmul.bf16.gmra.mxu1 %v8562_v20  ;;  %v9142_v20 = vor.u32 %v9723_v25, %v9141_v50  ;;  %v9627_v50 = vld [vmem:[%s15009_s1 + $0xa34] sm:$0xf] }
 0x6f4   : > { %v6806_v62 = vpop.f32.mrf.mxu2 }
 0x6f5   : > { %v6807_v53 = vadd.f32 %v6806_v62, %v14088_v27  ;;  %v8581_v27 = vld [vmem:[%s15009_s1 + $0xa30] sm:$0xf]  ;;  %v9630_v62 = vld [vmem:[%s15009_s1 + $0xa44] sm:$0xf0] }
 0x6f6   : > { %v5708_v58 = vpop.f32.mrf.mxu0  ;;  %v8582_v29 = vor.u32 %v9630_v62, %v8581_v27  ;;  %v9731_v27 = vld [vmem:[%s15011_s3 + $0x16c] sm:$0xf0] }
 0x6f7   : > { %v5709_v14 = vadd.f32 %v5708_v58, %v15369_v43  ;;  %v8586_v43 = vor.u32 %v9627_v50, %v8583_v24  ;;  %v15372_v50 = vld [vmem:[#allocation77_spill] sm:$0xff] }
 0x6f8   : > { %v14366_v30 = vpop.f32.mrf.mxu3  ;;  %v6037_v15 = vpop.f32.mrf.mxu1 }
 0x6f9   : > { %15370 = vst [vmem:[#allocation26_spill] sm:$0xff] %v14366_v30  ;;  %v14370_v56 = vadd.f32 %v6037_v15, %v5709_v14  ;;  %v15371_v30 = vld [vmem:[#allocation115_spill] sm:$0xff] }
 0x6fc   : > { %v14380_v58 = vpop.f32.mrf.mxu2  ;;  %6898 = vmatmul.bf16.gmra.mxu2 %v9142_v20 }
 0x6fe   : > { %v5711_v25 = vpop.f32.mrf.mxu0 }
 0x6ff   : > { %v5712_v20 = vadd.f32 %v5711_v25, %v15371_v30  ;;  %v9636_v30 = vld [vmem:[%s15009_s1 + $0xa74] sm:$0xf0] }
 0x700   : > { %v6850_v14 = vpop.f32.mrf.mxu3  ;;  %v6040_v15 = vpop.f32.mrf.mxu1 }
 0x701   : > { %v14388_v32 = vadd.f32 %v6850_v14, %v6802_v19  ;;  %5750 = vmatmul.bf16.gmra.mxu0 %v8582_v29  ;;  %v6041_v14 = vadd.f32 %v6040_v15, %v5712_v20 }
 0x703   : > { %6079 = vmatmul.bf16.gmra.mxu1 %v8586_v43  ;;  %v9174_v43 = vor.u32 %v9731_v27, %v9173_v28  ;;  %v8607_v28 = vld [vmem:[%s15009_s1 + $0xa78] sm:$0xf0] }
 0x704   : > { %v6811_v37 = vpop.f32.mrf.mxu2 }
 0x705   : > { %v6812_v31 = vadd.f32 %v6811_v37, %v14128_v17  ;;  %v8605_v17 = vld [vmem:[%s15009_s1 + $0xa60] sm:$0xf] }
 0x706   : > { %v5713_v62 = vpop.f32.mrf.mxu0  ;;  %v8606_v15 = vor.u32 %v9636_v30, %v8605_v17  ;;  %v9739_v17 = vld [vmem:[%s15011_s3 + $0x1ac] sm:$0xf0] }
 0x707   : > { %v5714_v24 = vadd.f32 %v5713_v62, %v15372_v50  ;;  %v9633_v62 = vld [vmem:[%s15009_s1 + $0xa64] sm:$0xf] }
 0x708   : > { %v14399_v19 = vpop.f32.mrf.mxu3  ;;  %v6042_v29 = vpop.f32.mrf.mxu1  ;;  %v8610_v27 = vor.u32 %v9633_v62, %v8607_v28  ;;  %v15375_v62 = vld [vmem:[#allocation78_spill] sm:$0xff] }
 0x709   : > { %v6043_v33 = vadd.f32 %v6042_v29, %v5714_v24 }
 0x70b   : > { %v6240_v37 = vpack.c.bf16 %v6043_v33, %v6041_v14  ;;  %v15374_v14 = vld [vmem:[#allocation117_spill] sm:$0xff] }
 0x70c   : > { %v14407_v25 = vpop.f32.mrf.mxu2  ;;  %6903 = vmatmul.bf16.gmra.mxu2 %v9174_v43 }
 0x70d   : > { %15373 = vst [vmem:[#allocation108_spill] sm:$0xff] %v14407_v25 }
 0x70e   : > { %v5716_v20 = vpop.f32.mrf.mxu0 }
 0x70f   : > { %v5717_v43 = vadd.f32 %v5716_v20, %v15374_v14  ;;  %v9642_v20 = vld [vmem:[%s15009_s1 + $0xaa4] sm:$0xf0]  ;;  %v9639_v14 = vld [vmem:[%s15009_s1 + $0xa94] sm:$0xf] }
 0x710   : > { %v6855_v50 = vpop.f32.mrf.mxu3  ;;  %v6045_v24 = vpop.f32.mrf.mxu1 }
 0x711   : > { %v14415_v29 = vadd.f32 %v6855_v50, %v6807_v53  ;;  %5755 = vmatmul.bf16.gmra.mxu0 %v8606_v15  ;;  %v6046_v50 = vadd.f32 %v6045_v24, %v5717_v43 }
 0x713   : > { %6084 = vmatmul.bf16.gmra.mxu1 %v8610_v27  ;;  %v9206_v27 = vor.u32 %v9739_v17, %v9205_v0  ;;  %v8631_v0 = vld [vmem:[%s15009_s1 + $0xaa8] sm:$0xf0]  ;;  %v15376_v17 = vld [vmem:[#allocation119_spill] sm:$0xff] }
 0x714   : > { %v6816_v33 = vpop.f32.mrf.mxu2 }
 0x715   : > { %v6817_v26 = vadd.f32 %v6816_v33, %v14162_v45  ;;  %v8629_v45 = vld [vmem:[%s15009_s1 + $0xa90] sm:$0xf] }
 0x716   : > { %v5718_v30 = vpop.f32.mrf.mxu0  ;;  %v8630_v24 = vor.u32 %v9642_v20, %v8629_v45  ;;  %v9747_v45 = vld [vmem:[%s15011_s3 + $0x1ec] sm:$0xf0] }
 0x717   : > { %v5719_v28 = vadd.f32 %v5718_v30, %v15375_v62  ;;  %v8634_v62 = vor.u32 %v9639_v14, %v8631_v0 }
 0x718   : > { %v14426_v53 = vpop.f32.mrf.mxu3  ;;  %v6047_v15 = vpop.f32.mrf.mxu1 }
 0x719   : > { %v6048_v39 = vadd.f32 %v6047_v15, %v5719_v28 }
 0x71b   : > { %v6241_v33 = vpack.c.bf16 %v6048_v39, %v6046_v50  ;;  %v9237_v50 = vld [vmem:[%s15011_s3 + $0x1d0] sm:$0xf] }
 0x71c   : > { %6908 = vmatmul.bf16.gmra.mxu2 %v9206_v27  ;;  %v15377_v27 = vpack.c.bf16 %v14370_v56, %v14368_v7  ;;  %v15380_v7 = vpack.c.bf16 %v14337_v2, %v14325_v11  ;;  %v8653_v56 = vld [vmem:[%s15009_s1 + $0xac0] sm:$0xf]  ;;  %v8655_v11 = vld [vmem:[%s15009_s1 + $0xad8] sm:$0xf0]  ;;  %v15381_v2 = vpack.c.bf16 %v14304_v13, %v14292_v5  ;;  %v15384_v5 = vpack.c.bf16 %v14235_v61, %v14217_v48  ;;  %v9687_v13 = vld [vmem:[%s15011_s3 + $0x14] sm:$0xf] }
 0x71d   : > { %6919 = vmatpush.bf16.msra.mxu3 %v6241_v33  ;;  %v15387_v48 = vpack.c.bf16 %v14192_v60, %v14179_v42  ;;  %v8677_v61 = vld [vmem:[%s15009_s1 + $0xaf0] sm:$0xf]  ;;  %v8679_v42 = vld [vmem:[%s15009_s1 + $0xb08] sm:$0xf0] }
 0x71e   : > { %v5721_v43 = vpop.f32.mrf.mxu0 }
 0x71f   : > { %v5722_v30 = vadd.f32 %v5721_v43, %v15376_v17  ;;  %v9648_v43 = vld [vmem:[%s15009_s1 + $0xad4] sm:$0xf0] }
 0x720   : > { %v6860_v28 = vpop.f32.mrf.mxu3  ;;  %v6050_v15 = vpop.f32.mrf.mxu1 }
 0x721   : > { %v14441_v52 = vadd.f32 %v6860_v28, %v6812_v31  ;;  %v14443_v39 = vadd.f32 %v6050_v15, %v5722_v30  ;;  %5760 = vmatmul.bf16.gmra.mxu0 %v8630_v24  ;;  %6920 = vmatpush.bf16.msra.mxu3 %v6240_v37  ;;  %v15378_v31 = vld [vmem:[#allocation80_spill] sm:$0xff]  ;;  %v9238_v37 = vor.u32 %v9747_v45, %v9237_v50  ;;  %v15382_v15 = vld [vmem:[#allocation81_spill] sm:$0xff] }
 0x722   : > { %v9645_v30 = vld [vmem:[%s15009_s1 + $0xac4] sm:$0xf] }
 0x723   : > { %6089 = vmatmul.bf16.gmra.mxu1 %v8634_v62  ;;  %v8654_v62 = vor.u32 %v9648_v43, %v8653_v56  ;;  %v8658_v50 = vor.u32 %v9645_v30, %v8655_v11  ;;  %v15386_v56 = vld [vmem:[#allocation83_spill] sm:$0xff]  ;;  %v9654_v11 = vld [vmem:[%s15009_s1 + $0xb04] sm:$0xf0] }
 0x724   : > { %v8678_v60 = vor.u32 %v9654_v11, %v8677_v61  ;;  %v8701_v61 = vld [vmem:[%s15009_s1 + $0xb20] sm:$0xf]  ;;  %v9660_v11 = vld [vmem:[%s15009_s1 + $0xb34] sm:$0xf0] }
 0x725   : > { %6921 = vmatpush.bf16.msra.mxu3 %v15377_v27 }
 0x726   : > { %v5723_v20 = vpop.f32.mrf.mxu0 }
 0x727   : > { %v5724_v33 = vadd.f32 %v5723_v20, %v15378_v31 }
 0x728   : > { %v14455_v14 = vpop.f32.mrf.mxu3  ;;  %v6052_v0 = vpop.f32.mrf.mxu1 }
 0x729   : > { %15379 = vst [vmem:[#allocation27_spill] sm:$0xff] %v14455_v14  ;;  %v14457_v24 = vadd.f32 %v6052_v0, %v5724_v33  ;;  %6922 = vmatpush.bf16.msra.mxu3 %v15380_v7  ;;  %v15383_v0 = vpack.c.bf16 %v14271_v44, %v14259_v23  ;;  %v14496_v7 = vpop.f32.mrf.mxu2 }
 0x72a   : > { %15385 = vst [vmem:[#allocation28_spill] sm:$0xff] %v14496_v7 }
 0x72c   : > { %6913 = vmatmul.bf16.gmra.mxu2 %v9238_v37 }
 0x72d   : > { %6923 = vmatpush.bf16.msra.mxu3 %v15381_v2 }
 0x72e   : > { %v5726_v28 = vpop.f32.mrf.mxu0 }
 0x72f   : > { %v5727_v27 = vadd.f32 %v5726_v28, %v15382_v15  ;;  %v15388_v15 = vld [vmem:[#allocation85_spill] sm:$0xff] }
 0x730   : > { %v6865_v45 = vpop.f32.mrf.mxu3  ;;  %v6055_v20 = vpop.f32.mrf.mxu1 }
 0x731   : > { %v14480_v31 = vadd.f32 %v6865_v45, %v6817_v26  ;;  %v14482_v33 = vadd.f32 %v6055_v20, %v5727_v27  ;;  %5765 = vmatmul.bf16.gmra.mxu0 %v8654_v62  ;;  %6924 = vmatpush.bf16.msra.mxu3 %v15383_v0  ;;  %v9015_v26 = vld [vmem:[%s15011_s3 + $0x30] sm:$0xf0] }
 0x732   : > { %v9018_v44 = vor.u32 %v9687_v13, %v9015_v26  ;;  %v9651_v62 = vld [vmem:[%s15009_s1 + $0xaf4] sm:$0xf] }
 0x733   : > { %6094 = vmatmul.bf16.gmra.mxu1 %v8658_v50  ;;  %v8682_v45 = vor.u32 %v9651_v62, %v8679_v42  ;;  %v9695_v13 = vld [vmem:[%s15011_s3 + $0x54] sm:$0xf]  ;;  %v9657_v42 = vld [vmem:[%s15009_s1 + $0xb24] sm:$0xf]  ;;  %v15397_v62 = vld [vmem:[#allocation91_spill] sm:$0xff] }
 0x734   : > { %v9047_v26 = vld [vmem:[%s15011_s3 + $0x70] sm:$0xf0] }
 0x735   : > { %6925 = vmatpush.bf16.msra.mxu3 %v15384_v5 }
 0x736   : > { %v5728_v37 = vpop.f32.mrf.mxu0 }
 0x737   : > { %v5729_v43 = vadd.f32 %v5728_v37, %v15386_v56  ;;  %v15389_v56 = vld [vmem:[#allocation86_spill] sm:$0xff] }
 0x738   : > { %v6057_v23 = vpop.f32.mrf.mxu1 }
 0x739   : > { %v14499_v30 = vadd.f32 %v6057_v23, %v5729_v43  ;;  %6926 = vmatpush.bf16.msra.mxu3 %v15387_v48 }
 0x73c   : > { %6927 = vmatmul.bf16.vlgmr.msra.gmra.mxu3 %v9018_v44  ;;  %v9050_v44 = vor.u32 %v9695_v13, %v9047_v26 }
 0x73e   : > { %v5731_v28 = vpop.f32.mrf.mxu0 }
 0x73f   : > { %v5732_v27 = vadd.f32 %v5731_v28, %v15388_v15  ;;  %v6879_v50 = vpop.f32.mrf.mxu2  ;;  %v8702_v28 = vor.u32 %v9660_v11, %v8701_v61 }
 0x740   : > { %v14520_v20 = vadd.f32 %v6879_v50, %v14257_v8  ;;  %v6060_v0 = vpop.f32.mrf.mxu1 }
 0x741   : > { %v14522_v5 = vadd.f32 %v6060_v0, %v5732_v27  ;;  %5770 = vmatmul.bf16.gmra.mxu0 %v8678_v60  ;;  %v8703_v60 = vld [vmem:[%s15009_s1 + $0xb38] sm:$0xf0] }
 0x742   : > { %v15391_v27 = vld [vmem:[#allocation87_spill] sm:$0xff]  ;;  %v8706_v0 = vor.u32 %v9657_v42, %v8703_v60 }
 0x743   : > { %6099 = vmatmul.bf16.gmra.mxu1 %v8682_v45 }
 0x746   : > { %v5733_v37 = vpop.f32.mrf.mxu0 }
 0x747   : > { %v5734_v43 = vadd.f32 %v5733_v37, %v15389_v56  ;;  %v14531_v23 = vpop.f32.mrf.mxu2  ;;  %v9703_v56 = vld [vmem:[%s15011_s3 + $0x94] sm:$0xf] }
 0x748   : > { %15390 = vst [vmem:[#allocation29_spill] sm:$0xff] %v14531_v23  ;;  %v6062_v8 = vpop.f32.mrf.mxu1 }
 0x749   : > { %v14533_v48 = vadd.f32 %v6062_v8, %v5734_v43  ;;  %v9079_v43 = vld [vmem:[%s15011_s3 + $0xb0] sm:$0xf0] }
 0x74a   : > { %v9082_v42 = vor.u32 %v9703_v56, %v9079_v43  ;;  %v15394_v56 = vld [vmem:[#allocation89_spill] sm:$0xff] }
 0x74c   : > { %6932 = vmatmul.bf16.gmra.mxu3 %v9050_v44  ;;  %v15392_v44 = vld [vmem:[#allocation88_spill] sm:$0xff] }
 0x74e   : > { %v5736_v15 = vpop.f32.mrf.mxu0 }
 0x74f   : > { %v5737_v50 = vadd.f32 %v5736_v15, %v15391_v27  ;;  %v6884_v45 = vpop.f32.mrf.mxu2  ;;  %v9666_v15 = vld [vmem:[%s15009_s1 + $0xb64] sm:$0xf0]  ;;  %v9719_v27 = vld [vmem:[%s15011_s3 + $0x114] sm:$0xf] }
 0x750   : > { %v14551_v13 = vadd.f32 %v6884_v45, %v14290_v22  ;;  %v6065_v26 = vpop.f32.mrf.mxu1  ;;  %v8727_v45 = vld [vmem:[%s15009_s1 + $0xb68] sm:$0xf0] }
 0x751   : > { %v14553_v37 = vadd.f32 %v6065_v26, %v5737_v50  ;;  %5775 = vmatmul.bf16.gmra.mxu0 %v8702_v28  ;;  %v8725_v28 = vld [vmem:[%s15009_s1 + $0xb50] sm:$0xf]  ;;  %v9663_v50 = vld [vmem:[%s15009_s1 + $0xb54] sm:$0xf] }
 0x753   : > { %6104 = vmatmul.bf16.gmra.mxu1 %v8706_v0  ;;  %v8726_v0 = vor.u32 %v9666_v15, %v8725_v28  ;;  %v9111_v28 = vld [vmem:[%s15011_s3 + $0xf0] sm:$0xf0] }
 0x756   : > { %v5738_v8 = vpop.f32.mrf.mxu0 }
 0x757   : > { %v5739_v61 = vadd.f32 %v5738_v8, %v15392_v44  ;;  %v14562_v11 = vpop.f32.mrf.mxu2  ;;  %v8730_v44 = vor.u32 %v9663_v50, %v8727_v45 }
 0x758   : > { %15393 = vst [vmem:[#allocation110_spill] sm:$0xff] %v14562_v11  ;;  %v6067_v22 = vpop.f32.mrf.mxu1  ;;  %v9207_v11 = vld [vmem:[%s15011_s3 + $0x1b0] sm:$0xf0] }
 0x759   : > { %v14564_v60 = vadd.f32 %v6067_v22, %v5739_v61 }
 0x75c   : > { %6937 = vmatmul.bf16.gmra.mxu3 %v9082_v42  ;;  %v9711_v42 = vld [vmem:[%s15011_s3 + $0xd4] sm:$0xf] }
 0x75d   : > { %v9114_v45 = vor.u32 %v9711_v42, %v9111_v28  ;;  %v8751_v42 = vld [vmem:[%s15009_s1 + $0xb98] sm:$0xf0] }
 0x75e   : > { %v5741_v26 = vpop.f32.mrf.mxu0 }
 0x75f   : > { %v5742_v43 = vadd.f32 %v5741_v26, %v15394_v56  ;;  %v6889_v8 = vpop.f32.mrf.mxu2  ;;  %v15395_v26 = vld [vmem:[#allocation90_spill] sm:$0xff] }
 0x760   : > { %v14582_v61 = vadd.f32 %v6889_v8, %v14323_v59  ;;  %v6070_v22 = vpop.f32.mrf.mxu1 }
 0x761   : > { %v14584_v17 = vadd.f32 %v6070_v22, %v5742_v43  ;;  %5780 = vmatmul.bf16.gmra.mxu0 %v8726_v0  ;;  %v8749_v0 = vld [vmem:[%s15009_s1 + $0xb80] sm:$0xf]  ;;  %v9672_v43 = vld [vmem:[%s15009_s1 + $0xb94] sm:$0xf0]  ;;  %v9669_v22 = vld [vmem:[%s15009_s1 + $0xb84] sm:$0xf] }
 0x762   : > { %v8750_v28 = vor.u32 %v9672_v43, %v8749_v0  ;;  %v15398_v43 = vld [vmem:[#allocation4_spill] sm:$0xff] }
 0x763   : > { %6109 = vmatmul.bf16.gmra.mxu1 %v8730_v44  ;;  %v9143_v44 = vld [vmem:[%s15011_s3 + $0x130] sm:$0xf0] }
 0x766   : > { %v5743_v15 = vpop.f32.mrf.mxu0 }
 0x767   : > { %v5744_v56 = vadd.f32 %v5743_v15, %v15395_v26  ;;  %v14593_v50 = vpop.f32.mrf.mxu2 }
 0x768   : > { %15396 = vst [vmem:[#allocation30_spill] sm:$0xff] %v14593_v50  ;;  %v6072_v59 = vpop.f32.mrf.mxu1 }
 0x769   : > { %v14595_v8 = vadd.f32 %v6072_v59, %v5744_v56  ;;  %v8754_v56 = vor.u32 %v9669_v22, %v8751_v42  ;;  %v9146_v42 = vor.u32 %v9719_v27, %v9143_v44  ;;  %v8775_v27 = vld [vmem:[%s15009_s1 + $0xbc8] sm:$0xf0] }
 0x76c   : > { %6942 = vmatmul.bf16.gmra.mxu3 %v9114_v45 }
 0x76e   : > { %v5746_v15 = vpop.f32.mrf.mxu0 }
 0x76f   : > { %v6894_v26 = vpop.f32.mrf.mxu2  ;;  %v5747_v45 = vadd.f32 %v5746_v15, %v15397_v62  ;;  %v8773_v62 = vld [vmem:[%s15009_s1 + $0xbb0] sm:$0xf]  ;;  %v9678_v15 = vld [vmem:[%s15009_s1 + $0xbc4] sm:$0xf0] }
 0x770   : > { %v14612_v59 = vadd.f32 %v6894_v26, %v14355_v49  ;;  %v6075_v2 = vpop.f32.mrf.mxu1 }
 0x771   : > { %5785 = vmatmul.bf16.gmra.mxu0 %v8750_v28  ;;  %v6076_v26 = vadd.f32 %v6075_v2, %v5747_v45  ;;  %v8774_v2 = vor.u32 %v9678_v15, %v8773_v62  ;;  %v15401_v15 = vld [vmem:[#allocation5_spill] sm:$0xff] }
 0x773   : > { %6114 = vmatmul.bf16.gmra.mxu1 %v8754_v56 }
 0x776   : > { %v5748_v0 = vpop.f32.mrf.mxu0 }
 0x777   : > { %v5749_v7 = vadd.f32 %v5748_v0, %v15398_v43  ;;  %v14622_v22 = vpop.f32.mrf.mxu2  ;;  %v9675_v0 = vld [vmem:[%s15009_s1 + $0xbb4] sm:$0xf] }
 0x778   : > { %15399 = vst [vmem:[#allocation112_spill] sm:$0xff] %v14622_v22  ;;  %v6077_v49 = vpop.f32.mrf.mxu1  ;;  %v8778_v45 = vor.u32 %v9675_v0, %v8775_v27  ;;  %v9175_v22 = vld [vmem:[%s15011_s3 + $0x170] sm:$0xf0] }
 0x779   : > { %v6078_v28 = vadd.f32 %v6077_v49, %v5749_v7 }
 0x77b   : > { %v6247_v56 = vpack.c.bf16 %v6078_v28, %v6076_v26  ;;  %v15400_v26 = vld [vmem:[#allocation93_spill] sm:$0xff]  ;;  %v9727_v28 = vld [vmem:[%s15011_s3 + $0x154] sm:$0xf] }
 0x77c   : > { %6947 = vmatmul.bf16.gmra.mxu3 %v9146_v42  ;;  %v9178_v27 = vor.u32 %v9727_v28, %v9175_v22  ;;  %v8799_v22 = vld [vmem:[%s15009_s1 + $0xbf8] sm:$0xf0] }
 0x77e   : > { %v5751_v7 = vpop.f32.mrf.mxu0 }
 0x77f   : > { %v6899_v44 = vpop.f32.mrf.mxu2  ;;  %v5752_v42 = vadd.f32 %v5751_v7, %v15400_v26  ;;  %v8797_v7 = vld [vmem:[%s15009_s1 + $0xbe0] sm:$0xf] }
 0x780   : > { %v14637_v43 = vadd.f32 %v6899_v44, %v14388_v32  ;;  %v6080_v49 = vpop.f32.mrf.mxu1 }
 0x781   : > { %5790 = vmatmul.bf16.gmra.mxu0 %v8774_v2  ;;  %v6081_v44 = vadd.f32 %v6080_v49, %v5752_v42 }
 0x783   : > { %6119 = vmatmul.bf16.gmra.mxu1 %v8778_v45  ;;  %v9684_v45 = vld [vmem:[%s15009_s1 + $0xbf4] sm:$0xf0] }
 0x784   : > { %v8798_v49 = vor.u32 %v9684_v45, %v8797_v7 }
 0x786   : > { %v5753_v62 = vpop.f32.mrf.mxu0 }
 0x787   : > { %v5754_v50 = vadd.f32 %v5753_v62, %v15401_v15  ;;  %v14647_v0 = vpop.f32.mrf.mxu2  ;;  %v9681_v62 = vld [vmem:[%s15009_s1 + $0xbe4] sm:$0xf] }
 0x788   : > { %v6082_v32 = vpop.f32.mrf.mxu1  ;;  %v8802_v28 = vor.u32 %v9681_v62, %v8799_v22 }
 0x789   : > { %v6083_v2 = vadd.f32 %v6082_v32, %v5754_v50 }
 0x78b   : > { %v6248_v26 = vpack.c.bf16 %v6083_v2, %v6081_v44  ;;  %v15402_v44 = vld [vmem:[#allocation6_spill] sm:$0xff] }
 0x78c   : > { %6952 = vmatmul.bf16.gmra.mxu3 %v9178_v27  ;;  %v9735_v2 = vld [vmem:[%s15011_s3 + $0x194] sm:$0xf] }
 0x78d   : > { %v9210_v22 = vor.u32 %v9735_v2, %v9207_v11  ;;  %v9239_v11 = vld [vmem:[%s15011_s3 + $0x1f0] sm:$0xf0] }
 0x78e   : > { %v5756_v50 = vpop.f32.mrf.mxu0 }
 0x78f   : > { %v6904_v42 = vpop.f32.mrf.mxu2  ;;  %v5757_v27 = vadd.f32 %v5756_v50, %v15402_v44 }
 0x790   : > { %v14662_v15 = vadd.f32 %v6904_v42, %v14415_v29  ;;  %v6085_v32 = vpop.f32.mrf.mxu1 }
 0x791   : > { %5795 = vmatmul.bf16.gmra.mxu0 %v8798_v49  ;;  %v6086_v42 = vadd.f32 %v6085_v32, %v5757_v27 }
 0x793   : > { %6124 = vmatmul.bf16.gmra.mxu1 %v8802_v28 }
 0x796   : > { %v5758_v7 = vpop.f32.mrf.mxu0 }
 0x797   : > { %v5759_v45 = vadd.f32 %v5758_v7, %v13542_v16  ;;  %v14672_v62 = vpop.f32.mrf.mxu2  ;;  %v9743_v16 = vld [vmem:[%s15011_s3 + $0x1d4] sm:$0xf] }
 0x798   : > { %v6087_v29 = vpop.f32.mrf.mxu1 }
 0x799   : > { %v6088_v49 = vadd.f32 %v6087_v29, %v5759_v45 }
 0x79b   : > { %v6249_v28 = vpack.c.bf16 %v6088_v49, %v6086_v42 }
 0x79c   : > { %6957 = vmatmul.bf16.gmra.mxu3 %v9210_v22 }
 0x79d   : > { %6968 = vmatpush.bf16.msrb.mxu2 %v6249_v28 }
 0x79e   : > { %v5761_v50 = vpop.f32.mrf.mxu0 }
 0x79f   : > { %v5762_v44 = vadd.f32 %v5761_v50, %v13552_v41  ;;  %v6909_v23 = vpop.f32.mrf.mxu2 }
 0x7a0   : > { %v14676_v14 = vadd.f32 %v6909_v23, %v14441_v52  ;;  %v6090_v25 = vpop.f32.mrf.mxu1  ;;  %v9242_v23 = vor.u32 %v9743_v16, %v9239_v11 }
 0x7a1   : > { %v14678_v6 = vadd.f32 %v6090_v25, %v5762_v44  ;;  %6969 = vmatpush.bf16.msrb.mxu2 %v6248_v26  ;;  %v15403_v25 = vpack.c.bf16 %v14595_v8, %v14584_v17  ;;  %v15404_v26 = vpack.c.bf16 %v14564_v60, %v14553_v37  ;;  %v15405_v17 = vpack.c.bf16 %v14533_v48, %v14522_v5  ;;  %v9021_v37 = vld [vmem:[%s15011_s3 + $0x18] sm:$0xf]  ;;  %v14717_v60 = vpop.f32.mrf.mxu3 }
 0x7a2   : > { %v15406_v8 = vpack.c.bf16 %v14499_v30, %v14482_v33  ;;  %v15407_v33 = vpack.c.bf16 %v14457_v24, %v14443_v39  ;;  %v9700_v39 = vld [vmem:[%s15011_s3 + $0x74] sm:$0xf0] }
 0x7a5   : > { %6970 = vmatpush.bf16.msrb.mxu2 %v6247_v56 }
 0x7a6   : > { %v5763_v32 = vpop.f32.mrf.mxu0 }
 0x7a7   : > { %v5764_v41 = vadd.f32 %v5763_v32, %v13591_v47  ;;  %v14687_v27 = vpop.f32.mrf.mxu2 }
 0x7a8   : > { %v6092_v52 = vpop.f32.mrf.mxu1 }
 0x7a9   : > { %v14689_v2 = vadd.f32 %v6092_v52, %v5764_v41  ;;  %6971 = vmatpush.bf16.msrb.mxu2 %v15403_v25  ;;  %v9053_v41 = vld [vmem:[%s15011_s3 + $0x58] sm:$0xf] }
 0x7aa   : > { %v9054_v25 = vor.u32 %v9700_v39, %v9053_v41 }
 0x7ab   : > { %v6250_v56 = vpack.c.bf16 %v14689_v2, %v14678_v6  ;;  %v9696_v6 = vld [vmem:[%s15011_s3 + $0x5c] sm:$0xf] }
 0x7ac   : > { %6962 = vmatmul.bf16.gmra.mxu3 %v9242_v23  ;;  %v9055_v2 = vld [vmem:[%s15011_s3 + $0x78] sm:$0xf0] }
 0x7ad   : > { %6972 = vmatpush.bf16.msrb.mxu2 %v15404_v26 }
 0x7ae   : > { %v5766_v7 = vpop.f32.mrf.mxu0 }
 0x7af   : > { %v5767_v47 = vadd.f32 %v5766_v7, %v13604_v55  ;;  %v6914_v45 = vpop.f32.mrf.mxu2  ;;  %v9692_v55 = vld [vmem:[%s15011_s3 + $0x34] sm:$0xf0] }
 0x7b0   : > { %v14701_v29 = vadd.f32 %v6914_v45, %v14480_v31  ;;  %v6095_v22 = vpop.f32.mrf.mxu1  ;;  %v9022_v5 = vor.u32 %v9692_v55, %v9021_v37  ;;  %v9708_v37 = vld [vmem:[%s15011_s3 + $0xb4] sm:$0xf0] }
 0x7b1   : > { %v14703_v42 = vadd.f32 %v6095_v22, %v5767_v47  ;;  %6973 = vmatpush.bf16.msrb.mxu2 %v15405_v17 }
 0x7b5   : > { %6974 = vmatpush.bf16.msrb.mxu2 %v15406_v8 }
 0x7b6   : > { %v5768_v31 = vpop.f32.mrf.mxu0 }
 0x7b7   : > { %v5769_v49 = vadd.f32 %v5768_v31, %v13640_v40 }
 0x7b8   : > { %v6097_v28 = vpop.f32.mrf.mxu1 }
 0x7b9   : > { %v14720_v48 = vadd.f32 %v6097_v28, %v5769_v49  ;;  %6975 = vmatpush.bf16.msrb.mxu2 %v15407_v33  ;;  %v15409_v33 = vld [vmem:[#allocation54_spill] sm:$0xff] }
 0x7bb   : > { %v6251_v30 = vpack.c.bf16 %v14720_v48, %v14703_v42  ;;  %v15432_v42 = vld [vmem:[#allocation9_spill] sm:$0xff] }
 0x7bc   : > { %6976 = vmatmul.bf16.vlgmr.msrb.gmra.mxu2 %v9022_v5  ;;  %v15408_v5 = vld [vmem:[#allocation92_spill] sm:$0xff] }
 0x7be   : > { %v5771_v50 = vpop.f32.mrf.mxu0 }
 0x7bf   : > { %v5772_v44 = vadd.f32 %v5771_v50, %v13648_v63  ;;  %v6928_v16 = vpop.f32.mrf.mxu3  ;;  %v4468_v50 = vadd.f32 %v15409_v33, %v15408_v5  ;;  %v15413_v5 = vld [vmem:[#allocation59_spill] sm:$0xff] }
 0x7c0   : > { %v14729_v11 = vadd.f32 %v6928_v16, %v14520_v20  ;;  %v6100_v40 = vpop.f32.mrf.mxu1 }
 0x7c1   : > { %v14731_v32 = vadd.f32 %v6100_v40, %v5772_v44  ;;  %v15410_v40 = vld [vmem:[#allocation55_spill] sm:$0xff] }
 0x7c2   : > { %v4797_v41 = vadd.f32 %v15410_v40, %v4468_v50 }
 0x7c6   : > { %v5773_v24 = vpop.f32.mrf.mxu0 }
 0x7c7   : > { %v5774_v52 = vadd.f32 %v5773_v24, %v13682_v54  ;;  %v14740_v23 = vpop.f32.mrf.mxu3  ;;  %v9085_v54 = vld [vmem:[%s15011_s3 + $0x98] sm:$0xf] }
 0x7c8   : > { %v6102_v63 = vpop.f32.mrf.mxu1  ;;  %v9086_v28 = vor.u32 %v9708_v37, %v9085_v54 }
 0x7c9   : > { %v14742_v20 = vadd.f32 %v6102_v63, %v5774_v52  ;;  %v5126_v63 = vadd.f32 %v13752_v36, %v4797_v41  ;;  %v15411_v36 = vld [vmem:[#allocation84_spill] sm:$0xff] }
 0x7cb   : > { %v6252_v26 = vpack.c.bf16 %v14742_v20, %v14731_v32  ;;  %v15430_v32 = vld [vmem:[#allocation10_spill] sm:$0xff]  ;;  %v15431_v20 = vld [vmem:[#allocation95_spill] sm:$0xff] }
 0x7cc   : > { %6981 = vmatmul.bf16.gmra.mxu2 %v9054_v25 }
 0x7ce   : > { %v5776_v7 = vpop.f32.mrf.mxu0 }
 0x7cf   : > { %v5777_v47 = vadd.f32 %v5776_v7, %v13690_v51  ;;  %v6933_v45 = vpop.f32.mrf.mxu3  ;;  %v5455_v7 = vadd.f32 %v13763_v4, %v5126_v63  ;;  %v9724_v63 = vld [vmem:[%s15011_s3 + $0x134] sm:$0xf0] }
 0x7d0   : > { %v14748_v22 = vadd.f32 %v6933_v45, %v14551_v13  ;;  %v6105_v17 = vpop.f32.mrf.mxu1  ;;  %v9716_v45 = vld [vmem:[%s15011_s3 + $0xf4] sm:$0xf0] }
 0x7d1   : > { %v14750_v8 = vadd.f32 %v6105_v17, %v5777_v47  ;;  %v9117_v47 = vld [vmem:[%s15011_s3 + $0xd8] sm:$0xf] }
 0x7d2   : > { %v9118_v37 = vor.u32 %v9716_v45, %v9117_v47 }
 0x7d6   : > { %v5778_v55 = vpop.f32.mrf.mxu0 }
 0x7d7   : > { %v5779_v31 = vadd.f32 %v5778_v55, %v13724_v12  ;;  %v14759_v49 = vpop.f32.mrf.mxu3 }
 0x7d8   : > { %v6107_v51 = vpop.f32.mrf.mxu1 }
 0x7d9   : > { %v14761_v13 = vadd.f32 %v6107_v51, %v5779_v31  ;;  %v15412_v31 = vld [vmem:[#allocation58_spill] sm:$0xff] }
 0x7da   : > { %v4473_v51 = vadd.f32 %v15412_v31, %v15411_v36  ;;  %v6706_v36 = vadd.f32 %v14070_v21, %v14097_v9  ;;  %v9181_v9 = vld [vmem:[%s15011_s3 + $0x158] sm:$0xf] }
 0x7db   : > { %v6253_v44 = vpack.c.bf16 %v14761_v13, %v14750_v8  ;;  %v9023_v8 = vld [vmem:[%s15011_s3 + $0x38] sm:$0xf0]  ;;  %v14894_v13 = vpop.f32.mrf.mxu2 }
 0x7dc   : > { %6986 = vmatmul.bf16.gmra.mxu2 %v9086_v28  ;;  %v4802_v33 = vadd.f32 %v15413_v5, %v4473_v51  ;;  %v15416_v51 = vld [vmem:[#allocation63_spill] sm:$0xff] }
 0x7de   : > { %v5781_v16 = vpop.f32.mrf.mxu0  ;;  %v5131_v41 = vadd.f32 %v13793_v34, %v4802_v33  ;;  %v6755_v33 = vadd.f32 %v14078_v10, %v6706_v36  ;;  %v9732_v10 = vld [vmem:[%s15011_s3 + $0x174] sm:$0xf0] }
 0x7df   : > { %v5782_v39 = vadd.f32 %v5781_v16, %v13730_v46  ;;  %v6938_v24 = vpop.f32.mrf.mxu3 }
 0x7e0   : > { %v14770_v12 = vadd.f32 %v6938_v24, %v14582_v61  ;;  %v6110_v52 = vpop.f32.mrf.mxu1 }
 0x7e1   : > { %v14773_v25 = vadd.f32 %v6110_v52, %v5782_v39  ;;  %v5460_v39 = vadd.f32 %v13804_v35, %v5131_v41  ;;  %v9149_v52 = vld [vmem:[%s15011_s3 + $0x118] sm:$0xf] }
 0x7e2   : > { %v15414_v35 = vld [vmem:[#allocation79_spill] sm:$0xff] }
 0x7e6   : > { %v5783_v46 = vpop.f32.mrf.mxu0 }
 0x7e7   : > { %v5784_v17 = vadd.f32 %v5783_v46, %v5455_v7  ;;  %v14782_v54 = vpop.f32.mrf.mxu3  ;;  %v9150_v46 = vor.u32 %v9724_v63, %v9149_v52 }
 0x7e8   : > { %v6112_v61 = vpop.f32.mrf.mxu1 }
 0x7e9   : > { %v14784_v55 = vadd.f32 %v6112_v61, %v5784_v17 }
 0x7eb   : > { %v6254_v4 = vpack.c.bf16 %v14784_v55, %v14773_v25 }
 0x7ec   : > { %6991 = vmatmul.bf16.gmra.mxu2 %v9118_v37 }
 0x7ee   : > { %v5786_v28 = vpop.f32.mrf.mxu0 }
 0x7ef   : > { %v6943_v50 = vpop.f32.mrf.mxu3  ;;  %v5787_v24 = vadd.f32 %v5786_v28, %v13769_v38  ;;  %v15415_v38 = vld [vmem:[#allocation62_spill] sm:$0xff] }
 0x7f0   : > { %v14792_v16 = vadd.f32 %v6943_v50, %v14612_v59  ;;  %v6115_v40 = vpop.f32.mrf.mxu1  ;;  %v4478_v61 = vadd.f32 %v15415_v38, %v15414_v35  ;;  %v15419_v35 = vld [vmem:[#allocation18_spill] sm:$0xff]  ;;  %v15420_v38 = vld [vmem:[#allocation99_spill] sm:$0xff] }
 0x7f1   : > { %v14805_v17 = vadd.f32 %v6115_v40, %v5787_v24 }
 0x7f2   : > { %v4807_v28 = vadd.f32 %v15416_v51, %v4478_v61  ;;  %v6711_v61 = vadd.f32 %v15420_v38, %v15419_v35  ;;  %v15426_v35 = vld [vmem:[#allocation100_spill] sm:$0xff] }
 0x7f4   : > { %v5136_v41 = vadd.f32 %v13828_v1, %v4807_v28  ;;  %v15422_v28 = vld [vmem:[#allocation17_spill] sm:$0xff] }
 0x7f6   : > { %v5788_v7 = vpop.f32.mrf.mxu0  ;;  %v5465_v52 = vadd.f32 %v13839_v18, %v5136_v41 }
 0x7f7   : > { %v5789_v47 = vadd.f32 %v5788_v7, %v5460_v39  ;;  %v14803_v45 = vpop.f32.mrf.mxu3  ;;  %v6804_v39 = vadd.f32 %v14347_v3, %v6755_v33 }
 0x7f8   : > { %v6117_v59 = vpop.f32.mrf.mxu1 }
 0x7f9   : > { %v14807_v34 = vadd.f32 %v6117_v59, %v5789_v47  ;;  %v6853_v24 = vadd.f32 %v14399_v19, %v6804_v39  ;;  %v9182_v47 = vor.u32 %v9732_v10, %v9181_v9  ;;  %v15425_v10 = vld [vmem:[#allocation94_spill] sm:$0xff] }
 0x7fb   : > { %v6255_v37 = vpack.c.bf16 %v14807_v34, %v14805_v17 }
 0x7fc   : > { %6996 = vmatmul.bf16.gmra.mxu2 %v9150_v46  ;;  %v15418_v46 = vld [vmem:[#allocation66_spill] sm:$0xff] }
 0x7fe   : > { %v5791_v31 = vpop.f32.mrf.mxu0 }
 0x7ff   : > { %v6948_v5 = vpop.f32.mrf.mxu3  ;;  %v5792_v21 = vadd.f32 %v5791_v31, %v13810_v57  ;;  %v15417_v57 = vld [vmem:[#allocation82_spill] sm:$0xff]  ;;  %v15421_v31 = vld [vmem:[#allocation67_spill] sm:$0xff] }
 0x800   : > { %v14818_v50 = vadd.f32 %v6948_v5, %v14637_v43  ;;  %v6120_v40 = vpop.f32.mrf.mxu1  ;;  %v6902_v43 = vadd.f32 %v14647_v0, %v6853_v24  ;;  %v4483_v17 = vadd.f32 %v15418_v46, %v15417_v57  ;;  %v6760_v5 = vadd.f32 %v15422_v28, %v6711_v61  ;;  %v6342_v46 = vpop.permute.xlu0 %6341  ;;  %v15429_v28 = vld [vmem:[#allocation27_spill] sm:$0xff] }
 0x801   : > { %v6121_v18 = vadd.f32 %v6120_v40, %v5792_v21  ;;  %v15423_v40 = vld [vmem:[#allocation7_spill] sm:$0xff]  ;;  %v15424_v21 = vld [vmem:[#allocation8_spill] sm:$0xff]  ;;  %v6716_v38 = vadd.f32 %v15426_v35, %v6342_v46  ;;  %v15441_v35 = vld [vmem:[#allocation110_spill] sm:$0xff] }
 0x802   : > { %v4812_v0 = vadd.f32 %v15421_v31, %v4483_v17  ;;  %v6809_v24 = vadd.f32 %v14380_v58, %v6760_v5  ;;  %v15440_v46 = vld [vmem:[#allocation24_spill] sm:$0xff] }
 0x804   : > { %v5141_v39 = vadd.f32 %v15423_v40, %v4812_v0  ;;  %v15428_v0 = vld [vmem:[#allocation108_spill] sm:$0xff]  ;;  %v9748_v40 = vld [vmem:[%s15011_s3 + $0x1f4] sm:$0xf0] }
 0x806   : > { %v5793_v63 = vpop.f32.mrf.mxu0  ;;  %v5470_v9 = vadd.f32 %v15424_v21, %v5141_v39 }
 0x807   : > { %v5794_v1 = vadd.f32 %v5793_v63, %v5465_v52  ;;  %v6950_v7 = vpop.f32.mrf.mxu3  ;;  %v6858_v52 = vadd.f32 %v14426_v53, %v6809_v24  ;;  %v9213_v63 = vld [vmem:[%s15011_s3 + $0x198] sm:$0xf] }
 0x808   : > { %v14832_v3 = vadd.f32 %v6950_v7, %v6902_v43  ;;  %v6122_v19 = vpop.f32.mrf.mxu1 }
 0x809   : > { %v6123_v59 = vadd.f32 %v6122_v19, %v5794_v1  ;;  %v6907_v1 = vadd.f32 %v14672_v62, %v6858_v52 }
 0x80b   : > { %v6256_v34 = vpack.c.bf16 %v6123_v59, %v6121_v18 }
 0x80c   : > { %7001 = vmatmul.bf16.gmra.mxu2 %v9182_v47 }
 0x80e   : > { %v5796_v36 = vpop.f32.mrf.mxu0 }
 0x80f   : > { %v6953_v51 = vpop.f32.mrf.mxu3  ;;  %v5797_v43 = vadd.f32 %v5796_v36, %v15425_v10  ;;  %v15427_v36 = vld [vmem:[#allocation19_spill] sm:$0xff] }
 0x810   : > { %v14841_v33 = vadd.f32 %v6953_v51, %v14662_v15  ;;  %v6125_v41 = vpop.f32.mrf.mxu1  ;;  %v9740_v15 = vld [vmem:[%s15011_s3 + $0x1b4] sm:$0xf0]  ;;  %v6765_v31 = vadd.f32 %v15427_v36, %v6716_v38 }
 0x811   : > { %v9214_v18 = vor.u32 %v9740_v15, %v9213_v63  ;;  %v6126_v59 = vadd.f32 %v6125_v41, %v5797_v43  ;;  %v9245_v41 = vld [vmem:[%s15011_s3 + $0x1d8] sm:$0xf]  ;;  %v9058_v15 = vor.u32 %v9696_v6, %v9055_v2 }
 0x812   : > { %v6814_v51 = vadd.f32 %v15428_v0, %v6765_v31 }
 0x814   : > { %v6863_v5 = vadd.f32 %v15429_v28, %v6814_v51 }
 0x816   : > { %v5798_v7 = vpop.f32.mrf.mxu0  ;;  %v6912_v39 = vadd.f32 %v14687_v27, %v6863_v5  ;;  %v9688_v27 = vld [vmem:[%s15011_s3 + $0x1c] sm:$0xf] }
 0x817   : > { %v5799_v19 = vadd.f32 %v5798_v7, %v5470_v9  ;;  %v6955_v47 = vpop.f32.mrf.mxu3  ;;  %v15435_v9 = vld [vmem:[#allocation29_spill] sm:$0xff]  ;;  %v15437_v7 = vld [vmem:[#allocation96_spill] sm:$0xff]  ;;  %v9712_v5 = vld [vmem:[%s15011_s3 + $0xdc] sm:$0xf] }
 0x818   : > { %v14855_v58 = vadd.f32 %v6955_v47, %v6907_v1  ;;  %v6127_v53 = vpop.f32.mrf.mxu1  ;;  %v15436_v1 = vld [vmem:[#allocation12_spill] sm:$0xff] }
 0x819   : > { %v6128_v57 = vadd.f32 %v6127_v53, %v5799_v19  ;;  %v15438_v19 = vld [vmem:[#allocation11_spill] sm:$0xff] }
 0x81b   : > { %v6257_v17 = vpack.c.bf16 %v6128_v57, %v6126_v59 }
 0x81c   : > { %7006 = vmatmul.bf16.gmra.mxu2 %v9214_v18  ;;  %v15439_v18 = vld [vmem:[#allocation22_spill] sm:$0xff] }
 0x81d   : > { %7017 = vmatpush.bf16.msrb.mxu3 %v6257_v17 }
 0x81f   : > { %v6958_v61 = vpop.f32.mrf.mxu3 }
 0x820   : > { %v14860_v62 = vadd.f32 %v6958_v61, %v14676_v14  ;;  %v9246_v14 = vor.u32 %v9748_v40, %v9245_v41  ;;  %v9087_v61 = vld [vmem:[%s15011_s3 + $0xb8] sm:$0xf0] }
 0x821   : > { %7018 = vmatpush.bf16.msrb.mxu3 %v6256_v34  ;;  %v9119_v41 = vld [vmem:[%s15011_s3 + $0xf8] sm:$0xf0] }
 0x822   : > { %v9122_v40 = vor.u32 %v9712_v5, %v9119_v41  ;;  %v15447_v5 = vld [vmem:[#allocation30_spill] sm:$0xff] }
 0x825   : > { %7019 = vmatpush.bf16.msrb.mxu3 %v6255_v37 }
 0x827   : > { %v6960_v24 = vpop.f32.mrf.mxu3 }
 0x828   : > { %v14871_v52 = vadd.f32 %v6960_v24, %v6912_v39  ;;  %v9151_v39 = vld [vmem:[%s15011_s3 + $0x138] sm:$0xf0] }
 0x829   : > { %7020 = vmatpush.bf16.msrb.mxu3 %v6254_v4  ;;  %v15434_v4 = vld [vmem:[#allocation104_spill] sm:$0xff] }
 0x82c   : > { %7011 = vmatmul.bf16.gmra.mxu2 %v9246_v14  ;;  %v9183_v14 = vld [vmem:[%s15011_s3 + $0x178] sm:$0xf0] }
 0x82d   : > { %7021 = vmatpush.bf16.msrb.mxu3 %v6253_v44  ;;  %v15433_v44 = vld [vmem:[#allocation102_spill] sm:$0xff] }
 0x82f   : > { %v6963_v37 = vpop.f32.mrf.mxu3 }
 0x830   : > { %v14880_v34 = vadd.f32 %v6963_v37, %v14701_v29  ;;  %v9026_v29 = vor.u32 %v9688_v27, %v9023_v8  ;;  %v9736_v27 = vld [vmem:[%s15011_s3 + $0x19c] sm:$0xf] }
 0x831   : > { %7022 = vmatpush.bf16.msrb.mxu3 %v6252_v26  ;;  %v6686_v26 = vadd.f32 %v15431_v20, %v15430_v32  ;;  %v9215_v8 = vld [vmem:[%s15011_s3 + $0x1b8] sm:$0xf0] }
 0x832   : > { %v9744_v32 = vld [vmem:[%s15011_s3 + $0x1dc] sm:$0xf] }
 0x833   : > { %v6735_v48 = vadd.f32 %v15432_v42, %v6686_v26  ;;  %v9247_v20 = vld [vmem:[%s15011_s3 + $0x1f8] sm:$0xf0] }
 0x834   : > { %v9250_v26 = vor.u32 %v9744_v32, %v9247_v20  ;;  %v15450_v20 = vld [vmem:[#allocation15_spill] sm:$0xff] }
 0x835   : > { %7023 = vmatpush.bf16.msrb.mxu3 %v6251_v30  ;;  %v6784_v25 = vadd.f32 %v15433_v44, %v6735_v48  ;;  %v14960_v44 = vpop.permute.xlu2 %6351 }
 0x837   : > { %v6833_v21 = vadd.f32 %v15434_v4, %v6784_v25  ;;  %v14958_v42 = vpop.f32.mrf.mxu3 }
 0x839   : > { %7024 = vmatpush.bf16.msrb.mxu3 %v6250_v56  ;;  %v6882_v10 = vadd.f32 %v15435_v9, %v6833_v21  ;;  %v7090_v21 = vpop.permute.xlu1 %7089  ;;  %v7085_v9 = vpop.permute.xlu0 %7084 }
 0x83b   : > { %v6931_v56 = vadd.f32 %v14740_v23, %v6882_v10  ;;  %v9704_v23 = vld [vmem:[%s15011_s3 + $0x9c] sm:$0xf] }
 0x83c   : > { %7025 = vmatmul.bf16.vlgmr.msrb.gmra.mxu3 %v9026_v29  ;;  %v9090_v51 = vor.u32 %v9704_v23, %v9087_v61  ;;  %v9218_v29 = vor.u32 %v9736_v27, %v9215_v8  ;;  %v15445_v23 = vld [vmem:[#allocation23_spill] sm:$0xff] }
 0x83f   : > { %v6977_v30 = vpop.f32.mrf.mxu2 }
 0x840   : > { %v6978_v55 = vadd.f32 %v6977_v30, %v14729_v11  ;;  %v6691_v11 = vadd.f32 %v15437_v7, %v15436_v1  ;;  %v7095_v1 = vpop.permute.xlu2 %7094 }
 0x842   : > { %v6740_v47 = vadd.f32 %v15438_v19, %v6691_v11 }
 0x844   : > { %v6789_v59 = vadd.f32 %v15439_v18, %v6740_v47  ;;  %v15442_v47 = vld [vmem:[#allocation14_spill] sm:$0xff] }
 0x846   : > { %v6838_v17 = vadd.f32 %v15440_v46, %v6789_v59  ;;  %v7100_v59 = vpop.permute.xlu0 %7099 }
 0x847   : > { %v6979_v43 = vpop.f32.mrf.mxu2 }
 0x848   : > { %v6980_v63 = vadd.f32 %v6979_v43, %v6931_v56  ;;  %v6887_v38 = vadd.f32 %v15441_v35, %v6838_v17 }
 0x84a   : > { %v6936_v36 = vadd.f32 %v14759_v49, %v6887_v38  ;;  %v9720_v49 = vld [vmem:[%s15011_s3 + $0x11c] sm:$0xf] }
 0x84b   : > { %v9154_v24 = vor.u32 %v9720_v49, %v9151_v39 }
 0x84c   : > { %7030 = vmatmul.bf16.gmra.mxu3 %v9058_v15 }
 0x84f   : > { %v6982_v53 = vpop.f32.mrf.mxu2 }
 0x850   : > { %v6983_v57 = vadd.f32 %v6982_v53, %v14748_v22  ;;  %v15443_v53 = vld [vmem:[#allocation97_spill] sm:$0xff] }
 0x851   : > { %v6696_v18 = vadd.f32 %v15443_v53, %v15442_v47 }
 0x857   : > { %v6984_v31 = vpop.f32.mrf.mxu2 }
 0x858   : > { %v6985_v0 = vadd.f32 %v6984_v31, %v6936_v36  ;;  %v15446_v31 = vld [vmem:[#allocation106_spill] sm:$0xff] }
 0x85c   : > { %7035 = vmatmul.bf16.gmra.mxu3 %v9090_v51 }
 0x85f   : > { %v6987_v28 = vpop.f32.mrf.mxu2 }
 0x860   : > { %v6988_v22 = vadd.f32 %v6987_v28, %v14770_v12  ;;  %v9728_v12 = vld [vmem:[%s15011_s3 + $0x15c] sm:$0xf]  ;;  %v7105_v28 = vpop.permute.xlu1 %7104 }
 0x861   : > { %v9186_v37 = vor.u32 %v9728_v12, %v9183_v14  ;;  %v15448_v14 = vld [vmem:[#allocation16_spill] sm:$0xff] }
 0x867   : > { %v6989_v56 = vpop.f32.mrf.mxu2 }
 0x868   : > { %v7120_v53 = vpop.permute.xlu1 %7119 }
 0x86c   : > { %7040 = vmatmul.bf16.gmra.mxu3 %v9122_v40 }
 0x86f   : > { %v6992_v46 = vpop.f32.mrf.mxu2 }
 0x877   : > { %v6994_v49 = vpop.f32.mrf.mxu2 }
 0x87c   : > { %7045 = vmatmul.bf16.gmra.mxu3 %v9154_v24 }
 0x88c   : > { %7050 = vmatmul.bf16.gmra.mxu3 %v9186_v37  ;;  %v15449_v37 = vld [vmem:[#allocation98_spill] sm:$0xff] }
 0x88d   : > { %v6701_v27 = vadd.f32 %v15449_v37, %v15448_v14 }
 0x89c   : > { %7055 = vmatmul.bf16.gmra.mxu3 %v9218_v29  ;;  %v7110_v29 = vpop.permute.xlu2 %7109 }
 0x8ac   : > { %7060 = vmatmul.bf16.gmra.mxu3 %v9250_v26  ;;  %v6750_v26 = vadd.f32 %v15450_v20, %v6701_v27 }
 0x8bf   : > { %v7026_v48 = vpop.f32.mrf.mxu3 }
 0x8c0   : > { %v7027_v30 = vadd.f32 %v7026_v48, %v6978_v55 }
 0x8c2   : > { %v7162_v10 = vmul.f32 %v7085_v9, %v7027_v30  ;;  %v15451_v30 = vld [vmem:[#allocation25_spill] sm:$0xff]  ;;  %v15452_v9 = vld [vmem:[#allocation26_spill] sm:$0xff] }
 0x8c7   : > { %v7028_v25 = vpop.f32.mrf.mxu3 }
 0x8c8   : > { %v7029_v4 = vadd.f32 %v7028_v25, %v6980_v63  ;;  %v15444_v63 = vld [vmem:[#allocation13_spill] sm:$0xff]  ;;  %v6799_v25 = vadd.f32 %v15451_v30, %v6750_v26  ;;  %v15454_v30 = vld [vmem:[#allocation20_spill] sm:$0xff] }
 0x8c9   : > { %v6745_v35 = vadd.f32 %v15444_v63, %v6696_v18 }
 0x8ca   : > { %v7163_v6 = vmul.f32 %v7090_v21, %v7029_v4  ;;  %v6993_v4 = vadd.f32 %v6992_v46, %v14792_v16 }
 0x8cb   : > { %v6794_v61 = vadd.f32 %v15445_v23, %v6745_v35 }
 0x8cc   : > { %v7178_v2 = vadd.f32 %v7163_v6, %v7162_v10  ;;  %v7115_v6 = vpop.permute.xlu0 %7114 }
 0x8cd   : > { %v6843_v51 = vadd.f32 %v15446_v31, %v6794_v61 }
 0x8cf   : > { %v7031_v43 = vpop.f32.mrf.mxu3  ;;  %v6892_v41 = vadd.f32 %v15447_v5, %v6843_v51 }
 0x8d0   : > { %v7032_v15 = vadd.f32 %v7031_v43, %v6983_v57 }
 0x8d1   : > { %v6941_v39 = vadd.f32 %v14782_v54, %v6892_v41  ;;  %v6848_v54 = vadd.f32 %v15452_v9, %v6799_v25  ;;  %v6721_v25 = vadd.f32 %v15454_v30, %v14960_v44 }
 0x8d2   : > { %v7164_v7 = vmul.f32 %v7095_v1, %v7032_v15 }
 0x8d3   : > { %v6990_v24 = vadd.f32 %v6989_v56, %v6941_v39 }
 0x8d4   : > { %v7179_v11 = vadd.f32 %v7178_v2, %v7164_v7  ;;  %v15453_v2 = vld [vmem:[#allocation112_spill] sm:$0xff] }
 0x8d5   : > { %v6897_v56 = vadd.f32 %v15453_v2, %v6848_v54  ;;  %v15455_v54 = vld [vmem:[#allocation21_spill] sm:$0xff] }
 0x8d7   : > { %v7033_v19 = vpop.f32.mrf.mxu3  ;;  %v6946_v15 = vadd.f32 %v14803_v45, %v6897_v56 }
 0x8d8   : > { %v7034_v55 = vadd.f32 %v7033_v19, %v6985_v0 }
 0x8d9   : > { %v6995_v7 = vadd.f32 %v6994_v49, %v6946_v15 }
 0x8da   : > { %v7165_v17 = vmul.f32 %v7100_v59, %v7034_v55 }
 0x8dc   : > { %v7180_v38 = vadd.f32 %v7179_v11, %v7165_v17  ;;  %v7125_v17 = vpop.permute.xlu2 %7124 }
 0x8df   : > { %v7036_v36 = vpop.f32.mrf.mxu3 }
 0x8e0   : > { %v7037_v57 = vadd.f32 %v7036_v36, %v6988_v22  ;;  %v6997_v22 = vpop.f32.mrf.mxu2  ;;  %v7130_v36 = vpop.permute.xlu0 %7129 }
 0x8e1   : > { %v6998_v16 = vadd.f32 %v6997_v22, %v14818_v50 }
 0x8e2   : > { %v7166_v40 = vmul.f32 %v7105_v28, %v7037_v57 }
 0x8e4   : > { %v7181_v0 = vadd.f32 %v7180_v38, %v7166_v40  ;;  %v7135_v40 = vpop.permute.xlu1 %7134  ;;  %v7140_v14 = vpop.permute.xlu2 %7139 }
 0x8e7   : > { %v7038_v12 = vpop.f32.mrf.mxu3 }
 0x8e8   : > { %v7039_v8 = vadd.f32 %v7038_v12, %v6990_v24  ;;  %v6999_v11 = vpop.f32.mrf.mxu2  ;;  %v7145_v20 = vpop.permute.xlu0 %7144 }
 0x8e9   : > { %v7000_v23 = vadd.f32 %v6999_v11, %v14832_v3 }
 0x8ea   : > { %v7167_v32 = vmul.f32 %v7110_v29, %v7039_v8 }
 0x8ec   : > { %v7182_v48 = vadd.f32 %v7181_v0, %v7167_v32 }
 0x8ef   : > { %v7041_v21 = vpop.f32.mrf.mxu3 }
 0x8f0   : > { %v7042_v10 = vadd.f32 %v7041_v21, %v6993_v4  ;;  %v7002_v63 = vpop.f32.mrf.mxu2  ;;  %v7150_v4 = vpop.permute.xlu1 %7149 }
 0x8f1   : > { %v7003_v28 = vadd.f32 %v7002_v63, %v14841_v33 }
 0x8f2   : > { %v7168_v43 = vmul.f32 %v7115_v6, %v7042_v10  ;;  %v6770_v10 = vadd.f32 %v15455_v54, %v6721_v25 }
 0x8f4   : > { %v7183_v1 = vadd.f32 %v7182_v48, %v7168_v43 }
 0x8f7   : > { %v7043_v19 = vpop.f32.mrf.mxu3 }
 0x8f8   : > { %v7044_v47 = vadd.f32 %v7043_v19, %v6995_v7  ;;  %v7004_v51 = vpop.f32.mrf.mxu2 }
 0x8f9   : > { %v7005_v0 = vadd.f32 %v7004_v51, %v14855_v58 }
 0x8fa   : > { %v7169_v18 = vmul.f32 %v7120_v53, %v7044_v47 }
 0x8fc   : > { %v7184_v55 = vadd.f32 %v7183_v1, %v7169_v18  ;;  %v7155_v1 = vpop.permute.xlu2 %7154 }
 0x8ff   : > { %v7046_v59 = vpop.f32.mrf.mxu3 }
 0x900   : > { %v7047_v46 = vadd.f32 %v7046_v59, %v6998_v16  ;;  %v7007_v39 = vpop.f32.mrf.mxu2  ;;  %v7160_v16 = vpop.permute.xlu0 %7159 }
 0x901   : > { %v7008_v27 = vadd.f32 %v7007_v39, %v14860_v62  ;;  %v15456_v62 = vld [vmem:[#allocation28_spill] sm:$0xff] }
 0x902   : > { %v7170_v35 = vmul.f32 %v7125_v17, %v7047_v46  ;;  %v6819_v2 = vadd.f32 %v15456_v62, %v6770_v10 }
 0x904   : > { %v7185_v38 = vadd.f32 %v7184_v55, %v7170_v35  ;;  %v6868_v15 = vadd.f32 %v14717_v60, %v6819_v2  ;;  %v7203_v35 = vpop.permute.xlu1 %7202 }
 0x906   : > { %v6917_v7 = vadd.f32 %v14894_v13, %v6868_v15 }
 0x907   : > { %v7048_v61 = vpop.f32.mrf.mxu3 }
 0x908   : > { %v7049_v45 = vadd.f32 %v7048_v61, %v7000_v23  ;;  %v7009_v8 = vpop.f32.mrf.mxu2  ;;  %v6966_v19 = vadd.f32 %v14958_v42, %v6917_v7 }
 0x909   : > { %v7010_v48 = vadd.f32 %v7009_v8, %v14871_v52 }
 0x90a   : > { %v7171_v31 = vmul.f32 %v7130_v36, %v7049_v45 }
 0x90c   : > { %v7186_v57 = vadd.f32 %v7185_v38, %v7171_v31  ;;  %v7205_v38 = vperm.slane %v7203_v35, 0 }
 0x90f   : > { %v7051_v5 = vpop.f32.mrf.mxu3 }
 0x910   : > { %v7052_v41 = vadd.f32 %v7051_v5, %v7003_v28  ;;  %v7012_v21 = vpop.f32.mrf.mxu2 }
 0x911   : > { %v7013_v56 = vadd.f32 %v7012_v21, %v14880_v34 }
 0x912   : > { %v7172_v50 = vmul.f32 %v7135_v40, %v7052_v41 }
 0x914   : > { %v7187_v49 = vadd.f32 %v7186_v57, %v7172_v50 }
 0x917   : > { %v7053_v24 = vpop.f32.mrf.mxu3 }
 0x918   : > { %v7054_v12 = vadd.f32 %v7053_v24, %v7005_v0  ;;  %v7014_v11 = vpop.f32.mrf.mxu2 }
 0x919   : > { %v7015_v53 = vadd.f32 %v7014_v11, %v6966_v19 }
 0x91a   : > { %v7173_v3 = vmul.f32 %v7140_v14, %v7054_v12 }
 0x91c   : > { %v7188_v37 = vadd.f32 %v7187_v49, %v7173_v3 }
 0x91f   : > { %v7056_v29 = vpop.f32.mrf.mxu3 }
 0x920   : > { %v7057_v32 = vadd.f32 %v7056_v29, %v7008_v27 }
 0x922   : > { %v7174_v33 = vmul.f32 %v7145_v20, %v7057_v32 }
 0x924   : > { %v7189_v26 = vadd.f32 %v7188_v37, %v7174_v33 }
 0x927   : > { %v7058_v22 = vpop.f32.mrf.mxu3 }
 0x928   : > { %v7059_v58 = vadd.f32 %v7058_v22, %v7010_v48 }
 0x92a   : > { %v7175_v9 = vmul.f32 %v7150_v4, %v7059_v58 }
 0x92c   : > { %v7190_v6 = vadd.f32 %v7189_v26, %v7175_v9 }
 0x92f   : > { %v7061_v43 = vpop.f32.mrf.mxu3 }
 0x930   : > { %v7062_v52 = vadd.f32 %v7061_v43, %v7013_v56 }
 0x932   : > { %v7176_v44 = vmul.f32 %v7155_v1, %v7062_v52 }
 0x934   : > { %v7191_v47 = vadd.f32 %v7190_v6, %v7176_v44 }
 0x937   : > { %v7063_v18 = vpop.f32.mrf.mxu3 }
 0x938   : > { %v7064_v55 = vadd.f32 %v7063_v18, %v7015_v53 }
 0x93a   : > { %v7177_v59 = vmul.f32 %v7160_v16, %v7064_v55 }
 0x93c   : > { %v7192_v34 = vadd.f32 %v7191_v47, %v7177_v59 }
 0x93e   : > { %v7193_v46 = vrot.slane %v7192_v34, 4 }
 0x940   : > { %v7194_v17 = vadd.f32 %v7193_v46, %v7192_v34 }
 0x942   : > { %v7195_v60 = vrot.slane %v7194_v17, 2 }
 0x944   : > { %v7196_v63 = vadd.f32 %v7195_v60, %v7194_v17 }
 0x946   : > { %v7197_v13 = vrot.slane %v7196_v63, 1 }
 0x948   : > { %v7198_v23 = vadd.f32 %v7197_v13, %v7196_v63 }
 0x94a   : > { %v7206_v42 = vadd.f32 %v7205_v38, %v7198_v23 }
 0x94c   : > { %7207 = vst [vmem:[%s699_s23] sm:$0x1] %v7206_v42 }
 0x94d PF: > { %p16_p9 = scmp.ge.s32.totalorder %s9880_s29, 4   ;;  %s15457_s26 = smov %s9813_s27 }
 0x94e   : > { %s15458_s27 = smov %s9889_s9  ;;  %s15459_s28 = smov %s9880_s29 }
 0x94f   :  { %18 = sbr.rel (!%p16_p9) target bundleno = 5 (0x5), region = 124 }

</bundles_post_ra>
